<compile_context>
chip_gen: v7x
topology: tpu7x:2x2x1
jax: 0.10.0
libtpu: 0.0.40
codegen_flags: <defaults>
</compile_context>

<pallas_src>
import numpy as np
import jax
import jax.numpy as jnp
from jax import lax
from jax.experimental import pallas as pl
from jax.experimental.pallas import tpu as pltpu

# ----------------------------- static geometry ----------------------------- #
WP = 18          # canvas pitch = max padded width anywhere in the net
M0 = 24          # aligned margin: stored pixel (i, j) -> canvas row M0 + i*WP + j
RCOMP = 328      # rows computed/stored per layer (multiple of 8, >= 18*18)
RC = 392         # canvas rows (multiple of 8, >= M0 + max_read_offset + RCOMP)
C_PAD = 128      # channel lanes
OUT_ROWS = 288   # = 16*WP, the only rows the wrapper reads (multiple of 8)

_PAD = M0 - (WP + 1)    # read base when the layer zero-pads its input by 1 -> 5
_CROP = M0 + (WP + 1)   # read base when the layer crops its input by 1     -> 43
_SAME = M0              # read base with no pad / crop                      -> 24

# kind: "conv1" (Cin=1, VPU) | "conv" (MXU, packed taps) | "pool" (VPU).
LAYERS = (
    dict(kind="conv1", k=3, out=16, rb=_PAD,  act="relu",    w="w1", b="b1"),
    dict(kind="pool",  k=2, out=17, rb=_PAD,  act="none",    w=None, b=None),
    dict(kind="conv",  k=2, out=16, rb=_SAME, act="relu",    w="w3", b="b3"),
    dict(kind="pool",  k=2, out=17, rb=_PAD,  act="none",    w=None, b=None),
    dict(kind="conv",  k=2, out=16, rb=_SAME, act="relu",    w="w5", b="b5"),
    dict(kind="pool",  k=2, out=17, rb=_PAD,  act="none",    w=None, b=None),
    dict(kind="conv",  k=2, out=14, rb=_CROP, act="relu",    w="w7", b="b7"),  # ConvT p=2
    dict(kind="conv",  k=2, out=15, rb=_PAD,  act="relu",    w="w8", b="b8"),  # ConvT p=0
    dict(kind="conv",  k=2, out=16, rb=_PAD,  act="sigmoid", w="w9", b="b9"),  # ConvT p=0
)


# ------------------------------- fused kernel ------------------------------ #

def _fused_kernel(x_ref, w1, b1, w3, b3, w5, b5, w7, b7, w8, b8, w9, b9,
                  masks_ref, o_ref, can_a, can_b):
    refs = dict(w1=w1, b1=b1, w3=w3, b3=b3, w5=w5, b5=b5,
                w7=w7, b7=b7, w8=w8, b8=b8, w9=w9, b9=b9)

    # Only the margins (never written by any layer) must read as exact zeros;
    # the RCOMP region is fully overwritten + masked by every layer.
    hi = RC - M0 - RCOMP
    for can in (can_a, can_b):
        can[pl.ds(0, M0), :] = jnp.zeros((M0, C_PAD), jnp.float32)
        can[pl.ds(M0 + RCOMP, hi), :] = jnp.zeros((hi, C_PAD), jnp.float32)

    def x_reader(off):                               # layer-1 input (lane-replicated)
        return x_ref[0, pl.ds(off, RCOMP), :]        # (RCOMP, 128)

    def canvas_reader(can):
        def rd(off):
            return can[pl.ds(off, RCOMP), :]         # (RCOMP, 128)
        return rd

    read = x_reader
    canvases = (can_a, can_b)
    n_layers = len(LAYERS)

    for li, cfg in enumerate(LAYERS):
        k, rb, kind = cfg["k"], cfg["rb"], cfg["kind"]
        taps = [(kh, kw) for kh in range(k) for kw in range(k)]

        if kind == "pool":                           # AvgPool k2 s1 p1 (incl. pad)
            acc = None
            for kh, kw in taps:
                v = read(rb + kh * WP + kw)
                acc = v if acc is None else acc + v
            y = acc * 0.25

        elif kind == "conv1":                        # Cin=1 conv on the VPU
            w_ref, b_ref = refs[cfg["w"]], refs[cfg["b"]]
            acc = None
            for t, (kh, kw) in enumerate(taps):
                a = read(rb + kh * WP + kw)          # (RCOMP,128), lane-replicated
                term = a * w_ref[t]                  # (1,128) tap, dense vmul
                acc = term if acc is None else acc + term
            acc = acc + b_ref[...]
            y = jnp.maximum(acc, 0.0)

        else:                                        # MXU conv: one packed dot
            w_ref, b_ref = refs[cfg["w"]], refs[cfg["b"]]
            a_cat = jnp.concatenate(
                [read(rb + kh * WP + kw) for kh, kw in taps],
                axis=-1)                             # (RCOMP, k*k*128)
            acc = jnp.dot(a_cat, w_ref[...],
                          preferred_element_type=jnp.float32) + b_ref[...]
            if cfg["act"] == "relu":
                y = jnp.maximum(acc, 0.0)
            else:                                    # sigmoid via EUP tanh
                y = 0.5 * jnp.tanh(0.5 * acc) + 0.5

        # Zero pitch-wraparound / out-of-range rows so the next layer reads
        # exact zeros at its padding positions (lane-replicated dense mask).
        y = y * masks_ref[li]

        if li == n_layers - 1:
            o_ref[0, :, :] = y[:OUT_ROWS, :]         # lane-dense output block
        else:
            dst = canvases[li % 2]
            dst[pl.ds(M0, RCOMP), :] = y             # aligned, lane-dense store
            read = canvas_reader(dst)


def _fused_call(x_can, prep):
    N = x_can.shape[0]
    args = (x_can,
            prep["w1"], prep["b1"], prep["w3"], prep["b3"], prep["w5"],
            prep["b5"], prep["w7"], prep["b7"], prep["w8"], prep["b8"],
            prep["w9"], prep["b9"], prep["masks"])

    def bcast_spec(a):
        nd = a.ndim
        return pl.BlockSpec(a.shape, lambda n, _nd=nd: (0,) * _nd)

    in_specs = [pl.BlockSpec((1, RC, C_PAD), lambda n: (n, 0, 0))]
    in_specs += [bcast_spec(a) for a in args[1:]]

    return pl.pallas_call(
        _fused_kernel,
        out_shape=jax.ShapeDtypeStruct((N, OUT_ROWS, C_PAD), jnp.float32),
        grid=(N,),
        in_specs=in_specs,
        out_specs=pl.BlockSpec((1, OUT_ROWS, C_PAD), lambda n: (n, 0, 0)),
        scratch_shapes=[pltpu.VMEM((RC, C_PAD), jnp.float32),
                        pltpu.VMEM((RC, C_PAD), jnp.float32)],
        compiler_params=pltpu.CompilerParams(
            dimension_semantics=("parallel",)),
    )(*args)


@jax.jit
def pallas_forward(x_nchw, prep):
    """ConvAutoencoderLuma3.forward — NCHW in, NCHW out."""
    N, _, H, W = x_nchw.shape                        # 16 x 16
    x = x_nchw[:, 0].astype(jnp.float32)             # (N, 16, 16)
    # image pixel (i, j) -> canvas row M0 + i*WP + j, replicated across lanes
    x_rows = jnp.pad(x, ((0, 0), (0, 0), (0, WP - W)))          # (N, 16, WP)
    can = jnp.zeros((N, RC), jnp.float32)
    can = can.at[:, M0:M0 + H * WP].set(x_rows.reshape(N, H * WP))
    can128 = jnp.broadcast_to(can[:, :, None], (N, RC, C_PAD))  # lane-dense input

    y = _fused_call(can128, prep)                                # (N, 288, 128)
    y = y[:, :H * WP, 0].reshape(N, H, WP)[:, :, :W]             # (N, 16, 16)
    return y[:, None, :, :]


# ----------------------- one-time weight preparation ----------------------- #

def _pad_taps_packed(w_oihw):
    """[Cout, Cin, k, k] -> (k*k*128, 128) packed contraction matrix (kh-major)."""
    cout, cin, k, _ = w_oihw.shape
    wt = jnp.transpose(w_oihw, (2, 3, 1, 0)).reshape(k * k, cin, cout)
    out = jnp.zeros((k * k, C_PAD, C_PAD), jnp.float32)
    out = out.at[:, :cin, :cout].set(wt.astype(jnp.float32))
    return out.reshape(k * k * C_PAD, C_PAD)


def _pad_taps_packed_transposed(w_iohw):
    """ConvTranspose2d weight [Cin, Cout, k, k] -> packed cross-corr taps."""
    w_eq = jnp.transpose(w_iohw[:, :, ::-1, ::-1], (1, 0, 2, 3))
    return _pad_taps_packed(w_eq)


def _pad_taps_conv1(w_oihw):
    """Cin=1 conv weight [Cout, 1, k, k] -> (k*k, 1, 128) per-tap VPU rows."""
    cout, cin, k, _ = w_oihw.shape
    wt = jnp.transpose(w_oihw, (2, 3, 1, 0)).reshape(k * k, cin, cout)
    out = jnp.zeros((k * k, 1, C_PAD), jnp.float32)
    return out.at[:, :, :cout].set(wt.astype(jnp.float32))


def _pad_bias(b):
    return jnp.zeros((1, C_PAD), jnp.float32).at[0, :b.shape[0]].set(b)


def _row_masks():
    """Lane-replicated validity masks (n_layers, RCOMP, 128)."""
    m = np.zeros((len(LAYERS), RCOMP, C_PAD), np.float32)
    r = np.arange(RCOMP)
    for li, cfg in enumerate(LAYERS):
        ho = wo = cfg["out"]
        row = (((r % WP) < wo) & (r < ho * WP)).astype(np.float32)
        m[li] = row[:, None]
    return jnp.asarray(m)


def prepare_params(params):
    """Flip/transpose/pack/zero-pad all weights once, off the hot path."""
    return {
        "w1": _pad_taps_conv1(params["c1_w"]), "b1": _pad_bias(params["c1_b"]),
        "w3": _pad_taps_packed(params["c2_w"]), "b3": _pad_bias(params["c2_b"]),
        "w5": _pad_taps_packed(params["c3_w"]), "b5": _pad_bias(params["c3_b"]),
        "w7": _pad_taps_packed_transposed(params["t1_w"]), "b7": _pad_bias(params["t1_b"]),
        "w8": _pad_taps_packed_transposed(params["t2_w"]), "b8": _pad_bias(params["t2_b"]),
        "w9": _pad_taps_packed_transposed(params["t3_w"]), "b9": _pad_bias(params["t3_b"]),
        "masks": _row_masks(),
    }


# --------------------------- reference (pure JAX) --------------------------- #

def ref_forward(x, params):
    def conv(x, w, b, pad):
        y = lax.conv_general_dilated(x, w, (1, 1), [(pad, pad), (pad, pad)],
                                     dimension_numbers=("NCHW", "OIHW", "NCHW"))
        return y + b.reshape(1, -1, 1, 1)

    def avgpool(x):
        s = lax.reduce_window(x, 0.0, lax.add, (1, 1, 2, 2), (1, 1, 1, 1),
                              ((0, 0), (0, 0), (1, 1), (1, 1)))
        return s * 0.25

    def convT(x, w_pt, b, p, k=2):
        q = k - 1 - p
        if q >= 0:
            xq = jnp.pad(x, ((0, 0), (0, 0), (q, q), (q, q)))
        else:
            c = -q
            xq = x[:, :, c:-c, c:-c]
        w_eq = jnp.transpose(w_pt[:, :, ::-1, ::-1], (1, 0, 2, 3))
        return conv(xq, w_eq, b, 0)

    x = jax.nn.relu(conv(x, params["c1_w"], params["c1_b"], 1))
    x = avgpool(x)
    x = jax.nn.relu(conv(x, params["c2_w"], params["c2_b"], 0))
    x = avgpool(x)
    x = jax.nn.relu(conv(x, params["c3_w"], params["c3_b"], 0))
    x = avgpool(x)
    x = jax.nn.relu(convT(x, params["t1_w"], params["t1_b"], 2))
    x = jax.nn.relu(convT(x, params["t2_w"], params["t2_b"], 0))
    x = jax.nn.sigmoid(convT(x, params["t3_w"], params["t3_b"], 0))
    return x


# ------------------------------ params / main ------------------------------ #

def init_params(key):
    def conv_init(key, cout, cin, k):
        k1, k2 = jax.random.split(key)
        bound = 1.0 / np.sqrt(cin * k * k)
        w = jax.random.uniform(k1, (cout, cin, k, k), jnp.float32, -bound, bound)
        b = jax.random.uniform(k2, (cout,), jnp.float32, -bound, bound)
        return w, b

    def convT_init(key, cin, cout, k):
        k1, k2 = jax.random.split(key)
        bound = 1.0 / np.sqrt(cout * k * k)
        w = jax.random.uniform(k1, (cin, cout, k, k), jnp.float32, -bound, bound)
        b = jax.random.uniform(k2, (cout,), jnp.float32, -bound, bound)
        return w, b

    keys = jax.random.split(key, 6)
    p = {}
    p["c1_w"], p["c1_b"] = conv_init(keys[0], 76, 1, 3)
    p["c2_w"], p["c2_b"] = conv_init(keys[1], 38, 76, 2)
    p["c3_w"], p["c3_b"] = conv_init(keys[2], 38, 38, 2)
    p["t1_w"], p["t1_b"] = convT_init(keys[3], 38, 38, 2)
    p["t2_w"], p["t2_b"] = convT_init(keys[4], 38, 76, 2)
    p["t3_w"], p["t3_b"] = convT_init(keys[5], 76, 1, 2)
    return p


if __name__ == "__main__":
    key = jax.random.PRNGKey(0)
    kx, kp = jax.random.split(key)
    x = jax.random.normal(kx, (2, 1, 16, 16), dtype=jnp.float32)
    params = init_params(kp)
    prep = prepare_params(params)          # one-time weight relayout (off hot path)

    y = jax.block_until_ready(pallas_forward(x, prep))
    assert y.shape == (2, 1, 16, 16), y.shape

    y_ref = jax.block_until_ready(ref_forward(x, params))
    err = float(np.max(np.abs(np.asarray(y) - np.asarray(y_ref))))
    assert np.allclose(np.asarray(y), np.asarray(y_ref), atol=1e-4, rtol=1e-4), err

    print("KERNEL_OK")
</pallas_src>

<mosaic_0001>
module attributes {stable_mosaic.version = 11 : i64} {
  func.func @_fused_kernel(%arg0: i32, %arg1: memref<1x392x128xf32, #tpu.memory_space<vmem>>, %arg2: memref<9x1x128xf32, #tpu.memory_space<vmem>>, %arg3: memref<1x128xf32, #tpu.memory_space<vmem>>, %arg4: memref<512x128xf32, #tpu.memory_space<vmem>>, %arg5: memref<1x128xf32, #tpu.memory_space<vmem>>, %arg6: memref<512x128xf32, #tpu.memory_space<vmem>>, %arg7: memref<1x128xf32, #tpu.memory_space<vmem>>, %arg8: memref<512x128xf32, #tpu.memory_space<vmem>>, %arg9: memref<1x128xf32, #tpu.memory_space<vmem>>, %arg10: memref<512x128xf32, #tpu.memory_space<vmem>>, %arg11: memref<1x128xf32, #tpu.memory_space<vmem>>, %arg12: memref<512x128xf32, #tpu.memory_space<vmem>>, %arg13: memref<1x128xf32, #tpu.memory_space<vmem>>, %arg14: memref<9x328x128xf32, #tpu.memory_space<vmem>>, %arg15: memref<1x288x128xf32, #tpu.memory_space<vmem>>, %arg16: memref<392x128xf32, #tpu.memory_space<vmem>>, %arg17: memref<392x128xf32, #tpu.memory_space<vmem>>) attributes {dimension_semantics = [#tpu.dimension_semantics<parallel>], iteration_bounds = array<i64: 2>, scalar_prefetch = 0 : i64, scratch_operands = 2 : i64, tpu.core_type = #tpu.core_type<tc>, window_params = [{transform_indices = @transform_0, window_bounds = array<i64: 1, 392, 128>}, {pipeline_mode = #tpu.pipeline_mode<synchronous>, transform_indices = @transform_1, window_bounds = array<i64: 9, 1, 128>}, {pipeline_mode = #tpu.pipeline_mode<synchronous>, transform_indices = @transform_2, window_bounds = array<i64: 1, 128>}, {pipeline_mode = #tpu.pipeline_mode<synchronous>, transform_indices = @transform_3, window_bounds = array<i64: 512, 128>}, {pipeline_mode = #tpu.pipeline_mode<synchronous>, transform_indices = @transform_4, window_bounds = array<i64: 1, 128>}, {pipeline_mode = #tpu.pipeline_mode<synchronous>, transform_indices = @transform_5, window_bounds = array<i64: 512, 128>}, {pipeline_mode = #tpu.pipeline_mode<synchronous>, transform_indices = @transform_6, window_bounds = array<i64: 1, 128>}, {pipeline_mode = #tpu.pipeline_mode<synchronous>, transform_indices = @transform_7, window_bounds = array<i64: 512, 128>}, {pipeline_mode = #tpu.pipeline_mode<synchronous>, transform_indices = @transform_8, window_bounds = array<i64: 1, 128>}, {pipeline_mode = #tpu.pipeline_mode<synchronous>, transform_indices = @transform_9, window_bounds = array<i64: 512, 128>}, {pipeline_mode = #tpu.pipeline_mode<synchronous>, transform_indices = @transform_10, window_bounds = array<i64: 1, 128>}, {pipeline_mode = #tpu.pipeline_mode<synchronous>, transform_indices = @transform_11, window_bounds = array<i64: 512, 128>}, {pipeline_mode = #tpu.pipeline_mode<synchronous>, transform_indices = @transform_12, window_bounds = array<i64: 1, 128>}, {pipeline_mode = #tpu.pipeline_mode<synchronous>, transform_indices = @transform_13, window_bounds = array<i64: 9, 328, 128>}, {transform_indices = @transform_14, window_bounds = array<i64: 1, 288, 128>}]} {
    %cst = arith.constant 0.000000e+00 : f32
    %0 = vector.broadcast %cst : f32 to vector<24x128xf32>
    %c0 = arith.constant 0 : index
    %c0_0 = arith.constant 0 : index
    %1 = vector.load %arg16[%c0, %c0_0] : memref<392x128xf32, #tpu.memory_space<vmem>>, vector<24x128xf32>
    tpu.vector_store %arg16[%c0, %c0_0], %0 {strides = array<i32>} : memref<392x128xf32, #tpu.memory_space<vmem>>, vector<24x128xf32>,
    %cst_1 = arith.constant 0.000000e+00 : f32
    %2 = vector.broadcast %cst_1 : f32 to vector<40x128xf32>
    %c352 = arith.constant 352 : index
    %c0_2 = arith.constant 0 : index
    %3 = vector.load %arg16[%c352, %c0_2] : memref<392x128xf32, #tpu.memory_space<vmem>>, vector<40x128xf32>
    tpu.vector_store %arg16[%c352, %c0_2], %2 {strides = array<i32>} : memref<392x128xf32, #tpu.memory_space<vmem>>, vector<40x128xf32>,
    %cst_3 = arith.constant 0.000000e+00 : f32
    %4 = vector.broadcast %cst_3 : f32 to vector<24x128xf32>
    %c0_4 = arith.constant 0 : index
    %c0_5 = arith.constant 0 : index
    %5 = vector.load %arg17[%c0_4, %c0_5] : memref<392x128xf32, #tpu.memory_space<vmem>>, vector<24x128xf32>
    tpu.vector_store %arg17[%c0_4, %c0_5], %4 {strides = array<i32>} : memref<392x128xf32, #tpu.memory_space<vmem>>, vector<24x128xf32>,
    %cst_6 = arith.constant 0.000000e+00 : f32
    %6 = vector.broadcast %cst_6 : f32 to vector<40x128xf32>
    %c352_7 = arith.constant 352 : index
    %c0_8 = arith.constant 0 : index
    %7 = vector.load %arg17[%c352_7, %c0_8] : memref<392x128xf32, #tpu.memory_space<vmem>>, vector<40x128xf32>
    tpu.vector_store %arg17[%c352_7, %c0_8], %6 {strides = array<i32>} : memref<392x128xf32, #tpu.memory_space<vmem>>, vector<40x128xf32>,
    %c0_9 = arith.constant 0 : index
    %c5 = arith.constant 5 : index
    %c0_10 = arith.constant 0 : index
    %8 = vector.load %arg1[%c0_9, %c5, %c0_10] : memref<1x392x128xf32, #tpu.memory_space<vmem>>, vector<1x328x128xf32>
    %9 = vector.shape_cast %8 : vector<1x328x128xf32> to vector<328x128xf32>
    %c0_11 = arith.constant 0 : index
    %c0_12 = arith.constant 0 : index
    %c0_13 = arith.constant 0 : index
    %10 = vector.load %arg2[%c0_11, %c0_12, %c0_13] : memref<9x1x128xf32, #tpu.memory_space<vmem>>, vector<1x1x128xf32>
    %11 = vector.shape_cast %10 : vector<1x1x128xf32> to vector<1x128xf32>
    %12 = vector.broadcast %11 : vector<1x128xf32> to vector<328x128xf32>
    %13 = arith.mulf %9, %12 : vector<328x128xf32>
    %c0_14 = arith.constant 0 : index
    %c6 = arith.constant 6 : index
    %c0_15 = arith.constant 0 : index
    %14 = vector.load %arg1[%c0_14, %c6, %c0_15] : memref<1x392x128xf32, #tpu.memory_space<vmem>>, vector<1x328x128xf32>
    %15 = vector.shape_cast %14 : vector<1x328x128xf32> to vector<328x128xf32>
    %c1 = arith.constant 1 : index
    %c0_16 = arith.constant 0 : index
    %c0_17 = arith.constant 0 : index
    %16 = vector.load %arg2[%c1, %c0_16, %c0_17] : memref<9x1x128xf32, #tpu.memory_space<vmem>>, vector<1x1x128xf32>
    %17 = vector.shape_cast %16 : vector<1x1x128xf32> to vector<1x128xf32>
    %18 = vector.broadcast %17 : vector<1x128xf32> to vector<328x128xf32>
    %19 = arith.mulf %15, %18 : vector<328x128xf32>
    %20 = arith.addf %13, %19 : vector<328x128xf32>
    %c0_18 = arith.constant 0 : index
    %c7 = arith.constant 7 : index
    %c0_19 = arith.constant 0 : index
    %21 = vector.load %arg1[%c0_18, %c7, %c0_19] : memref<1x392x128xf32, #tpu.memory_space<vmem>>, vector<1x328x128xf32>
    %22 = vector.shape_cast %21 : vector<1x328x128xf32> to vector<328x128xf32>
    %c2 = arith.constant 2 : index
    %c0_20 = arith.constant 0 : index
    %c0_21 = arith.constant 0 : index
    %23 = vector.load %arg2[%c2, %c0_20, %c0_21] : memref<9x1x128xf32, #tpu.memory_space<vmem>>, vector<1x1x128xf32>
    %24 = vector.shape_cast %23 : vector<1x1x128xf32> to vector<1x128xf32>
    %25 = vector.broadcast %24 : vector<1x128xf32> to vector<328x128xf32>
    %26 = arith.mulf %22, %25 : vector<328x128xf32>
    %27 = arith.addf %20, %26 : vector<328x128xf32>
    %c0_22 = arith.constant 0 : index
    %c23 = arith.constant 23 : index
    %c0_23 = arith.constant 0 : index
    %28 = vector.load %arg1[%c0_22, %c23, %c0_23] : memref<1x392x128xf32, #tpu.memory_space<vmem>>, vector<1x328x128xf32>
    %29 = vector.shape_cast %28 : vector<1x328x128xf32> to vector<328x128xf32>
    %c3 = arith.constant 3 : index
    %c0_24 = arith.constant 0 : index
    %c0_25 = arith.constant 0 : index
    %30 = vector.load %arg2[%c3, %c0_24, %c0_25] : memref<9x1x128xf32, #tpu.memory_space<vmem>>, vector<1x1x128xf32>
    %31 = vector.shape_cast %30 : vector<1x1x128xf32> to vector<1x128xf32>
    %32 = vector.broadcast %31 : vector<1x128xf32> to vector<328x128xf32>
    %33 = arith.mulf %29, %32 : vector<328x128xf32>
    %34 = arith.addf %27, %33 : vector<328x128xf32>
    %c0_26 = arith.constant 0 : index
    %c24 = arith.constant 24 : index
    %c0_27 = arith.constant 0 : index
    %35 = vector.load %arg1[%c0_26, %c24, %c0_27] : memref<1x392x128xf32, #tpu.memory_space<vmem>>, vector<1x328x128xf32>
    %36 = vector.shape_cast %35 : vector<1x328x128xf32> to vector<328x128xf32>
    %c4 = arith.constant 4 : index
    %c0_28 = arith.constant 0 : index
    %c0_29 = arith.constant 0 : index
    %37 = vector.load %arg2[%c4, %c0_28, %c0_29] : memref<9x1x128xf32, #tpu.memory_space<vmem>>, vector<1x1x128xf32>
    %38 = vector.shape_cast %37 : vector<1x1x128xf32> to vector<1x128xf32>
    %39 = vector.broadcast %38 : vector<1x128xf32> to vector<328x128xf32>
    %40 = arith.mulf %36, %39 : vector<328x128xf32>
    %41 = arith.addf %34, %40 : vector<328x128xf32>
    %c0_30 = arith.constant 0 : index
    %c25 = arith.constant 25 : index
    %c0_31 = arith.constant 0 : index
    %42 = vector.load %arg1[%c0_30, %c25, %c0_31] : memref<1x392x128xf32, #tpu.memory_space<vmem>>, vector<1x328x128xf32>
    %43 = vector.shape_cast %42 : vector<1x328x128xf32> to vector<328x128xf32>
    %c5_32 = arith.constant 5 : index
    %c0_33 = arith.constant 0 : index
    %c0_34 = arith.constant 0 : index
    %44 = vector.load %arg2[%c5_32, %c0_33, %c0_34] : memref<9x1x128xf32, #tpu.memory_space<vmem>>, vector<1x1x128xf32>
    %45 = vector.shape_cast %44 : vector<1x1x128xf32> to vector<1x128xf32>
    %46 = vector.broadcast %45 : vector<1x128xf32> to vector<328x128xf32>
    %47 = arith.mulf %43, %46 : vector<328x128xf32>
    %48 = arith.addf %41, %47 : vector<328x128xf32>
    %c0_35 = arith.constant 0 : index
    %c41 = arith.constant 41 : index
    %c0_36 = arith.constant 0 : index
    %49 = vector.load %arg1[%c0_35, %c41, %c0_36] : memref<1x392x128xf32, #tpu.memory_space<vmem>>, vector<1x328x128xf32>
    %50 = vector.shape_cast %49 : vector<1x328x128xf32> to vector<328x128xf32>
    %c6_37 = arith.constant 6 : index
    %c0_38 = arith.constant 0 : index
    %c0_39 = arith.constant 0 : index
    %51 = vector.load %arg2[%c6_37, %c0_38, %c0_39] : memref<9x1x128xf32, #tpu.memory_space<vmem>>, vector<1x1x128xf32>
    %52 = vector.shape_cast %51 : vector<1x1x128xf32> to vector<1x128xf32>
    %53 = vector.broadcast %52 : vector<1x128xf32> to vector<328x128xf32>
    %54 = arith.mulf %50, %53 : vector<328x128xf32>
    %55 = arith.addf %48, %54 : vector<328x128xf32>
    %c0_40 = arith.constant 0 : index
    %c42 = arith.constant 42 : index
    %c0_41 = arith.constant 0 : index
    %56 = vector.load %arg1[%c0_40, %c42, %c0_41] : memref<1x392x128xf32, #tpu.memory_space<vmem>>, vector<1x328x128xf32>
    %57 = vector.shape_cast %56 : vector<1x328x128xf32> to vector<328x128xf32>
    %c7_42 = arith.constant 7 : index
    %c0_43 = arith.constant 0 : index
    %c0_44 = arith.constant 0 : index
    %58 = vector.load %arg2[%c7_42, %c0_43, %c0_44] : memref<9x1x128xf32, #tpu.memory_space<vmem>>, vector<1x1x128xf32>
    %59 = vector.shape_cast %58 : vector<1x1x128xf32> to vector<1x128xf32>
    %60 = vector.broadcast %59 : vector<1x128xf32> to vector<328x128xf32>
    %61 = arith.mulf %57, %60 : vector<328x128xf32>
    %62 = arith.addf %55, %61 : vector<328x128xf32>
    %c0_45 = arith.constant 0 : index
    %c43 = arith.constant 43 : index
    %c0_46 = arith.constant 0 : index
    %63 = vector.load %arg1[%c0_45, %c43, %c0_46] : memref<1x392x128xf32, #tpu.memory_space<vmem>>, vector<1x328x128xf32>
    %64 = vector.shape_cast %63 : vector<1x328x128xf32> to vector<328x128xf32>
    %c8 = arith.constant 8 : index
    %c0_47 = arith.constant 0 : index
    %c0_48 = arith.constant 0 : index
    %65 = vector.load %arg2[%c8, %c0_47, %c0_48] : memref<9x1x128xf32, #tpu.memory_space<vmem>>, vector<1x1x128xf32>
    %66 = vector.shape_cast %65 : vector<1x1x128xf32> to vector<1x128xf32>
    %67 = vector.broadcast %66 : vector<1x128xf32> to vector<328x128xf32>
    %68 = arith.mulf %64, %67 : vector<328x128xf32>
    %69 = arith.addf %62, %68 : vector<328x128xf32>
    %c0_49 = arith.constant 0 : index
    %c0_50 = arith.constant 0 : index
    %70 = vector.load %arg3[%c0_49, %c0_50] : memref<1x128xf32, #tpu.memory_space<vmem>>, vector<1x128xf32>
    %71 = vector.broadcast %70 : vector<1x128xf32> to vector<328x128xf32>
    %72 = arith.addf %69, %71 : vector<328x128xf32>
    %cst_51 = arith.constant 0.000000e+00 : f32
    %73 = vector.broadcast %cst_51 : f32 to vector<328x128xf32>
    %74 = arith.maximumf %72, %73 : vector<328x128xf32>
    %c0_52 = arith.constant 0 : index
    %c0_53 = arith.constant 0 : index
    %c0_54 = arith.constant 0 : index
    %75 = vector.load %arg14[%c0_52, %c0_53, %c0_54] : memref<9x328x128xf32, #tpu.memory_space<vmem>>, vector<1x328x128xf32>
    %76 = vector.shape_cast %75 : vector<1x328x128xf32> to vector<328x128xf32>
    %77 = arith.mulf %74, %76 : vector<328x128xf32>
    %c24_55 = arith.constant 24 : index
    %c0_56 = arith.constant 0 : index
    %78 = vector.load %arg16[%c24_55, %c0_56] : memref<392x128xf32, #tpu.memory_space<vmem>>, vector<328x128xf32>
    tpu.vector_store %arg16[%c24_55, %c0_56], %77 {strides = array<i32>} : memref<392x128xf32, #tpu.memory_space<vmem>>, vector<328x128xf32>,
    %c5_57 = arith.constant 5 : index
    %c0_58 = arith.constant 0 : index
    %79 = vector.load %arg16[%c5_57, %c0_58] : memref<392x128xf32, #tpu.memory_space<vmem>>, vector<328x128xf32>
    %c6_59 = arith.constant 6 : index
    %c0_60 = arith.constant 0 : index
    %80 = vector.load %arg16[%c6_59, %c0_60] : memref<392x128xf32, #tpu.memory_space<vmem>>, vector<328x128xf32>
    %81 = arith.addf %79, %80 : vector<328x128xf32>
    %c23_61 = arith.constant 23 : index
    %c0_62 = arith.constant 0 : index
    %82 = vector.load %arg16[%c23_61, %c0_62] : memref<392x128xf32, #tpu.memory_space<vmem>>, vector<328x128xf32>
    %83 = arith.addf %81, %82 : vector<328x128xf32>
    %c24_63 = arith.constant 24 : index
    %c0_64 = arith.constant 0 : index
    %84 = vector.load %arg16[%c24_63, %c0_64] : memref<392x128xf32, #tpu.memory_space<vmem>>, vector<328x128xf32>
    %85 = arith.addf %83, %84 : vector<328x128xf32>
    %cst_65 = arith.constant 2.500000e-01 : f32
    %86 = vector.broadcast %cst_65 : f32 to vector<328x128xf32>
    %87 = arith.mulf %85, %86 : vector<328x128xf32>
    %c1_66 = arith.constant 1 : index
    %c0_67 = arith.constant 0 : index
    %c0_68 = arith.constant 0 : index
    %88 = vector.load %arg14[%c1_66, %c0_67, %c0_68] : memref<9x328x128xf32, #tpu.memory_space<vmem>>, vector<1x328x128xf32>
    %89 = vector.shape_cast %88 : vector<1x328x128xf32> to vector<328x128xf32>
    %90 = arith.mulf %87, %89 : vector<328x128xf32>
    %c24_69 = arith.constant 24 : index
    %c0_70 = arith.constant 0 : index
    %91 = vector.load %arg17[%c24_69, %c0_70] : memref<392x128xf32, #tpu.memory_space<vmem>>, vector<328x128xf32>
    tpu.vector_store %arg17[%c24_69, %c0_70], %90 {strides = array<i32>} : memref<392x128xf32, #tpu.memory_space<vmem>>, vector<328x128xf32>,
    %c24_71 = arith.constant 24 : index
    %c0_72 = arith.constant 0 : index
    %92 = vector.load %arg17[%c24_71, %c0_72] : memref<392x128xf32, #tpu.memory_space<vmem>>, vector<328x128xf32>
    %c25_73 = arith.constant 25 : index
    %c0_74 = arith.constant 0 : index
    %93 = vector.load %arg17[%c25_73, %c0_74] : memref<392x128xf32, #tpu.memory_space<vmem>>, vector<328x128xf32>
    %c42_75 = arith.constant 42 : index
    %c0_76 = arith.constant 0 : index
    %94 = vector.load %arg17[%c42_75, %c0_76] : memref<392x128xf32, #tpu.memory_space<vmem>>, vector<328x128xf32>
    %c43_77 = arith.constant 43 : index
    %c0_78 = arith.constant 0 : index
    %95 = vector.load %arg17[%c43_77, %c0_78] : memref<392x128xf32, #tpu.memory_space<vmem>>, vector<328x128xf32>
    %96 = tpu.concatenate %92, %93, %94, %95 in 1 : vector<328x128xf32>, vector<328x128xf32>, vector<328x128xf32>, vector<328x128xf32> -> vector<328x512xf32>
    %c0_79 = arith.constant 0 : index
    %c0_80 = arith.constant 0 : index
    %97 = vector.load %arg4[%c0_79, %c0_80] : memref<512x128xf32, #tpu.memory_space<vmem>>, vector<512x128xf32>
    %cst_81 = arith.constant dense<0.000000e+00> : vector<328x128xf32>
    %98 = tpu.matmul %96, %97, %cst_81 {dimension_numbers = #tpu.dot_dimension_numbers<[1], [0], [0], [1], [0, 0, 1, 1], [], []>} : vector<328x512xf32>, vector<512x128xf32>, vector<328x128xf32> -> vector<328x128xf32>
    %c0_82 = arith.constant 0 : index
    %c0_83 = arith.constant 0 : index
    %99 = vector.load %arg5[%c0_82, %c0_83] : memref<1x128xf32, #tpu.memory_space<vmem>>, vector<1x128xf32>
    %100 = vector.broadcast %99 : vector<1x128xf32> to vector<328x128xf32>
    %101 = arith.addf %98, %100 : vector<328x128xf32>
    %cst_84 = arith.constant 0.000000e+00 : f32
    %102 = vector.broadcast %cst_84 : f32 to vector<328x128xf32>
    %103 = arith.maximumf %101, %102 : vector<328x128xf32>
    %c2_85 = arith.constant 2 : index
    %c0_86 = arith.constant 0 : index
    %c0_87 = arith.constant 0 : index
    %104 = vector.load %arg14[%c2_85, %c0_86, %c0_87] : memref<9x328x128xf32, #tpu.memory_space<vmem>>, vector<1x328x128xf32>
    %105 = vector.shape_cast %104 : vector<1x328x128xf32> to vector<328x128xf32>
    %106 = arith.mulf %103, %105 : vector<328x128xf32>
    %c24_88 = arith.constant 24 : index
    %c0_89 = arith.constant 0 : index
    %107 = vector.load %arg16[%c24_88, %c0_89] : memref<392x128xf32, #tpu.memory_space<vmem>>, vector<328x128xf32>
    tpu.vector_store %arg16[%c24_88, %c0_89], %106 {strides = array<i32>} : memref<392x128xf32, #tpu.memory_space<vmem>>, vector<328x128xf32>,
    %c5_90 = arith.constant 5 : index
    %c0_91 = arith.constant 0 : index
    %108 = vector.load %arg16[%c5_90, %c0_91] : memref<392x128xf32, #tpu.memory_space<vmem>>, vector<328x128xf32>
    %c6_92 = arith.constant 6 : index
    %c0_93 = arith.constant 0 : index
    %109 = vector.load %arg16[%c6_92, %c0_93] : memref<392x128xf32, #tpu.memory_space<vmem>>, vector<328x128xf32>
    %110 = arith.addf %108, %109 : vector<328x128xf32>
    %c23_94 = arith.constant 23 : index
    %c0_95 = arith.constant 0 : index
    %111 = vector.load %arg16[%c23_94, %c0_95] : memref<392x128xf32, #tpu.memory_space<vmem>>, vector<328x128xf32>
    %112 = arith.addf %110, %111 : vector<328x128xf32>
    %c24_96 = arith.constant 24 : index
    %c0_97 = arith.constant 0 : index
    %113 = vector.load %arg16[%c24_96, %c0_97] : memref<392x128xf32, #tpu.memory_space<vmem>>, vector<328x128xf32>
    %114 = arith.addf %112, %113 : vector<328x128xf32>
    %cst_98 = arith.constant 2.500000e-01 : f32
    %115 = vector.broadcast %cst_98 : f32 to vector<328x128xf32>
    %116 = arith.mulf %114, %115 : vector<328x128xf32>
    %c3_99 = arith.constant 3 : index
    %c0_100 = arith.constant 0 : index
    %c0_101 = arith.constant 0 : index
    %117 = vector.load %arg14[%c3_99, %c0_100, %c0_101] : memref<9x328x128xf32, #tpu.memory_space<vmem>>, vector<1x328x128xf32>
    %118 = vector.shape_cast %117 : vector<1x328x128xf32> to vector<328x128xf32>
    %119 = arith.mulf %116, %118 : vector<328x128xf32>
    %c24_102 = arith.constant 24 : index
    %c0_103 = arith.constant 0 : index
    %120 = vector.load %arg17[%c24_102, %c0_103] : memref<392x128xf32, #tpu.memory_space<vmem>>, vector<328x128xf32>
    tpu.vector_store %arg17[%c24_102, %c0_103], %119 {strides = array<i32>} : memref<392x128xf32, #tpu.memory_space<vmem>>, vector<328x128xf32>,
    %c24_104 = arith.constant 24 : index
    %c0_105 = arith.constant 0 : index
    %121 = vector.load %arg17[%c24_104, %c0_105] : memref<392x128xf32, #tpu.memory_space<vmem>>, vector<328x128xf32>
    %c25_106 = arith.constant 25 : index
    %c0_107 = arith.constant 0 : index
    %122 = vector.load %arg17[%c25_106, %c0_107] : memref<392x128xf32, #tpu.memory_space<vmem>>, vector<328x128xf32>
    %c42_108 = arith.constant 42 : index
    %c0_109 = arith.constant 0 : index
    %123 = vector.load %arg17[%c42_108, %c0_109] : memref<392x128xf32, #tpu.memory_space<vmem>>, vector<328x128xf32>
    %c43_110 = arith.constant 43 : index
    %c0_111 = arith.constant 0 : index
    %124 = vector.load %arg17[%c43_110, %c0_111] : memref<392x128xf32, #tpu.memory_space<vmem>>, vector<328x128xf32>
    %125 = tpu.concatenate %121, %122, %123, %124 in 1 : vector<328x128xf32>, vector<328x128xf32>, vector<328x128xf32>, vector<328x128xf32> -> vector<328x512xf32>
    %c0_112 = arith.constant 0 : index
    %c0_113 = arith.constant 0 : index
    %126 = vector.load %arg6[%c0_112, %c0_113] : memref<512x128xf32, #tpu.memory_space<vmem>>, vector<512x128xf32>
    %cst_114 = arith.constant dense<0.000000e+00> : vector<328x128xf32>
    %127 = tpu.matmul %125, %126, %cst_114 {dimension_numbers = #tpu.dot_dimension_numbers<[1], [0], [0], [1], [0, 0, 1, 1], [], []>} : vector<328x512xf32>, vector<512x128xf32>, vector<328x128xf32> -> vector<328x128xf32>
    %c0_115 = arith.constant 0 : index
    %c0_116 = arith.constant 0 : index
    %128 = vector.load %arg7[%c0_115, %c0_116] : memref<1x128xf32, #tpu.memory_space<vmem>>, vector<1x128xf32>
    %129 = vector.broadcast %128 : vector<1x128xf32> to vector<328x128xf32>
    %130 = arith.addf %127, %129 : vector<328x128xf32>
    %cst_117 = arith.constant 0.000000e+00 : f32
    %131 = vector.broadcast %cst_117 : f32 to vector<328x128xf32>
    %132 = arith.maximumf %130, %131 : vector<328x128xf32>
    %c4_118 = arith.constant 4 : index
    %c0_119 = arith.constant 0 : index
    %c0_120 = arith.constant 0 : index
    %133 = vector.load %arg14[%c4_118, %c0_119, %c0_120] : memref<9x328x128xf32, #tpu.memory_space<vmem>>, vector<1x328x128xf32>
    %134 = vector.shape_cast %133 : vector<1x328x128xf32> to vector<328x128xf32>
    %135 = arith.mulf %132, %134 : vector<328x128xf32>
    %c24_121 = arith.constant 24 : index
    %c0_122 = arith.constant 0 : index
    %136 = vector.load %arg16[%c24_121, %c0_122] : memref<392x128xf32, #tpu.memory_space<vmem>>, vector<328x128xf32>
    tpu.vector_store %arg16[%c24_121, %c0_122], %135 {strides = array<i32>} : memref<392x128xf32, #tpu.memory_space<vmem>>, vector<328x128xf32>,
    %c5_123 = arith.constant 5 : index
    %c0_124 = arith.constant 0 : index
    %137 = vector.load %arg16[%c5_123, %c0_124] : memref<392x128xf32, #tpu.memory_space<vmem>>, vector<328x128xf32>
    %c6_125 = arith.constant 6 : index
    %c0_126 = arith.constant 0 : index
    %138 = vector.load %arg16[%c6_125, %c0_126] : memref<392x128xf32, #tpu.memory_space<vmem>>, vector<328x128xf32>
    %139 = arith.addf %137, %138 : vector<328x128xf32>
    %c23_127 = arith.constant 23 : index
    %c0_128 = arith.constant 0 : index
    %140 = vector.load %arg16[%c23_127, %c0_128] : memref<392x128xf32, #tpu.memory_space<vmem>>, vector<328x128xf32>
    %141 = arith.addf %139, %140 : vector<328x128xf32>
    %c24_129 = arith.constant 24 : index
    %c0_130 = arith.constant 0 : index
    %142 = vector.load %arg16[%c24_129, %c0_130] : memref<392x128xf32, #tpu.memory_space<vmem>>, vector<328x128xf32>
    %143 = arith.addf %141, %142 : vector<328x128xf32>
    %cst_131 = arith.constant 2.500000e-01 : f32
    %144 = vector.broadcast %cst_131 : f32 to vector<328x128xf32>
    %145 = arith.mulf %143, %144 : vector<328x128xf32>
    %c5_132 = arith.constant 5 : index
    %c0_133 = arith.constant 0 : index
    %c0_134 = arith.constant 0 : index
    %146 = vector.load %arg14[%c5_132, %c0_133, %c0_134] : memref<9x328x128xf32, #tpu.memory_space<vmem>>, vector<1x328x128xf32>
    %147 = vector.shape_cast %146 : vector<1x328x128xf32> to vector<328x128xf32>
    %148 = arith.mulf %145, %147 : vector<328x128xf32>
    %c24_135 = arith.constant 24 : index
    %c0_136 = arith.constant 0 : index
    %149 = vector.load %arg17[%c24_135, %c0_136] : memref<392x128xf32, #tpu.memory_space<vmem>>, vector<328x128xf32>
    tpu.vector_store %arg17[%c24_135, %c0_136], %148 {strides = array<i32>} : memref<392x128xf32, #tpu.memory_space<vmem>>, vector<328x128xf32>,
    %c43_137 = arith.constant 43 : index
    %c0_138 = arith.constant 0 : index
    %150 = vector.load %arg17[%c43_137, %c0_138] : memref<392x128xf32, #tpu.memory_space<vmem>>, vector<328x128xf32>
    %c44 = arith.constant 44 : index
    %c0_139 = arith.constant 0 : index
    %151 = vector.load %arg17[%c44, %c0_139] : memref<392x128xf32, #tpu.memory_space<vmem>>, vector<328x128xf32>
    %c61 = arith.constant 61 : index
    %c0_140 = arith.constant 0 : index
    %152 = vector.load %arg17[%c61, %c0_140] : memref<392x128xf32, #tpu.memory_space<vmem>>, vector<328x128xf32>
    %c62 = arith.constant 62 : index
    %c0_141 = arith.constant 0 : index
    %153 = vector.load %arg17[%c62, %c0_141] : memref<392x128xf32, #tpu.memory_space<vmem>>, vector<328x128xf32>
    %154 = tpu.concatenate %150, %151, %152, %153 in 1 : vector<328x128xf32>, vector<328x128xf32>, vector<328x128xf32>, vector<328x128xf32> -> vector<328x512xf32>
    %c0_142 = arith.constant 0 : index
    %c0_143 = arith.constant 0 : index
    %155 = vector.load %arg8[%c0_142, %c0_143] : memref<512x128xf32, #tpu.memory_space<vmem>>, vector<512x128xf32>
    %cst_144 = arith.constant dense<0.000000e+00> : vector<328x128xf32>
    %156 = tpu.matmul %154, %155, %cst_144 {dimension_numbers = #tpu.dot_dimension_numbers<[1], [0], [0], [1], [0, 0, 1, 1], [], []>} : vector<328x512xf32>, vector<512x128xf32>, vector<328x128xf32> -> vector<328x128xf32>
    %c0_145 = arith.constant 0 : index
    %c0_146 = arith.constant 0 : index
    %157 = vector.load %arg9[%c0_145, %c0_146] : memref<1x128xf32, #tpu.memory_space<vmem>>, vector<1x128xf32>
    %158 = vector.broadcast %157 : vector<1x128xf32> to vector<328x128xf32>
    %159 = arith.addf %156, %158 : vector<328x128xf32>
    %cst_147 = arith.constant 0.000000e+00 : f32
    %160 = vector.broadcast %cst_147 : f32 to vector<328x128xf32>
    %161 = arith.maximumf %159, %160 : vector<328x128xf32>
    %c6_148 = arith.constant 6 : index
    %c0_149 = arith.constant 0 : index
    %c0_150 = arith.constant 0 : index
    %162 = vector.load %arg14[%c6_148, %c0_149, %c0_150] : memref<9x328x128xf32, #tpu.memory_space<vmem>>, vector<1x328x128xf32>
    %163 = vector.shape_cast %162 : vector<1x328x128xf32> to vector<328x128xf32>
    %164 = arith.mulf %161, %163 : vector<328x128xf32>
    %c24_151 = arith.constant 24 : index
    %c0_152 = arith.constant 0 : index
    %165 = vector.load %arg16[%c24_151, %c0_152] : memref<392x128xf32, #tpu.memory_space<vmem>>, vector<328x128xf32>
    tpu.vector_store %arg16[%c24_151, %c0_152], %164 {strides = array<i32>} : memref<392x128xf32, #tpu.memory_space<vmem>>, vector<328x128xf32>,
    %c5_153 = arith.constant 5 : index
    %c0_154 = arith.constant 0 : index
    %166 = vector.load %arg16[%c5_153, %c0_154] : memref<392x128xf32, #tpu.memory_space<vmem>>, vector<328x128xf32>
    %c6_155 = arith.constant 6 : index
    %c0_156 = arith.constant 0 : index
    %167 = vector.load %arg16[%c6_155, %c0_156] : memref<392x128xf32, #tpu.memory_space<vmem>>, vector<328x128xf32>
    %c23_157 = arith.constant 23 : index
    %c0_158 = arith.constant 0 : index
    %168 = vector.load %arg16[%c23_157, %c0_158] : memref<392x128xf32, #tpu.memory_space<vmem>>, vector<328x128xf32>
    %c24_159 = arith.constant 24 : index
    %c0_160 = arith.constant 0 : index
    %169 = vector.load %arg16[%c24_159, %c0_160] : memref<392x128xf32, #tpu.memory_space<vmem>>, vector<328x128xf32>
    %170 = tpu.concatenate %166, %167, %168, %169 in 1 : vector<328x128xf32>, vector<328x128xf32>, vector<328x128xf32>, vector<328x128xf32> -> vector<328x512xf32>
    %c0_161 = arith.constant 0 : index
    %c0_162 = arith.constant 0 : index
    %171 = vector.load %arg10[%c0_161, %c0_162] : memref<512x128xf32, #tpu.memory_space<vmem>>, vector<512x128xf32>
    %cst_163 = arith.constant dense<0.000000e+00> : vector<328x128xf32>
    %172 = tpu.matmul %170, %171, %cst_163 {dimension_numbers = #tpu.dot_dimension_numbers<[1], [0], [0], [1], [0, 0, 1, 1], [], []>} : vector<328x512xf32>, vector<512x128xf32>, vector<328x128xf32> -> vector<328x128xf32>
    %c0_164 = arith.constant 0 : index
    %c0_165 = arith.constant 0 : index
    %173 = vector.load %arg11[%c0_164, %c0_165] : memref<1x128xf32, #tpu.memory_space<vmem>>, vector<1x128xf32>
    %174 = vector.broadcast %173 : vector<1x128xf32> to vector<328x128xf32>
    %175 = arith.addf %172, %174 : vector<328x128xf32>
    %cst_166 = arith.constant 0.000000e+00 : f32
    %176 = vector.broadcast %cst_166 : f32 to vector<328x128xf32>
    %177 = arith.maximumf %175, %176 : vector<328x128xf32>
    %c7_167 = arith.constant 7 : index
    %c0_168 = arith.constant 0 : index
    %c0_169 = arith.constant 0 : index
    %178 = vector.load %arg14[%c7_167, %c0_168, %c0_169] : memref<9x328x128xf32, #tpu.memory_space<vmem>>, vector<1x328x128xf32>
    %179 = vector.shape_cast %178 : vector<1x328x128xf32> to vector<328x128xf32>
    %180 = arith.mulf %177, %179 : vector<328x128xf32>
    %c24_170 = arith.constant 24 : index
    %c0_171 = arith.constant 0 : index
    %181 = vector.load %arg17[%c24_170, %c0_171] : memref<392x128xf32, #tpu.memory_space<vmem>>, vector<328x128xf32>
    tpu.vector_store %arg17[%c24_170, %c0_171], %180 {strides = array<i32>} : memref<392x128xf32, #tpu.memory_space<vmem>>, vector<328x128xf32>,
    %c5_172 = arith.constant 5 : index
    %c0_173 = arith.constant 0 : index
    %182 = vector.load %arg17[%c5_172, %c0_173] : memref<392x128xf32, #tpu.memory_space<vmem>>, vector<328x128xf32>
    %c6_174 = arith.constant 6 : index
    %c0_175 = arith.constant 0 : index
    %183 = vector.load %arg17[%c6_174, %c0_175] : memref<392x128xf32, #tpu.memory_space<vmem>>, vector<328x128xf32>
    %c23_176 = arith.constant 23 : index
    %c0_177 = arith.constant 0 : index
    %184 = vector.load %arg17[%c23_176, %c0_177] : memref<392x128xf32, #tpu.memory_space<vmem>>, vector<328x128xf32>
    %c24_178 = arith.constant 24 : index
    %c0_179 = arith.constant 0 : index
    %185 = vector.load %arg17[%c24_178, %c0_179] : memref<392x128xf32, #tpu.memory_space<vmem>>, vector<328x128xf32>
    %186 = tpu.concatenate %182, %183, %184, %185 in 1 : vector<328x128xf32>, vector<328x128xf32>, vector<328x128xf32>, vector<328x128xf32> -> vector<328x512xf32>
    %c0_180 = arith.constant 0 : index
    %c0_181 = arith.constant 0 : index
    %187 = vector.load %arg12[%c0_180, %c0_181] : memref<512x128xf32, #tpu.memory_space<vmem>>, vector<512x128xf32>
    %cst_182 = arith.constant dense<0.000000e+00> : vector<328x128xf32>
    %188 = tpu.matmul %186, %187, %cst_182 {dimension_numbers = #tpu.dot_dimension_numbers<[1], [0], [0], [1], [0, 0, 1, 1], [], []>} : vector<328x512xf32>, vector<512x128xf32>, vector<328x128xf32> -> vector<328x128xf32>
    %c0_183 = arith.constant 0 : index
    %c0_184 = arith.constant 0 : index
    %189 = vector.load %arg13[%c0_183, %c0_184] : memref<1x128xf32, #tpu.memory_space<vmem>>, vector<1x128xf32>
    %190 = vector.broadcast %189 : vector<1x128xf32> to vector<328x128xf32>
    %191 = arith.addf %188, %190 : vector<328x128xf32>
    %cst_185 = arith.constant 5.000000e-01 : f32
    %192 = vector.broadcast %cst_185 : f32 to vector<328x128xf32>
    %193 = arith.mulf %192, %191 : vector<328x128xf32>
    %194 = math.tanh %193 : vector<328x128xf32>
    %cst_186 = arith.constant 5.000000e-01 : f32
    %195 = vector.broadcast %cst_186 : f32 to vector<328x128xf32>
    %196 = arith.mulf %195, %194 : vector<328x128xf32>
    %cst_187 = arith.constant 5.000000e-01 : f32
    %197 = vector.broadcast %cst_187 : f32 to vector<328x128xf32>
    %198 = arith.addf %196, %197 : vector<328x128xf32>
    %c8_188 = arith.constant 8 : index
    %c0_189 = arith.constant 0 : index
    %c0_190 = arith.constant 0 : index
    %199 = vector.load %arg14[%c8_188, %c0_189, %c0_190] : memref<9x328x128xf32, #tpu.memory_space<vmem>>, vector<1x328x128xf32>
    %200 = vector.shape_cast %199 : vector<1x328x128xf32> to vector<328x128xf32>
    %201 = arith.mulf %198, %200 : vector<328x128xf32>
    %202 = vector.extract_strided_slice %201 {offsets = [0, 0], sizes = [288, 128], strides = [1, 1]} : vector<328x128xf32> to vector<288x128xf32>
    %c0_191 = arith.constant 0 : index
    %c0_192 = arith.constant 0 : index
    %c0_193 = arith.constant 0 : index
    %203 = vector.load %arg15[%c0_191, %c0_192, %c0_193] : memref<1x288x128xf32, #tpu.memory_space<vmem>>, vector<1x288x128xf32>
    %204 = vector.shape_cast %203 : vector<1x288x128xf32> to vector<288x128xf32>
    %205 = vector.shape_cast %202 : vector<288x128xf32> to vector<1x288x128xf32>
    tpu.vector_store %arg15[%c0_191, %c0_192, %c0_193], %205 {strides = array<i32>} : memref<1x288x128xf32, #tpu.memory_space<vmem>>, vector<1x288x128xf32>,
    return
  }
  func.func @transform_0(%arg0: i32) -> (i32, i32, i32) {
    %c0_i32 = arith.constant 0 : i32
    %c0_i32_0 = arith.constant 0 : i32
    %c0_i32_1 = arith.constant 0 : i32
    return %arg0, %c0_i32, %c0_i32_0 : i32, i32, i32
  }
  func.func @transform_1(%arg0: i32) -> (i32, i32, i32) {
    %c0_i32 = arith.constant 0 : i32
    %c0_i32_0 = arith.constant 0 : i32
    %c0_i32_1 = arith.constant 0 : i32
    %c0_i32_2 = arith.constant 0 : i32
    return %c0_i32, %c0_i32_0, %c0_i32_1 : i32, i32, i32
  }
  func.func @transform_2(%arg0: i32) -> (i32, i32) {
    %c0_i32 = arith.constant 0 : i32
    %c0_i32_0 = arith.constant 0 : i32
    %c0_i32_1 = arith.constant 0 : i32
    return %c0_i32, %c0_i32_0 : i32, i32
  }
  func.func @transform_3(%arg0: i32) -> (i32, i32) {
    %c0_i32 = arith.constant 0 : i32
    %c0_i32_0 = arith.constant 0 : i32
    %c0_i32_1 = arith.constant 0 : i32
    return %c0_i32, %c0_i32_0 : i32, i32
  }
  func.func @transform_4(%arg0: i32) -> (i32, i32) {
    %c0_i32 = arith.constant 0 : i32
    %c0_i32_0 = arith.constant 0 : i32
    %c0_i32_1 = arith.constant 0 : i32
    return %c0_i32, %c0_i32_0 : i32, i32
  }
  func.func @transform_5(%arg0: i32) -> (i32, i32) {
    %c0_i32 = arith.constant 0 : i32
    %c0_i32_0 = arith.constant 0 : i32
    %c0_i32_1 = arith.constant 0 : i32
    return %c0_i32, %c0_i32_0 : i32, i32
  }
  func.func @transform_6(%arg0: i32) -> (i32, i32) {
    %c0_i32 = arith.constant 0 : i32
    %c0_i32_0 = arith.constant 0 : i32
    %c0_i32_1 = arith.constant 0 : i32
    return %c0_i32, %c0_i32_0 : i32, i32
  }
  func.func @transform_7(%arg0: i32) -> (i32, i32) {
    %c0_i32 = arith.constant 0 : i32
    %c0_i32_0 = arith.constant 0 : i32
    %c0_i32_1 = arith.constant 0 : i32
    return %c0_i32, %c0_i32_0 : i32, i32
  }
  func.func @transform_8(%arg0: i32) -> (i32, i32) {
    %c0_i32 = arith.constant 0 : i32
    %c0_i32_0 = arith.constant 0 : i32
    %c0_i32_1 = arith.constant 0 : i32
    return %c0_i32, %c0_i32_0 : i32, i32
  }
  func.func @transform_9(%arg0: i32) -> (i32, i32) {
    %c0_i32 = arith.constant 0 : i32
    %c0_i32_0 = arith.constant 0 : i32
    %c0_i32_1 = arith.constant 0 : i32
    return %c0_i32, %c0_i32_0 : i32, i32
  }
  func.func @transform_10(%arg0: i32) -> (i32, i32) {
    %c0_i32 = arith.constant 0 : i32
    %c0_i32_0 = arith.constant 0 : i32
    %c0_i32_1 = arith.constant 0 : i32
    return %c0_i32, %c0_i32_0 : i32, i32
  }
  func.func @transform_11(%arg0: i32) -> (i32, i32) {
    %c0_i32 = arith.constant 0 : i32
    %c0_i32_0 = arith.constant 0 : i32
    %c0_i32_1 = arith.constant 0 : i32
    return %c0_i32, %c0_i32_0 : i32, i32
  }
  func.func @transform_12(%arg0: i32) -> (i32, i32) {
    %c0_i32 = arith.constant 0 : i32
    %c0_i32_0 = arith.constant 0 : i32
    %c0_i32_1 = arith.constant 0 : i32
    return %c0_i32, %c0_i32_0 : i32, i32
  }
  func.func @transform_13(%arg0: i32) -> (i32, i32, i32) {
    %c0_i32 = arith.constant 0 : i32
    %c0_i32_0 = arith.constant 0 : i32
    %c0_i32_1 = arith.constant 0 : i32
    %c0_i32_2 = arith.constant 0 : i32
    return %c0_i32, %c0_i32_0, %c0_i32_1 : i32, i32, i32
  }
  func.func @transform_14(%arg0: i32) -> (i32, i32, i32) {
    %c0_i32 = arith.constant 0 : i32
    %c0_i32_0 = arith.constant 0 : i32
    %c0_i32_1 = arith.constant 0 : i32
    return %arg0, %c0_i32, %c0_i32_0 : i32, i32, i32
  }
}

</mosaic_0001>

<bundles_post_ra>
// kernel: squeeze.3
= control target key start
LH: loop header
LB: loop body
LE: loop exit
PB: predicated region body
PF: predicated region fallthrough
CT: control target
= control target key end

     0   :  { %vm107_vm0 = vcmask 1014784   ;;  %s166_s12 = smov 114   ;;  %vm120_vm1 = vcmask 1031168   ;;  %s167_s13 = smov 4   ;;  %vm16_vm2 = vcmask 146432   ;;  %vm111_vm3 = vcmask 31744   ;;  %s267_s0 = inlined_call_operand.vmem [shape: f32[2,288], index: 0, kind: input, shape index: {}]   ;;  %s268_s1 = inlined_call_operand.vmem [shape: f32[2,16,18], index: 1, kind: output, shape index: {}]  }
   0x1   :  { %v13_v0 = vld [vmem:[%s267_s0] sm:$0x3]  ;;  %v131_v1 = vld [vmem:[%s267_s0 + $0x4] sm:$0x3]  ;;  %v132_v2 = vld [vmem:[%s267_s0 + $0x2] sm:$0x3] }
   0x2   :  { %14 = vst [vmem:[#allocation0] sm:$0x3] %v13_v0  ;;  %8 = vst [vmem:[#allocation0 + $0x10] sm:$0x3] %v131_v1  ;;  %s165_s0 = smov 110   ;;  %s168_s14 = smov 112  }
   0x3   :  { %12 = vst [vmem:[#allocation0 + $0x8] sm:$0x3] %v132_v2  ;;  %s169_s17 = smov 2   ;;  %s170_s18 = smov 94   ;;  %vm114_vm4 = vcmask 146464   ;;  %vm124_vm5 = vcmask 15360  }
   0x4   :  { %s171_s19 = smov 92   ;;  %s172_s20 = smov 76   ;;  %vm127_vm6 = vcmask 146448  }
   0x5   :  { %s173_s21 = smov 74   ;;  %s174_s22 = smov 58  }
   0x6   :  { %s175_s23 = smov 56   ;;  %s176_s24 = smov 40  }
   0x7   :  { %s177_s25 = smov 38   ;;  %s178_s26 = smov 22  }
   0x8   :  { %s179_s27 = smov 20  }
   0x9   :  { %v32_v3 = vld [vmem:[#allocation0] sm:$0x3]   ;;  %v106_v4 = vld [vmem:[#allocation0 + $0x10] sm:$0x3]  }
   0xa   :  { %v19_v5 = vld [vmem:[#allocation0 + $0x10] sm:$0x3]   ;;  %33 = vrot.lane.b32.xlu0 %v32_v3, %s165_s0  ;;  %v104_v6 = vld [vmem:[#allocation0 + $0x8] sm:$0x3]   ;;  %v117_v9 = vld [vmem:[#allocation0] sm:$0x3]  }
   0xb   :  { %20 = vrot.lane.b32.xlu1 %v19_v5, %s166_s12  ;;  %v108_v7 = vsel %vm107_vm0, %v106_v4, %v104_v6  ;;  %v26_v8 = vld [vmem:[#allocation0 + $0x8] sm:$0x3]   ;;  %v15_v11 = vld [vmem:[#allocation0] sm:$0x3]  }
   0xc   :  { %v119_v10 = vld [vmem:[#allocation0 + $0x8] sm:$0x3]   ;;  %17 = vst.msk [vmem:[%s268_s1] ss:$16 sm:$0x3] %vm16_vm2, %v15_v11  }
   0xd   :  { %v121_v12 = vsel %vm120_vm1, %v119_v10, %v117_v9  ;;  %v39_v13 = vld [vmem:[#allocation0 + $0x8] sm:$0x3]   ;;  %v45_v14 = vld [vmem:[#allocation0] sm:$0x3]  }
   0xe   :  { %109 = vrot.lane.b32.xlu0 %v108_v7, %s167_s13  ;;  %v52_v15 = vld [vmem:[#allocation0 + $0x8] sm:$0x3]   ;;  %v58_v16 = vld [vmem:[#allocation0] sm:$0x3]  }
   0xf   :  { %27 = vrot.lane.b32.xlu1 %v26_v8, %s168_s14  ;;  %v65_v17 = vld [vmem:[#allocation0 + $0x8] sm:$0x3]   ;;  %v71_v18 = vld [vmem:[#allocation0] sm:$0x3]  }
  0x10   :  { %v78_v19 = vld [vmem:[#allocation0 + $0x8] sm:$0x3]   ;;  %v84_v20 = vld [vmem:[#allocation0] sm:$0x3]  }
  0x11   :  { %v91_v21 = vld [vmem:[#allocation0 + $0x8] sm:$0x3]   ;;  %v97_v22 = vld [vmem:[#allocation0] sm:$0x3]  }
  0x12   :  { %122 = vrot.lane.b32.xlu0 %v121_v12, %s169_s17 }
  0x13   :  { %40 = vrot.lane.b32.xlu1 %v39_v13, %s170_s18 }
  0x16   :  { %46 = vrot.lane.b32.xlu0 %v45_v14, %s171_s19 }
  0x17   :  { %53 = vrot.lane.b32.xlu1 %v52_v15, %s172_s20 }
  0x1a   :  { %59 = vrot.lane.b32.xlu0 %v58_v16, %s173_s21 }
  0x1b   :  { %66 = vrot.lane.b32.xlu1 %v65_v17, %s174_s22 }
  0x1e   :  { %72 = vrot.lane.b32.xlu0 %v71_v18, %s175_s23 }
  0x1f   :  { %79 = vrot.lane.b32.xlu1 %v78_v19, %s176_s24 }
  0x22   :  { %85 = vrot.lane.b32.xlu0 %v84_v20, %s177_s25 }
  0x23   :  { %92 = vrot.lane.b32.xlu1 %v91_v21, %s178_s26 }
  0x26   :  { %98 = vrot.lane.b32.xlu0 %v97_v22, %s179_s27 }
  0x7c   :  { %v34_v23 = vpop.permute.xlu0 %33  }
  0x7d   :  { %v21_v24 = vpop.permute.xlu1 %20   ;;  %135 = vst.msk [vmem:[%s268_s1 + $0x1] ss:$16 sm:$0x3] %vm16_vm2, %v34_v23  }
  0x7e   :  { %133 = vst.msk [vmem:[%s268_s1 + $0xf] ss:$16 sm:$0x3] %vm16_vm2, %v21_v24  }
  0x80   :  { %v110_v25 = vpop.permute.xlu0 %109  }
  0x81   :  { %v28_v26 = vpop.permute.xlu1 %27   ;;  %146 = vst.msk [vmem:[%s268_s1 + $0xe] ss:$16 sm:$0x3] %vm111_vm3, %v110_v25  }
  0x82   :  { %134 = vst.msk [vmem:[%s268_s1 + $0x8] ss:$16 sm:$0x3] %vm16_vm2, %v28_v26  }
  0x83   :  { %147 = vst.msk [vmem:[%s268_s1 + $0xe] ss:$16 sm:$0x3] %vm114_vm4, %v110_v25  }
  0x84   :  { %v123_v27 = vpop.permute.xlu0 %122  }
  0x85   :  { %v41_v28 = vpop.permute.xlu1 %40   ;;  %148 = vst.msk [vmem:[%s268_s1 + $0x7] ss:$16 sm:$0x3] %vm124_vm5, %v123_v27  }
  0x86   :  { %136 = vst.msk [vmem:[%s268_s1 + $0x9] ss:$16 sm:$0x3] %vm16_vm2, %v41_v28  }
  0x87   :  { %149 = vst.msk [vmem:[%s268_s1 + $0x7] ss:$16 sm:$0x3] %vm127_vm6, %v123_v27  }
  0x88   :  { %v47_v29 = vpop.permute.xlu0 %46  }
  0x89   :  { %v54_v30 = vpop.permute.xlu1 %53   ;;  %137 = vst.msk [vmem:[%s268_s1 + $0x2] ss:$16 sm:$0x3] %vm16_vm2, %v47_v29  }
  0x8a   :  { %138 = vst.msk [vmem:[%s268_s1 + $0xa] ss:$16 sm:$0x3] %vm16_vm2, %v54_v30  }
  0x8c   :  { %v60_v31 = vpop.permute.xlu0 %59  }
  0x8d   :  { %v67_v32 = vpop.permute.xlu1 %66   ;;  %139 = vst.msk [vmem:[%s268_s1 + $0x3] ss:$16 sm:$0x3] %vm16_vm2, %v60_v31  }
  0x8e   :  { %140 = vst.msk [vmem:[%s268_s1 + $0xb] ss:$16 sm:$0x3] %vm16_vm2, %v67_v32  }
  0x90   :  { %v73_v33 = vpop.permute.xlu0 %72  }
  0x91   :  { %v80_v34 = vpop.permute.xlu1 %79   ;;  %141 = vst.msk [vmem:[%s268_s1 + $0x4] ss:$16 sm:$0x3] %vm16_vm2, %v73_v33  }
  0x92   :  { %142 = vst.msk [vmem:[%s268_s1 + $0xc] ss:$16 sm:$0x3] %vm16_vm2, %v80_v34  }
  0x94   :  { %v86_v35 = vpop.permute.xlu0 %85  }
  0x95   :  { %v93_v36 = vpop.permute.xlu1 %92   ;;  %143 = vst.msk [vmem:[%s268_s1 + $0x5] ss:$16 sm:$0x3] %vm16_vm2, %v86_v35  }
  0x96   :  { %144 = vst.msk [vmem:[%s268_s1 + $0xd] ss:$16 sm:$0x3] %vm16_vm2, %v93_v36  }
  0x98   :  { %v99_v37 = vpop.permute.xlu0 %98  }
  0x99   :  { %145 = vst.msk [vmem:[%s268_s1 + $0x6] ss:$16 sm:$0x3] %vm16_vm2, %v99_v37  }

// kernel: pallas_forward.1
= control target key start
LH: loop header
LB: loop body
LE: loop exit
PB: predicated region body
PF: predicated region fallthrough
CT: control target
= control target key end

     0   :  { %s13119_s0 = inlined_call_operand.vmem [shape: f32[2,392,128], index: 0, kind: input, shape index: {}]   ;;  %s13120_s1 = inlined_call_operand.hbm [shape: f32[9,1,128], index: 1, kind: input, shape index: {}]   ;;  %s13121_s2 = inlined_call_operand.hbm [shape: f32[1,128], index: 2, kind: input, shape index: {}]   ;;  %s13122_s3 = inlined_call_operand.hbm [shape: f32[512,128], index: 3, kind: input, shape index: {}]   ;;  %s13123_s4 = inlined_call_operand.hbm [shape: f32[1,128], index: 4, kind: input, shape index: {}]   ;;  %s13124_s5 = inlined_call_operand.hbm [shape: f32[512,128], index: 5, kind: input, shape index: {}]   ;;  %s13125_s6 = inlined_call_operand.hbm [shape: f32[1,128], index: 6, kind: input, shape index: {}]   ;;  %s13126_s7 = inlined_call_operand.hbm [shape: f32[512,128], index: 7, kind: input, shape index: {}]   ;;  %s13127_s8 = inlined_call_operand.hbm [shape: f32[1,128], index: 8, kind: input, shape index: {}]   ;;  %s13128_s9 = inlined_call_operand.hbm [shape: f32[512,128], index: 9, kind: input, shape index: {}]   ;;  %s13129_s10 = inlined_call_operand.hbm [shape: f32[1,128], index: 10, kind: input, shape index: {}]   ;;  %s13130_s11 = inlined_call_operand.hbm [shape: f32[512,128], index: 11, kind: input, shape index: {}]   ;;  %s13131_s12 = inlined_call_operand.hbm [shape: f32[1,128], index: 12, kind: input, shape index: {}]   ;;  %s13132_s13 = inlined_call_operand.hbm [shape: f32[9,328,128], index: 13, kind: input, shape index: {}]   ;;  %s13133_s14 = inlined_call_operand.vmem [shape: f32[2,288,128], index: 14, kind: output, shape index: {}]  }
   0x1   :  { %13148 = sst [smem:[#allocation41_spill]] %s13120_s1 }
   0x2   :  { %13149 = sst [smem:[#allocation42_spill]] %s13121_s2 }
   0x3   :  { %13150 = sst [smem:[#allocation43_spill]] %s13123_s4 }
   0x4   :  { %13151 = sst [smem:[#allocation44_spill]] %s13133_s14 }
   0x5   :  { %19 = vsyncpa [#allocation5], 0 }
   0x6   :  { %20 = vsyncpa [#allocation7], 0 }
   0x7   :  { %21 = vsyncpa [#allocation10], 0 }
   0x8   :  { %22 = vsyncpa [#allocation13], 0 }
   0x9   :  { %23 = vsyncpa [#allocation16], 0 }
   0xa   :  { %24 = vsyncpa [#allocation19], 0 }
   0xb   :  { %25 = vsyncpa [#allocation22], 0  ;;  %s10082_s29 = smov 0  }
   0xc LB: > { %13152 = sst [smem:[#allocation31_spill]] %s9986_s29  ;;  %s9988_s30 = smov [#allocation6]   ;;  %s9986_s29 = sphi %s10082_s29, %s31_s29  }
   0xd   : > { %s387_s15 = sshll.u32 %s9988_s30, 4  ;;  %s10088_s16 = sadd.s32 4294967295, %s9986_s29   ;;  %s10093_s15 = int_to_ptr.vmem [resolvable:$true] %s387_s15 }
   0xe   : > { %p8249_p0 = scmp.ge.s32.totalorder %s9986_s29, 1  ;;  %p361_p1 = scmp.lt.s32.totalorder %s9986_s29, 3 }
   0xf   : > { %p13135_p2 = scmp.eq.s32.totalorder %s10088_s16, 0  ;;  %s9989_s18 = smov [#allocation9]  }
  0x10   : > { %p10095_p3 = pnand %p8249_p0, %p361_p1  ;;  %s411_s19 = sshll.u32 %s9989_s18, 4  ;;  %s10101_s19 = int_to_ptr.vmem [resolvable:$true] %s411_s19 }
  0x11   : > { %s9990_s20 = smov [#allocation12]   ;;  %s9991_s23 = smov [#allocation15]  }
  0x12   : > { %s13153_s17 = scalar_select %p10095_p3, 1, 0 }
  0x13   : > { %p9390_p4 = pneg %p10095_p3  ;;  %s435_s21 = sshll.u32 %s9990_s20, 4  ;;  %s10109_s21 = int_to_ptr.vmem [resolvable:$true] %s435_s21 }
  0x14   : > { %s459_s24 = sshll.u32 %s9991_s23, 4  ;;  %s13155_s2 = sld [smem:[#allocation42_spill]]  ;;  %s10111_s24 = int_to_ptr.vmem [resolvable:$true] %s459_s24 }
  0x15   : > { %p10105_p5 = pnand %p13135_p2, %p9390_p4 }
  0x17   : > { %p10121_p7 = pneg %p10105_p5 }
  0x1a   : > { %s9588_s27 = scalar_lea.hbm %s13155_s2, 16 }
  0x1b   : > { %p9589_p6 = scmp.ne.s32.totalorder %s13155_s2, %s9588_s27  ;;  %p9595_p10 = scmp.lt.u32.totalorder %s9588_s27, %s13155_s2 }
  0x1d   : > { %p9591_p8 = pnand %p10121_p7, %p9589_p6 }
  0x1f   : > { %p9592_p9 = pneg %p9591_p8 }
  0x21   : > { %p9597_p11 = pnand %p9595_p10, %p9592_p9 }
  0x23   : > { %9600 = shalt.err (!%p9597_p11)
}
  0x24   : > { %s9601_s25 = scalar_lea.vmem %s10093_s15, 16  ;;  %s9608_s26 = scalar_lea.vmem %s10093_s15, 32 }
  0x25   : > { %p9602_p12 = scmp.ne.s32.totalorder %s10093_s15, %s9601_s25  ;;  %p9609_p1 = scmp.lt.s32.totalorder %s10093_s15, %s10093_s15 }
  0x26   : > { %p9610_p4 = scmp.lt.s32.totalorder %s9608_s26, %s9601_s25 }
  0x27   : > { %p9604_p13 = pnand %p9602_p12, %p10121_p7 }
  0x28   : > { %p9611_p6 = por %p9610_p4, %p9609_p1 }
  0x29   : > { %p9605_p0 = pneg %p9604_p13 }
  0x2b   : > { %p9612_p8 = pnand %p9611_p6, %p9605_p0 }
  0x2d   : > { %9615 = shalt.err (!%p9612_p8)
}
  0x2e   : > { %9396 = dma.hbm_to_vmem [thread:$0]  (!%p10105_p5), %s13155_s2, 16, %s10093_s15, [#allocation7]  }
  0x2f   : > { %s13157_s4 = sld [smem:[#allocation43_spill]] }
  0x35   : > { %s9616_s23 = scalar_lea.hbm %s13157_s4, 16 }
  0x36   : > { %p9617_p9 = scmp.ne.s32.totalorder %s13157_s4, %s9616_s23  ;;  %p9623_p12 = scmp.lt.u32.totalorder %s9616_s23, %s13157_s4 }
  0x38   : > { %p9619_p10 = pnand %p9617_p9, %p10121_p7 }
  0x3a   : > { %p9620_p11 = pneg %p9619_p10 }
  0x3c   : > { %p9625_p13 = pnand %p9623_p12, %p9620_p11 }
  0x3e   : > { %9628 = shalt.err (!%p9625_p13)
}
  0x3f   : > { %s9629_s15 = scalar_lea.vmem %s10101_s19, 16  ;;  %s9636_s14 = scalar_lea.vmem %s10101_s19, 32 }
  0x40   : > { %p9630_p0 = scmp.ne.s32.totalorder %s10101_s19, %s9629_s15  ;;  %p9637_p6 = scmp.lt.s32.totalorder %s10101_s19, %s10101_s19 }
  0x41   : > { %p9638_p8 = scmp.lt.s32.totalorder %s9636_s14, %s9629_s15 }
  0x42   : > { %p9632_p1 = pnand %p9630_p0, %p10121_p7 }
  0x43   : > { %p9639_p9 = por %p9638_p8, %p9637_p6 }
  0x44   : > { %p9633_p4 = pneg %p9632_p1 }
  0x46   : > { %p9640_p10 = pnand %p9639_p9, %p9633_p4 }
  0x48   : > { %9643 = shalt.err (!%p9640_p10)
}
  0x49   : > { %9402 = dma.hbm_to_vmem [thread:$0]  (!%p10105_p5), %s13157_s4, 16, %s10101_s19, [#allocation10]  }
  0x4a   : > { %s9644_s20 = scalar_lea.hbm %s13125_s6, 16 }
  0x4b   : > { %p9645_p11 = scmp.ne.s32.totalorder %s13125_s6, %s9644_s20  ;;  %p9651_p0 = scmp.lt.u32.totalorder %s9644_s20, %s13125_s6 }
  0x4d   : > { %p9647_p12 = pnand %p9645_p11, %p10121_p7 }
  0x4f   : > { %p9648_p13 = pneg %p9647_p12 }
  0x51   : > { %p9653_p1 = pnand %p9651_p0, %p9648_p13 }
  0x53   : > { %9656 = shalt.err (!%p9653_p1)
}
  0x54   : > { %s9657_s19 = scalar_lea.vmem %s10109_s21, 16  ;;  %s9664_s14 = scalar_lea.vmem %s10109_s21, 32 }
  0x55   : > { %p9658_p4 = scmp.ne.s32.totalorder %s10109_s21, %s9657_s19  ;;  %p9665_p9 = scmp.lt.s32.totalorder %s10109_s21, %s10109_s21 }
  0x56   : > { %p9666_p10 = scmp.lt.s32.totalorder %s9664_s14, %s9657_s19 }
  0x57   : > { %p9660_p6 = pnand %p9658_p4, %p10121_p7 }
  0x58   : > { %p9667_p11 = por %p9666_p10, %p9665_p9 }
  0x59   : > { %p9661_p8 = pneg %p9660_p6 }
  0x5b   : > { %p9668_p12 = pnand %p9667_p11, %p9661_p8 }
  0x5d   : > { %9671 = shalt.err (!%p9668_p12)
}
  0x5e   : > { %9408 = dma.hbm_to_vmem [thread:$0]  (!%p10105_p5), %s13125_s6, 16, %s10109_s21, [#allocation13]  }
  0x5f   : > { %s9672_s20 = scalar_lea.hbm %s13127_s8, 16 }
  0x60   : > { %p9673_p13 = scmp.ne.s32.totalorder %s13127_s8, %s9672_s20  ;;  %p9679_p4 = scmp.lt.u32.totalorder %s9672_s20, %s13127_s8 }
  0x62   : > { %p9675_p0 = pnand %p9673_p13, %p10121_p7 }
  0x64   : > { %p9676_p1 = pneg %p9675_p0 }
  0x66   : > { %p9681_p6 = pnand %p9679_p4, %p9676_p1 }
  0x68   : > { %9684 = shalt.err (!%p9681_p6)
}
  0x69   : > { %s9685_s21 = scalar_lea.vmem %s10111_s24, 16  ;;  %s9692_s19 = scalar_lea.vmem %s10111_s24, 32 }
  0x6a   : > { %p9686_p8 = scmp.ne.s32.totalorder %s10111_s24, %s9685_s21  ;;  %p9693_p11 = scmp.lt.s32.totalorder %s10111_s24, %s10111_s24 }
  0x6b   : > { %p9694_p12 = scmp.lt.s32.totalorder %s9692_s19, %s9685_s21 }
  0x6c   : > { %p9688_p9 = pnand %p9686_p8, %p10121_p7 }
  0x6d   : > { %p9695_p13 = por %p9694_p12, %p9693_p11 }
  0x6e   : > { %p9689_p10 = pneg %p9688_p9 }
  0x70   : > { %p9696_p0 = pnand %p9695_p13, %p9689_p10 }
  0x72   : > { %9699 = shalt.err (!%p9696_p0)
}
  0x73   : > { %9414 = dma.hbm_to_vmem [thread:$0]  (!%p10105_p5), %s13127_s8, 16, %s10111_s24, [#allocation16]  }
  0x74   : > { %s9992_s27 = smov [#allocation18]   ;;  %s9993_s30 = smov [#allocation21]  }
  0x75   : > { %s483_s28 = sshll.u32 %s9992_s27, 4  ;;  %s507_s20 = sshll.u32 %s9993_s30, 4  ;;  %s484_s28 = int_to_ptr.vmem [resolvable:$true] %s483_s28  ;;  %s508_s20 = int_to_ptr.vmem [resolvable:$true] %s507_s20 }
  0x76   : > { %s9700_s26 = scalar_lea.hbm %s13129_s10, 16 }
  0x77   : > { %p9701_p1 = scmp.ne.s32.totalorder %s13129_s10, %s9700_s26  ;;  %p9707_p8 = scmp.lt.u32.totalorder %s9700_s26, %s13129_s10 }
  0x79   : > { %p9703_p4 = pnand %p9701_p1, %p10121_p7 }
  0x7b   : > { %p9704_p6 = pneg %p9703_p4 }
  0x7d   : > { %p9709_p9 = pnand %p9707_p8, %p9704_p6 }
  0x7f   : > { %9712 = shalt.err (!%p9709_p9)
}
  0x80   : > { %s9713_s24 = scalar_lea.vmem %s484_s28, 16  ;;  %s9720_s29 = scalar_lea.vmem %s484_s28, 32 }
  0x81   : > { %p9714_p10 = scmp.ne.s32.totalorder %s484_s28, %s9713_s24  ;;  %p9721_p13 = scmp.lt.s32.totalorder %s484_s28, %s484_s28 }
  0x82   : > { %p9722_p0 = scmp.lt.s32.totalorder %s9720_s29, %s9713_s24 }
  0x83   : > { %p9716_p11 = pnand %p9714_p10, %p10121_p7 }
  0x84   : > { %p9723_p2 = por %p9722_p0, %p9721_p13 }
  0x85   : > { %p9717_p12 = pneg %p9716_p11 }
  0x87   : > { %p9724_p3 = pnand %p9723_p2, %p9717_p12 }
  0x89   : > { %9727 = shalt.err (!%p9724_p3)
}
  0x8a   : > { %9420 = dma.hbm_to_vmem [thread:$0]  (!%p10105_p5), %s13129_s10, 16, %s484_s28, [#allocation19]  }
  0x8b   : > { %s9728_s26 = scalar_lea.hbm %s13131_s12, 16 }
  0x8c   : > { %p9729_p1 = scmp.ne.s32.totalorder %s13131_s12, %s9728_s26  ;;  %p9735_p3 = scmp.lt.u32.totalorder %s9728_s26, %s13131_s12 }
  0x8e   : > { %p9731_p4 = pnand %p9729_p1, %p10121_p7 }
  0x90   : > { %p9732_p2 = pneg %p9731_p4 }
  0x92   : > { %p9737_p6 = pnand %p9735_p3, %p9732_p2 }
  0x94   : > { %9740 = shalt.err (!%p9737_p6)
}
  0x95   : > { %s9741_s24 = scalar_lea.vmem %s508_s20, 16  ;;  %s9748_s28 = scalar_lea.vmem %s508_s20, 32 }
  0x96   : > { %p9742_p8 = scmp.ne.s32.totalorder %s508_s20, %s9741_s24  ;;  %p9749_p11 = scmp.lt.s32.totalorder %s508_s20, %s508_s20 }
  0x97   : > { %p9750_p12 = scmp.lt.s32.totalorder %s9748_s28, %s9741_s24 }
  0x98   : > { %p9744_p9 = pnand %p9742_p8, %p10121_p7 }
  0x99   : > { %p9751_p13 = por %p9750_p12, %p9749_p11 }
  0x9a   : > { %p9745_p10 = pneg %p9744_p9 }
  0x9c   : > { %p9752_p0 = pnand %p9751_p13, %p9745_p10 }
  0x9e   : > { %9755 = shalt.err (!%p9752_p0)
}
  0x9f   : > { %9426 = dma.hbm_to_vmem [thread:$0]  (!%p10105_p5), %s13131_s12, 16, %s508_s20, [#allocation22]  }
  0xa0   : > { %s9994_s30 = smov [#allocation4]   ;;  %s13158_s1 = sld [smem:[#allocation41_spill]] }
  0xa1   : > { %s373_s23 = sshll.u32 %s9994_s30, 4  ;;  %s374_s23 = int_to_ptr.vmem [resolvable:$true] %s373_s23 }
  0xa6   : > { %s9756_s15 = scalar_lea.hbm %s13158_s1, 144 }
  0xa7   : > { %p9757_p1 = scmp.ne.s32.totalorder %s13158_s1, %s9756_s15  ;;  %p9763_p3 = scmp.lt.u32.totalorder %s9756_s15, %s13158_s1 }
  0xa9   : > { %p9759_p4 = pnand %p9757_p1, %p10121_p7 }
  0xab   : > { %p9760_p2 = pneg %p9759_p4 }
  0xad   : > { %p9765_p6 = pnand %p9763_p3, %p9760_p2 }
  0xaf   : > { %9768 = shalt.err (!%p9765_p6)
}
  0xb0   : > { %s9769_s20 = scalar_lea.vmem %s374_s23, 144  ;;  %s9776_s28 = scalar_lea.vmem %s374_s23, 160 }
  0xb1   : > { %p9770_p8 = scmp.ne.s32.totalorder %s374_s23, %s9769_s20  ;;  %p9777_p11 = scmp.lt.s32.totalorder %s374_s23, %s374_s23 }
  0xb2   : > { %p9778_p12 = scmp.lt.s32.totalorder %s9776_s28, %s9769_s20 }
  0xb3   : > { %p9772_p9 = pnand %p9770_p8, %p10121_p7 }
  0xb4   : > { %p9779_p13 = por %p9778_p12, %p9777_p11 }
  0xb5   : > { %p9773_p10 = pneg %p9772_p9 }
  0xb7   : > { %p9780_p0 = pnand %p9779_p13, %p9773_p10 }
  0xb9   : > { %9783 = shalt.err (!%p9780_p0)
}
  0xba   : > { %s9995_s29 = smov 16   ;;  %s9996_s27 = smov 1  }
  0xbb   : > { %9393 = dma.hbm_to_vmem [thread:$0]  (!%p10105_p5), %s13158_s1, 144, %s374_s23, [#allocation5], %s9995_s29, %s9995_s29, %s9996_s27  }
  0xbc   : > { %s9997_s26 = smov [#allocation8]   ;;  %s9784_s14 = scalar_lea.hbm %s13122_s3, 8192 }
  0xbd   : > { %s397_s15 = sshll.u32 %s9997_s26, 4  ;;  %p9785_p1 = scmp.ne.s32.totalorder %s13122_s3, %s9784_s14  ;;  %s398_s15 = int_to_ptr.vmem [resolvable:$true] %s397_s15 }
  0xbe   : > { %p9791_p3 = scmp.lt.u32.totalorder %s9784_s14, %s13122_s3 }
  0xbf   : > { %p9787_p4 = pnand %p9785_p1, %p10121_p7 }
  0xc1   : > { %p9788_p2 = pneg %p9787_p4 }
  0xc3   : > { %p9793_p6 = pnand %p9791_p3, %p9788_p2 }
  0xc5   : > { %9796 = shalt.err (!%p9793_p6)
}
  0xc6   : > { %s9797_s23 = scalar_lea.vmem %s398_s15, 8192  ;;  %p9805_p11 = scmp.lt.s32.totalorder %s398_s15, %s398_s15 }
  0xc7   : > { %p9798_p8 = scmp.ne.s32.totalorder %s398_s15, %s9797_s23  ;;  %p9806_p12 = scmp.lt.s32.totalorder %s9797_s23, %s9797_s23 }
  0xc9   : > { %p9800_p9 = pnand %p9798_p8, %p10121_p7  ;;  %p9807_p13 = por %p9806_p12, %p9805_p11 }
  0xcb   : > { %p9801_p10 = pneg %p9800_p9 }
  0xcd   : > { %p9808_p0 = pnand %p9807_p13, %p9801_p10 }
  0xcf   : > { %9811 = shalt.err (!%p9808_p0)
}
  0xd0   : > { %s9998_s29 = smov 128   ;;  %s9999_s27 = smov 8  }
  0xd1   : > { %9399 = dma.hbm_to_vmem [thread:$0]  (!%p10105_p5), %s13122_s3, 8192, %s398_s15, [#allocation7], %s9998_s29, %s9998_s29, %s9999_s27  }
  0xd2   : > { %s10000_s25 = smov [#allocation11]   ;;  %s10001_s21 = smov [#allocation14]  }
  0xd3   : > { %s421_s26 = sshll.u32 %s10000_s25, 4  ;;  %s445_s19 = sshll.u32 %s10001_s21, 4  ;;  %s422_s26 = int_to_ptr.vmem [resolvable:$true] %s421_s26  ;;  %s446_s19 = int_to_ptr.vmem [resolvable:$true] %s445_s19 }
  0xd4   : > { %s9812_s20 = scalar_lea.hbm %s13124_s5, 8192 }
  0xd5   : > { %p9813_p1 = scmp.ne.s32.totalorder %s13124_s5, %s9812_s20  ;;  %p9819_p3 = scmp.lt.u32.totalorder %s9812_s20, %s13124_s5 }
  0xd7   : > { %p9815_p4 = pnand %p9813_p1, %p10121_p7 }
  0xd9   : > { %p9816_p2 = pneg %p9815_p4 }
  0xdb   : > { %p9821_p6 = pnand %p9819_p3, %p9816_p2 }
  0xdd   : > { %9824 = shalt.err (!%p9821_p6)
}
  0xde   : > { %s9825_s15 = scalar_lea.vmem %s422_s26, 8192  ;;  %p9833_p11 = scmp.lt.s32.totalorder %s422_s26, %s422_s26 }
  0xdf   : > { %p9826_p8 = scmp.ne.s32.totalorder %s422_s26, %s9825_s15  ;;  %p9834_p12 = scmp.lt.s32.totalorder %s9825_s15, %s9825_s15 }
  0xe1   : > { %p9828_p9 = pnand %p9826_p8, %p10121_p7  ;;  %p9835_p13 = por %p9834_p12, %p9833_p11 }
  0xe3   : > { %p9829_p10 = pneg %p9828_p9 }
  0xe5   : > { %p9836_p0 = pnand %p9835_p13, %p9829_p10 }
  0xe7   : > { %9839 = shalt.err (!%p9836_p0)
}
  0xe8   : > { %9405 = dma.hbm_to_vmem [thread:$0]  (!%p10105_p5), %s13124_s5, 8192, %s422_s26, [#allocation10], %s9998_s29, %s9998_s29, %s9999_s27  }
  0xe9   : > { %s9840_s25 = scalar_lea.hbm %s13126_s7, 8192 }
  0xea   : > { %p9841_p1 = scmp.ne.s32.totalorder %s13126_s7, %s9840_s25  ;;  %p9847_p3 = scmp.lt.u32.totalorder %s9840_s25, %s13126_s7 }
  0xec   : > { %p9843_p4 = pnand %p9841_p1, %p10121_p7 }
  0xee   : > { %p9844_p2 = pneg %p9843_p4 }
  0xf0   : > { %p9849_p6 = pnand %p9847_p3, %p9844_p2 }
  0xf2   : > { %9852 = shalt.err (!%p9849_p6)
}
  0xf3   : > { %s9853_s28 = scalar_lea.vmem %s446_s19, 8192  ;;  %p9861_p11 = scmp.lt.s32.totalorder %s446_s19, %s446_s19 }
  0xf4   : > { %p9854_p8 = scmp.ne.s32.totalorder %s446_s19, %s9853_s28  ;;  %p9862_p12 = scmp.lt.s32.totalorder %s9853_s28, %s9853_s28 }
  0xf6   : > { %p9856_p9 = pnand %p9854_p8, %p10121_p7  ;;  %p9863_p13 = por %p9862_p12, %p9861_p11 }
  0xf8   : > { %p9857_p10 = pneg %p9856_p9 }
  0xfa   : > { %p9864_p0 = pnand %p9863_p13, %p9857_p10 }
  0xfc   : > { %9867 = shalt.err (!%p9864_p0)
}
  0xfd   : > { %9411 = dma.hbm_to_vmem [thread:$0]  (!%p10105_p5), %s13126_s7, 8192, %s446_s19, [#allocation13], %s9998_s29, %s9998_s29, %s9999_s27  }
  0xfe   : > { %s10002_s15 = smov [#allocation17]   ;;  %s10003_s4 = smov [#allocation20]  }
  0xff   : > { %s469_s1 = sshll.u32 %s10002_s15, 4  ;;  %s493_s2 = sshll.u32 %s10003_s4, 4  ;;  %s470_s1 = int_to_ptr.vmem [resolvable:$true] %s469_s1  ;;  %s494_s2 = int_to_ptr.vmem [resolvable:$true] %s493_s2 }
 0x100   : > { %s9868_s21 = scalar_lea.hbm %s13128_s9, 8192 }
 0x101   : > { %p9869_p1 = scmp.ne.s32.totalorder %s13128_s9, %s9868_s21  ;;  %p9875_p3 = scmp.lt.u32.totalorder %s9868_s21, %s13128_s9 }
 0x103   : > { %p9871_p4 = pnand %p9869_p1, %p10121_p7 }
 0x105   : > { %p9872_p2 = pneg %p9871_p4 }
 0x107   : > { %p9877_p6 = pnand %p9875_p3, %p9872_p2 }
 0x109   : > { %9880 = shalt.err (!%p9877_p6)
}
 0x10a   : > { %s9881_s19 = scalar_lea.vmem %s470_s1, 8192  ;;  %p9889_p11 = scmp.lt.s32.totalorder %s470_s1, %s470_s1 }
 0x10b   : > { %p9882_p8 = scmp.ne.s32.totalorder %s470_s1, %s9881_s19  ;;  %p9890_p12 = scmp.lt.s32.totalorder %s9881_s19, %s9881_s19 }
 0x10d   : > { %p9884_p9 = pnand %p9882_p8, %p10121_p7  ;;  %p9891_p13 = por %p9890_p12, %p9889_p11 }
 0x10f   : > { %p9885_p10 = pneg %p9884_p9 }
 0x111   : > { %p9892_p0 = pnand %p9891_p13, %p9885_p10 }
 0x113   : > { %9895 = shalt.err (!%p9892_p0)
}
 0x114   : > { %9417 = dma.hbm_to_vmem [thread:$0]  (!%p10105_p5), %s13128_s9, 8192, %s470_s1, [#allocation16], %s9998_s29, %s9998_s29, %s9999_s27  }
 0x115   : > { %s9896_s30 = scalar_lea.hbm %s13130_s11, 8192 }
 0x116   : > { %p9897_p1 = scmp.ne.s32.totalorder %s13130_s11, %s9896_s30  ;;  %p9903_p3 = scmp.lt.u32.totalorder %s9896_s30, %s13130_s11 }
 0x118   : > { %p9899_p4 = pnand %p9897_p1, %p10121_p7 }
 0x11a   : > { %p9900_p2 = pneg %p9899_p4 }
 0x11c   : > { %p9905_p6 = pnand %p9903_p3, %p9900_p2 }
 0x11e   : > { %9908 = shalt.err (!%p9905_p6)
}
 0x11f   : > { %s9909_s20 = scalar_lea.vmem %s494_s2, 8192  ;;  %p9917_p11 = scmp.lt.s32.totalorder %s494_s2, %s494_s2 }
 0x120   : > { %p9910_p8 = scmp.ne.s32.totalorder %s494_s2, %s9909_s20  ;;  %p9918_p12 = scmp.lt.s32.totalorder %s9909_s20, %s9909_s20 }
 0x122   : > { %p9912_p9 = pnand %p9910_p8, %p10121_p7  ;;  %p9919_p13 = por %p9918_p12, %p9917_p11 }
 0x124   : > { %p9913_p10 = pneg %p9912_p9 }
 0x126   : > { %p9920_p0 = pnand %p9919_p13, %p9913_p10 }
 0x128   : > { %9923 = shalt.err (!%p9920_p0)
}
 0x129   : > { %9423 = dma.hbm_to_vmem [thread:$0]  (!%p10105_p5), %s13130_s11, 8192, %s494_s2, [#allocation19], %s9998_s29, %s9998_s29, %s9999_s27  }
 0x12a   : > { %s10004_s19 = smov [#allocation23]   ;;  %s9924_s4 = scalar_lea.hbm %s13132_s13, 47232 }
 0x12b   : > { %s517_s26 = sshll.u32 %s10004_s19, 4  ;;  %p9925_p1 = scmp.ne.s32.totalorder %s13132_s13, %s9924_s4  ;;  %s518_s26 = int_to_ptr.vmem [resolvable:$true] %s517_s26 }
 0x12c   : > { %p9931_p3 = scmp.lt.u32.totalorder %s9924_s4, %s13132_s13 }
 0x12d   : > { %p9927_p4 = pnand %p9925_p1, %p10121_p7 }
 0x12f   : > { %p9928_p2 = pneg %p9927_p4 }
 0x131   : > { %p9933_p6 = pnand %p9931_p3, %p9928_p2 }
 0x133   : > { %9936 = shalt.err (!%p9933_p6)
}
 0x134   : > { %s9937_s2 = scalar_lea.vmem %s518_s26, 47232  ;;  %p9945_p11 = scmp.lt.s32.totalorder %s518_s26, %s518_s26 }
 0x135   : > { %p9938_p8 = scmp.ne.s32.totalorder %s518_s26, %s9937_s2  ;;  %p9946_p12 = scmp.lt.s32.totalorder %s9937_s2, %s9937_s2 }
 0x137   : > { %p9940_p9 = pnand %p9938_p8, %p10121_p7  ;;  %p9947_p13 = por %p9946_p12, %p9945_p11 }
 0x139   : > { %p9941_p10 = pneg %p9940_p9 }
 0x13b   : > { %p9948_p0 = pnand %p9947_p13, %p9941_p10 }
 0x13d   : > { %9951 = shalt.err (!%p9948_p0)
}
 0x13e   : > { %9429 = dma.hbm_to_vmem [thread:$0]  (!%p10105_p5), %s13132_s13, 47232, %s518_s26, [#allocation22], %s9998_s29, %s9998_s29, %s9999_s27  }
 0x13f   : > { %p13159_p1 = scmp.ne.s32.totalorder %s13153_s17, 0 }
 0x141   : > { %541 = sbr.rel (%p13159_p1) target bundleno = 2510 (0x9ce), region = 76 }
 0x148   : > { %p13160_p7 = scmp.eq.s32.totalorder %s10088_s16, 0 }
 0x14a   : > { %9957 = dma.done.wait (%p13160_p7), [#allocation5], 144   ;;  %p13161_p4 = pmov %p13160_p7 }
 0x14c   : > { %9959 = vsyncadd (%p13161_p4), [#allocation5], 4294967152  ;;  %p13162_p2 = pmov %p13161_p4 }
 0x14e   : > { %9961 = dma.done.wait (%p13162_p2), [#allocation7], 8208   ;;  %p13163_p3 = pmov %p13162_p2 }
 0x14f   : > { %p13164_p6 = pmov %p13162_p2 }
 0x150   : > { %9963 = vsyncadd (%p13163_p3), [#allocation7], 4294959088 }
 0x151   : > { %9965 = dma.done.wait (%p13164_p6), [#allocation10], 8208   ;;  %p13165_p5 = pmov %p13162_p2 }
 0x152   : > { %p13166_p8 = pmov %p13162_p2 }
 0x153   : > { %9967 = vsyncadd (%p13165_p5), [#allocation10], 4294959088 }
 0x154   : > { %9969 = dma.done.wait (%p13166_p8), [#allocation13], 8208   ;;  %p13167_p9 = pmov %p13162_p2 }
 0x155   : > { %p13168_p10 = pmov %p13162_p2 }
 0x156   : > { %9971 = vsyncadd (%p13167_p9), [#allocation13], 4294959088 }
 0x157   : > { %9973 = dma.done.wait (%p13168_p10), [#allocation16], 8208   ;;  %p13169_p11 = pmov %p13162_p2 }
 0x158   : > { %p13170_p12 = pmov %p13162_p2 }
 0x159   : > { %9975 = vsyncadd (%p13169_p11), [#allocation16], 4294959088 }
 0x15a   : > { %9977 = dma.done.wait (%p13170_p12), [#allocation19], 8208   ;;  %p13171_p13 = pmov %p13162_p2 }
 0x15b   : > { %p13172_p0 = pmov %p13162_p2 }
 0x15c   : > { %9979 = vsyncadd (%p13171_p13), [#allocation19], 4294959088 }
 0x15d   : > { %9981 = dma.done.wait (%p13172_p0), [#allocation22], 47248   ;;  %p13173_p1 = pmov %p13172_p0 }
 0x15e   : > { %v13138_v0 = vmov 0.0|0.0   ;;  %v10006_v1 = vmov 0.0   ;;  %v2548_v2 = vld [vmem:[#allocation8] sm:$0xff]  ;;  %v2549_v3 = vld [vmem:[#allocation8 + $0x8] sm:$0xff]  ;;  %v2550_v7 = vld [vmem:[#allocation8 + $0x10] sm:$0xff]  ;;  %p635_p7 = scmp.lt.s32.totalorder %s10088_s16, 1 }
 0x15f   : > { %9983 = vsyncadd (%p13173_p1), [#allocation22], 4294920048  ;;  %8297 = vmatprep.subr.bf16.mxu1 %v13138_v0  ;;  %8345 = vmatprep.subr.bf16.mxu0 %v13138_v0  ;;  %645 = vst [vmem:[#allocation2] sm:$0xff] %v10006_v1  ;;  %v2580_v4 = vld [vmem:[#allocation8 + $0x100] sm:$0xff]  ;;  %v8298_v5 = vpack.c.bf16 %v2549_v3, %v2548_v2  ;;  %v2581_v6 = vld [vmem:[#allocation8 + $0x108] sm:$0xff]  ;;  %s13211_s19 = sld [smem:[#allocation44_spill]] }
 0x160   : > { %646 = vst [vmem:[#allocation2 + $0x8] sm:$0xff] %v10006_v1  ;;  %647 = vst [vmem:[#allocation2 + $0x10] sm:$0xff] %v10006_v1  ;;  %v2551_v8 = vld [vmem:[#allocation8 + $0x18] sm:$0xff]  ;;  %v8346_v9 = vpack.c.bf16 %v2581_v6, %v2580_v4  ;;  %v2582_v10 = vld [vmem:[#allocation8 + $0x110] sm:$0xff]  ;;  %s13214_s16 = smov (!%p635_p7, %s10088_s16), 1 }
 0x161   : > { %653 = vst [vmem:[#allocation3] sm:$0xff] %v10006_v1  ;;  %654 = vst [vmem:[#allocation3 + $0x8] sm:$0xff] %v10006_v1  ;;  %v2583_v11 = vld [vmem:[#allocation8 + $0x118] sm:$0xff]  ;;  %8299 = vmatpush1.bf16.msra.mxu1 %v8298_v5  ;;  %v8301_v12 = vpack.c.bf16 %v2551_v8, %v2550_v7  ;;  %v2552_v14 = vld [vmem:[#allocation8 + $0x20] sm:$0xff]  ;;  %s9336_s17 = smul.u32 392, %s13214_s16 }
 0x162   : > { %655 = vst [vmem:[#allocation3 + $0x10] sm:$0xff] %v10006_v1  ;;  %656 = vst [vmem:[#allocation3 + $0x160] sm:$0xff] %v10006_v1  ;;  %8347 = vmatpush1.bf16.msra.mxu0 %v8346_v9  ;;  %8300 = vmatprep.subr.bf16.mxu1 %v13138_v0  ;;  %v8349_v13 = vpack.c.bf16 %v2583_v11, %v2582_v10  ;;  %v2553_v15 = vld [vmem:[#allocation8 + $0x28] sm:$0xff]  ;;  %v2584_v16 = vld [vmem:[#allocation8 + $0x120] sm:$0xff]  ;;  %s9337_s27 = smul.u32 288, %s13214_s16 }
 0x163   : > { %657 = vst [vmem:[#allocation3 + $0x168] sm:$0xff] %v10006_v1  ;;  %658 = vst [vmem:[#allocation3 + $0x170] sm:$0xff] %v10006_v1  ;;  %8348 = vmatprep.subr.bf16.mxu0 %v13138_v0  ;;  %v2585_v17 = vld [vmem:[#allocation8 + $0x128] sm:$0xff]  ;;  %v8304_v18 = vpack.c.bf16 %v2553_v15, %v2552_v14  ;;  %v2554_v20 = vld [vmem:[#allocation8 + $0x30] sm:$0xff]  ;;  %s10495_s29 = scalar_lea.vmem %s13119_s0, %s9336_s17 }
 0x164   : > { %659 = vst [vmem:[#allocation3 + $0x178] sm:$0xff] %v10006_v1  ;;  %660 = vst [vmem:[#allocation3 + $0x180] sm:$0xff] %v10006_v1  ;;  %v8352_v19 = vpack.c.bf16 %v2585_v17, %v2584_v16  ;;  %v2555_v21 = vld [vmem:[#allocation8 + $0x38] sm:$0xff]  ;;  %v2586_v22 = vld [vmem:[#allocation8 + $0x130] sm:$0xff] }
 0x165   : > { %8302 = vmatpush1.bf16.msra.mxu1 %v8301_v12  ;;  %v2587_v23 = vld [vmem:[#allocation8 + $0x138] sm:$0xff]  ;;  %v8307_v24 = vpack.c.bf16 %v2555_v21, %v2554_v20  ;;  %v2556_v26 = vld [vmem:[#allocation8 + $0x40] sm:$0xff]  ;;  %v2557_v27 = vld [vmem:[#allocation8 + $0x48] sm:$0xff]  ;;  %s13047_s26 = scalar_lea.vmem %s13211_s19, %s9337_s27 }
 0x166   : > { %8350 = vmatpush1.bf16.msra.mxu0 %v8349_v13  ;;  %8303 = vmatprep.subr.bf16.mxu1 %v13138_v0  ;;  %v8355_v25 = vpack.c.bf16 %v2587_v23, %v2586_v22  ;;  %v2588_v28 = vld [vmem:[#allocation8 + $0x140] sm:$0xff]  ;;  %v2589_v29 = vld [vmem:[#allocation8 + $0x148] sm:$0xff]  ;;  %v10437_v30 = vld [vmem:[#allocation8 + $0x50] sm:$0xff]  ;;  %v8310_v32 = vpack.c.bf16 %v2557_v27, %v2556_v26 }
 0x167   : > { %8351 = vmatprep.subr.bf16.mxu0 %v13138_v0  ;;  %v10439_v31 = vld [vmem:[#allocation8 + $0x58] sm:$0xff]  ;;  %v10442_v33 = vld [vmem:[#allocation8 + $0x150] sm:$0xff]  ;;  %v10446_v35 = vld [vmem:[#allocation8 + $0x60] sm:$0xff]  ;;  %v8358_v37 = vpack.c.bf16 %v2589_v29, %v2588_v28 }
 0x168   : > { %v10444_v34 = vld [vmem:[#allocation8 + $0x158] sm:$0xff]  ;;  %v10448_v36 = vld [vmem:[#allocation8 + $0x68] sm:$0xff]  ;;  %v10451_v38 = vld [vmem:[#allocation8 + $0x160] sm:$0xff]  ;;  %v8313_v57 = vpack.c.bf16 %v10439_v31, %v10437_v30 }
 0x169   : > { %8305 = vmatpush1.bf16.msra.mxu1 %v8304_v18  ;;  %v10453_v39 = vld [vmem:[#allocation8 + $0x168] sm:$0xff]  ;;  %v10455_v40 = vld [vmem:[#allocation8 + $0x70] sm:$0xff]  ;;  %v10457_v41 = vld [vmem:[#allocation8 + $0x78] sm:$0xff]  ;;  %v8361_v61 = vpack.c.bf16 %v10444_v34, %v10442_v33  ;;  %v8316_v62 = vpack.c.bf16 %v10448_v36, %v10446_v35 }
 0x16a   : > { %8353 = vmatpush1.bf16.msra.mxu0 %v8352_v19  ;;  %8306 = vmatprep.subr.bf16.mxu1 %v13138_v0  ;;  %v10459_v42 = vld [vmem:[#allocation8 + $0x170] sm:$0xff]  ;;  %v10461_v43 = vld [vmem:[#allocation8 + $0x178] sm:$0xff]  ;;  %v10463_v44 = vld [vmem:[#allocation8 + $0x80] sm:$0xff]  ;;  %v8364_v3 = vpack.c.bf16 %v10453_v39, %v10451_v38 }
 0x16b   : > { %8354 = vmatprep.subr.bf16.mxu0 %v13138_v0  ;;  %v10465_v45 = vld [vmem:[#allocation8 + $0x88] sm:$0xff]  ;;  %v10468_v46 = vld [vmem:[#allocation8 + $0x180] sm:$0xff]  ;;  %v10472_v48 = vld [vmem:[#allocation8 + $0x90] sm:$0xff] }
 0x16c   : > { %v10470_v47 = vld [vmem:[#allocation8 + $0x188] sm:$0xff]  ;;  %v10474_v49 = vld [vmem:[#allocation8 + $0x98] sm:$0xff]  ;;  %v10476_v50 = vld [vmem:[#allocation8 + $0x190] sm:$0xff] }
 0x16d   : > { %8308 = vmatpush1.bf16.msra.mxu1 %v8307_v24  ;;  %v10478_v51 = vld [vmem:[#allocation8 + $0x198] sm:$0xff]  ;;  %v10480_v52 = vld [vmem:[#allocation8 + $0xa0] sm:$0xff]  ;;  %v10482_v53 = vld [vmem:[#allocation8 + $0xa8] sm:$0xff] }
 0x16e   : > { %8356 = vmatpush1.bf16.msra.mxu0 %v8355_v25  ;;  %8309 = vmatprep.subr.bf16.mxu1 %v13138_v0  ;;  %v10484_v54 = vld [vmem:[#allocation8 + $0x1a0] sm:$0xff]  ;;  %v10486_v55 = vld [vmem:[#allocation8 + $0x1a8] sm:$0xff]  ;;  %v10488_v56 = vld [vmem:[#allocation8 + $0xb0] sm:$0xff] }
 0x16f   : > { %8357 = vmatprep.subr.bf16.mxu0 %v13138_v0  ;;  %v10499_v58 = vld [vmem:[#allocation8 + $0xb8] sm:$0xff]  ;;  %v10501_v59 = vld [vmem:[#allocation8 + $0x1b0] sm:$0xff]  ;;  %v10510_v63 = vld [vmem:[#allocation8 + $0xc0] sm:$0xff] }
 0x170   : > { %v10503_v60 = vld [vmem:[#allocation8 + $0x1b8] sm:$0xff]  ;;  %v10512_v1 = vld [vmem:[#allocation8 + $0xc8] sm:$0xff]  ;;  %v10514_v2 = vld [vmem:[#allocation8 + $0x1c0] sm:$0xff] }
 0x171   : > { %8311 = vmatpush1.bf16.msra.mxu1 %v8310_v32  ;;  %v10525_v7 = vld [vmem:[#allocation8 + $0x1c8] sm:$0xff]  ;;  %v662_v9 = vld [vmem:[%s10495_s29 + $0xd] sm:$0xff]  ;;  %v10545_v18 = vld [vmem:[#allocation8 + $0xe0] sm:$0xff] }
 0x172   : > { %8359 = vmatpush1.bf16.msra.mxu0 %v8358_v37  ;;  %8312 = vmatprep.subr.bf16.mxu1 %v13138_v0  ;;  %v661_v8 = vld [vmem:[%s10495_s29 + $0x5] sm:$0xff]  ;;  %v10539_v15 = vld [vmem:[#allocation8 + $0xd8] sm:$0xff]  ;;  %13175 = vst [vmem:[#allocation33_spill] sm:$0xff] %v10545_v18  ;;  %v10549_v20 = vld [vmem:[#allocation4] ss:$0 sm:$0xff] }
 0x173   : > { %8360 = vmatprep.subr.bf16.mxu0 %v13138_v0  ;;  %v10537_v14 = vld [vmem:[#allocation8 + $0xd0] sm:$0xff]  ;;  %v10543_v17 = vld [vmem:[#allocation8 + $0x1d8] sm:$0xff]  ;;  %v10547_v19 = vld [vmem:[#allocation8 + $0xe8] sm:$0xff]  ;;  %v709_v25 = vmul.f32 %v10549_v20, %v661_v8  ;;  %v710_v26 = vmul.f32 %v10549_v20, %v662_v9 }
 0x174   : > { %v10541_v16 = vld [vmem:[#allocation8 + $0x1d0] sm:$0xff]  ;;  %13176 = vst [vmem:[#allocation34_spill] sm:$0xff] %v10547_v19  ;;  %v10566_v31 = vld [vmem:[#allocation8 + $0x1e0] sm:$0xff]  ;;  %v10568_v32 = vld [vmem:[#allocation8 + $0x1e8] sm:$0xff] }
 0x175   : > { %13174 = vst [vmem:[#allocation32_spill] sm:$0xff] %v10541_v16  ;;  %v750_v21 = vld [vmem:[%s10495_s29 + $0x6] sm:$0xff]  ;;  %v751_v22 = vld [vmem:[%s10495_s29 + $0xe] sm:$0xff]  ;;  %8314 = vmatpush1.bf16.msra.mxu1 %v8313_v57  ;;  %13177 = vst [vmem:[#allocation35_spill] sm:$0xff] %v10566_v31 }
 0x176   : > { %v10559_v27 = vld [vmem:[#allocation4 + $0x1] ss:$0 sm:$0xff]  ;;  %v881_v28 = vld [vmem:[%s10495_s29 + $0x7] sm:$0xff]  ;;  %8362 = vmatpush1.bf16.msra.mxu0 %v8361_v61  ;;  %8315 = vmatprep.subr.bf16.mxu1 %v13138_v0  ;;  %13178 = vst [vmem:[#allocation36_spill] sm:$0xff] %v10568_v32  ;;  %v10572_v34 = vld [vmem:[#allocation8 + $0xf8] sm:$0xff] }
 0x177   : > { %v882_v29 = vld [vmem:[%s10495_s29 + $0xf] sm:$0xff]  ;;  %13180 = vst [vmem:[#allocation38_spill] sm:$0xff] %v10572_v34  ;;  %v799_v35 = vmul.f32 %v10559_v27, %v750_v21  ;;  %v800_v36 = vmul.f32 %v10559_v27, %v751_v22  ;;  %v883_v37 = vld [vmem:[%s10495_s29 + $0x17] sm:$0xff]  ;;  %v884_v38 = vld [vmem:[%s10495_s29 + $0x1f] sm:$0xff]  ;;  %8363 = vmatprep.subr.bf16.mxu0 %v13138_v0 }
 0x178   : > { %v10570_v33 = vld [vmem:[#allocation8 + $0xf0] sm:$0xff]  ;;  %v1104_v22 = vld [vmem:[%s10495_s29 + $0x18] sm:$0xff]  ;;  %v1105_v30 = vld [vmem:[%s10495_s29 + $0x20] sm:$0xff] }
 0x179   : > { %13179 = vst [vmem:[#allocation37_spill] sm:$0xff] %v10570_v33  ;;  %v10578_v39 = vld [vmem:[#allocation4 + $0x2] ss:$0 sm:$0xff]  ;;  %v10587_v21 = vld [vmem:[#allocation4 + $0x3] ss:$0 sm:$0xff]  ;;  %v10593_v23 = vld [vmem:[#allocation8 + $0x1f8] sm:$0xff]  ;;  %v840_v13 = vadd.f32 %v799_v35, %v709_v25  ;;  %v841_v12 = vadd.f32 %v800_v36, %v710_v26  ;;  %8317 = vmatpush1.bf16.msra.mxu1 %v8316_v62 }
 0x17a   : > { %v930_v8 = vmul.f32 %v10578_v39, %v881_v28  ;;  %v931_v9 = vmul.f32 %v10578_v39, %v882_v29  ;;  %v10591_v24 = vld [vmem:[#allocation8 + $0x1f0] sm:$0xff]  ;;  %13182 = vst [vmem:[#allocation40_spill] sm:$0xff] %v10593_v23  ;;  %v1022_v57 = vmul.f32 %v10587_v21, %v883_v37  ;;  %v1023_v61 = vmul.f32 %v10587_v21, %v884_v38  ;;  %v10597_v28 = vld [vmem:[#allocation4 + $0x4] ss:$0 sm:$0xff]  ;;  %v1235_v26 = vld [vmem:[%s10495_s29 + $0x19] sm:$0xff] }
 0x17b   : > { %13181 = vst [vmem:[#allocation39_spill] sm:$0xff] %v10591_v24  ;;  %v1153_v25 = vmul.f32 %v10597_v28, %v1104_v22  ;;  %v1236_v35 = vld [vmem:[%s10495_s29 + $0x21] sm:$0xff]  ;;  %v10608_v36 = vld [vmem:[#allocation4 + $0x5] ss:$0 sm:$0xff]  ;;  %8365 = vmatpush1.bf16.msra.mxu0 %v8364_v3  ;;  %8318 = vmatprep.subr.bf16.mxu1 %v13138_v0  ;;  %v1154_v29 = vmul.f32 %v10597_v28, %v1105_v30  ;;  %v1237_v11 = vld [vmem:[%s10495_s29 + $0x29] sm:$0xff] }
 0x17c   : > { %v971_v62 = vadd.f32 %v930_v8, %v840_v13  ;;  %v972_v6 = vadd.f32 %v931_v9, %v841_v12  ;;  %v1238_v5 = vld [vmem:[%s10495_s29 + $0x31] sm:$0xff]  ;;  %8366 = vmatprep.subr.bf16.mxu0 %v13138_v0  ;;  %v10628_v9 = vmul.f32 %v10578_v39, %v883_v37  ;;  %v1284_v0 = vmul.f32 %v10608_v36, %v1235_v26  ;;  %v1932_v37 = vld [vmem:[#allocation2 + $0x5] sm:$0xff] }
 0x17d   : > { %v10614_v10 = vld [vmem:[#allocation4 + $0x6] ss:$0 sm:$0xff]  ;;  %v1458_v12 = vld [vmem:[%s10495_s29 + $0x2a] sm:$0xff]  ;;  %v10625_v30 = vld [vmem:[#allocation4 + $0x7] ss:$0 sm:$0xff]  ;;  %v1285_v19 = vmul.f32 %v10608_v36, %v1236_v35  ;;  %v13183_v13 = vpack.c.bf16 %v10457_v41, %v10455_v40  ;;  %v13185_v26 = vmov 0.0|0.0  }
 0x17e   : > { %v1459_v8 = vld [vmem:[%s10495_s29 + $0x32] sm:$0xff]  ;;  %v1063_v4 = vadd.f32 %v1022_v57, %v971_v62  ;;  %v1064_v18 = vadd.f32 %v1023_v61, %v972_v6  ;;  %v1376_v3 = vmul.f32 %v10614_v10, %v1237_v11  ;;  %v1377_v24 = vmul.f32 %v10614_v10, %v1238_v5 }
 0x17f   : > { %v1589_v22 = vld [vmem:[%s10495_s29 + $0x2b] sm:$0xff]  ;;  %v1590_v31 = vld [vmem:[%s10495_s29 + $0x33] sm:$0xff]  ;;  %8320 = vmatpush1.bf16.msra.mxu1 %v13183_v13  ;;  %v933_v6 = vmul.f32 %v10578_v39, %v884_v38  ;;  %v10643_v57 = vmul.f32 %v10608_v36, %v1237_v11  ;;  %v13184_v61 = vpack.c.bf16 %v10461_v43, %v10459_v42  ;;  %v1507_v35 = vmul.f32 %v10625_v30, %v1458_v12 }
 0x180   : > { %v10634_v32 = vld [vmem:[#allocation4 + $0x8] ss:$0 sm:$0xff]  ;;  %8321 = vmatprep.subr.bf16.mxu1 %v13185_v26  ;;  %v1194_v40 = vadd.f32 %v1153_v25, %v1063_v4  ;;  %v1195_v41 = vadd.f32 %v1154_v29, %v1064_v18  ;;  %v1933_v62 = vld [vmem:[#allocation2 + $0xd] sm:$0xff]  ;;  %v1508_v11 = vmul.f32 %v10625_v30, %v1459_v8  ;;  %v664_v4 = vld [vmem:[%s10495_s29 + $0x1d] sm:$0xff]  ;;  %v10657_v18 = vmul.f32 %v10608_v36, %v1238_v5 }
 0x181   : > { %8368 = vmatpush1.bf16.msra.mxu0 %v13184_v61  ;;  %v1973_v13 = vld [vmem:[#allocation2 + $0x6] sm:$0xff]  ;;  %v1974_v23 = vld [vmem:[#allocation2 + $0xe] sm:$0xff]  ;;  %v1638_v38 = vmul.f32 %v10634_v32, %v1589_v22  ;;  %v1639_v42 = vmul.f32 %v10634_v32, %v1590_v31  ;;  %v712_v61 = vmul.f32 %v10549_v20, %v664_v4  ;;  %v752_v33 = vld [vmem:[%s10495_s29 + $0x16] sm:$0xff]  ;;  %v13186_v31 = vpack.c.bf16 %v10465_v45, %v10463_v44 }
 0x182   : > { %8369 = vmatprep.subr.bf16.mxu0 %v13185_v26  ;;  %v663_v43 = vld [vmem:[%s10495_s29 + $0x15] sm:$0xff]  ;;  %v1325_v29 = vadd.f32 %v1284_v0, %v1194_v40  ;;  %v1326_v25 = vadd.f32 %v1285_v19, %v1195_v41  ;;  %v753_v8 = vld [vmem:[%s10495_s29 + $0x1e] sm:$0xff]  ;;  %v885_v22 = vld [vmem:[%s10495_s29 + $0x27] sm:$0xff]  ;;  %v10667_v34 = vadd.f32 %v1973_v13, %v1932_v37  ;;  %v10669_v16 = vadd.f32 %v1974_v23, %v1933_v62 }
 0x183   : > { %v711_v12 = vmul.f32 %v10549_v20, %v663_v43  ;;  %8323 = vmatpush1.bf16.msra.mxu1 %v13186_v31  ;;  %v801_v0 = vmul.f32 %v10559_v27, %v752_v33  ;;  %v802_v5 = vmul.f32 %v10559_v27, %v753_v8  ;;  %v10674_v19 = vld [vmem:[%s10495_s29 + $0x2f] sm:$0xff]  ;;  %v13187_v43 = vpack.c.bf16 %v10470_v47, %v10468_v46  ;;  %v1239_v37 = vld [vmem:[%s10495_s29 + $0x39] sm:$0xff]  ;;  %v10685_v33 = vld [vmem:[%s10495_s29 + $0x41] sm:$0xff] }
 0x184   : > { %v1106_v40 = vld [vmem:[%s10495_s29 + $0x28] sm:$0xff]  ;;  %v1107_v41 = vld [vmem:[%s10495_s29 + $0x30] sm:$0xff]  ;;  %8324 = vmatprep.subr.bf16.mxu1 %v13185_v26  ;;  %v1417_v44 = vadd.f32 %v1376_v3, %v1325_v29  ;;  %v1418_v45 = vadd.f32 %v1377_v24, %v1326_v25  ;;  %v1024_v23 = vmul.f32 %v10587_v21, %v885_v22  ;;  %v1025_v46 = vmul.f32 %v10587_v21, %v10674_v19  ;;  %v1460_v47 = vld [vmem:[%s10495_s29 + $0x3a] sm:$0xff] }
 0x185   : > { %8371 = vmatpush1.bf16.msra.mxu0 %v13187_v43  ;;  %v842_v62 = vadd.f32 %v801_v0, %v711_v12  ;;  %v843_v13 = vadd.f32 %v802_v5, %v712_v61  ;;  %v934_v3 = vmul.f32 %v10578_v39, %v885_v22  ;;  %v10692_v29 = vld [vmem:[#allocation6] ss:$0 sm:$0xff]  ;;  %v1155_v25 = vmul.f32 %v10597_v28, %v1106_v40  ;;  %v1461_v12 = vld [vmem:[%s10495_s29 + $0x42] sm:$0xff] }
 0x186   : > { %8372 = vmatprep.subr.bf16.mxu0 %v13185_v26  ;;  %v1548_v4 = vadd.f32 %v1507_v35, %v1417_v44  ;;  %v1549_v24 = vadd.f32 %v1508_v11, %v1418_v45  ;;  %v1156_v8 = vmul.f32 %v10597_v28, %v1107_v41  ;;  %v13188_v61 = vpack.c.bf16 %v10474_v49, %v10472_v48  ;;  %v1591_v11 = vld [vmem:[%s10495_s29 + $0x3b] sm:$0xff]  ;;  %v665_v5 = vld [vmem:[%s10495_s29 + $0x25] sm:$0xff] }
 0x187   : > { %v973_v31 = vadd.f32 %v10628_v9, %v842_v62  ;;  %v974_v0 = vadd.f32 %v933_v6, %v843_v13  ;;  %v1378_v22 = vmul.f32 %v10614_v10, %v1239_v37  ;;  %v1379_v35 = vmul.f32 %v10614_v10, %v10685_v33  ;;  %v754_v40 = vld [vmem:[%s10495_s29 + $0x26] sm:$0xff]  ;;  %v10714_v43 = vld [vmem:[%s10495_s29 + $0x37] sm:$0xff] }
 0x188   : > { %8326 = vmatpush1.bf16.msra.mxu1 %v13188_v61  ;;  %v13189_v41 = vpack.c.bf16 %v10478_v51, %v10476_v50  ;;  %v1679_v48 = vadd.f32 %v1638_v38, %v1548_v4  ;;  %v1680_v49 = vadd.f32 %v1639_v42, %v1549_v24  ;;  %v1509_v9 = vmul.f32 %v10625_v30, %v1460_v47  ;;  %v1592_v6 = vld [vmem:[%s10495_s29 + $0x43] sm:$0xff]  ;;  %v1108_v51 = vld [vmem:[%s10495_s29 + $0x38] sm:$0xff]  ;;  %v1810_v24 = vld [vmem:[#allocation23 + $0x8] sm:$0xff] }
 0x189   : > { %8327 = vmatprep.subr.bf16.mxu1 %v13185_v26  ;;  %v1065_v44 = vadd.f32 %v1024_v23, %v973_v31  ;;  %v1066_v45 = vadd.f32 %v1025_v46, %v974_v0  ;;  %v1510_v62 = vmul.f32 %v10625_v30, %v1461_v12  ;;  %v713_v50 = vmul.f32 %v10549_v20, %v665_v5  ;;  %v10725_v4 = vld [vmem:[%s10495_s29 + $0x49] sm:$0xff] }
 0x18a   : > { %8374 = vmatpush1.bf16.msra.mxu0 %v13189_v41  ;;  %v1727_v13 = vadd.f32 %v10692_v29, %v1679_v48  ;;  %v1728_v38 = vadd.f32 %v10692_v29, %v1680_v49  ;;  %v1640_v42 = vmul.f32 %v10634_v32, %v1591_v11  ;;  %v803_v47 = vmul.f32 %v10559_v27, %v754_v40  ;;  %v1809_v46 = vld [vmem:[#allocation23] sm:$0xff] }
 0x18b   : > { %8375 = vmatprep.subr.bf16.mxu0 %v13185_v26  ;;  %v13190_v23 = vpack.c.bf16 %v10482_v53, %v10480_v52  ;;  %v1196_v12 = vadd.f32 %v1155_v25, %v1065_v44  ;;  %v1197_v61 = vadd.f32 %v1156_v8, %v1066_v45  ;;  %v1641_v31 = vmul.f32 %v10634_v32, %v1592_v6  ;;  %v666_v11 = vld [vmem:[%s10495_s29 + $0x2d] sm:$0xff] }
 0x18c   : > { %v1026_v0 = vmul.f32 %v10587_v21, %v10714_v43  ;;  %v13191_v5 = vpack.c.bf16 %v10486_v55, %v10484_v54  ;;  %v1768_v52 = vmax.f32 %v1727_v13, 0.0  ;;  %v1769_v53 = vmax.f32 %v1728_v38, 0.0  ;;  %v755_v8 = vld [vmem:[%s10495_s29 + $0x2e] sm:$0xff] }
 0x18d   : > { %8329 = vmatpush1.bf16.msra.mxu1 %v13190_v23  ;;  %v844_v40 = vadd.f32 %v803_v47, %v713_v50  ;;  %v1157_v25 = vmul.f32 %v10597_v28, %v1108_v51  ;;  %v1327_v41 = vadd.f32 %v10643_v57, %v1196_v12  ;;  %v1328_v48 = vadd.f32 %v10657_v18, %v1197_v61  ;;  %v1462_v49 = vld [vmem:[%s10495_s29 + $0x4a] sm:$0xff]  ;;  %v10754_v57 = vld [vmem:[%s10495_s29 + $0x3f] sm:$0xff]  ;;  %v1463_v12 = vld [vmem:[%s10495_s29 + $0x52] sm:$0xff] }
 0x18e   : > { %8377 = vmatpush1.bf16.msra.mxu0 %v13191_v5  ;;  %8330 = vmatprep.subr.bf16.mxu1 %v13185_v26  ;;  %v1288_v54 = vmul.f32 %v10608_v36, %v1239_v37  ;;  %v1380_v55 = vmul.f32 %v10614_v10, %v10725_v4  ;;  %v1593_v6 = vld [vmem:[%s10495_s29 + $0x4b] sm:$0xff]  ;;  %v10748_v44 = vmul.f32 %v1809_v46, %v1768_v52  ;;  %v1109_v23 = vld [vmem:[%s10495_s29 + $0x40] sm:$0xff]  ;;  %v756_v61 = vld [vmem:[%s10495_s29 + $0x36] sm:$0xff] }
 0x18f   : > { %8378 = vmatprep.subr.bf16.mxu0 %v13185_v26  ;;  %v10750_v45 = vmul.f32 %v1810_v24, %v1769_v53  ;;  %v975_v50 = vadd.f32 %v934_v3, %v844_v40  ;;  %v714_v51 = vmul.f32 %v10549_v20, %v666_v11  ;;  %v13192_v18 = vpack.c.bf16 %v10499_v58, %v10488_v56  ;;  %v10764_v3 = vld [vmem:[%s10495_s29 + $0x51] sm:$0xff] }
 0x190   : > { %v1419_v37 = vadd.f32 %v1378_v22, %v1327_v41  ;;  %v1420_v13 = vadd.f32 %v1379_v35, %v1328_v48  ;;  %v804_v38 = vmul.f32 %v10559_v27, %v755_v8  ;;  %v935_v47 = vmul.f32 %v10578_v39, %v10674_v19  ;;  %1891 = vst [vmem:[#allocation2 + $0x18] sm:$0xff] %v10748_v44  ;;  %v667_v22 = vld [vmem:[%s10495_s29 + $0x35] sm:$0xff]  ;;  %v10793_v41 = vld [vmem:[%s10495_s29 + $0x47] sm:$0xff] }
 0x191   : > { %8332 = vmatpush1.bf16.msra.mxu1 %v13192_v18  ;;  %v13193_v46 = vpack.c.bf16 %v10503_v60, %v10501_v59  ;;  %1892 = vst [vmem:[#allocation2 + $0x20] sm:$0xff] %v10750_v45  ;;  %v1067_v56 = vadd.f32 %v1026_v0, %v975_v50  ;;  %v1511_v58 = vmul.f32 %v10625_v30, %v1462_v49  ;;  %v1812_v50 = vld [vmem:[#allocation23 + $0x18] sm:$0xff] }
 0x192   : > { %8333 = vmatprep.subr.bf16.mxu1 %v13185_v26  ;;  %v1642_v19 = vmul.f32 %v10634_v32, %v1593_v6  ;;  %v1550_v35 = vadd.f32 %v1509_v9, %v1419_v37  ;;  %v1551_v24 = vadd.f32 %v1510_v62, %v1420_v13  ;;  %v845_v59 = vadd.f32 %v804_v38, %v714_v51  ;;  %v1594_v9 = vld [vmem:[%s10495_s29 + $0x53] sm:$0xff]  ;;  %v668_v38 = vld [vmem:[%s10495_s29 + $0x3d] sm:$0xff] }
 0x193   : > { %8380 = vmatpush1.bf16.msra.mxu0 %v13193_v46  ;;  %v1027_v60 = vmul.f32 %v10587_v21, %v10754_v57  ;;  %v1198_v11 = vadd.f32 %v1157_v25, %v1067_v56  ;;  %v1158_v0 = vmul.f32 %v10597_v28, %v1109_v23  ;;  %v1289_v5 = vmul.f32 %v10608_v36, %v10685_v33  ;;  %v1811_v6 = vld [vmem:[#allocation23 + $0x10] sm:$0xff] }
 0x194   : > { %8381 = vmatprep.subr.bf16.mxu0 %v13185_v26  ;;  %v10785_v52 = vmul.f32 %v10614_v10, %v10764_v3  ;;  %v13194_v62 = vpack.c.bf16 %v10512_v1, %v10510_v63  ;;  %v1681_v53 = vadd.f32 %v1640_v42, %v1550_v35  ;;  %v1682_v40 = vadd.f32 %v1641_v31, %v1551_v24  ;;  %v1110_v1 = vld [vmem:[%s10495_s29 + $0x48] sm:$0xff]  ;;  %v10815_v13 = vld [vmem:[%s10495_s29 + $0x59] sm:$0xff] }
 0x195   : > { %v976_v8 = vadd.f32 %v935_v47, %v845_v59  ;;  %v715_v25 = vmul.f32 %v10549_v20, %v667_v22  ;;  %v13195_v48 = vpack.c.bf16 %v10525_v7, %v10514_v2  ;;  %v1329_v33 = vadd.f32 %v1288_v54, %v1198_v11 }
 0x196   : > { %8335 = vmatpush1.bf16.msra.mxu1 %v13194_v62  ;;  %v10800_v49 = vmul.f32 %v10625_v30, %v1463_v12  ;;  %v805_v63 = vmul.f32 %v10559_v27, %v756_v61  ;;  %v1729_v42 = vadd.f32 %v10692_v29, %v1681_v53  ;;  %v1730_v31 = vadd.f32 %v10692_v29, %v1682_v40 }
 0x197   : > { %8383 = vmatpush1.bf16.msra.mxu0 %v13195_v48  ;;  %8336 = vmatprep.subr.bf16.mxu1 %v13185_v26  ;;  %v1068_v2 = vadd.f32 %v1027_v60, %v976_v8  ;;  %v10808_v7 = vmul.f32 %v10634_v32, %v1594_v9  ;;  %v1421_v54 = vadd.f32 %v1380_v55, %v1329_v33  ;;  %v2055_v23 = vld [vmem:[#allocation2 + $0x17] sm:$0xff] }
 0x198   : > { %8384 = vmatprep.subr.bf16.mxu0 %v13185_v26  ;;  %v846_v51 = vadd.f32 %v805_v63, %v715_v25  ;;  %v936_v18 = vmul.f32 %v10578_v39, %v10714_v43  ;;  %v1028_v37 = vmul.f32 %v10587_v21, %v10793_v41  ;;  %v13196_v47 = vpack.c.bf16 %v10539_v15, %v10537_v14  ;;  %v2056_v46 = vld [vmem:[#allocation2 + $0x1f] sm:$0xff]  ;;  %v1934_v35 = vld [vmem:[#allocation2 + $0x15] sm:$0xff] }
 0x199   : > { %v1770_v56 = vmax.f32 %v1729_v42, 0.0  ;;  %v1771_v22 = vmax.f32 %v1730_v31, 0.0  ;;  %v1199_v55 = vadd.f32 %v1158_v0, %v1068_v2  ;;  %v1159_v24 = vmul.f32 %v10597_v28, %v1110_v1  ;;  %v13197_v43 = vld [vmem:[#allocation32_spill] sm:$0xff]  ;;  %v1935_v15 = vld [vmem:[#allocation2 + $0x1d] sm:$0xff] }
 0x19a   : > { %8338 = vmatpush1.bf16.msra.mxu1 %v13196_v47  ;;  %v13198_v59 = vpack.c.bf16 %v10543_v17, %v13197_v43  ;;  %v2096_v60 = vadd.f32 %v2055_v23, %v10667_v34  ;;  %v2097_v14 = vadd.f32 %v2056_v46, %v10669_v16  ;;  %v1975_v12 = vld [vmem:[#allocation2 + $0x16] sm:$0xff]  ;;  %v1976_v61 = vld [vmem:[#allocation2 + $0x1e] sm:$0xff]  ;;  %v1552_v11 = vadd.f32 %v1511_v58, %v1421_v54  ;;  %v2261_v63 = vld [vmem:[#allocation23 + $0x148] sm:$0xff] }
 0x19b   : > { %8339 = vmatprep.subr.bf16.mxu1 %v13185_v26  ;;  %v10829_v0 = vmul.f32 %v1811_v6, %v1770_v56  ;;  %v10831_v9 = vmul.f32 %v1812_v50, %v1771_v22  ;;  %v1290_v17 = vmul.f32 %v10608_v36, %v10725_v4  ;;  %v10837_v62 = vmul.f32 %v10614_v10, %v10815_v13  ;;  %v1464_v58 = vld [vmem:[%s10495_s29 + $0x5a] sm:$0xff]  ;;  %v10857_v23 = vld [vmem:[%s10495_s29 + $0x4f] sm:$0xff] }
 0x19c   : > { %8386 = vmatpush1.bf16.msra.mxu0 %v13198_v59  ;;  %v2178_v34 = vadd.f32 %v2096_v60, %v10748_v44  ;;  %v2179_v16 = vadd.f32 %v2097_v14, %v10750_v45  ;;  %v1683_v53 = vadd.f32 %v1642_v19, %v1552_v11  ;;  %v1330_v40 = vadd.f32 %v1289_v5, %v1199_v55  ;;  %v757_v8 = vld [vmem:[%s10495_s29 + $0x3e] sm:$0xff]  ;;  %v13200_v48 = vld [vmem:[#allocation33_spill] sm:$0xff]  ;;  %v13202_v19 = vld [vmem:[#allocation36_spill] sm:$0xff] }
 0x19d   : > { %8387 = vmatprep.subr.bf16.mxu0 %v13185_v26  ;;  %v13199_v25 = vld [vmem:[#allocation34_spill] sm:$0xff]  ;;  %v2262_v4 = vld [vmem:[#allocation23 + $0x150] sm:$0xff]  ;;  %1893 = vst [vmem:[#allocation2 + $0x28] sm:$0xff] %v10829_v0  ;;  %1894 = vst [vmem:[#allocation2 + $0x30] sm:$0xff] %v10831_v9  ;;  %v2016_v1 = vadd.f32 %v1975_v12, %v1934_v35  ;;  %v2017_v44 = vadd.f32 %v1976_v61, %v1935_v15  ;;  %v977_v42 = vadd.f32 %v936_v18, %v846_v51 }
 0x19e   : > { %v13201_v33 = vpack.c.bf16 %v13199_v25, %v13200_v48  ;;  %v716_v45 = vmul.f32 %v10549_v20, %v668_v38  ;;  %v13203_v5 = vld [vmem:[#allocation35_spill] sm:$0xff]  ;;  %v2219_v6 = vmul.f32 0.25, %v2178_v34  ;;  %v2220_v2 = vmul.f32 0.25, %v2179_v16  ;;  %v1595_v47 = vld [vmem:[%s10495_s29 + $0x5b] sm:$0xff]  ;;  %v1111_v22 = vld [vmem:[%s10495_s29 + $0x50] sm:$0xff] }
 0x19f   : > { %v13204_v31 = vpack.c.bf16 %v13202_v19, %v13203_v5  ;;  %v1731_v50 = vadd.f32 %v10692_v29, %v1683_v53  ;;  %v1422_v54 = vadd.f32 %v10785_v52, %v1330_v40  ;;  %v1813_v51 = vld [vmem:[#allocation23 + $0x20] sm:$0xff]  ;;  %v1069_v18 = vadd.f32 %v1028_v37, %v977_v42  ;;  %v13205_v60 = vld [vmem:[#allocation38_spill] sm:$0xff]  ;;  %v13206_v14 = vld [vmem:[#allocation37_spill] sm:$0xff] }
 0x1a0   : > { %8341 = vmatpush1.bf16.msra.mxu1 %v13201_v33  ;;  %v1513_v38 = vmul.f32 %v10625_v30, %v1464_v58  ;;  %v806_v46 = vmul.f32 %v10559_v27, %v757_v8  ;;  %v937_v56 = vmul.f32 %v10578_v39, %v10754_v57  ;;  %v10865_v35 = vmul.f32 %v2261_v63, %v2219_v6  ;;  %v10871_v59 = vld [vmem:[%s10495_s29 + $0x61] sm:$0xff]  ;;  %v13208_v53 = vld [vmem:[#allocation40_spill] sm:$0xff] }
 0x1a1   : > { %8389 = vmatpush1.bf16.msra.mxu0 %v13204_v31  ;;  %8342 = vmatprep.subr.bf16.mxu1 %v13185_v26  ;;  %v10867_v52 = vmul.f32 %v2262_v4, %v2220_v2  ;;  %v1772_v55 = vmax.f32 %v1731_v50, 0.0  ;;  %v1553_v43 = vadd.f32 %v10800_v49, %v1422_v54  ;;  %v669_v37 = vld [vmem:[%s10495_s29 + $0x45] sm:$0xff]  ;;  %v13207_v15 = vpack.c.bf16 %v13205_v60, %v13206_v14 }
 0x1a2   : > { %8390 = vmatprep.subr.bf16.mxu0 %v13185_v26  ;;  %v1200_v12 = vadd.f32 %v1159_v24, %v1069_v18  ;;  %v1644_v61 = vmul.f32 %v10634_v32, %v1595_v47  ;;  %v847_v57 = vadd.f32 %v806_v46, %v716_v45  ;;  %v1029_v11 = vmul.f32 %v10587_v21, %v10857_v23  ;;  %v1465_v34 = vld [vmem:[%s10495_s29 + $0x62] sm:$0xff]  ;;  %v10898_v45 = vld [vmem:[%s10495_s29 + $0x57] sm:$0xff] }
 0x1a3   : > { %v758_v16 = vld [vmem:[%s10495_s29 + $0x46] sm:$0xff]  ;;  %2343 = vst [vmem:[#allocation3 + $0x18] sm:$0xff] %v10865_v35  ;;  %2344 = vst [vmem:[#allocation3 + $0x20] sm:$0xff] %v10867_v52  ;;  %v10887_v58 = vmul.f32 %v1813_v51, %v1772_v55  ;;  %v1684_v24 = vadd.f32 %v10808_v7, %v1553_v43  ;;  %v1160_v8 = vmul.f32 %v10597_v28, %v1111_v22  ;;  %v1112_v46 = vld [vmem:[%s10495_s29 + $0x58] sm:$0xff] }
 0x1a4   : > { %8344 = vmatpush1.bf16.msra.mxu1 %v13207_v15  ;;  %v13209_v49 = vld [vmem:[#allocation39_spill] sm:$0xff]  ;;  %v1291_v25 = vmul.f32 %v10608_v36, %v10764_v3  ;;  %v1331_v48 = vadd.f32 %v1290_v17, %v1200_v12  ;;  %v978_v33 = vadd.f32 %v937_v56, %v847_v57  ;;  %v1383_v63 = vmul.f32 %v10614_v10, %v10871_v59  ;;  %v2058_v7 = vld [vmem:[#allocation2 + $0x2f] sm:$0xff]  ;;  %v2263_v15 = vld [vmem:[#allocation23 + $0x158] sm:$0xff] }
 0x1a5   : > { %v13210_v40 = vpack.c.bf16 %v13208_v53, %v13209_v49  ;;  %v1596_v4 = vld [vmem:[%s10495_s29 + $0x63] sm:$0xff]  ;;  %v717_v42 = vmul.f32 %v10549_v20, %v669_v37  ;;  %8393 = vmatprep.subr.bf16.mxu1 %v13185_v26  ;;  %1895 = vst [vmem:[#allocation2 + $0x38] sm:$0xff] %v10887_v58  ;;  %v1732_v5 = vadd.f32 %v10692_v29, %v1684_v24  ;;  %v1814_v3 = vld [vmem:[#allocation23 + $0x28] sm:$0xff] }
 0x1a6   : > { %v2057_v19 = vld [vmem:[#allocation2 + $0x27] sm:$0xff]  ;;  %v1514_v17 = vmul.f32 %v10625_v30, %v1465_v34  ;;  %v807_v31 = vmul.f32 %v10559_v27, %v758_v16  ;;  %v938_v6 = vmul.f32 %v10578_v39, %v10793_v41  ;;  %v2099_v50 = vadd.f32 %v2058_v7, %v2017_v44 }
 0x1a7   : > { %8392 = vmatpush1.bf16.msra.mxu0 %v13210_v40  ;;  %v2098_v2 = vadd.f32 %v2057_v19, %v2016_v1  ;;  %v1936_v54 = vld [vmem:[#allocation2 + $0x25] sm:$0xff]  ;;  %v1423_v51 = vadd.f32 %v10837_v62, %v1331_v48  ;;  %v1070_v18 = vadd.f32 %v1029_v11, %v978_v33  ;;  %v1773_v56 = vmax.f32 %v1732_v5, 0.0  ;;  %v1937_v1 = vld [vmem:[#allocation2 + $0x2d] sm:$0xff] }
 0x1a8   : > { %8489 = vmatprep.subr.bf16.mxu0 %v13185_v26  ;;  %v1977_v47 = vld [vmem:[#allocation2 + $0x26] sm:$0xff]  ;;  %v1645_v22 = vmul.f32 %v10634_v32, %v1596_v4  ;;  %v848_v55 = vadd.f32 %v807_v31, %v717_v42  ;;  %v1030_v43 = vmul.f32 %v10587_v21, %v10898_v45  ;;  %v2181_v37 = vadd.f32 %v2099_v50, %v10831_v9  ;;  %v1978_v44 = vld [vmem:[#allocation2 + $0x2e] sm:$0xff] }
 0x1a9   : > { %v2180_v41 = vadd.f32 %v2098_v2, %v10829_v0  ;;  %v1554_v60 = vadd.f32 %v1513_v38, %v1423_v51  ;;  %v1201_v14 = vadd.f32 %v1160_v8, %v1070_v18  ;;  %v10916_v62 = vld [vmem:[%s10495_s29 + $0x69] sm:$0xff]  ;;  %v2018_v57 = vadd.f32 %v1977_v47, %v1936_v54  ;;  %v1815_v2 = vld [vmem:[#allocation23 + $0x30] sm:$0xff]  ;;  %v10939_v47 = vld [vmem:[%s10495_s29 + $0x5f] sm:$0xff] }
 0x1aa   : > { %v2264_v12 = vld [vmem:[#allocation23 + $0x160] sm:$0xff]  ;;  %v10918_v11 = vmul.f32 %v1814_v3, %v1773_v56  ;;  %v979_v34 = vadd.f32 %v938_v6, %v848_v55  ;;  %v1161_v0 = vmul.f32 %v10597_v28, %v1112_v46  ;;  %v2222_v53 = vmul.f32 0.25, %v2181_v37  ;;  %v759_v19 = vld [vmem:[%s10495_s29 + $0x4e] sm:$0xff] }
 0x1ab   : > { %v2425_v16 = vld [vmem:[#allocation3 + $0x19] sm:$0xff]  ;;  %v2221_v9 = vmul.f32 0.25, %v2180_v41  ;;  %v1685_v49 = vadd.f32 %v1644_v61, %v1554_v60  ;;  %v1332_v40 = vadd.f32 %v1291_v25, %v1201_v14  ;;  %v1466_v24 = vld [vmem:[%s10495_s29 + $0x6a] sm:$0xff]  ;;  %v2019_v8 = vadd.f32 %v1978_v44, %v1937_v1  ;;  %v671_v44 = vld [vmem:[%s10495_s29 + $0x55] sm:$0xff] }
 0x1ac   : > { %v670_v38 = vld [vmem:[%s10495_s29 + $0x4d] sm:$0xff]  ;;  %2683 = vmatprep.mubr.f32.mxu1 %v2425_v16  ;;  %1896 = vst [vmem:[#allocation2 + $0x40] sm:$0xff] %v10918_v11  ;;  %v1071_v48 = vadd.f32 %v1030_v43, %v979_v34  ;;  %v1292_v33 = vmul.f32 %v10608_v36, %v10815_v13  ;;  %v1384_v4 = vmul.f32 %v10614_v10, %v10916_v62  ;;  %v2059_v7 = vld [vmem:[#allocation2 + $0x37] sm:$0xff]  ;;  %v1113_v56 = vld [vmem:[%s10495_s29 + $0x60] sm:$0xff] }
 0x1ad   : > { %v1597_v42 = vld [vmem:[%s10495_s29 + $0x6b] sm:$0xff]  ;;  %2684 = vmatmul.mubr.f32.vlgmr.msra.gmra.mrb[0].mxu1 %v10865_v35  ;;  %v10931_v61 = vmul.f32 %v2263_v15, %v2221_v9  ;;  %v10933_v25 = vmul.f32 %v2264_v12, %v2222_v53  ;;  %v1733_v5 = vadd.f32 %v10692_v29, %v1685_v49  ;;  %v1938_v3 = vld [vmem:[#allocation2 + $0x35] sm:$0xff]  ;;  %v1424_v6 = vadd.f32 %v1383_v63, %v1332_v40 }
 0x1ae   : > { %v1979_v31 = vld [vmem:[#allocation2 + $0x36] sm:$0xff]  ;;  %v2100_v13 = vadd.f32 %v2059_v7, %v2018_v57  ;;  %v1202_v50 = vadd.f32 %v1161_v0, %v1071_v48  ;;  %v1515_v54 = vmul.f32 %v10625_v30, %v1466_v24  ;;  %v718_v35 = vmul.f32 %v10549_v20, %v670_v38  ;;  %v2265_v60 = vld [vmem:[#allocation23 + $0x168] sm:$0xff] }
 0x1af   : > { %2345 = vst [vmem:[#allocation3 + $0x28] sm:$0xff] %v10931_v61  ;;  %2346 = vst [vmem:[#allocation3 + $0x30] sm:$0xff] %v10933_v25  ;;  %v1774_v51 = vmax.f32 %v1733_v5, 0.0  ;;  %v1555_v18 = vadd.f32 %v1514_v17, %v1424_v6  ;;  %v808_v63 = vmul.f32 %v10559_v27, %v759_v19  ;;  %v939_v46 = vmul.f32 %v10578_v39, %v10857_v23  ;;  %v10952_v1 = vld [vmem:[%s10495_s29 + $0x71] sm:$0xff]  ;;  %v10971_v38 = vld [vmem:[%s10495_s29 + $0x67] sm:$0xff] }
 0x1b0   : > { %v2182_v55 = vadd.f32 %v2100_v13, %v10887_v58  ;;  %v10948_v43 = vadd.f32 %v1979_v31, %v1938_v3  ;;  %v1333_v41 = vadd.f32 %v1292_v33, %v1202_v50  ;;  %v1646_v37 = vmul.f32 %v10634_v32, %v1597_v42  ;;  %v1467_v58 = vld [vmem:[%s10495_s29 + $0x72] sm:$0xff]  ;;  %v1114_v19 = vld [vmem:[%s10495_s29 + $0x68] sm:$0xff] }
 0x1b1   : > { %v10955_v17 = vmul.f32 %v1815_v2, %v1774_v51  ;;  %v1686_v14 = vadd.f32 %v1645_v22, %v1555_v18  ;;  %v849_v15 = vadd.f32 %v808_v63, %v718_v35  ;;  %v1031_v23 = vmul.f32 %v10587_v21, %v10939_v47  ;;  %v760_v16 = vld [vmem:[%s10495_s29 + $0x56] sm:$0xff] }
 0x1b2   : > { %v2223_v12 = vmul.f32 0.25, %v2182_v55  ;;  %v1425_v57 = vadd.f32 %v1384_v4, %v1333_v41  ;;  %v1162_v34 = vmul.f32 %v10597_v28, %v1113_v56  ;;  %v1293_v0 = vmul.f32 %v10608_v36, %v10871_v59  ;;  %v1598_v40 = vld [vmem:[%s10495_s29 + $0x73] sm:$0xff]  ;;  %v1816_v59 = vld [vmem:[#allocation23 + $0x38] sm:$0xff] }
 0x1b3   : > { %v2060_v9 = vld [vmem:[#allocation2 + $0x3f] sm:$0xff]  ;;  %1897 = vst [vmem:[#allocation2 + $0x48] sm:$0xff] %v10955_v17  ;;  %v1734_v22 = vadd.f32 %v10692_v29, %v1686_v14  ;;  %v980_v53 = vadd.f32 %v939_v46, %v849_v15  ;;  %v1385_v49 = vmul.f32 %v10614_v10, %v10952_v1  ;;  %v719_v24 = vmul.f32 %v10549_v20, %v671_v44  ;;  %v2266_v7 = vld [vmem:[#allocation23 + $0x170] sm:$0xff] }
 0x1b4   : > { %v10973_v48 = vmul.f32 %v2265_v60, %v2223_v12  ;;  %v2101_v33 = vadd.f32 %v2060_v9, %v2019_v8  ;;  %v1556_v4 = vadd.f32 %v1515_v54, %v1425_v57  ;;  %v10976_v42 = vmul.f32 %v10625_v30, %v1467_v58  ;;  %v1939_v3 = vld [vmem:[#allocation2 + $0x3d] sm:$0xff]  ;;  %v1817_v58 = vld [vmem:[#allocation23 + $0x40] sm:$0xff] }
 0x1b5   : > { %v1775_v5 = vmax.f32 %v1734_v22, 0.0  ;;  %v1980_v31 = vld [vmem:[#allocation2 + $0x3e] sm:$0xff]  ;;  %v1072_v6 = vadd.f32 %v1031_v23, %v980_v53  ;;  %v809_v13 = vmul.f32 %v10559_v27, %v760_v16  ;;  %v940_v2 = vmul.f32 %v10578_v39, %v10898_v45  ;;  %v11008_v16 = vld [vmem:[%s10495_s29 + $0x6f] sm:$0xff] }
 0x1b6   : > { %v10983_v50 = vld [vmem:[%s10495_s29 + $0x79] sm:$0xff]  ;;  %v2426_v35 = vld [vmem:[#allocation3 + $0x21] sm:$0xff]  ;;  %2347 = vst [vmem:[#allocation3 + $0x38] sm:$0xff] %v10973_v48  ;;  %v2183_v51 = vadd.f32 %v2101_v33, %v10918_v11  ;;  %v1687_v18 = vadd.f32 %v1646_v37, %v1556_v4  ;;  %v10988_v63 = vmul.f32 %v10634_v32, %v1598_v40  ;;  %v1032_v46 = vmul.f32 %v10587_v21, %v10971_v38  ;;  %v2427_v45 = vld [vmem:[#allocation3 + $0x29] sm:$0xff] }
 0x1b7   : > { %v2507_v8 = vld [vmem:[#allocation3 + $0x2b] sm:$0xff]  ;;  %2688 = vmatprep.mubr.f32.mxu1 %v2426_v35  ;;  %v10992_v56 = vmul.f32 %v1816_v59, %v1775_v5  ;;  %v1203_v55 = vadd.f32 %v1162_v34, %v1072_v6  ;;  %v850_v41 = vadd.f32 %v809_v13, %v719_v24  ;;  %v672_v44 = vld [vmem:[%s10495_s29 + $0x5d] sm:$0xff]  ;;  %v10997_v37 = vadd.f32 %v1980_v31, %v1939_v3 }
 0x1b8   : > { %v2466_v54 = vld [vmem:[#allocation3 + $0x2a] sm:$0xff]  ;;  %2953 = vmatprep.mubr.f32.mxu0 %v2507_v8  ;;  %v761_v60 = vld [vmem:[%s10495_s29 + $0x5e] sm:$0xff]  ;;  %2689 = vmatmul.mubr.f32.gmra.mrb[2].mxu1 %v10867_v52  ;;  %v2224_v11 = vmul.f32 0.25, %v2183_v51  ;;  %v1735_v14 = vadd.f32 %v10692_v29, %v1687_v18  ;;  %v1163_v15 = vmul.f32 %v10597_v28, %v1114_v19  ;;  %v1294_v34 = vmul.f32 %v10608_v36, %v10916_v62 }
 0x1b9   : > { %2954 = vmatmul.mubr.f32.vlgmr.msra.gmra.mrb[0].mxu0 %v2466_v54  ;;  %v1468_v23 = vld [vmem:[%s10495_s29 + $0x7a] sm:$0xff]  ;;  %2693 = vmatprep.mubr.f32.mxu1 %v2427_v45  ;;  %1898 = vst [vmem:[#allocation2 + $0x50] sm:$0xff] %v10992_v56  ;;  %v1334_v12 = vadd.f32 %v1293_v0, %v1203_v55  ;;  %v981_v57 = vadd.f32 %v940_v2, %v850_v41  ;;  %v762_v2 = vld [vmem:[%s10495_s29 + $0x66] sm:$0xff] }
 0x1ba   : > { %v1386_v52 = vmul.f32 %v10614_v10, %v10983_v50  ;;  %v11010_v9 = vmul.f32 %v2266_v7, %v2224_v11  ;;  %v2061_v22 = vld [vmem:[#allocation2 + $0x47] sm:$0xff]  ;;  %v1776_v53 = vmax.f32 %v1735_v14, 0.0  ;;  %v1599_v40 = vld [vmem:[%s10495_s29 + $0x7b] sm:$0xff]  ;;  %v720_v24 = vmul.f32 %v10549_v20, %v672_v44  ;;  %v1115_v7 = vld [vmem:[%s10495_s29 + $0x70] sm:$0xff] }
 0x1bb   : > { %v810_v0 = vmul.f32 %v10559_v27, %v761_v60  ;;  %v2102_v33 = vadd.f32 %v2061_v22, %v10948_v43  ;;  %v1940_v62 = vld [vmem:[#allocation2 + $0x45] sm:$0xff]  ;;  %v1426_v4 = vadd.f32 %v1385_v49, %v1334_v12  ;;  %v1073_v19 = vadd.f32 %v1032_v46, %v981_v57  ;;  %v11047_v22 = vld [vmem:[%s10495_s29 + $0x77] sm:$0xff] }
 0x1bc   : > { %v1981_v59 = vld [vmem:[#allocation2 + $0x46] sm:$0xff]  ;;  %v1517_v5 = vmul.f32 %v10625_v30, %v1468_v23  ;;  %2694 = vmatmul.mubr.f32.gmra.mrb[4].mxu1 %v10931_v61  ;;  %2348 = vst [vmem:[#allocation3 + $0x40] sm:$0xff] %v11010_v9  ;;  %v11020_v3 = vmul.f32 %v1817_v58, %v1776_v53  ;;  %v941_v6 = vmul.f32 %v10578_v39, %v10939_v47  ;;  %v2267_v47 = vld [vmem:[#allocation23 + $0x178] sm:$0xff] }
 0x1bd   : > { %v851_v31 = vadd.f32 %v810_v0, %v720_v24  ;;  %v1033_v43 = vmul.f32 %v10587_v21, %v11008_v16  ;;  %v11027_v13 = vld [vmem:[%s10495_s29 + $0x81] sm:$0xff]  ;;  %v2428_v35 = vld [vmem:[#allocation3 + $0x31] sm:$0xff]  ;;  %v2184_v61 = vadd.f32 %v2102_v33, %v10955_v17  ;;  %v1557_v51 = vadd.f32 %v10976_v42, %v1426_v4 }
 0x1be   : > { %v673_v49 = vld [vmem:[%s10495_s29 + $0x65] sm:$0xff]  ;;  %v2508_v8 = vld [vmem:[#allocation3 + $0x33] sm:$0xff]  ;;  %v1204_v18 = vadd.f32 %v1163_v15, %v1073_v19  ;;  %v1648_v46 = vmul.f32 %v10634_v32, %v1599_v40  ;;  %2698 = vmatprep.mubr.f32.mxu1 %v2428_v35  ;;  %1899 = vst [vmem:[#allocation2 + $0x58] sm:$0xff] %v11020_v3  ;;  %v2022_v45 = vadd.f32 %v1981_v59, %v1940_v62 }
 0x1bf   : > { %v2467_v54 = vld [vmem:[#allocation3 + $0x32] sm:$0xff]  ;;  %2958 = vmatprep.mubr.f32.mxu0 %v2508_v8  ;;  %v982_v55 = vadd.f32 %v941_v6, %v851_v31  ;;  %v1164_v41 = vmul.f32 %v10597_v28, %v1115_v7  ;;  %v1469_v44 = vld [vmem:[%s10495_s29 + $0x82] sm:$0xff]  ;;  %v2225_v60 = vmul.f32 0.25, %v2184_v61  ;;  %v1688_v17 = vadd.f32 %v10988_v63, %v1557_v51 }
 0x1c0   : > { %2959 = vmatmul.mubr.f32.gmra.mrb[2].mxu0 %v2467_v54  ;;  %v1335_v42 = vadd.f32 %v1294_v34, %v1204_v18  ;;  %v1295_v11 = vmul.f32 %v10608_v36, %v10952_v1  ;;  %2699 = vmatmul.mubr.f32.gmra.mrb[6].mxu1 %v10933_v25  ;;  %v2062_v14 = vld [vmem:[#allocation2 + $0x4f] sm:$0xff]  ;;  %v1387_v23 = vmul.f32 %v10614_v10, %v11027_v13  ;;  %v1600_v58 = vld [vmem:[%s10495_s29 + $0x83] sm:$0xff] }
 0x1c1   : > { %v1074_v15 = vadd.f32 %v1033_v43, %v982_v55  ;;  %v721_v12 = vmul.f32 %v10549_v20, %v673_v49  ;;  %v811_v57 = vmul.f32 %v10559_v27, %v762_v2  ;;  %v11049_v63 = vmul.f32 %v2267_v47, %v2225_v60  ;;  %v1818_v25 = vld [vmem:[#allocation23 + $0x48] sm:$0xff]  ;;  %v1116_v27 = vld [vmem:[%s10495_s29 + $0x78] sm:$0xff]  ;;  %v2268_v6 = vld [vmem:[#allocation23 + $0x180] sm:$0xff] }
 0x1c2   : > { %v2103_v34 = vadd.f32 %v2062_v14, %v10997_v37  ;;  %v1736_v1 = vadd.f32 %v10692_v29, %v1688_v17  ;;  %v1518_v53 = vmul.f32 %v10625_v30, %v1469_v44  ;;  %v1941_v40 = vld [vmem:[#allocation2 + $0x4d] sm:$0xff]  ;;  %v1427_v0 = vadd.f32 %v1386_v52, %v1335_v42  ;;  %v11090_v14 = vld [vmem:[%s10495_s29 + $0x7f] sm:$0xff] }
 0x1c3   : > { %v1982_v24 = vld [vmem:[#allocation2 + $0x4e] sm:$0xff]  ;;  %v1205_v33 = vadd.f32 %v1164_v41, %v1074_v15  ;;  %v852_v62 = vadd.f32 %v811_v57, %v721_v12  ;;  %v942_v20 = vmul.f32 %v10578_v39, %v10971_v38  ;;  %v2509_v59 = vld [vmem:[#allocation3 + $0x3b] sm:$0xff]  ;;  %2349 = vst [vmem:[#allocation3 + $0x48] sm:$0xff] %v11049_v63  ;;  %v1649_v31 = vmul.f32 %v10634_v32, %v1600_v58 }
 0x1c4   : > { %v2468_v4 = vld [vmem:[#allocation3 + $0x3a] sm:$0xff]  ;;  %v2185_v19 = vadd.f32 %v2103_v34, %v10992_v56  ;;  %v1777_v7 = vmax.f32 %v1736_v1, 0.0  ;;  %v1034_v52 = vmul.f32 %v10587_v21, %v11047_v22  ;;  %2963 = vmatprep.mubr.f32.mxu0 %v2509_v59  ;;  %v1558_v39 = vadd.f32 %v1517_v5, %v1427_v0  ;;  %v674_v2 = vld [vmem:[%s10495_s29 + $0x6d] sm:$0xff] }
 0x1c5   : > { %v2429_v37 = vld [vmem:[#allocation3 + $0x39] sm:$0xff]  ;;  %v1336_v38 = vadd.f32 %v1295_v11, %v1205_v33  ;;  %v983_v43 = vadd.f32 %v942_v20, %v852_v62  ;;  %v11063_v49 = vld [vmem:[%s10495_s29 + $0x89] sm:$0xff]  ;;  %2964 = vmatmul.mubr.f32.gmra.mrb[4].mxu0 %v2468_v4  ;;  %v2063_v8 = vld [vmem:[#allocation2 + $0x57] sm:$0xff]  ;;  %v11069_v21 = vadd.f32 %v1982_v24, %v1941_v40  ;;  %v1165_v5 = vmul.f32 %v10597_v28, %v1116_v27 }
 0x1c6   : > { %2703 = vmatprep.mubr.f32.mxu1 %v2429_v37  ;;  %v2226_v56 = vmul.f32 0.25, %v2185_v19  ;;  %v11067_v54 = vmul.f32 %v1818_v25, %v1777_v7  ;;  %v1942_v35 = vld [vmem:[#allocation2 + $0x55] sm:$0xff]  ;;  %v2104_v51 = vadd.f32 %v2063_v8, %v2022_v45  ;;  %v1689_v18 = vadd.f32 %v1648_v46, %v1558_v39  ;;  %v1470_v41 = vld [vmem:[%s10495_s29 + $0x8a] sm:$0xff]  ;;  %v11097_v57 = vld [vmem:[#allocation4 + $0x2] ss:$0 sm:$0xff] }
 0x1c7   : > { %2704 = vmatmul.mubr.f32.gmra.mrb[8].mxu1 %v10973_v48  ;;  %v1983_v61 = vld [vmem:[#allocation2 + $0x56] sm:$0xff]  ;;  %v1428_v47 = vadd.f32 %v1387_v23, %v1336_v38  ;;  %v1296_v55 = vmul.f32 %v10608_v36, %v10983_v50  ;;  %v763_v48 = vld [vmem:[%s10495_s29 + $0x6e] sm:$0xff]  ;;  %v1075_v17 = vadd.f32 %v1034_v52, %v983_v43  ;;  %v1388_v42 = vmul.f32 %v10614_v10, %v11063_v49  ;;  %v1117_v1 = vld [vmem:[%s10495_s29 + $0x80] sm:$0xff] }
 0x1c8   : > { %v11076_v44 = vmul.f32 %v2268_v6, %v2226_v56  ;;  %1900 = vst [vmem:[#allocation2 + $0x60] sm:$0xff] %v11067_v54  ;;  %v11079_v60 = vadd.f32 %v1983_v61, %v1942_v35  ;;  %v1601_v28 = vld [vmem:[%s10495_s29 + $0x8b] sm:$0xff]  ;;  %v2186_v46 = vadd.f32 %v2104_v51, %v11020_v3  ;;  %v1737_v45 = vadd.f32 %v10692_v29, %v1689_v18  ;;  %v1819_v23 = vld [vmem:[#allocation23 + $0x50] sm:$0xff]  ;;  %v11103_v27 = vld [vmem:[#allocation4 + $0x3] ss:$0 sm:$0xff] }
 0x1c9   : > { %v1559_v11 = vadd.f32 %v1518_v53, %v1428_v47  ;;  %v11086_v36 = vld [vmem:[#allocation4] ss:$0 sm:$0xff]  ;;  %v1206_v58 = vadd.f32 %v1165_v5, %v1075_v17  ;;  %v1519_v10 = vmul.f32 %v10625_v30, %v1470_v41  ;;  %v11094_v12 = vld [vmem:[#allocation4 + $0x1] ss:$0 sm:$0xff]  ;;  %v943_v34 = vmul.f32 %v11097_v57, %v11008_v16  ;;  %v675_v4 = vld [vmem:[%s10495_s29 + $0x75] sm:$0xff] }
 0x1ca   : > { %v722_v50 = vmul.f32 %v11086_v36, %v674_v2  ;;  %2350 = vst [vmem:[#allocation3 + $0x50] sm:$0xff] %v11076_v44  ;;  %v2269_v15 = vld [vmem:[#allocation23 + $0x188] sm:$0xff]  ;;  %v812_v3 = vmul.f32 %v11094_v12, %v763_v48  ;;  %v2227_v24 = vmul.f32 0.25, %v2186_v46  ;;  %v1778_v0 = vmax.f32 %v1737_v45, 0.0  ;;  %v764_v37 = vld [vmem:[%s10495_s29 + $0x76] sm:$0xff]  ;;  %v1820_v52 = vld [vmem:[#allocation23 + $0x58] sm:$0xff] }
 0x1cb   : > { %v2510_v25 = vld [vmem:[#allocation3 + $0x43] sm:$0xff]  ;;  %v1690_v33 = vadd.f32 %v1649_v31, %v1559_v11  ;;  %v1650_v30 = vmul.f32 %v10634_v32, %v1601_v28  ;;  %v1337_v62 = vadd.f32 %v1296_v55, %v1206_v58  ;;  %v1035_v16 = vmul.f32 %v11103_v27, %v11090_v14  ;;  %v11119_v38 = vld [vmem:[#allocation4 + $0x4] ss:$0 sm:$0xff]  ;;  %v11122_v2 = vld [vmem:[#allocation4 + $0x5] ss:$0 sm:$0xff] }
 0x1cc   : > { %v2469_v53 = vld [vmem:[#allocation3 + $0x42] sm:$0xff]  ;;  %2968 = vmatprep.mubr.f32.mxu0 %v2510_v25  ;;  %v853_v20 = vadd.f32 %v812_v3, %v722_v50  ;;  %v11113_v19 = vmul.f32 %v2269_v15, %v2227_v24  ;;  %v11115_v32 = vmul.f32 %v1819_v23, %v1778_v0  ;;  %v1471_v31 = vld [vmem:[%s10495_s29 + $0x92] sm:$0xff]  ;;  %v1166_v43 = vmul.f32 %v11119_v38, %v1117_v1  ;;  %v676_v25 = vld [vmem:[%s10495_s29 + $0x7d] sm:$0xff] }
 0x1cd   : > { %v2430_v40 = vld [vmem:[#allocation3 + $0x41] sm:$0xff]  ;;  %v11108_v59 = vld [vmem:[%s10495_s29 + $0x91] sm:$0xff]  ;;  %2969 = vmatmul.mubr.f32.gmra.mrb[6].mxu0 %v2469_v53  ;;  %v1738_v7 = vadd.f32 %v10692_v29, %v1690_v33  ;;  %v1429_v6 = vadd.f32 %v1388_v42, %v1337_v62  ;;  %v723_v18 = vmul.f32 %v11086_v36, %v675_v4  ;;  %v813_v47 = vmul.f32 %v11094_v12, %v764_v37  ;;  %v11151_v1 = vld [vmem:[%s10495_s29 + $0x99] sm:$0xff] }
 0x1ce   : > { %2708 = vmatprep.mubr.f32.mxu1 %v2430_v40  ;;  %v984_v39 = vadd.f32 %v943_v34, %v853_v20  ;;  %v11127_v56 = vld [vmem:[%s10495_s29 + $0x87] sm:$0xff]  ;;  %2351 = vst [vmem:[#allocation3 + $0x58] sm:$0xff] %v11113_v19  ;;  %1901 = vst [vmem:[#allocation2 + $0x68] sm:$0xff] %v11115_v32  ;;  %v11131_v61 = vld [vmem:[#allocation4 + $0x6] ss:$0 sm:$0xff] }
 0x1cf   : > { %2709 = vmatmul.mubr.f32.gmra.mrb[10].mxu1 %v11010_v9  ;;  %v1297_v9 = vmul.f32 %v11122_v2, %v11027_v13  ;;  %v2064_v8 = vld [vmem:[#allocation2 + $0x5f] sm:$0xff]  ;;  %v1779_v35 = vmax.f32 %v1738_v7, 0.0  ;;  %v1389_v5 = vmul.f32 %v11131_v61, %v11108_v59  ;;  %v1602_v51 = vld [vmem:[%s10495_s29 + $0x93] sm:$0xff]  ;;  %v1560_v48 = vadd.f32 %v1519_v10, %v1429_v6  ;;  %v1118_v46 = vld [vmem:[%s10495_s29 + $0x88] sm:$0xff] }
 0x1d0   : > { %v2105_v13 = vadd.f32 %v2064_v8, %v11069_v21  ;;  %v1943_v55 = vld [vmem:[#allocation2 + $0x5d] sm:$0xff]  ;;  %v1076_v17 = vadd.f32 %v1035_v16, %v984_v39  ;;  %v11139_v42 = vld [vmem:[#allocation4 + $0x7] ss:$0 sm:$0xff]  ;;  %v854_v23 = vadd.f32 %v813_v47, %v723_v18  ;;  %v944_v21 = vmul.f32 %v11097_v57, %v11047_v22  ;;  %v11156_v22 = vld [vmem:[#allocation4 + $0x8] ss:$0 sm:$0xff] }
 0x1d1   : > { %v1984_v41 = vld [vmem:[#allocation2 + $0x5e] sm:$0xff]  ;;  %v1520_v28 = vmul.f32 %v11139_v42, %v1471_v31  ;;  %v2511_v45 = vld [vmem:[#allocation3 + $0x4b] sm:$0xff]  ;;  %v11143_v15 = vmul.f32 %v1820_v52, %v1779_v35  ;;  %v1036_v58 = vmul.f32 %v11103_v27, %v11127_v56  ;;  %v1691_v3 = vadd.f32 %v1650_v30, %v1560_v48  ;;  %v1821_v4 = vld [vmem:[#allocation23 + $0x60] sm:$0xff] }
 0x1d2   : > { %v2470_v11 = vld [vmem:[#allocation3 + $0x4a] sm:$0xff]  ;;  %2973 = vmatprep.mubr.f32.mxu0 %v2511_v45  ;;  %v2187_v10 = vadd.f32 %v2105_v13, %v11067_v54  ;;  %v1207_v34 = vadd.f32 %v1166_v43, %v1076_v17  ;;  %v1651_v40 = vmul.f32 %v11156_v22, %v1602_v51  ;;  %v985_v54 = vadd.f32 %v944_v21, %v854_v23  ;;  %v765_v0 = vld [vmem:[%s10495_s29 + $0x7e] sm:$0xff] }
 0x1d3   : > { %v2431_v50 = vld [vmem:[#allocation3 + $0x49] sm:$0xff]  ;;  %2974 = vmatmul.mubr.f32.gmra.mrb[8].mxu0 %v2470_v11  ;;  %1902 = vst [vmem:[#allocation2 + $0x70] sm:$0xff] %v11143_v15  ;;  %v1167_v24 = vmul.f32 %v11119_v38, %v1118_v46  ;;  %v2025_v30 = vadd.f32 %v1984_v41, %v1943_v55  ;;  %v1739_v62 = vadd.f32 %v10692_v29, %v1691_v3  ;;  %v1472_v16 = vld [vmem:[%s10495_s29 + $0x9a] sm:$0xff] }
 0x1d4   : > { %2713 = vmatprep.mubr.f32.mxu1 %v2431_v50  ;;  %v2270_v53 = vld [vmem:[#allocation23 + $0x190] sm:$0xff]  ;;  %v2228_v33 = vmul.f32 0.25, %v2187_v10  ;;  %v1338_v20 = vadd.f32 %v1297_v9, %v1207_v34  ;;  %v1077_v37 = vadd.f32 %v1036_v58, %v985_v54  ;;  %v1298_v7 = vmul.f32 %v11122_v2, %v11063_v49  ;;  %v11186_v45 = vld [vmem:[%s10495_s29 + $0xa1] sm:$0xff] }
 0x1d5   : > { %2714 = vmatmul.mubr.f32.gmra.mrb[12].mxu1 %v11049_v63  ;;  %v1603_v63 = vld [vmem:[%s10495_s29 + $0x9b] sm:$0xff]  ;;  %v1390_v31 = vmul.f32 %v11131_v61, %v11151_v1  ;;  %v724_v52 = vmul.f32 %v11086_v36, %v676_v25  ;;  %v11170_v6 = vld [vmem:[%s10495_s29 + $0x8f] sm:$0xff]  ;;  %v1780_v9 = vmax.f32 %v1739_v62, 0.0  ;;  %v814_v18 = vmul.f32 %v11094_v12, %v765_v0  ;;  %v2065_v49 = vld [vmem:[#allocation2 + $0x67] sm:$0xff] }
 0x1d6   : > { %v1119_v39 = vld [vmem:[%s10495_s29 + $0x90] sm:$0xff]  ;;  %v2512_v43 = vld [vmem:[#allocation3 + $0x53] sm:$0xff]  ;;  %v11173_v35 = vmul.f32 %v2270_v53, %v2228_v33  ;;  %v1430_v51 = vadd.f32 %v1389_v5, %v1338_v20  ;;  %v1944_v47 = vld [vmem:[#allocation2 + $0x65] sm:$0xff]  ;;  %v1208_v55 = vadd.f32 %v1167_v24, %v1077_v37  ;;  %v1521_v41 = vmul.f32 %v11139_v42, %v1472_v16 }
 0x1d7   : > { %v2471_v8 = vld [vmem:[#allocation3 + $0x52] sm:$0xff]  ;;  %2978 = vmatprep.mubr.f32.mxu0 %v2512_v43  ;;  %v1985_v13 = vld [vmem:[#allocation2 + $0x66] sm:$0xff]  ;;  %v1652_v48 = vmul.f32 %v11156_v22, %v1603_v63  ;;  %v2106_v5 = vadd.f32 %v2065_v49, %v11079_v60  ;;  %v11181_v17 = vmul.f32 %v1821_v4, %v1780_v9  ;;  %v945_v46 = vmul.f32 %v11097_v57, %v11090_v14  ;;  %v1822_v43 = vld [vmem:[#allocation23 + $0x68] sm:$0xff] }
 0x1d8   : > { %v2432_v29 = vld [vmem:[#allocation3 + $0x51] sm:$0xff]  ;;  %2979 = vmatmul.mubr.f32.gmra.mrb[10].mxu0 %v2471_v8  ;;  %2352 = vst [vmem:[#allocation3 + $0x60] sm:$0xff] %v11173_v35  ;;  %v1561_v11 = vadd.f32 %v1520_v28, %v1430_v51  ;;  %v1339_v50 = vadd.f32 %v1298_v7, %v1208_v55  ;;  %v855_v23 = vadd.f32 %v814_v18, %v724_v52  ;;  %v1473_v58 = vld [vmem:[%s10495_s29 + $0xa2] sm:$0xff] }
 0x1d9   : > { %2718 = vmatprep.mubr.f32.mxu1 %v2432_v29  ;;  %v1037_v21 = vmul.f32 %v11103_v27, %v11170_v6  ;;  %v677_v10 = vld [vmem:[%s10495_s29 + $0x85] sm:$0xff]  ;;  %1903 = vst [vmem:[#allocation2 + $0x78] sm:$0xff] %v11181_v17  ;;  %v2026_v60 = vadd.f32 %v1985_v13, %v1944_v47  ;;  %v1168_v34 = vmul.f32 %v11119_v38, %v1119_v39  ;;  %v11205_v4 = vld [vmem:[#allocation6] ss:$0 sm:$0xff] }
 0x1da   : > { %2719 = vmatmul.mubr.f32.gmra.mrb[14].mxu1 %v11076_v44  ;;  %v2188_v44 = vadd.f32 %v2106_v5, %v11115_v32  ;;  %v2066_v3 = vld [vmem:[#allocation2 + $0x6f] sm:$0xff]  ;;  %v1299_v14 = vmul.f32 %v11122_v2, %v11108_v59  ;;  %v766_v25 = vld [vmem:[%s10495_s29 + $0x86] sm:$0xff]  ;;  %v2271_v28 = vld [vmem:[#allocation23 + $0x198] sm:$0xff]  ;;  %v1692_v54 = vadd.f32 %v1651_v40, %v1561_v11  ;;  %v1431_v33 = vadd.f32 %v1390_v31, %v1339_v50 }
 0x1db   : > { %v2107_v53 = vadd.f32 %v2066_v3, %v2025_v30  ;;  %v1945_v24 = vld [vmem:[#allocation2 + $0x6d] sm:$0xff]  ;;  %v1391_v32 = vmul.f32 %v11131_v61, %v11186_v45  ;;  %v986_v20 = vadd.f32 %v945_v46, %v855_v23  ;;  %v11201_v16 = vmul.f32 %v11139_v42, %v1473_v58  ;;  %v1604_v37 = vld [vmem:[%s10495_s29 + $0xa3] sm:$0xff]  ;;  %v11211_v31 = vld [vmem:[%s10495_s29 + $0x97] sm:$0xff] }
 0x1dc   : > { %v1986_v0 = vld [vmem:[#allocation2 + $0x6e] sm:$0xff]  ;;  %v2229_v62 = vmul.f32 0.25, %v2188_v44  ;;  %v725_v59 = vmul.f32 %v11086_v36, %v677_v10  ;;  %v1740_v40 = vadd.f32 %v11205_v4, %v1692_v54  ;;  %v1562_v30 = vadd.f32 %v1521_v41, %v1431_v33  ;;  %v2272_v39 = vld [vmem:[#allocation23 + $0x1a0] sm:$0xff]  ;;  %v1120_v9 = vld [vmem:[%s10495_s29 + $0x98] sm:$0xff] }
 0x1dd   : > { %v2189_v63 = vadd.f32 %v2107_v53, %v11143_v15  ;;  %v815_v7 = vmul.f32 %v11094_v12, %v766_v25  ;;  %v11215_v8 = vadd.f32 %v1986_v0, %v1945_v24  ;;  %v1078_v29 = vadd.f32 %v1037_v21, %v986_v20  ;;  %v678_v50 = vld [vmem:[%s10495_s29 + $0x8d] sm:$0xff] }
 0x1de   : > { %v11213_v52 = vmul.f32 %v2271_v28, %v2229_v62  ;;  %v946_v15 = vmul.f32 %v11097_v57, %v11127_v56  ;;  %v1781_v13 = vmax.f32 %v1740_v40, 0.0  ;;  %v1693_v55 = vadd.f32 %v1652_v48, %v1562_v30  ;;  %v11225_v56 = vld [vmem:[%s10495_s29 + $0xa9] sm:$0xff]  ;;  %v11249_v40 = vld [vmem:[%s10495_s29 + $0x9f] sm:$0xff] }
 0x1df   : > { %v2513_v51 = vld [vmem:[#allocation3 + $0x5b] sm:$0xff]  ;;  %v2230_v47 = vmul.f32 0.25, %v2189_v63  ;;  %v856_v41 = vadd.f32 %v815_v7, %v725_v59  ;;  %v1209_v5 = vadd.f32 %v1168_v34, %v1078_v29  ;;  %v1653_v46 = vmul.f32 %v11156_v22, %v1604_v37  ;;  %v1823_v34 = vld [vmem:[#allocation23 + $0x70] sm:$0xff]  ;;  %v1605_v33 = vld [vmem:[%s10495_s29 + $0xab] sm:$0xff] }
 0x1e0   : > { %v2472_v18 = vld [vmem:[#allocation3 + $0x5a] sm:$0xff]  ;;  %2983 = vmatprep.mubr.f32.mxu0 %v2513_v51  ;;  %2353 = vst [vmem:[#allocation3 + $0x68] sm:$0xff] %v11213_v52  ;;  %v1038_v11 = vmul.f32 %v11103_v27, %v11211_v31  ;;  %v2067_v23 = vld [vmem:[#allocation2 + $0x77] sm:$0xff]  ;;  %v11231_v21 = vmul.f32 %v1822_v43, %v1781_v13  ;;  %v1741_v58 = vadd.f32 %v11205_v4, %v1693_v55  ;;  %v1474_v54 = vld [vmem:[%s10495_s29 + $0xaa] sm:$0xff] }
 0x1e1   : > { %v2433_v49 = vld [vmem:[#allocation3 + $0x59] sm:$0xff]  ;;  %2984 = vmatmul.mubr.f32.gmra.mrb[12].mxu0 %v2472_v18  ;;  %v11229_v48 = vmul.f32 %v2272_v39, %v2230_v47  ;;  %v1946_v10 = vld [vmem:[#allocation2 + $0x75] sm:$0xff]  ;;  %v2108_v3 = vadd.f32 %v2067_v23, %v2026_v60  ;;  %v1340_v25 = vadd.f32 %v1299_v14, %v1209_v5  ;;  %v987_v28 = vadd.f32 %v946_v15, %v856_v41 }
 0x1e2   : > { %2723 = vmatprep.mubr.f32.mxu1 %v2433_v49  ;;  %v1987_v44 = vld [vmem:[#allocation2 + $0x76] sm:$0xff]  ;;  %v1169_v53 = vmul.f32 %v11119_v38, %v1120_v9  ;;  %1904 = vst [vmem:[#allocation2 + $0x80] sm:$0xff] %v11231_v21  ;;  %v1782_v24 = vmax.f32 %v1741_v58, 0.0  ;;  %v1300_v60 = vmul.f32 %v11122_v2, %v11151_v1  ;;  %v1392_v14 = vmul.f32 %v11131_v61, %v11225_v56  ;;  %v1121_v30 = vld [vmem:[%s10495_s29 + $0xa0] sm:$0xff]  ;;  %v2273_v37 = vld [vmem:[#allocation23 + $0x1a8] sm:$0xff] }
 0x1e3   : > { %2724 = vmatmul.mubr.f32.gmra.mrb[16].mxu1 %v11113_v19  ;;  %v767_v19 = vld [vmem:[%s10495_s29 + $0x8e] sm:$0xff]  ;;  %2354 = vst [vmem:[#allocation3 + $0x70] sm:$0xff] %v11229_v48  ;;  %v11239_v0 = vadd.f32 %v1987_v44, %v1946_v10  ;;  %v2190_v62 = vadd.f32 %v2108_v3, %v11181_v17  ;;  %v1432_v20 = vadd.f32 %v1391_v32, %v1340_v25  ;;  %v768_v49 = vld [vmem:[%s10495_s29 + $0x96] sm:$0xff]  ;;  %v1824_v10 = vld [vmem:[#allocation23 + $0x78] sm:$0xff] }
 0x1e4   : > { %v1079_v59 = vadd.f32 %v1038_v11, %v987_v28  ;;  %v726_v63 = vmul.f32 %v11086_v36, %v678_v50  ;;  %v11252_v7 = vmul.f32 %v1823_v34, %v1782_v24  ;;  %v1523_v1 = vmul.f32 %v11139_v42, %v1474_v54  ;;  %v11259_v43 = vld [vmem:[%s10495_s29 + $0xb1] sm:$0xff]  ;;  %v11280_v25 = vld [vmem:[%s10495_s29 + $0xa7] sm:$0xff] }
 0x1e5   : > { %v816_v39 = vmul.f32 %v11094_v12, %v767_v19  ;;  %v947_v17 = vmul.f32 %v11097_v57, %v11170_v6  ;;  %v2231_v32 = vmul.f32 0.25, %v2190_v62  ;;  %v1563_v29 = vadd.f32 %v11201_v16, %v1432_v20  ;;  %v1475_v51 = vld [vmem:[%s10495_s29 + $0xb2] sm:$0xff] }
 0x1e6   : > { %v1210_v15 = vadd.f32 %v1169_v53, %v1079_v59  ;;  %v1654_v9 = vmul.f32 %v11156_v22, %v1605_v33  ;;  %v679_v18 = vld [vmem:[%s10495_s29 + $0x95] sm:$0xff]  ;;  %1905 = vst [vmem:[#allocation2 + $0x88] sm:$0xff] %v11252_v7  ;;  %v1039_v6 = vmul.f32 %v11103_v27, %v11249_v40  ;;  %v1170_v16 = vmul.f32 %v11119_v38, %v1121_v30 }
 0x1e7   : > { %v2514_v47 = vld [vmem:[#allocation3 + $0x63] sm:$0xff]  ;;  %v857_v41 = vadd.f32 %v816_v39, %v726_v63  ;;  %v1301_v5 = vmul.f32 %v11122_v2, %v11186_v45  ;;  %v11272_v11 = vmul.f32 %v2273_v37, %v2231_v32  ;;  %v1694_v50 = vadd.f32 %v1653_v46, %v1563_v29  ;;  %v1606_v58 = vld [vmem:[%s10495_s29 + $0xb3] sm:$0xff] }
 0x1e8   : > { %v2473_v13 = vld [vmem:[#allocation3 + $0x62] sm:$0xff]  ;;  %2988 = vmatprep.mubr.f32.mxu0 %v2514_v47  ;;  %v1341_v23 = vadd.f32 %v1300_v60, %v1210_v15  ;;  %v1393_v3 = vmul.f32 %v11131_v61, %v11259_v43  ;;  %v727_v34 = vmul.f32 %v11086_v36, %v679_v18  ;;  %v817_v24 = vmul.f32 %v11094_v12, %v768_v49  ;;  %v11298_v15 = vld [vmem:[%s10495_s29 + $0xb9] sm:$0xff] }
 0x1e9   : > { %v2434_v55 = vld [vmem:[#allocation3 + $0x61] sm:$0xff]  ;;  %2989 = vmatmul.mubr.f32.gmra.mrb[14].mxu0 %v2473_v13  ;;  %v988_v44 = vadd.f32 %v947_v17, %v857_v41  ;;  %2355 = vst [vmem:[#allocation3 + $0x78] sm:$0xff] %v11272_v11  ;;  %v1742_v54 = vadd.f32 %v11205_v4, %v1694_v50  ;;  %v2068_v60 = vld [vmem:[#allocation2 + $0x7f] sm:$0xff]  ;;  %v11288_v59 = vmul.f32 %v11156_v22, %v1606_v58  ;;  %v2274_v13 = vld [vmem:[#allocation23 + $0x1b0] sm:$0xff] }
 0x1ea   : > { %2728 = vmatprep.mubr.f32.mxu1 %v2434_v55  ;;  %v1122_v45 = vld [vmem:[%s10495_s29 + $0xa8] sm:$0xff]  ;;  %v2515_v28 = vld [vmem:[#allocation3 + $0x6b] sm:$0xff]  ;;  %v1433_v19 = vadd.f32 %v1392_v14, %v1341_v23  ;;  %v1947_v33 = vld [vmem:[#allocation2 + $0x7d] sm:$0xff]  ;;  %v948_v63 = vmul.f32 %v11097_v57, %v11211_v31  ;;  %v2109_v14 = vadd.f32 %v2068_v60, %v11215_v8  ;;  %v1040_v39 = vmul.f32 %v11103_v27, %v11280_v25 }
 0x1eb   : > { %2729 = vmatmul.mubr.f32.gmra.mrb[18].mxu1 %v11173_v35  ;;  %v2474_v53 = vld [vmem:[#allocation3 + $0x6a] sm:$0xff]  ;;  %v1524_v35 = vmul.f32 %v11139_v42, %v1475_v51  ;;  %2993 = vmatprep.mubr.f32.mxu0 %v2515_v28  ;;  %v1988_v62 = vld [vmem:[#allocation2 + $0x7e] sm:$0xff]  ;;  %v1080_v20 = vadd.f32 %v1039_v6, %v988_v44  ;;  %v1783_v30 = vmax.f32 %v1742_v54, 0.0  ;;  %v858_v32 = vadd.f32 %v817_v24, %v727_v34  ;;  %v1825_v41 = vld [vmem:[#allocation23 + $0x80] sm:$0xff] }
 0x1ec   : > { %v2435_v46 = vld [vmem:[#allocation3 + $0x69] sm:$0xff]  ;;  %v1564_v37 = vadd.f32 %v1523_v1, %v1433_v19  ;;  %v1171_v29 = vmul.f32 %v11119_v38, %v1122_v45  ;;  %v680_v51 = vld [vmem:[%s10495_s29 + $0x9d] sm:$0xff]  ;;  %v2191_v31 = vadd.f32 %v2109_v14, %v11231_v21  ;;  %v11304_v1 = vadd.f32 %v1988_v62, %v1947_v33 }
 0x1ed   : > { %2733 = vmatprep.mubr.f32.mxu1 %v2435_v46  ;;  %2994 = vmatmul.mubr.f32.gmra.mrb[16].mxu0 %v2474_v53  ;;  %v1211_v17 = vadd.f32 %v1170_v16, %v1080_v20  ;;  %v2069_v18 = vld [vmem:[#allocation2 + $0x87] sm:$0xff]  ;;  %v11302_v8 = vmul.f32 %v1824_v10, %v1783_v30  ;;  %v989_v16 = vadd.f32 %v948_v63, %v858_v32  ;;  %v769_v50 = vld [vmem:[%s10495_s29 + $0x9e] sm:$0xff]  ;;  %v1123_v20 = vld [vmem:[%s10495_s29 + $0xb0] sm:$0xff] }
 0x1ee   : > { %v1695_v49 = vadd.f32 %v1654_v9, %v1564_v37  ;;  %v1948_v47 = vld [vmem:[#allocation2 + $0x85] sm:$0xff]  ;;  %v2110_v55 = vadd.f32 %v2069_v18, %v11239_v0  ;;  %v1302_v21 = vmul.f32 %v11122_v2, %v11225_v56  ;;  %v2232_v23 = vmul.f32 0.25, %v2191_v31  ;;  %v1476_v44 = vld [vmem:[%s10495_s29 + $0xba] sm:$0xff]  ;;  %v11319_v0 = vld [vmem:[%s10495_s29 + $0xaf] sm:$0xff] }
 0x1ef   : > { %2734 = vmatmul.mubr.f32.gmra.mrb[20].mxu1 %v11213_v52  ;;  %v1989_v52 = vld [vmem:[#allocation2 + $0x86] sm:$0xff]  ;;  %v1342_v6 = vadd.f32 %v1301_v5, %v1211_v17  ;;  %1906 = vst [vmem:[#allocation2 + $0x90] sm:$0xff] %v11302_v8  ;;  %v1394_v10 = vmul.f32 %v11131_v61, %v11298_v15  ;;  %v1607_v34 = vld [vmem:[%s10495_s29 + $0xbb] sm:$0xff]  ;;  %v1081_v46 = vadd.f32 %v1040_v39, %v989_v16 }
 0x1f0   : > { %v1743_v58 = vadd.f32 %v11205_v4, %v1695_v49  ;;  %v11312_v9 = vadd.f32 %v1989_v52, %v1948_v47  ;;  %v2516_v5 = vld [vmem:[#allocation3 + $0x73] sm:$0xff]  ;;  %v2192_v56 = vadd.f32 %v2110_v55, %v11252_v7  ;;  %v728_v54 = vmul.f32 %v11086_v36, %v680_v51  ;;  %v681_v37 = vld [vmem:[%s10495_s29 + $0xa5] sm:$0xff] }
 0x1f1   : > { %v2475_v45 = vld [vmem:[#allocation3 + $0x72] sm:$0xff]  ;;  %v1434_v53 = vadd.f32 %v1393_v3, %v1342_v6  ;;  %2998 = vmatprep.mubr.f32.mxu0 %v2516_v5  ;;  %v11323_v19 = vmul.f32 %v2274_v13, %v2232_v23  ;;  %v818_v33 = vmul.f32 %v11094_v12, %v769_v50  ;;  %v949_v62 = vmul.f32 %v11097_v57, %v11249_v40  ;;  %v1477_v18 = vld [vmem:[%s10495_s29 + $0xc2] sm:$0xff] }
 0x1f2   : > { %v2436_v28 = vld [vmem:[#allocation3 + $0x71] sm:$0xff]  ;;  %v1784_v60 = vmax.f32 %v1743_v58, 0.0  ;;  %2999 = vmatmul.mubr.f32.gmra.mrb[18].mxu0 %v2475_v45  ;;  %v2233_v7 = vmul.f32 0.25, %v2192_v56  ;;  %v1212_v63 = vadd.f32 %v1171_v29, %v1081_v46  ;;  %v1525_v14 = vmul.f32 %v11139_v42, %v1476_v44  ;;  %v11332_v30 = vld [vmem:[%s10495_s29 + $0xc1] sm:$0xff] }
 0x1f3   : > { %2738 = vmatprep.mubr.f32.mxu1 %v2436_v28  ;;  %v2275_v24 = vld [vmem:[#allocation23 + $0x1b8] sm:$0xff]  ;;  %v1565_v3 = vadd.f32 %v1524_v35, %v1434_v53  ;;  %2356 = vst [vmem:[#allocation3 + $0x80] sm:$0xff] %v11323_v19  ;;  %v1656_v40 = vmul.f32 %v11156_v22, %v1607_v34  ;;  %v859_v17 = vadd.f32 %v818_v33, %v728_v54  ;;  %v770_v35 = vld [vmem:[%s10495_s29 + $0xa6] sm:$0xff]  ;;  %v1826_v34 = vld [vmem:[#allocation23 + $0x88] sm:$0xff] }
 0x1f4   : > { %2739 = vmatmul.mubr.f32.gmra.mrb[22].mxu1 %v11229_v48  ;;  %v11336_v39 = vmul.f32 %v1825_v41, %v1784_v60  ;;  %v1041_v48 = vmul.f32 %v11103_v27, %v11319_v0  ;;  %v11342_v32 = vmul.f32 %v2275_v24, %v2233_v7  ;;  %v1343_v51 = vadd.f32 %v1302_v21, %v1212_v63  ;;  %v1608_v49 = vld [vmem:[%s10495_s29 + $0xc3] sm:$0xff]  ;;  %v11355_v41 = vld [vmem:[%s10495_s29 + $0xb7] sm:$0xff]  ;;  %v771_v7 = vld [vmem:[%s10495_s29 + $0xae] sm:$0xff] }
 0x1f5   : > { %v1696_v29 = vadd.f32 %v11288_v59, %v1565_v3  ;;  %v1172_v31 = vmul.f32 %v11119_v38, %v1123_v20  ;;  %v990_v47 = vadd.f32 %v949_v62, %v859_v17  ;;  %v1303_v52 = vmul.f32 %v11122_v2, %v11259_v43  ;;  %v1124_v6 = vld [vmem:[%s10495_s29 + $0xb8] sm:$0xff]  ;;  %v11371_v54 = vld [vmem:[%s10495_s29 + $0xc9] sm:$0xff] }
 0x1f6   : > { %1907 = vst [vmem:[#allocation2 + $0x98] sm:$0xff] %v11336_v39  ;;  %v1395_v13 = vmul.f32 %v11131_v61, %v11332_v30  ;;  %v729_v55 = vmul.f32 %v11086_v36, %v681_v37  ;;  %2357 = vst [vmem:[#allocation3 + $0x88] sm:$0xff] %v11342_v32  ;;  %v2070_v59 = vld [vmem:[#allocation2 + $0x8f] sm:$0xff]  ;;  %v1435_v23 = vadd.f32 %v1394_v10, %v1343_v51  ;;  %v2276_v24 = vld [vmem:[#allocation23 + $0x1c0] sm:$0xff] }
 0x1f7   : > { %v1744_v16 = vadd.f32 %v11205_v4, %v1696_v29  ;;  %v1949_v21 = vld [vmem:[#allocation2 + $0x8d] sm:$0xff]  ;;  %v819_v43 = vmul.f32 %v11094_v12, %v770_v35  ;;  %v950_v58 = vmul.f32 %v11097_v57, %v11280_v25  ;;  %v2111_v44 = vadd.f32 %v2070_v59, %v11304_v1  ;;  %v1827_v29 = vld [vmem:[#allocation23 + $0x90] sm:$0xff] }
 0x1f8   : > { %v1990_v50 = vld [vmem:[#allocation2 + $0x8e] sm:$0xff]  ;;  %v1082_v5 = vadd.f32 %v1041_v48, %v990_v47  ;;  %v1526_v45 = vmul.f32 %v11139_v42, %v1477_v18  ;;  %v11366_v28 = vmul.f32 %v11156_v22, %v1608_v49  ;;  %v1566_v53 = vadd.f32 %v1525_v14, %v1435_v23 }
 0x1f9   : > { %v1785_v56 = vmax.f32 %v1744_v16, 0.0  ;;  %v860_v46 = vadd.f32 %v819_v43, %v729_v55  ;;  %v1042_v10 = vmul.f32 %v11103_v27, %v11355_v41  ;;  %v682_v25 = vld [vmem:[%s10495_s29 + $0xad] sm:$0xff]  ;;  %v2193_v1 = vadd.f32 %v2111_v44, %v11302_v8  ;;  %v11392_v55 = vld [vmem:[%s10495_s29 + $0xbf] sm:$0xff] }
 0x1fa   : > { %v11375_v60 = vadd.f32 %v1990_v50, %v1949_v21  ;;  %v1213_v33 = vadd.f32 %v1172_v31, %v1082_v5  ;;  %v1173_v62 = vmul.f32 %v11119_v38, %v1124_v6  ;;  %v1478_v20 = vld [vmem:[%s10495_s29 + $0xca] sm:$0xff]  ;;  %v2476_v63 = vld [vmem:[#allocation3 + $0x7a] sm:$0xff]  ;;  %v1697_v17 = vadd.f32 %v1656_v40, %v1566_v53 }
 0x1fb   : > { %v2517_v3 = vld [vmem:[#allocation3 + $0x7b] sm:$0xff]  ;;  %v11380_v37 = vmul.f32 %v1826_v34, %v1785_v56  ;;  %v991_v48 = vadd.f32 %v950_v58, %v860_v46  ;;  %v1304_v35 = vmul.f32 %v11122_v2, %v11298_v15  ;;  %v2234_v8 = vmul.f32 0.25, %v2193_v1  ;;  %v1609_v5 = vld [vmem:[%s10495_s29 + $0xcb] sm:$0xff] }
 0x1fc   : > { %v2437_v14 = vld [vmem:[#allocation3 + $0x79] sm:$0xff]  ;;  %3003 = vmatprep.mubr.f32.mxu0 %v2517_v3  ;;  %v1344_v51 = vadd.f32 %v1303_v52, %v1213_v33  ;;  %v1396_v31 = vmul.f32 %v11131_v61, %v11371_v54  ;;  %v730_v18 = vmul.f32 %v11086_v36, %v682_v25  ;;  %v1745_v49 = vadd.f32 %v11205_v4, %v1697_v17  ;;  %v11408_v25 = vld [vmem:[%s10495_s29 + $0xd1] sm:$0xff] }
 0x1fd   : > { %2743 = vmatprep.mubr.f32.mxu1 %v2437_v14  ;;  %3004 = vmatmul.mubr.f32.gmra.mrb[20].mxu0 %v2476_v63  ;;  %v2071_v40 = vld [vmem:[#allocation2 + $0x97] sm:$0xff]  ;;  %1908 = vst [vmem:[#allocation2 + $0xa0] sm:$0xff] %v11380_v37  ;;  %v1083_v15 = vadd.f32 %v1042_v10, %v991_v48  ;;  %v820_v47 = vmul.f32 %v11094_v12, %v771_v7  ;;  %v1125_v52 = vld [vmem:[%s10495_s29 + $0xc0] sm:$0xff]  ;;  %v2518_v6 = vld [vmem:[#allocation3 + $0x83] sm:$0xff] }
 0x1fe   : > { %2744 = vmatmul.mubr.f32.gmra.mrb[24].mxu1 %v11272_v11  ;;  %v2477_v59 = vld [vmem:[#allocation3 + $0x82] sm:$0xff]  ;;  %v11395_v16 = vmul.f32 %v2276_v24, %v2234_v8  ;;  %v2112_v50 = vadd.f32 %v2071_v40, %v11312_v9  ;;  %v1436_v11 = vadd.f32 %v1395_v13, %v1344_v51  ;;  %v1527_v23 = vmul.f32 %v11139_v42, %v1478_v20  ;;  %v1950_v58 = vld [vmem:[#allocation2 + $0x95] sm:$0xff] }
 0x1ff   : > { %v2438_v21 = vld [vmem:[#allocation3 + $0x81] sm:$0xff]  ;;  %3008 = vmatprep.mubr.f32.mxu0 %v2518_v6  ;;  %v1786_v43 = vmax.f32 %v1745_v49, 0.0  ;;  %v1991_v44 = vld [vmem:[#allocation2 + $0x96] sm:$0xff]  ;;  %v1214_v34 = vadd.f32 %v1173_v62, %v1083_v15  ;;  %v861_v56 = vadd.f32 %v820_v47, %v730_v18  ;;  %v951_v53 = vmul.f32 %v11097_v57, %v11319_v0  ;;  %v1828_v49 = vld [vmem:[#allocation23 + $0x98] sm:$0xff] }
 0x200   : > { %2748 = vmatprep.mubr.f32.mxu1 %v2438_v21  ;;  %2358 = vst [vmem:[#allocation3 + $0x90] sm:$0xff] %v11395_v16  ;;  %v2194_v9 = vadd.f32 %v2112_v50, %v11336_v39  ;;  %v1567_v13 = vadd.f32 %v1526_v45, %v1436_v11  ;;  %v1043_v46 = vmul.f32 %v11103_v27, %v11392_v55  ;;  %v2277_v1 = vld [vmem:[#allocation23 + $0x1c8] sm:$0xff]  ;;  %v772_v39 = vld [vmem:[%s10495_s29 + $0xb6] sm:$0xff] }
 0x201   : > { %v1174_v10 = vmul.f32 %v11119_v38, %v1125_v52  ;;  %3009 = vmatmul.mubr.f32.gmra.mrb[22].mxu0 %v2477_v59  ;;  %v11411_v24 = vmul.f32 %v1827_v29, %v1786_v43  ;;  %v1345_v0 = vadd.f32 %v1304_v35, %v1214_v34  ;;  %v992_v33 = vadd.f32 %v951_v53, %v861_v56  ;;  %v683_v62 = vld [vmem:[%s10495_s29 + $0xb5] sm:$0xff]  ;;  %v11426_v35 = vld [vmem:[%s10495_s29 + $0xc7] sm:$0xff] }
 0x202   : > { %2749 = vmatmul.mubr.f32.gmra.mrb[26].mxu1 %v11323_v19  ;;  %v2235_v45 = vmul.f32 0.25, %v2194_v9  ;;  %v11415_v20 = vadd.f32 %v1991_v44, %v1950_v58  ;;  %v1698_v7 = vadd.f32 %v11366_v28, %v1567_v13  ;;  %v1658_v3 = vmul.f32 %v11156_v22, %v1609_v5  ;;  %v1479_v63 = vld [vmem:[%s10495_s29 + $0xd2] sm:$0xff]  ;;  %v1126_v52 = vld [vmem:[%s10495_s29 + $0xc8] sm:$0xff] }
 0x203   : > { %1909 = vst [vmem:[#allocation2 + $0xa8] sm:$0xff] %v11411_v24  ;;  %v1437_v19 = vadd.f32 %v1396_v31, %v1345_v0  ;;  %v1084_v14 = vadd.f32 %v1043_v46, %v992_v33  ;;  %v1305_v17 = vmul.f32 %v11122_v2, %v11332_v30  ;;  %v1397_v48 = vmul.f32 %v11131_v61, %v11408_v25  ;;  %v1610_v51 = vld [vmem:[%s10495_s29 + $0xd3] sm:$0xff] }
 0x204   : > { %v11428_v8 = vmul.f32 %v2277_v1, %v2235_v45  ;;  %v2072_v28 = vld [vmem:[#allocation2 + $0x9f] sm:$0xff]  ;;  %v1746_v29 = vadd.f32 %v11205_v4, %v1698_v7  ;;  %v731_v18 = vmul.f32 %v11086_v36, %v683_v62  ;;  %v821_v31 = vmul.f32 %v11094_v12, %v772_v39  ;;  %v2278_v13 = vld [vmem:[#allocation23 + $0x1d0] sm:$0xff] }
 0x205   : > { %v2113_v40 = vadd.f32 %v2072_v28, %v11375_v60  ;;  %v1568_v30 = vadd.f32 %v1527_v23, %v1437_v19  ;;  %v1215_v15 = vadd.f32 %v1174_v10, %v1084_v14  ;;  %v1528_v47 = vmul.f32 %v11139_v42, %v1479_v63  ;;  %v11438_v6 = vld [vmem:[%s10495_s29 + $0xd9] sm:$0xff]  ;;  %v1829_v62 = vld [vmem:[#allocation23 + $0xa0] sm:$0xff] }
 0x206   : > { %2359 = vst [vmem:[#allocation3 + $0x98] sm:$0xff] %v11428_v8  ;;  %v1787_v59 = vmax.f32 %v1746_v29, 0.0  ;;  %v1951_v21 = vld [vmem:[#allocation2 + $0x9d] sm:$0xff]  ;;  %v862_v11 = vadd.f32 %v821_v31, %v731_v18  ;;  %v952_v43 = vmul.f32 %v11097_v57, %v11355_v41  ;;  %v1044_v60 = vmul.f32 %v11103_v27, %v11426_v35 }
 0x207   : > { %v1992_v50 = vld [vmem:[#allocation2 + $0x9e] sm:$0xff]  ;;  %v2519_v58 = vld [vmem:[#allocation3 + $0x8b] sm:$0xff]  ;;  %v2195_v5 = vadd.f32 %v2113_v40, %v11380_v37  ;;  %v1699_v56 = vadd.f32 %v1658_v3, %v1568_v30  ;;  %v1346_v53 = vadd.f32 %v1305_v17, %v1215_v15  ;;  %v1659_v9 = vmul.f32 %v11156_v22, %v1610_v51 }
 0x208   : > { %v684_v23 = vld [vmem:[%s10495_s29 + $0xbd] sm:$0xff]  ;;  %v2478_v44 = vld [vmem:[#allocation3 + $0x8a] sm:$0xff]  ;;  %3013 = vmatprep.mubr.f32.mxu0 %v2519_v58  ;;  %v11448_v41 = vmul.f32 %v1828_v49, %v1787_v59  ;;  %v993_v46 = vadd.f32 %v952_v43, %v862_v11  ;;  %v1175_v10 = vmul.f32 %v11119_v38, %v1126_v52  ;;  %v11453_v37 = vadd.f32 %v1992_v50, %v1951_v21 }
 0x209   : > { %v2439_v34 = vld [vmem:[#allocation3 + $0x89] sm:$0xff]  ;;  %v1480_v1 = vld [vmem:[%s10495_s29 + $0xda] sm:$0xff]  ;;  %3014 = vmatmul.mubr.f32.gmra.mrb[24].mxu0 %v2478_v44  ;;  %v2236_v0 = vmul.f32 0.25, %v2195_v5  ;;  %v1747_v33 = vadd.f32 %v11205_v4, %v1699_v56  ;;  %v1438_v39 = vadd.f32 %v1397_v48, %v1346_v53  ;;  %v1398_v17 = vmul.f32 %v11131_v61, %v11438_v6  ;;  %v685_v44 = vld [vmem:[%s10495_s29 + $0xc5] sm:$0xff] }
 0x20a   : > { %2753 = vmatprep.mubr.f32.mxu1 %v2439_v34  ;;  %v1611_v45 = vld [vmem:[%s10495_s29 + $0xdb] sm:$0xff]  ;;  %v2073_v3 = vld [vmem:[#allocation2 + $0xa7] sm:$0xff]  ;;  %1910 = vst [vmem:[#allocation2 + $0xb0] sm:$0xff] %v11448_v41  ;;  %v1085_v14 = vadd.f32 %v1044_v60, %v993_v46  ;;  %v732_v28 = vmul.f32 %v11086_v36, %v684_v23  ;;  %v1529_v18 = vmul.f32 %v11139_v42, %v1480_v1  ;;  %v11470_v30 = vld [vmem:[%s10495_s29 + $0xcf] sm:$0xff] }
 0x20b   : > { %2754 = vmatmul.mubr.f32.gmra.mrb[28].mxu1 %v11342_v32  ;;  %v773_v7 = vld [vmem:[%s10495_s29 + $0xbe] sm:$0xff]  ;;  %v1993_v19 = vld [vmem:[#allocation2 + $0xa6] sm:$0xff]  ;;  %v1306_v32 = vmul.f32 %v11122_v2, %v11371_v54  ;;  %v11464_v48 = vmul.f32 %v2278_v13, %v2236_v0  ;;  %v2114_v29 = vadd.f32 %v2073_v3, %v11415_v20  ;;  %v1788_v51 = vmax.f32 %v1747_v33, 0.0  ;;  %v1127_v15 = vld [vmem:[%s10495_s29 + $0xd0] sm:$0xff] }
 0x20c   : > { %v1952_v63 = vld [vmem:[#allocation2 + $0xa5] sm:$0xff]  ;;  %v1569_v31 = vadd.f32 %v1528_v47, %v1438_v39  ;;  %v1216_v40 = vadd.f32 %v1175_v10, %v1085_v14  ;;  %v822_v49 = vmul.f32 %v11094_v12, %v773_v7  ;;  %v953_v54 = vmul.f32 %v11097_v57, %v11392_v55  ;;  %v1830_v46 = vld [vmem:[#allocation23 + $0xa8] sm:$0xff]  ;;  %v11502_v33 = vld [vmem:[%s10495_s29 + $0xd7] sm:$0xff] }
 0x20d   : > { %v11476_v52 = vld [vmem:[%s10495_s29 + $0xe1] sm:$0xff]  ;;  %2360 = vst [vmem:[#allocation3 + $0xa0] sm:$0xff] %v11464_v48  ;;  %v2440_v20 = vld [vmem:[#allocation3 + $0x91] sm:$0xff]  ;;  %v2196_v47 = vadd.f32 %v2114_v29, %v11411_v24  ;;  %v11480_v50 = vmul.f32 %v1829_v62, %v1788_v51  ;;  %v11482_v11 = vadd.f32 %v1993_v19, %v1952_v63  ;;  %v1660_v43 = vmul.f32 %v11156_v22, %v1611_v45 }
 0x20e   : > { %v2520_v59 = vld [vmem:[#allocation3 + $0x93] sm:$0xff]  ;;  %2758 = vmatprep.mubr.f32.mxu1 %v2440_v20  ;;  %v1700_v60 = vadd.f32 %v1659_v9, %v1569_v31  ;;  %v1347_v23 = vadd.f32 %v1306_v32, %v1216_v40  ;;  %v863_v58 = vadd.f32 %v822_v49, %v732_v28  ;;  %v774_v34 = vld [vmem:[%s10495_s29 + $0xc6] sm:$0xff]  ;;  %v1045_v5 = vmul.f32 %v11103_v27, %v11470_v30 }
 0x20f   : > { %v2479_v21 = vld [vmem:[#allocation3 + $0x92] sm:$0xff]  ;;  %3018 = vmatprep.mubr.f32.mxu0 %v2520_v59  ;;  %2759 = vmatmul.mubr.f32.gmra.mrb[30].mxu1 %v11395_v16  ;;  %v2237_v24 = vmul.f32 0.25, %v2196_v47  ;;  %1911 = vst [vmem:[#allocation2 + $0xb8] sm:$0xff] %v11480_v50  ;;  %v1176_v56 = vmul.f32 %v11119_v38, %v1127_v15  ;;  %v1307_v53 = vmul.f32 %v11122_v2, %v11408_v25  ;;  %v1481_v9 = vld [vmem:[%s10495_s29 + $0xe2] sm:$0xff] }
 0x210   : > { %v2279_v55 = vld [vmem:[#allocation23 + $0x1d8] sm:$0xff]  ;;  %3019 = vmatmul.mubr.f32.gmra.mrb[26].mxu0 %v2479_v21  ;;  %v1748_v13 = vadd.f32 %v11205_v4, %v1700_v60  ;;  %v1439_v10 = vadd.f32 %v1398_v17, %v1347_v23  ;;  %v994_v1 = vadd.f32 %v953_v54, %v863_v58  ;;  %v11498_v16 = vmul.f32 %v11131_v61, %v11476_v52  ;;  %v2280_v29 = vld [vmem:[#allocation23 + $0x1e0] sm:$0xff] }
 0x211   : > { %v1612_v0 = vld [vmem:[%s10495_s29 + $0xe3] sm:$0xff]  ;;  %v11504_v62 = vmul.f32 %v2279_v55, %v2237_v24  ;;  %v2074_v39 = vld [vmem:[#allocation2 + $0xaf] sm:$0xff]  ;;  %v733_v7 = vmul.f32 %v11086_v36, %v685_v44  ;;  %v823_v3 = vmul.f32 %v11094_v12, %v774_v34  ;;  %v954_v63 = vmul.f32 %v11097_v57, %v11426_v35  ;;  %v1128_v28 = vld [vmem:[%s10495_s29 + $0xd8] sm:$0xff] }
 0x212   : > { %v1953_v45 = vld [vmem:[#allocation2 + $0xad] sm:$0xff]  ;;  %v2115_v19 = vadd.f32 %v2074_v39, %v11453_v37  ;;  %v1789_v14 = vmax.f32 %v1748_v13, 0.0  ;;  %v1570_v32 = vadd.f32 %v1529_v18, %v1439_v10  ;;  %v11512_v17 = vmul.f32 %v11139_v42, %v1481_v9  ;;  %v3940_v47 = vld [vmem:[#allocation11] sm:$0xff]  ;;  %v1831_v24 = vld [vmem:[#allocation23 + $0xb0] sm:$0xff] }
 0x213   : > { %v1994_v25 = vld [vmem:[#allocation2 + $0xae] sm:$0xff]  ;;  %2361 = vst [vmem:[#allocation3 + $0xa8] sm:$0xff] %v11504_v62  ;;  %v1086_v51 = vadd.f32 %v1045_v5, %v994_v1  ;;  %v11517_v31 = vmul.f32 %v11156_v22, %v1612_v0  ;;  %v864_v36 = vadd.f32 %v823_v3, %v733_v7  ;;  %v1046_v12 = vmul.f32 %v11103_v27, %v11502_v33  ;;  %v3941_v55 = vld [vmem:[#allocation11 + $0x8] sm:$0xff] }
 0x214   : > { %v11522_v57 = vld [vmem:[%s10495_s29 + $0xe9] sm:$0xff]  ;;  %v2441_v40 = vld [vmem:[#allocation3 + $0x99] sm:$0xff]  ;;  %v2197_v49 = vadd.f32 %v2115_v19, %v11448_v41  ;;  %v11526_v54 = vmul.f32 %v1830_v46, %v1789_v14  ;;  %v11528_v15 = vadd.f32 %v1994_v25, %v1953_v45  ;;  %v1701_v59 = vadd.f32 %v1660_v43, %v1570_v32  ;;  %v11555_v45 = vld [vmem:[#allocation4 + $0x1] ss:$0 sm:$0xff] }
 0x215   : > { %v1482_v35 = vld [vmem:[%s10495_s29 + $0xea] sm:$0xff]  ;;  %v2480_v18 = vld [vmem:[#allocation3 + $0x9a] sm:$0xff]  ;;  %2763 = vmatprep.mubr.f32.mxu1 %v2441_v40  ;;  %v1217_v21 = vadd.f32 %v1176_v56, %v1086_v51  ;;  %v995_v20 = vadd.f32 %v954_v63, %v864_v36  ;;  %v1177_v27 = vmul.f32 %v11119_v38, %v1128_v28  ;;  %v1308_v58 = vmul.f32 %v11122_v2, %v11438_v6  ;;  %v11567_v28 = vld [vmem:[#allocation4 + $0x3] ss:$0 sm:$0xff] }
 0x216   : > { %v2521_v37 = vld [vmem:[#allocation3 + $0x9b] sm:$0xff]  ;;  %v686_v60 = vld [vmem:[%s10495_s29 + $0xcd] sm:$0xff]  ;;  %2764 = vmatmul.mubr.f32.gmra.mrb[32].mxu1 %v11428_v8  ;;  %v2238_v41 = vmul.f32 0.25, %v2197_v49  ;;  %v2075_v23 = vld [vmem:[#allocation2 + $0xb7] sm:$0xff]  ;;  %1912 = vst [vmem:[#allocation2 + $0xc0] sm:$0xff] %v11526_v54  ;;  %v1749_v43 = vadd.f32 %v11205_v4, %v1701_v59  ;;  %v1400_v38 = vmul.f32 %v11131_v61, %v11522_v57  ;;  %v11542_v8 = vmul.f32 %v11139_v42, %v1482_v35 }
 0x217   : > { %3023 = vmatprep.mubr.f32.mxu0 %v2521_v37  ;;  %v775_v44 = vld [vmem:[%s10495_s29 + $0xce] sm:$0xff]  ;;  %v2116_v34 = vadd.f32 %v2075_v23, %v11482_v11  ;;  %v1348_v5 = vadd.f32 %v1307_v53, %v1217_v21  ;;  %v1087_v56 = vadd.f32 %v1046_v12, %v995_v20  ;;  %v11546_v13 = vld [vmem:[%s10495_s29 + $0xdf] sm:$0xff]  ;;  %v8394_v6 = vpack.c.bf16 %v3941_v55, %v3940_v47  ;;  %v1995_v0 = vld [vmem:[#allocation2 + $0xb6] sm:$0xff] }
 0x218   : > { %3024 = vmatmul.mubr.f32.gmra.mrb[28].mxu0 %v2480_v18  ;;  %v1613_v9 = vld [vmem:[%s10495_s29 + $0xeb] sm:$0xff]  ;;  %v11548_v46 = vmul.f32 %v2280_v29, %v2238_v41  ;;  %v1790_v2 = vmax.f32 %v1749_v43, 0.0  ;;  %v1954_v53 = vld [vmem:[#allocation2 + $0xb5] sm:$0xff]  ;;  %v824_v25 = vmul.f32 %v11555_v45, %v775_v44  ;;  %v1129_v7 = vld [vmem:[%s10495_s29 + $0xe0] sm:$0xff]  ;;  %v1047_v29 = vmul.f32 %v11567_v28, %v11546_v13 }
 0x219   : > { %v2281_v10 = vld [vmem:[#allocation23 + $0x1e8] sm:$0xff]  ;;  %v2198_v11 = vadd.f32 %v2116_v34, %v11480_v50  ;;  %v1440_v42 = vadd.f32 %v11498_v16, %v1348_v5  ;;  %v1218_v39 = vadd.f32 %v1177_v27, %v1087_v56  ;;  %v1662_v50 = vmul.f32 %v11156_v22, %v1613_v9  ;;  %8395 = vmatpush1.bf16.msra.mxu1 %v8394_v6  ;;  %v776_v20 = vld [vmem:[%s10495_s29 + $0xd6] sm:$0xff]  ;;  %v1832_v6 = vld [vmem:[#allocation23 + $0xb8] sm:$0xff] }
 0x21a   : > { %v11550_v1 = vld [vmem:[#allocation4] ss:$0 sm:$0xff]  ;;  %2362 = vst [vmem:[#allocation3 + $0xb0] sm:$0xff] %v11548_v46  ;;  %v11560_v14 = vmul.f32 %v1831_v24, %v1790_v2  ;;  %v11563_v16 = vld [vmem:[#allocation4 + $0x2] ss:$0 sm:$0xff]  ;;  %v687_v18 = vld [vmem:[%s10495_s29 + $0xd5] sm:$0xff]  ;;  %8396 = vmatprep.subr.bf16.mxu1 %v13185_v26  ;;  %v825_v5 = vmul.f32 %v11555_v45, %v776_v20 }
 0x21b   : > { %v734_v61 = vmul.f32 %v11550_v1, %v686_v60  ;;  %v2522_v3 = vld [vmem:[#allocation3 + $0xa3] sm:$0xff]  ;;  %v955_v32 = vmul.f32 %v11563_v16, %v11470_v30  ;;  %v2239_v51 = vmul.f32 0.25, %v2198_v11  ;;  %v1571_v36 = vadd.f32 %v11512_v17, %v1440_v42  ;;  %v11579_v40 = vld [vmem:[#allocation4 + $0x4] ss:$0 sm:$0xff]  ;;  %v11582_v59 = vld [vmem:[#allocation4 + $0x5] ss:$0 sm:$0xff] }
 0x21c   : > { %v2481_v63 = vld [vmem:[#allocation3 + $0xa2] sm:$0xff]  ;;  %3028 = vmatprep.mubr.f32.mxu0 %v2522_v3  ;;  %v1349_v12 = vadd.f32 %v1308_v58, %v1218_v39  ;;  %v1483_v37 = vld [vmem:[%s10495_s29 + $0xf2] sm:$0xff]  ;;  %1913 = vst [vmem:[#allocation2 + $0xc8] sm:$0xff] %v11560_v14  ;;  %v2036_v30 = vadd.f32 %v1995_v0, %v1954_v53  ;;  %v1178_v49 = vmul.f32 %v11579_v40, %v1129_v7 }
 0x21d   : > { %v2442_v19 = vld [vmem:[#allocation3 + $0xa1] sm:$0xff]  ;;  %v865_v22 = vadd.f32 %v824_v25, %v734_v61  ;;  %v11573_v35 = vld [vmem:[%s10495_s29 + $0xf1] sm:$0xff]  ;;  %3029 = vmatmul.mubr.f32.gmra.mrb[30].mxu0 %v2481_v63  ;;  %v1309_v17 = vmul.f32 %v11582_v59, %v11476_v52  ;;  %v11588_v27 = vmul.f32 %v2281_v10, %v2239_v51  ;;  %v2076_v47 = vld [vmem:[#allocation2 + $0xbf] sm:$0xff]  ;;  %v1702_v55 = vadd.f32 %v11517_v31, %v1571_v36 }
 0x21e   : > { %2768 = vmatprep.mubr.f32.mxu1 %v2442_v19  ;;  %v1614_v21 = vld [vmem:[%s10495_s29 + $0xf3] sm:$0xff]  ;;  %v1996_v60 = vld [vmem:[#allocation2 + $0xbe] sm:$0xff]  ;;  %v1441_v41 = vadd.f32 %v1400_v38, %v1349_v12  ;;  %v2117_v43 = vadd.f32 %v2076_v47, %v11528_v15  ;;  %v735_v31 = vmul.f32 %v11550_v1, %v687_v18  ;;  %v11608_v56 = vld [vmem:[%s10495_s29 + $0xe7] sm:$0xff] }
 0x21f   : > { %2769 = vmatmul.mubr.f32.gmra.mrb[34].mxu1 %v11464_v48  ;;  %v1955_v48 = vld [vmem:[#allocation2 + $0xbd] sm:$0xff]  ;;  %v996_v23 = vadd.f32 %v955_v32, %v865_v22  ;;  %v11593_v58 = vld [vmem:[#allocation4 + $0x6] ss:$0 sm:$0xff]  ;;  %v11597_v44 = vld [vmem:[#allocation4 + $0x7] ss:$0 sm:$0xff]  ;;  %2363 = vst [vmem:[#allocation3 + $0xb8] sm:$0xff] %v11588_v27  ;;  %v1750_v38 = vadd.f32 %v11205_v4, %v1702_v55  ;;  %v1048_v32 = vmul.f32 %v11567_v28, %v11608_v56 }
 0x220   : > { %v1401_v52 = vmul.f32 %v11593_v58, %v11573_v35  ;;  %v11600_v34 = vmul.f32 %v11597_v44, %v1483_v37  ;;  %v1572_v24 = vadd.f32 %v11542_v8, %v1441_v41  ;;  %v1130_v9 = vld [vmem:[%s10495_s29 + $0xe8] sm:$0xff]  ;;  %v2199_v10 = vadd.f32 %v2117_v43, %v11526_v54  ;;  %v2282_v2 = vld [vmem:[#allocation23 + $0x1f0] sm:$0xff]  ;;  %v777_v18 = vld [vmem:[%s10495_s29 + $0xde] sm:$0xff] }
 0x221   : > { %v1088_v15 = vadd.f32 %v1047_v29, %v996_v23  ;;  %v11612_v61 = vadd.f32 %v1996_v60, %v1955_v48  ;;  %v11614_v11 = vld [vmem:[#allocation4 + $0x8] ss:$0 sm:$0xff]  ;;  %v956_v8 = vmul.f32 %v11563_v16, %v11502_v33  ;;  %v11622_v0 = vld [vmem:[%s10495_s29 + $0xf9] sm:$0xff]  ;;  %v1791_v54 = vmax.f32 %v1750_v38, 0.0  ;;  %v1833_v20 = vld [vmem:[#allocation23 + $0xc0] sm:$0xff] }
 0x222   : > { %v11617_v53 = vmul.f32 %v11614_v11, %v1614_v21  ;;  %v2523_v42 = vld [vmem:[#allocation3 + $0xab] sm:$0xff]  ;;  %v1703_v7 = vadd.f32 %v1662_v50, %v1572_v24  ;;  %v866_v63 = vadd.f32 %v825_v5, %v735_v31  ;;  %v2240_v19 = vmul.f32 0.25, %v2199_v10  ;;  %v688_v36 = vld [vmem:[%s10495_s29 + $0xdd] sm:$0xff] }
 0x223   : > { %v2482_v39 = vld [vmem:[#allocation3 + $0xaa] sm:$0xff]  ;;  %v1219_v3 = vadd.f32 %v1178_v49, %v1088_v15  ;;  %3033 = vmatprep.mubr.f32.mxu0 %v2523_v42  ;;  %v1179_v29 = vmul.f32 %v11579_v40, %v1130_v9  ;;  %v1310_v33 = vmul.f32 %v11582_v59, %v11522_v57  ;;  %v1484_v51 = vld [vmem:[%s10495_s29 + $0xfa] sm:$0xff]  ;;  %v2077_v50 = vld [vmem:[#allocation2 + $0xc7] sm:$0xff]  ;;  %v11632_v12 = vmul.f32 %v1832_v6, %v1791_v54 }
 0x224   : > { %v2443_v25 = vld [vmem:[#allocation3 + $0xa9] sm:$0xff]  ;;  %3034 = vmatmul.mubr.f32.gmra.mrb[32].mxu0 %v2482_v39  ;;  %v1751_v22 = vadd.f32 %v11205_v4, %v1703_v7  ;;  %v11636_v49 = vmul.f32 %v2282_v2, %v2240_v19  ;;  %v2118_v21 = vadd.f32 %v2077_v50, %v2036_v30  ;;  %v1956_v57 = vld [vmem:[#allocation2 + $0xc5] sm:$0xff]  ;;  %v997_v55 = vadd.f32 %v956_v8, %v866_v63 }
 0x225   : > { %2773 = vmatprep.mubr.f32.mxu1 %v2443_v25  ;;  %v1350_v37 = vadd.f32 %v1309_v17, %v1219_v3  ;;  %v1997_v47 = vld [vmem:[#allocation2 + $0xc6] sm:$0xff]  ;;  %1914 = vst [vmem:[#allocation2 + $0xd0] sm:$0xff] %v11632_v12  ;;  %v11642_v4 = vmul.f32 %v11597_v44, %v1484_v51  ;;  %v1615_v17 = vld [vmem:[%s10495_s29 + $0xfb] sm:$0xff]  ;;  %v736_v41 = vmul.f32 %v11550_v1, %v688_v36  ;;  %v11647_v23 = vld [vmem:[%s10495_s29 + $0xef] sm:$0xff] }
 0x226   : > { %2774 = vmatmul.mubr.f32.gmra.mrb[36].mxu1 %v11504_v62  ;;  %v1402_v62 = vmul.f32 %v11593_v58, %v11622_v0  ;;  %v1792_v48 = vmax.f32 %v1751_v22, 0.0  ;;  %v1131_v30 = vld [vmem:[%s10495_s29 + $0xf0] sm:$0xff]  ;;  %v2524_v43 = vld [vmem:[#allocation3 + $0xb3] sm:$0xff]  ;;  %2364 = vst [vmem:[#allocation3 + $0xc0] sm:$0xff] %v11636_v49  ;;  %v2200_v24 = vadd.f32 %v2118_v21, %v11560_v14  ;;  %v1089_v15 = vadd.f32 %v1048_v32, %v997_v55  ;;  %v689_v7 = vld [vmem:[%s10495_s29 + $0xe5] sm:$0xff] }
 0x227   : > { %v1442_v60 = vadd.f32 %v1401_v52, %v1350_v37  ;;  %v2483_v31 = vld [vmem:[#allocation3 + $0xb2] sm:$0xff]  ;;  %v826_v52 = vmul.f32 %v11555_v45, %v777_v18  ;;  %v957_v5 = vmul.f32 %v11563_v16, %v11546_v13  ;;  %3038 = vmatprep.mubr.f32.mxu0 %v2524_v43  ;;  %v11657_v2 = vadd.f32 %v1997_v47, %v1956_v57  ;;  %v3942_v14 = vld [vmem:[#allocation11 + $0x10] sm:$0xff]  ;;  %v778_v3 = vld [vmem:[%s10495_s29 + $0xe6] sm:$0xff] }
 0x228   : > { %v2444_v38 = vld [vmem:[#allocation3 + $0xb1] sm:$0xff]  ;;  %v11655_v10 = vmul.f32 %v1833_v20, %v1792_v48  ;;  %v11661_v8 = vld [vmem:[%s10495_s29 + $0x101] sm:$0xff]  ;;  %3039 = vmatmul.mubr.f32.gmra.mrb[34].mxu0 %v2483_v31  ;;  %v2241_v42 = vmul.f32 0.25, %v2200_v24  ;;  %v1220_v13 = vadd.f32 %v1179_v29, %v1089_v15  ;;  %v1049_v25 = vmul.f32 %v11567_v28, %v11647_v23  ;;  %v1834_v18 = vld [vmem:[#allocation23 + $0xc8] sm:$0xff] }
 0x229   : > { %2778 = vmatprep.mubr.f32.mxu1 %v2444_v38  ;;  %v2283_v9 = vld [vmem:[#allocation23 + $0x1f8] sm:$0xff]  ;;  %v1573_v6 = vadd.f32 %v11600_v34, %v1442_v60  ;;  %v867_v39 = vadd.f32 %v826_v52, %v736_v41  ;;  %v3943_v54 = vld [vmem:[#allocation11 + $0x18] sm:$0xff]  ;;  %v1664_v63 = vmul.f32 %v11614_v11, %v1615_v17  ;;  %v1311_v19 = vmul.f32 %v11582_v59, %v11573_v35 }
 0x22a   : > { %2779 = vmatmul.mubr.f32.gmra.mrb[38].mxu1 %v11548_v46  ;;  %1915 = vst [vmem:[#allocation2 + $0xd8] sm:$0xff] %v11655_v10  ;;  %v1180_v46 = vmul.f32 %v11579_v40, %v1131_v30  ;;  %v1485_v32 = vld [vmem:[%s10495_s29 + $0x102] sm:$0xff]  ;;  %v11675_v29 = vmul.f32 %v2283_v9, %v2241_v42  ;;  %v1351_v51 = vadd.f32 %v1310_v33, %v1220_v13  ;;  %v11680_v22 = vld [vmem:[%s10495_s29 + $0xf7] sm:$0xff] }
 0x22b   : > { %v1704_v34 = vadd.f32 %v11617_v53, %v1573_v6  ;;  %v998_v36 = vadd.f32 %v957_v5, %v867_v39  ;;  %v1403_v50 = vmul.f32 %v11593_v58, %v11661_v8  ;;  %v11682_v37 = vld [vmem:[#allocation6] ss:$0 sm:$0xff]  ;;  %v1616_v21 = vld [vmem:[%s10495_s29 + $0x103] sm:$0xff]  ;;  %v8397_v20 = vpack.c.bf16 %v3943_v54, %v3942_v14  ;;  %v690_v39 = vld [vmem:[%s10495_s29 + $0xed] sm:$0xff] }
 0x22c   : > { %v737_v57 = vmul.f32 %v11550_v1, %v689_v7  ;;  %v827_v35 = vmul.f32 %v11555_v45, %v778_v3  ;;  %v1132_v47 = vld [vmem:[%s10495_s29 + $0xf8] sm:$0xff]  ;;  %2365 = vst [vmem:[#allocation3 + $0xc8] sm:$0xff] %v11675_v29  ;;  %v2078_v33 = vld [vmem:[#allocation2 + $0xcf] sm:$0xff]  ;;  %v1443_v60 = vadd.f32 %v1402_v62, %v1351_v51  ;;  %v1534_v41 = vmul.f32 %v11597_v44, %v1485_v32  ;;  %v2284_v6 = vld [vmem:[#allocation23 + $0x200] sm:$0xff] }
 0x22d   : > { %v1752_v53 = vadd.f32 %v11682_v37, %v1704_v34  ;;  %v1957_v55 = vld [vmem:[#allocation2 + $0xcd] sm:$0xff]  ;;  %v1090_v17 = vadd.f32 %v1049_v25, %v998_v36  ;;  %v958_v30 = vmul.f32 %v11563_v16, %v11608_v56  ;;  %v2525_v43 = vld [vmem:[#allocation3 + $0xbb] sm:$0xff]  ;;  %v2119_v24 = vadd.f32 %v2078_v33, %v11612_v61  ;;  %8398 = vmatpush1.bf16.msra.mxu1 %v8397_v20  ;;  %v1835_v32 = vld [vmem:[#allocation23 + $0xd0] sm:$0xff] }
 0x22e   : > { %v1998_v48 = vld [vmem:[#allocation2 + $0xce] sm:$0xff]  ;;  %v2484_v31 = vld [vmem:[#allocation3 + $0xba] sm:$0xff]  ;;  %v868_v52 = vadd.f32 %v827_v35, %v737_v57  ;;  %v1050_v5 = vmul.f32 %v11567_v28, %v11680_v22  ;;  %3043 = vmatprep.mubr.f32.mxu0 %v2525_v43  ;;  %v1574_v62 = vadd.f32 %v11642_v4, %v1443_v60  ;;  %v1181_v56 = vmul.f32 %v11579_v40, %v1132_v47 }
 0x22f   : > { %v2445_v38 = vld [vmem:[#allocation3 + $0xb9] sm:$0xff]  ;;  %v1793_v15 = vmax.f32 %v1752_v53, 0.0  ;;  %v1221_v9 = vadd.f32 %v1180_v46, %v1090_v17  ;;  %3044 = vmatmul.mubr.f32.gmra.mrb[36].mxu0 %v2484_v31  ;;  %v2201_v61 = vadd.f32 %v2119_v24, %v11632_v12  ;;  %v11703_v13 = vld [vmem:[%s10495_s29 + $0x109] sm:$0xff]  ;;  %v11706_v54 = vadd.f32 %v1998_v48, %v1957_v55  ;;  %8399 = vmatprep.subr.bf16.mxu1 %v13185_v26 }
 0x230   : > { %2783 = vmatprep.mubr.f32.mxu1 %v2445_v38  ;;  %v999_v42 = vadd.f32 %v958_v30, %v868_v52  ;;  %v1705_v4 = vadd.f32 %v1664_v63, %v1574_v62  ;;  %v1312_v63 = vmul.f32 %v11582_v59, %v11622_v0  ;;  %v779_v36 = vld [vmem:[%s10495_s29 + $0xee] sm:$0xff]  ;;  %v738_v60 = vmul.f32 %v11550_v1, %v690_v39  ;;  %v1133_v38 = vld [vmem:[%s10495_s29 + $0x100] sm:$0xff] }
 0x231   : > { %2784 = vmatmul.mubr.f32.gmra.mrb[40].mxu1 %v11588_v27  ;;  %v11700_v14 = vmul.f32 %v1834_v18, %v1793_v15  ;;  %v2079_v25 = vld [vmem:[#allocation2 + $0xd7] sm:$0xff]  ;;  %v1352_v34 = vadd.f32 %v1311_v19, %v1221_v9  ;;  %v1665_v27 = vmul.f32 %v11614_v11, %v1616_v21  ;;  %v2242_v12 = vmul.f32 0.25, %v2201_v61  ;;  %v1486_v20 = vld [vmem:[%s10495_s29 + $0x10a] sm:$0xff] }
 0x232   : > { %v1958_v7 = vld [vmem:[#allocation2 + $0xd5] sm:$0xff]  ;;  %v2120_v46 = vadd.f32 %v2079_v25, %v11657_v2  ;;  %v1091_v51 = vadd.f32 %v1050_v5, %v999_v42  ;;  %v1753_v53 = vadd.f32 %v11682_v37, %v1705_v4  ;;  %v1404_v21 = vmul.f32 %v11593_v58, %v11703_v13  ;;  %v1617_v57 = vld [vmem:[%s10495_s29 + $0x10b] sm:$0xff]  ;;  %v11723_v2 = vld [vmem:[%s10495_s29 + $0xff] sm:$0xff] }
 0x233   : > { %v1999_v3 = vld [vmem:[#allocation2 + $0xd6] sm:$0xff]  ;;  %1916 = vst [vmem:[#allocation2 + $0xe0] sm:$0xff] %v11700_v14  ;;  %v1444_v19 = vadd.f32 %v1403_v50, %v1352_v34  ;;  %v2526_v35 = vld [vmem:[#allocation3 + $0xc3] sm:$0xff]  ;;  %v11725_v33 = vmul.f32 %v2284_v6, %v2242_v12  ;;  %v828_v43 = vmul.f32 %v11555_v45, %v779_v36  ;;  %v959_v31 = vmul.f32 %v11563_v16, %v11647_v23  ;;  %v3944_v5 = vld [vmem:[#allocation11 + $0x20] sm:$0xff] }
 0x234   : > { %v11716_v18 = vadd.f32 %v1999_v3, %v1958_v7  ;;  %v2485_v47 = vld [vmem:[#allocation3 + $0xc2] sm:$0xff]  ;;  %v2202_v0 = vadd.f32 %v2120_v46, %v11655_v10  ;;  %v1222_v48 = vadd.f32 %v1181_v56, %v1091_v51  ;;  %3048 = vmatprep.mubr.f32.mxu0 %v2526_v35  ;;  %v1794_v17 = vmax.f32 %v1753_v53, 0.0  ;;  %v691_v6 = vld [vmem:[%s10495_s29 + $0xf5] sm:$0xff]  ;;  %v1836_v36 = vld [vmem:[#allocation23 + $0xd8] sm:$0xff] }
 0x235   : > { %v2446_v55 = vld [vmem:[#allocation3 + $0xc1] sm:$0xff]  ;;  %v1575_v30 = vadd.f32 %v1534_v41, %v1444_v19  ;;  %3049 = vmatmul.mubr.f32.gmra.mrb[38].mxu0 %v2485_v47  ;;  %2366 = vst [vmem:[#allocation3 + $0xd0] sm:$0xff] %v11725_v33  ;;  %v1535_v15 = vmul.f32 %v11597_v44, %v1486_v20  ;;  %v1666_v41 = vmul.f32 %v11614_v11, %v1617_v57  ;;  %v11738_v52 = vld [vmem:[%s10495_s29 + $0x111] sm:$0xff] }
 0x236   : > { %2788 = vmatprep.mubr.f32.mxu1 %v2446_v55  ;;  %v2285_v50 = vld [vmem:[#allocation23 + $0x208] sm:$0xff]  ;;  %v2243_v10 = vmul.f32 0.25, %v2202_v0  ;;  %v1353_v24 = vadd.f32 %v1312_v63, %v1222_v48  ;;  %v3945_v23 = vld [vmem:[#allocation11 + $0x28] sm:$0xff]  ;;  %v11740_v62 = vmul.f32 %v1835_v32, %v1794_v17  ;;  %v869_v56 = vadd.f32 %v828_v43, %v738_v60  ;;  %v780_v3 = vld [vmem:[%s10495_s29 + $0xf6] sm:$0xff] }
 0x237   : > { %2789 = vmatmul.mubr.f32.gmra.mrb[42].mxu1 %v11636_v49  ;;  %v1706_v9 = vadd.f32 %v1665_v27, %v1575_v30  ;;  %v1051_v61 = vmul.f32 %v11567_v28, %v11723_v2  ;;  %v1487_v49 = vld [vmem:[%s10495_s29 + $0x112] sm:$0xff]  ;;  %v1182_v25 = vmul.f32 %v11579_v40, %v1133_v38  ;;  %v1313_v4 = vmul.f32 %v11582_v59, %v11661_v8  ;;  %v11764_v20 = vld [vmem:[%s10495_s29 + $0x107] sm:$0xff]  ;;  %v692_v43 = vld [vmem:[%s10495_s29 + $0xfd] sm:$0xff] }
 0x238   : > { %v11746_v42 = vmul.f32 %v2285_v50, %v2243_v10  ;;  %v1445_v39 = vadd.f32 %v1404_v21, %v1353_v24  ;;  %v1618_v7 = vld [vmem:[%s10495_s29 + $0x113] sm:$0xff]  ;;  %1917 = vst [vmem:[#allocation2 + $0xe8] sm:$0xff] %v11740_v62  ;;  %v1000_v32 = vadd.f32 %v959_v31, %v869_v56  ;;  %v1405_v51 = vmul.f32 %v11593_v58, %v11738_v52  ;;  %v1134_v0 = vld [vmem:[%s10495_s29 + $0x108] sm:$0xff]  ;;  %v781_v31 = vld [vmem:[%s10495_s29 + $0xfe] sm:$0xff] }
 0x239   : > { %v1754_v27 = vadd.f32 %v11682_v37, %v1706_v9  ;;  %v8400_v63 = vpack.c.bf16 %v3945_v23, %v3944_v5  ;;  %v11760_v19 = vmul.f32 %v11597_v44, %v1487_v49  ;;  %v739_v21 = vmul.f32 %v11550_v1, %v691_v6  ;;  %v2286_v57 = vld [vmem:[#allocation23 + $0x210] sm:$0xff]  ;;  %v1837_v49 = vld [vmem:[#allocation23 + $0xe0] sm:$0xff] }
 0x23a   : > { %v2080_v34 = vld [vmem:[#allocation2 + $0xdf] sm:$0xff]  ;;  %2367 = vst [vmem:[#allocation3 + $0xd8] sm:$0xff] %v11746_v42  ;;  %v1576_v53 = vadd.f32 %v1535_v15, %v1445_v39  ;;  %v1092_v47 = vadd.f32 %v1051_v61, %v1000_v32  ;;  %v829_v55 = vmul.f32 %v11555_v45, %v780_v3  ;;  %v11774_v17 = vmul.f32 %v11614_v11, %v1618_v7 }
 0x23b   : > { %v1959_v12 = vld [vmem:[#allocation2 + $0xdd] sm:$0xff]  ;;  %v2121_v8 = vadd.f32 %v2080_v34, %v11706_v54  ;;  %v1795_v35 = vmax.f32 %v1754_v27, 0.0  ;;  %8401 = vmatpush1.bf16.msra.mxu1 %v8400_v63  ;;  %v960_v54 = vmul.f32 %v11563_v16, %v11680_v22  ;;  %v1183_v9 = vmul.f32 %v11579_v40, %v1134_v0 }
 0x23c   : > { %v2000_v46 = vld [vmem:[#allocation2 + $0xde] sm:$0xff]  ;;  %v1707_v50 = vadd.f32 %v1666_v41, %v1576_v53  ;;  %8402 = vmatprep.subr.bf16.mxu1 %v13185_v26  ;;  %v2527_v38 = vld [vmem:[#allocation3 + $0xcb] sm:$0xff]  ;;  %v1223_v15 = vadd.f32 %v1182_v25, %v1092_v47  ;;  %v1052_v41 = vmul.f32 %v11567_v28, %v11764_v20  ;;  %v1314_v56 = vmul.f32 %v11582_v59, %v11703_v13 }
 0x23d   : > { %v2203_v48 = vadd.f32 %v2121_v8, %v11700_v14  ;;  %v11771_v60 = vadd.f32 %v2000_v46, %v1959_v12  ;;  %v11777_v30 = vld [vmem:[%s10495_s29 + $0x119] sm:$0xff]  ;;  %v2447_v24 = vld [vmem:[#allocation3 + $0xc9] sm:$0xff]  ;;  %v11782_v22 = vmul.f32 %v1836_v36, %v1795_v35  ;;  %v870_v14 = vadd.f32 %v829_v55, %v739_v21  ;;  %3053 = vmatprep.mubr.f32.mxu0 %v2527_v38 }
 0x23e   : > { %v2486_v10 = vld [vmem:[#allocation3 + $0xca] sm:$0xff]  ;;  %2793 = vmatprep.mubr.f32.mxu1 %v2447_v24  ;;  %v1755_v23 = vadd.f32 %v11682_v37, %v1707_v50  ;;  %v1488_v61 = vld [vmem:[%s10495_s29 + $0x11a] sm:$0xff]  ;;  %v1354_v6 = vadd.f32 %v1313_v4, %v1223_v15  ;;  %v1406_v25 = vmul.f32 %v11593_v58, %v11777_v30  ;;  %v740_v13 = vmul.f32 %v11550_v1, %v692_v43  ;;  %v693_v50 = vld [vmem:[%s10495_s29 + $0x105] sm:$0xff] }
 0x23f   : > { %v2244_v5 = vmul.f32 0.25, %v2203_v48  ;;  %3054 = vmatmul.mubr.f32.gmra.mrb[40].mxu0 %v2486_v10  ;;  %2794 = vmatmul.mubr.f32.gmra.mrb[44].mxu1 %v11675_v29  ;;  %1918 = vst [vmem:[#allocation2 + $0xf0] sm:$0xff] %v11782_v22  ;;  %v1001_v39 = vadd.f32 %v960_v54, %v870_v14  ;;  %v1619_v7 = vld [vmem:[%s10495_s29 + $0x11b] sm:$0xff]  ;;  %v2081_v34 = vld [vmem:[#allocation2 + $0xe7] sm:$0xff]  ;;  %v830_v12 = vmul.f32 %v11555_v45, %v781_v31  ;;  %v11801_v46 = vld [vmem:[%s10495_s29 + $0x10f] sm:$0xff] }
 0x240   : > { %v1796_v27 = vmax.f32 %v1755_v23, 0.0  ;;  %v1135_v29 = vld [vmem:[%s10495_s29 + $0x110] sm:$0xff]  ;;  %v2122_v4 = vadd.f32 %v2081_v34, %v11716_v18  ;;  %v1446_v36 = vadd.f32 %v1405_v51, %v1354_v6  ;;  %v1537_v21 = vmul.f32 %v11597_v44, %v1488_v61  ;;  %v1960_v35 = vld [vmem:[#allocation2 + $0xe5] sm:$0xff] }
 0x241   : > { %v11796_v3 = vmul.f32 %v2286_v57, %v2244_v5  ;;  %v2528_v32 = vld [vmem:[#allocation3 + $0xd3] sm:$0xff]  ;;  %v1093_v53 = vadd.f32 %v1052_v41, %v1001_v39  ;;  %v2001_v47 = vld [vmem:[#allocation2 + $0xe6] sm:$0xff]  ;;  %v871_v55 = vadd.f32 %v830_v12, %v740_v13  ;;  %v961_v54 = vmul.f32 %v11563_v16, %v11723_v2  ;;  %v1838_v13 = vld [vmem:[#allocation23 + $0xe8] sm:$0xff] }
 0x242   : > { %v2487_v63 = vld [vmem:[#allocation3 + $0xd2] sm:$0xff]  ;;  %3058 = vmatprep.mubr.f32.mxu0 %v2528_v32  ;;  %v11807_v57 = vmul.f32 %v1837_v49, %v1796_v27  ;;  %v2204_v18 = vadd.f32 %v2122_v4, %v11740_v62  ;;  %v1577_v51 = vadd.f32 %v11760_v19, %v1446_v36  ;;  %v1668_v31 = vmul.f32 %v11614_v11, %v1619_v7  ;;  %v1489_v62 = vld [vmem:[%s10495_s29 + $0x122] sm:$0xff] }
 0x243   : > { %v2448_v8 = vld [vmem:[#allocation3 + $0xd1] sm:$0xff]  ;;  %2368 = vst [vmem:[#allocation3 + $0xe0] sm:$0xff] %v11796_v3  ;;  %3059 = vmatmul.mubr.f32.gmra.mrb[42].mxu0 %v2487_v63  ;;  %v1224_v0 = vadd.f32 %v1183_v9, %v1093_v53  ;;  %v11815_v48 = vld [vmem:[%s10495_s29 + $0x121] sm:$0xff]  ;;  %v1002_v38 = vadd.f32 %v961_v54, %v871_v55  ;;  %v1053_v2 = vmul.f32 %v11567_v28, %v11801_v46 }
 0x244   : > { %2798 = vmatprep.mubr.f32.mxu1 %v2448_v8  ;;  %v2287_v43 = vld [vmem:[#allocation23 + $0x218] sm:$0xff]  ;;  %1919 = vst [vmem:[#allocation2 + $0xf8] sm:$0xff] %v11807_v57  ;;  %v2245_v10 = vmul.f32 0.25, %v2204_v18  ;;  %v2042_v24 = vadd.f32 %v2001_v47, %v1960_v35  ;;  %v1708_v19 = vadd.f32 %v11774_v17, %v1577_v51  ;;  %v782_v41 = vld [vmem:[%s10495_s29 + $0x106] sm:$0xff]  ;;  %v1315_v49 = vmul.f32 %v11582_v59, %v11738_v52 }
 0x245   : > { %2799 = vmatmul.mubr.f32.gmra.mrb[46].mxu1 %v11725_v33  ;;  %v1184_v33 = vmul.f32 %v11579_v40, %v1135_v29  ;;  %v1355_v15 = vadd.f32 %v1314_v56, %v1224_v0  ;;  %v1620_v14 = vld [vmem:[%s10495_s29 + $0x123] sm:$0xff]  ;;  %v1094_v61 = vadd.f32 %v1053_v2, %v1002_v38  ;;  %v1407_v6 = vmul.f32 %v11593_v58, %v11815_v48  ;;  %v11840_v63 = vld [vmem:[%s10495_s29 + $0x117] sm:$0xff]  ;;  %v3946_v0 = vld [vmem:[#allocation11 + $0x30] sm:$0xff] }
 0x246   : > { %v2082_v5 = vld [vmem:[#allocation2 + $0xef] sm:$0xff]  ;;  %v741_v39 = vmul.f32 %v11550_v1, %v693_v50  ;;  %v11832_v7 = vmul.f32 %v2287_v43, %v2245_v10  ;;  %v1756_v56 = vadd.f32 %v11682_v37, %v1708_v19  ;;  %v1538_v34 = vmul.f32 %v11597_v44, %v1489_v62  ;;  %v2288_v27 = vld [vmem:[#allocation23 + $0x220] sm:$0xff]  ;;  %v1136_v8 = vld [vmem:[%s10495_s29 + $0x118] sm:$0xff] }
 0x247   : > { %v1961_v23 = vld [vmem:[#allocation2 + $0xed] sm:$0xff]  ;;  %v2123_v17 = vadd.f32 %v2082_v5, %v11771_v60  ;;  %v1447_v12 = vadd.f32 %v1406_v25, %v1355_v15  ;;  %v1225_v29 = vadd.f32 %v1184_v33, %v1094_v61  ;;  %v1669_v32 = vmul.f32 %v11614_v11, %v1620_v14  ;;  %v3947_v50 = vld [vmem:[#allocation11 + $0x38] sm:$0xff] }
 0x248   : > { %v2002_v9 = vld [vmem:[#allocation2 + $0xee] sm:$0xff]  ;;  %v831_v52 = vmul.f32 %v11555_v45, %v782_v41  ;;  %2369 = vst [vmem:[#allocation3 + $0xe8] sm:$0xff] %v11832_v7  ;;  %v1797_v35 = vmax.f32 %v1756_v56, 0.0  ;;  %v962_v25 = vmul.f32 %v11563_v16, %v11764_v20  ;;  %v1185_v33 = vmul.f32 %v11579_v40, %v1136_v8 }
 0x249   : > { %v2205_v53 = vadd.f32 %v2123_v17, %v11782_v22  ;;  %v11845_v47 = vadd.f32 %v2002_v9, %v1961_v23  ;;  %v1578_v55 = vadd.f32 %v1537_v21, %v1447_v12  ;;  %v1356_v54 = vadd.f32 %v1315_v49, %v1225_v29  ;;  %v11850_v51 = vld [vmem:[%s10495_s29 + $0x129] sm:$0xff]  ;;  %v1839_v17 = vld [vmem:[#allocation23 + $0xf0] sm:$0xff]  ;;  %v1137_v29 = vld [vmem:[%s10495_s29 + $0x120] sm:$0xff] }
 0x24a   : > { %v2529_v4 = vld [vmem:[#allocation3 + $0xdb] sm:$0xff]  ;;  %v872_v18 = vadd.f32 %v831_v52, %v741_v39  ;;  %v11853_v38 = vmul.f32 %v1838_v13, %v1797_v35  ;;  %v1054_v21 = vmul.f32 %v11567_v28, %v11840_v63  ;;  %v1316_v15 = vmul.f32 %v11582_v59, %v11777_v30  ;;  %v783_v14 = vld [vmem:[%s10495_s29 + $0x10e] sm:$0xff] }
 0x24b   : > { %v2488_v36 = vld [vmem:[#allocation3 + $0xda] sm:$0xff]  ;;  %3063 = vmatprep.mubr.f32.mxu0 %v2529_v4  ;;  %v2246_v22 = vmul.f32 0.25, %v2205_v53  ;;  %v2083_v43 = vld [vmem:[#allocation2 + $0xf7] sm:$0xff]  ;;  %v1709_v10 = vadd.f32 %v1668_v31, %v1578_v55  ;;  %v1448_v19 = vadd.f32 %v1407_v6, %v1356_v54  ;;  %v1490_v31 = vld [vmem:[%s10495_s29 + $0x12a] sm:$0xff]  ;;  %v8403_v6 = vpack.c.bf16 %v3947_v50, %v3946_v0 }
 0x24c   : > { %v2449_v60 = vld [vmem:[#allocation3 + $0xd9] sm:$0xff]  ;;  %3064 = vmatmul.mubr.f32.gmra.mrb[44].mxu0 %v2488_v36  ;;  %v1962_v20 = vld [vmem:[#allocation2 + $0xf5] sm:$0xff]  ;;  %v2124_v62 = vadd.f32 %v2083_v43, %v2042_v24  ;;  %1920 = vst [vmem:[#allocation2 + $0x100] sm:$0xff] %v11853_v38  ;;  %v1003_v23 = vadd.f32 %v962_v25, %v872_v18  ;;  %v1408_v24 = vmul.f32 %v11593_v58, %v11850_v51 }
 0x24d   : > { %2803 = vmatprep.mubr.f32.mxu1 %v2449_v60  ;;  %v2003_v2 = vld [vmem:[#allocation2 + $0xf6] sm:$0xff]  ;;  %v11862_v41 = vmul.f32 %v2288_v27, %v2246_v22  ;;  %v2289_v61 = vld [vmem:[#allocation23 + $0x228] sm:$0xff]  ;;  %v1757_v30 = vadd.f32 %v11682_v37, %v1709_v10  ;;  %v1579_v49 = vadd.f32 %v1538_v34, %v1448_v19  ;;  %v11873_v39 = vld [vmem:[%s10495_s29 + $0x11f] sm:$0xff]  ;;  %v832_v12 = vmul.f32 %v11555_v45, %v783_v14 }
 0x24e   : > { %2804 = vmatmul.mubr.f32.gmra.mrb[48].mxu1 %v11746_v42  ;;  %v694_v42 = vld [vmem:[%s10495_s29 + $0x10d] sm:$0xff]  ;;  %v11865_v5 = vadd.f32 %v2003_v2, %v1962_v20  ;;  %v2206_v9 = vadd.f32 %v2124_v62, %v11807_v57  ;;  %v1095_v56 = vadd.f32 %v1054_v21, %v1003_v23  ;;  %v963_v57 = vmul.f32 %v11563_v16, %v11801_v46  ;;  %v695_v54 = vld [vmem:[%s10495_s29 + $0x115] sm:$0xff]  ;;  %v1840_v22 = vld [vmem:[#allocation23 + $0xf8] sm:$0xff] }
 0x24f   : > { %2370 = vst [vmem:[#allocation3 + $0xf0] sm:$0xff] %v11862_v41  ;;  %v1621_v27 = vld [vmem:[%s10495_s29 + $0x12b] sm:$0xff]  ;;  %v742_v13 = vmul.f32 %v11550_v1, %v694_v42  ;;  %v1798_v36 = vmax.f32 %v1757_v30, 0.0  ;;  %v1710_v60 = vadd.f32 %v1669_v32, %v1579_v49  ;;  %v1539_v53 = vmul.f32 %v11597_v44, %v1490_v31  ;;  %8404 = vmatpush1.bf16.msra.mxu1 %v8403_v6  ;;  %v784_v62 = vld [vmem:[%s10495_s29 + $0x116] sm:$0xff] }
 0x250   : > { %v2530_v52 = vld [vmem:[#allocation3 + $0xe3] sm:$0xff]  ;;  %v2247_v4 = vmul.f32 0.25, %v2206_v9  ;;  %v1226_v35 = vadd.f32 %v1185_v33, %v1095_v56  ;;  %v1055_v46 = vmul.f32 %v11567_v28, %v11873_v39  ;;  %v1670_v20 = vmul.f32 %v11614_v11, %v1621_v27  ;;  %v1622_v33 = vld [vmem:[%s10495_s29 + $0x133] sm:$0xff]  ;;  %8405 = vmatprep.subr.bf16.mxu1 %v13185_v26 }
 0x251   : > { %v2489_v34 = vld [vmem:[#allocation3 + $0xe2] sm:$0xff]  ;;  %3068 = vmatprep.mubr.f32.mxu0 %v2530_v52  ;;  %v873_v25 = vadd.f32 %v832_v12, %v742_v13  ;;  %v11892_v32 = vmul.f32 %v1839_v17, %v1798_v36  ;;  %v1758_v0 = vadd.f32 %v11682_v37, %v1710_v60  ;;  %v1491_v50 = vld [vmem:[%s10495_s29 + $0x132] sm:$0xff]  ;;  %v1186_v21 = vmul.f32 %v11579_v40, %v1137_v29  ;;  %v696_v60 = vld [vmem:[%s10495_s29 + $0x11d] sm:$0xff] }
 0x252   : > { %v2450_v8 = vld [vmem:[#allocation3 + $0xe1] sm:$0xff]  ;;  %v11886_v55 = vld [vmem:[%s10495_s29 + $0x131] sm:$0xff]  ;;  %3069 = vmatmul.mubr.f32.gmra.mrb[46].mxu0 %v2489_v34  ;;  %v11890_v18 = vmul.f32 %v2289_v61, %v2247_v4  ;;  %v1357_v43 = vadd.f32 %v1316_v15, %v1226_v35  ;;  %v1317_v19 = vmul.f32 %v11582_v59, %v11815_v48  ;;  %v743_v42 = vmul.f32 %v11550_v1, %v695_v54  ;;  %v11924_v52 = vld [vmem:[%s10495_s29 + $0x139] sm:$0xff] }
 0x253   : > { %2808 = vmatprep.mubr.f32.mxu1 %v2450_v8  ;;  %v1004_v2 = vadd.f32 %v963_v57, %v873_v25  ;;  %1921 = vst [vmem:[#allocation2 + $0x108] sm:$0xff] %v11892_v32  ;;  %v1799_v10 = vmax.f32 %v1758_v0, 0.0  ;;  %v1409_v15 = vmul.f32 %v11593_v58, %v11886_v55  ;;  %v11909_v14 = vld [vmem:[%s10495_s29 + $0x127] sm:$0xff]  ;;  %v1963_v31 = vld [vmem:[#allocation2 + $0xfd] sm:$0xff]  ;;  %v1540_v49 = vmul.f32 %v11597_v44, %v1491_v50 }
 0x254   : > { %2809 = vmatmul.mubr.f32.gmra.mrb[50].mxu1 %v11796_v3  ;;  %2371 = vst [vmem:[#allocation3 + $0xf8] sm:$0xff] %v11890_v18  ;;  %v2084_v3 = vld [vmem:[#allocation2 + $0xff] sm:$0xff]  ;;  %v1449_v61 = vadd.f32 %v1408_v24, %v1357_v43  ;;  %v1138_v6 = vld [vmem:[%s10495_s29 + $0x128] sm:$0xff]  ;;  %v11917_v13 = vmul.f32 %v11614_v11, %v1622_v33  ;;  %v833_v12 = vmul.f32 %v11555_v45, %v784_v62  ;;  %v2290_v4 = vld [vmem:[#allocation23 + $0x230] sm:$0xff] }
 0x255   : > { %v2125_v23 = vadd.f32 %v2084_v3, %v11845_v47  ;;  %v2004_v9 = vld [vmem:[#allocation2 + $0xfe] sm:$0xff]  ;;  %v1096_v30 = vadd.f32 %v1055_v46, %v1004_v2  ;;  %v11914_v27 = vmul.f32 %v1840_v22, %v1799_v10  ;;  %v964_v47 = vmul.f32 %v11563_v16, %v11840_v63  ;;  %v3949_v8 = vld [vmem:[#allocation11 + $0x48] sm:$0xff]  ;;  %v11940_v33 = vld [vmem:[%s10495_s29 + $0x12f] sm:$0xff] }
 0x256   : > { %v2531_v17 = vld [vmem:[#allocation3 + $0xeb] sm:$0xff]  ;;  %v1580_v57 = vadd.f32 %v1539_v53, %v1449_v61  ;;  %v3948_v34 = vld [vmem:[#allocation11 + $0x40] sm:$0xff]  ;;  %v2045_v63 = vadd.f32 %v2004_v9, %v1963_v31  ;;  %v874_v36 = vadd.f32 %v833_v12, %v743_v42  ;;  %v1187_v46 = vmul.f32 %v11579_v40, %v1138_v6  ;;  %v1841_v0 = vld [vmem:[#allocation23 + $0x100] sm:$0xff] }
 0x257   : > { %v2490_v56 = vld [vmem:[#allocation3 + $0xea] sm:$0xff]  ;;  %3073 = vmatprep.mubr.f32.mxu0 %v2531_v17  ;;  %v2207_v24 = vadd.f32 %v2125_v23, %v11853_v38  ;;  %v1227_v29 = vadd.f32 %v1186_v21, %v1096_v30  ;;  %1922 = vst [vmem:[#allocation2 + $0x110] sm:$0xff] %v11914_v27  ;;  %v1056_v38 = vmul.f32 %v11567_v28, %v11909_v14  ;;  %v785_v54 = vld [vmem:[%s10495_s29 + $0x11e] sm:$0xff] }
 0x258   : > { %v2451_v48 = vld [vmem:[#allocation3 + $0xe9] sm:$0xff]  ;;  %3074 = vmatmul.mubr.f32.gmra.mrb[48].mxu0 %v2490_v56  ;;  %v1711_v35 = vadd.f32 %v1670_v20, %v1580_v57  ;;  %v1318_v50 = vmul.f32 %v11582_v59, %v11850_v51  ;;  %v1410_v22 = vmul.f32 %v11593_v58, %v11924_v52  ;;  %v1492_v43 = vld [vmem:[%s10495_s29 + $0x13a] sm:$0xff]  ;;  %v8406_v21 = vpack.c.bf16 %v3949_v8, %v3948_v34 }
 0x259   : > { %2813 = vmatprep.mubr.f32.mxu1 %v2451_v48  ;;  %v2248_v53 = vmul.f32 0.25, %v2207_v24  ;;  %v1358_v25 = vadd.f32 %v1317_v19, %v1227_v29  ;;  %v1623_v2 = vld [vmem:[%s10495_s29 + $0x13b] sm:$0xff]  ;;  %v744_v23 = vmul.f32 %v11550_v1, %v696_v60  ;;  %v834_v30 = vmul.f32 %v11555_v45, %v785_v54  ;;  %v1139_v48 = vld [vmem:[%s10495_s29 + $0x130] sm:$0xff]  ;;  %v786_v60 = vld [vmem:[%s10495_s29 + $0x126] sm:$0xff] }
 0x25a   : > { %2814 = vmatmul.mubr.f32.gmra.mrb[52].mxu1 %v11832_v7  ;;  %v1005_v7 = vadd.f32 %v964_v47, %v874_v36  ;;  %v1759_v19 = vadd.f32 %v11682_v37, %v1711_v35  ;;  %v2085_v51 = vld [vmem:[#allocation2 + $0x107] sm:$0xff]  ;;  %v965_v6 = vmul.f32 %v11563_v16, %v11873_v39  ;;  %v1541_v56 = vmul.f32 %v11597_v44, %v1492_v43  ;;  %v2291_v34 = vld [vmem:[#allocation23 + $0x238] sm:$0xff] }
 0x25b   : > { %v2532_v62 = vld [vmem:[#allocation3 + $0xf3] sm:$0xff]  ;;  %v11942_v20 = vmul.f32 %v2290_v4, %v2248_v53  ;;  %v1450_v42 = vadd.f32 %v1409_v15, %v1358_v25  ;;  %v1964_v31 = vld [vmem:[#allocation2 + $0x105] sm:$0xff]  ;;  %v2126_v1 = vadd.f32 %v2085_v51, %v11865_v5  ;;  %v1672_v47 = vmul.f32 %v11614_v11, %v1623_v2  ;;  %8407 = vmatpush1.bf16.msra.mxu1 %v8406_v21  ;;  %v1842_v25 = vld [vmem:[#allocation23 + $0x108] sm:$0xff] }
 0x25c   : > { %v2491_v3 = vld [vmem:[#allocation3 + $0xf2] sm:$0xff]  ;;  %3078 = vmatprep.mubr.f32.mxu0 %v2532_v62  ;;  %v2005_v9 = vld [vmem:[#allocation2 + $0x106] sm:$0xff]  ;;  %v1097_v61 = vadd.f32 %v1056_v38, %v1005_v7  ;;  %v1800_v15 = vmax.f32 %v1759_v19, 0.0  ;;  %v875_v45 = vadd.f32 %v834_v30, %v744_v23  ;;  %v1057_v16 = vmul.f32 %v11567_v28, %v11940_v33  ;;  %8408 = vmatprep.subr.bf16.mxu1 %v13185_v26  ;;  %v11984_v2 = vld [vmem:[#allocation4] ss:$0 sm:$0xff] }
 0x25d   : > { %v2452_v10 = vld [vmem:[#allocation3 + $0xf1] sm:$0xff]  ;;  %3079 = vmatmul.mubr.f32.gmra.mrb[50].mxu0 %v2491_v3  ;;  %2372 = vst [vmem:[#allocation3 + $0x100] sm:$0xff] %v11942_v20  ;;  %v1581_v17 = vadd.f32 %v1540_v49, %v1450_v42  ;;  %v11958_v39 = vld [vmem:[%s10495_s29 + $0x141] sm:$0xff]  ;;  %v11963_v49 = vadd.f32 %v2005_v9, %v1964_v31  ;;  %v1188_v28 = vmul.f32 %v11579_v40, %v1139_v48  ;;  %v11991_v19 = vld [vmem:[#allocation4 + $0x2] ss:$0 sm:$0xff] }
 0x25e   : > { %2818 = vmatprep.mubr.f32.mxu1 %v2452_v10  ;;  %v1228_v12 = vadd.f32 %v1187_v46, %v1097_v61  ;;  %v2086_v5 = vld [vmem:[#allocation2 + $0x10f] sm:$0xff]  ;;  %v11961_v24 = vmul.f32 %v1841_v0, %v1800_v15  ;;  %v1493_v29 = vld [vmem:[%s10495_s29 + $0x142] sm:$0xff]  ;;  %v1006_v36 = vadd.f32 %v965_v6, %v875_v45  ;;  %v1411_v35 = vmul.f32 %v11593_v58, %v11958_v39  ;;  %v11980_v0 = vld [vmem:[%s10495_s29 + $0x137] sm:$0xff] }
 0x25f   : > { %2819 = vmatmul.mubr.f32.gmra.mrb[54].mxu1 %v11862_v41  ;;  %v2208_v41 = vadd.f32 %v2126_v1, %v11892_v32  ;;  %v1712_v57 = vadd.f32 %v11917_v13, %v1581_v17  ;;  %v2127_v8 = vadd.f32 %v2086_v5, %v2045_v63  ;;  %v697_v38 = vld [vmem:[%s10495_s29 + $0x125] sm:$0xff]  ;;  %v1319_v13 = vmul.f32 %v11582_v59, %v11886_v55  ;;  %v11987_v55 = vld [vmem:[#allocation4 + $0x1] ss:$0 sm:$0xff]  ;;  %v11999_v30 = vld [vmem:[#allocation4 + $0x3] ss:$0 sm:$0xff] }
 0x260   : > { %v1359_v4 = vadd.f32 %v1318_v50, %v1228_v12  ;;  %1923 = vst [vmem:[#allocation2 + $0x118] sm:$0xff] %v11961_v24  ;;  %v1098_v54 = vadd.f32 %v1057_v16, %v1006_v36  ;;  %v1542_v40 = vmul.f32 %v11597_v44, %v1493_v29  ;;  %v2292_v50 = vld [vmem:[#allocation23 + $0x240] sm:$0xff]  ;;  %v745_v59 = vmul.f32 %v11984_v2, %v697_v38  ;;  %v2006_v31 = vld [vmem:[#allocation2 + $0x10e] sm:$0xff] }
 0x261   : > { %v2249_v32 = vmul.f32 0.25, %v2208_v41  ;;  %v1760_v53 = vadd.f32 %v11682_v37, %v1712_v57  ;;  %v2209_v63 = vadd.f32 %v2127_v8, %v11914_v27  ;;  %v835_v58 = vmul.f32 %v11987_v55, %v786_v60  ;;  %v1140_v27 = vld [vmem:[%s10495_s29 + $0x138] sm:$0xff]  ;;  %v1965_v51 = vld [vmem:[#allocation2 + $0x10d] sm:$0xff]  ;;  %v1624_v9 = vld [vmem:[%s10495_s29 + $0x143] sm:$0xff] }
 0x262   : > { %v1451_v46 = vadd.f32 %v1410_v22, %v1359_v4  ;;  %v1229_v10 = vadd.f32 %v1188_v28, %v1098_v54  ;;  %v966_v42 = vmul.f32 %v11991_v19, %v11909_v14  ;;  %v1058_v6 = vmul.f32 %v11999_v30, %v11980_v0  ;;  %v698_v17 = vld [vmem:[%s10495_s29 + $0x12d] sm:$0xff]  ;;  %v1843_v8 = vld [vmem:[#allocation23 + $0x110] sm:$0xff]  ;;  %v12020_v36 = vld [vmem:[#allocation4 + $0x5] ss:$0 sm:$0xff] }
 0x263   : > { %v11982_v7 = vmul.f32 %v2291_v34, %v2249_v32  ;;  %v1801_v43 = vmax.f32 %v1760_v53, 0.0  ;;  %v2250_v44 = vmul.f32 0.25, %v2209_v63  ;;  %v876_v61 = vadd.f32 %v835_v58, %v745_v59  ;;  %v12008_v48 = vld [vmem:[#allocation4 + $0x4] ss:$0 sm:$0xff]  ;;  %v12016_v57 = vld [vmem:[%s10495_s29 + $0x149] sm:$0xff]  ;;  %v12026_v60 = vld [vmem:[%s10495_s29 + $0x13f] sm:$0xff] }
 0x264   : > { %v2533_v22 = vld [vmem:[#allocation3 + $0xfb] sm:$0xff]  ;;  %v1582_v3 = vadd.f32 %v1541_v56, %v1451_v46  ;;  %v1360_v15 = vadd.f32 %v1319_v13, %v1229_v10  ;;  %v1189_v12 = vmul.f32 %v12008_v48, %v1140_v27  ;;  %v787_v45 = vld [vmem:[%s10495_s29 + $0x12e] sm:$0xff]  ;;  %v1320_v28 = vmul.f32 %v12020_v36, %v11924_v52  ;;  %v12033_v52 = vld [vmem:[#allocation4 + $0x6] ss:$0 sm:$0xff] }
 0x265   : > { %v2492_v21 = vld [vmem:[#allocation3 + $0xfa] sm:$0xff]  ;;  %3083 = vmatprep.mubr.f32.mxu0 %v2533_v22  ;;  %2373 = vst [vmem:[#allocation3 + $0x108] sm:$0xff] %v11982_v7  ;;  %v11996_v23 = vmul.f32 %v1842_v25, %v1801_v43  ;;  %v12004_v14 = vmul.f32 %v2292_v50, %v2250_v44  ;;  %v1007_v56 = vadd.f32 %v966_v42, %v876_v61  ;;  %v1494_v29 = vld [vmem:[%s10495_s29 + $0x14a] sm:$0xff]  ;;  %v12037_v43 = vld [vmem:[#allocation4 + $0x7] ss:$0 sm:$0xff] }
 0x266   : > { %v2453_v62 = vld [vmem:[#allocation3 + $0xf9] sm:$0xff]  ;;  %3084 = vmatmul.mubr.f32.gmra.mrb[52].mxu0 %v2492_v21  ;;  %v1713_v1 = vadd.f32 %v1672_v47, %v1582_v3  ;;  %v1452_v5 = vadd.f32 %v1411_v35, %v1360_v15  ;;  %v1673_v47 = vmul.f32 %v11614_v11, %v1624_v9  ;;  %v746_v38 = vmul.f32 %v11984_v2, %v698_v17  ;;  %v1625_v35 = vld [vmem:[%s10495_s29 + $0x14b] sm:$0xff]  ;;  %v3951_v61 = vld [vmem:[#allocation11 + $0x58] sm:$0xff] }
 0x267   : > { %2823 = vmatprep.mubr.f32.mxu1 %v2453_v62  ;;  %1924 = vst [vmem:[#allocation2 + $0x120] sm:$0xff] %v11996_v23  ;;  %2374 = vst [vmem:[#allocation3 + $0x110] sm:$0xff] %v12004_v14  ;;  %v2087_v16 = vld [vmem:[#allocation2 + $0x117] sm:$0xff]  ;;  %v1099_v4 = vadd.f32 %v1058_v6, %v1007_v56  ;;  %v836_v63 = vmul.f32 %v11987_v55, %v787_v45  ;;  %v2293_v46 = vld [vmem:[#allocation23 + $0x248] sm:$0xff]  ;;  %v1412_v50 = vmul.f32 %v12033_v52, %v12016_v57 }
 0x268   : > { %2824 = vmatmul.mubr.f32.gmra.mrb[56].mxu1 %v11890_v18  ;;  %v2047_v18 = vadd.f32 %v2006_v31, %v1965_v51  ;;  %v1761_v41 = vadd.f32 %v11682_v37, %v1713_v1  ;;  %v2128_v34 = vadd.f32 %v2087_v16, %v11963_v49  ;;  %v1966_v53 = vld [vmem:[#allocation2 + $0x115] sm:$0xff]  ;;  %v1583_v13 = vadd.f32 %v1542_v40, %v1452_v5  ;;  %v1141_v40 = vld [vmem:[%s10495_s29 + $0x140] sm:$0xff] }
 0x269   : > { %v2007_v11 = vld [vmem:[#allocation2 + $0x116] sm:$0xff]  ;;  %v967_v49 = vmul.f32 %v11991_v19, %v11940_v33  ;;  %v1230_v54 = vadd.f32 %v1189_v12, %v1099_v4  ;;  %v1543_v59 = vmul.f32 %v12037_v43, %v1494_v29  ;;  %v1059_v62 = vmul.f32 %v11999_v30, %v12026_v60  ;;  %v1844_v10 = vld [vmem:[#allocation23 + $0x118] sm:$0xff]  ;;  %v3950_v9 = vld [vmem:[#allocation11 + $0x50] sm:$0xff] }
 0x26a   : > { %v1802_v32 = vmax.f32 %v1761_v41, 0.0  ;;  %v2210_v25 = vadd.f32 %v2128_v34, %v11961_v24  ;;  %v1714_v33 = vadd.f32 %v1673_v47, %v1583_v13  ;;  %v877_v24 = vadd.f32 %v836_v63, %v746_v38  ;;  %v12047_v51 = vld [vmem:[#allocation4 + $0x8] ss:$0 sm:$0xff] }
 0x26b   : > { %v12045_v3 = vadd.f32 %v2007_v11, %v1966_v53  ;;  %v1361_v42 = vadd.f32 %v1320_v28, %v1230_v54  ;;  %v1674_v31 = vmul.f32 %v12047_v51, %v1625_v35  ;;  %v699_v6 = vld [vmem:[%s10495_s29 + $0x135] sm:$0xff]  ;;  %v1190_v56 = vmul.f32 %v12008_v48, %v1141_v40  ;;  %v1142_v54 = vld [vmem:[%s10495_s29 + $0x148] sm:$0xff] }
 0x26c   : > { %v2534_v58 = vld [vmem:[#allocation3 + $0x103] sm:$0xff]  ;;  %v12041_v21 = vmul.f32 %v1843_v8, %v1802_v32  ;;  %v2251_v44 = vmul.f32 0.25, %v2210_v25  ;;  %v1762_v15 = vadd.f32 %v11682_v37, %v1714_v33  ;;  %v1008_v17 = vadd.f32 %v967_v49, %v877_v24  ;;  %v788_v45 = vld [vmem:[%s10495_s29 + $0x136] sm:$0xff]  ;;  %v789_v24 = vld [vmem:[%s10495_s29 + $0x13e] sm:$0xff] }
 0x26d   : > { %v2493_v27 = vld [vmem:[#allocation3 + $0x102] sm:$0xff]  ;;  %3088 = vmatprep.mubr.f32.mxu0 %v2534_v58  ;;  %v1321_v34 = vmul.f32 %v12020_v36, %v11958_v39  ;;  %v1495_v4 = vld [vmem:[%s10495_s29 + $0x152] sm:$0xff]  ;;  %v8409_v28 = vpack.c.bf16 %v3951_v61, %v3950_v9  ;;  %v747_v38 = vmul.f32 %v11984_v2, %v699_v6  ;;  %v837_v35 = vmul.f32 %v11987_v55, %v788_v45  ;;  %v700_v58 = vld [vmem:[%s10495_s29 + $0x13d] sm:$0xff] }
 0x26e   : > { %v2454_v22 = vld [vmem:[#allocation3 + $0x101] sm:$0xff]  ;;  %3089 = vmatmul.mubr.f32.gmra.mrb[54].mxu0 %v2493_v27  ;;  %v2088_v1 = vld [vmem:[#allocation2 + $0x11f] sm:$0xff]  ;;  %1925 = vst [vmem:[#allocation2 + $0x128] sm:$0xff] %v12041_v21  ;;  %v12056_v12 = vld [vmem:[%s10495_s29 + $0x151] sm:$0xff]  ;;  %v12059_v5 = vmul.f32 %v2293_v46, %v2251_v44  ;;  %v1803_v37 = vmax.f32 %v1762_v15, 0.0  ;;  %v1100_v8 = vadd.f32 %v1059_v62, %v1008_v17  ;;  %v968_v63 = vmul.f32 %v11991_v19, %v11980_v0 }
 0x26f   : > { %2828 = vmatprep.mubr.f32.mxu1 %v2454_v22  ;;  %v2535_v16 = vld [vmem:[#allocation3 + $0x10b] sm:$0xff]  ;;  %v2129_v29 = vadd.f32 %v2088_v1, %v2047_v18  ;;  %v12066_v32 = vld [vmem:[%s10495_s29 + $0x147] sm:$0xff]  ;;  %v1967_v53 = vld [vmem:[#allocation2 + $0x11d] sm:$0xff]  ;;  %8410 = vmatpush1.bf16.msra.mxu1 %v8409_v28  ;;  %v878_v40 = vadd.f32 %v837_v35, %v747_v38  ;;  %v1544_v22 = vmul.f32 %v12037_v43, %v1495_v4 }
 0x270   : > { %2829 = vmatmul.mubr.f32.gmra.mrb[58].mxu1 %v11942_v20  ;;  %v2494_v41 = vld [vmem:[#allocation3 + $0x10a] sm:$0xff]  ;;  %v1453_v20 = vadd.f32 %v1412_v50, %v1361_v42  ;;  %3093 = vmatprep.mubr.f32.mxu0 %v2535_v16  ;;  %2375 = vst [vmem:[#allocation3 + $0x118] sm:$0xff] %v12059_v5  ;;  %v2008_v11 = vld [vmem:[#allocation2 + $0x11e] sm:$0xff]  ;;  %v12075_v25 = vmul.f32 %v1844_v10, %v1803_v37  ;;  %v12090_v10 = vld [vmem:[#allocation6] ss:$0 sm:$0xff] }
 0x271   : > { %v2455_v47 = vld [vmem:[#allocation3 + $0x109] sm:$0xff]  ;;  %v2211_v18 = vadd.f32 %v2129_v29, %v11996_v23  ;;  %v1231_v46 = vadd.f32 %v1190_v56, %v1100_v8  ;;  %v1413_v23 = vmul.f32 %v12033_v52, %v12056_v12  ;;  %v1060_v0 = vmul.f32 %v11999_v30, %v12066_v32  ;;  %8411 = vmatprep.subr.bf16.mxu1 %v13185_v26  ;;  %v12095_v61 = vld [vmem:[%s10495_s29 + $0x159] sm:$0xff]  ;;  %v1845_v15 = vld [vmem:[#allocation23 + $0x120] sm:$0xff] }
 0x272   : > { %2833 = vmatprep.mubr.f32.mxu1 %v2455_v47  ;;  %v1584_v13 = vadd.f32 %v1543_v59, %v1453_v20  ;;  %v1626_v39 = vld [vmem:[%s10495_s29 + $0x153] sm:$0xff]  ;;  %3094 = vmatmul.mubr.f32.gmra.mrb[56].mxu0 %v2494_v41  ;;  %1926 = vst [vmem:[#allocation2 + $0x130] sm:$0xff] %v12075_v25  ;;  %v1191_v9 = vmul.f32 %v12008_v48, %v1142_v54  ;;  %v1627_v16 = vld [vmem:[%s10495_s29 + $0x15b] sm:$0xff]  ;;  %v3953_v54 = vld [vmem:[#allocation11 + $0x68] sm:$0xff] }
 0x273   : > { %v2294_v49 = vld [vmem:[#allocation23 + $0x250] sm:$0xff]  ;;  %v2252_v50 = vmul.f32 0.25, %v2211_v18  ;;  %v1362_v27 = vadd.f32 %v1321_v34, %v1231_v46  ;;  %v1675_v33 = vmul.f32 %v12047_v51, %v1626_v39  ;;  %v1322_v56 = vmul.f32 %v12020_v36, %v12016_v57 }
 0x274   : > { %2834 = vmatmul.mubr.f32.gmra.mrb[60].mxu1 %v11982_v7  ;;  %v1715_v59 = vadd.f32 %v1674_v31, %v1584_v13  ;;  %v2049_v7 = vadd.f32 %v2008_v11, %v1967_v53  ;;  %v1009_v31 = vadd.f32 %v968_v63, %v878_v40  ;;  %v1012_v6 = vld [vmem:[%s10495_s29 + $0x14f] sm:$0xff]  ;;  %v1496_v45 = vld [vmem:[%s10495_s29 + $0x15a] sm:$0xff]  ;;  %v748_v41 = vmul.f32 %v11984_v2, %v700_v58 }
 0x275   : > { %v12088_v62 = vmul.f32 %v2294_v49, %v2252_v50  ;;  %v2089_v44 = vld [vmem:[#allocation2 + $0x127] sm:$0xff]  ;;  %v1454_v17 = vadd.f32 %v1413_v23, %v1362_v27  ;;  %v838_v37 = vmul.f32 %v11987_v55, %v789_v24  ;;  %v1143_v8 = vld [vmem:[%s10495_s29 + $0x150] sm:$0xff]  ;;  %v1414_v53 = vmul.f32 %v12033_v52, %v12095_v61  ;;  %v2295_v13 = vld [vmem:[#allocation23 + $0x258] sm:$0xff] }
 0x276   : > { %v1763_v42 = vadd.f32 %v12090_v10, %v1715_v59  ;;  %v2130_v1 = vadd.f32 %v2089_v44, %v12045_v3  ;;  %v1968_v29 = vld [vmem:[#allocation2 + $0x125] sm:$0xff]  ;;  %v1101_v34 = vadd.f32 %v1060_v0, %v1009_v31  ;;  %v969_v3 = vmul.f32 %v11991_v19, %v12026_v60  ;;  %v1846_v31 = vld [vmem:[#allocation23 + $0x128] sm:$0xff] }
 0x277   : > { %2376 = vst [vmem:[#allocation3 + $0x120] sm:$0xff] %v12088_v62  ;;  %v2009_v20 = vld [vmem:[#allocation2 + $0x126] sm:$0xff]  ;;  %v2536_v4 = vld [vmem:[#allocation3 + $0x113] sm:$0xff]  ;;  %v1585_v18 = vadd.f32 %v1544_v22, %v1454_v17  ;;  %v1061_v11 = vmul.f32 %v11999_v30, %v1012_v6  ;;  %v879_v60 = vadd.f32 %v838_v37, %v748_v41  ;;  %v1545_v49 = vmul.f32 %v12037_v43, %v1496_v45 }
 0x278   : > { %v1804_v47 = vmax.f32 %v1763_v42, 0.0  ;;  %v2495_v28 = vld [vmem:[#allocation3 + $0x112] sm:$0xff]  ;;  %v2212_v57 = vadd.f32 %v2130_v1, %v12041_v21  ;;  %3098 = vmatprep.mubr.f32.mxu0 %v2536_v4  ;;  %v1232_v35 = vadd.f32 %v1191_v9, %v1101_v34  ;;  %v1676_v46 = vmul.f32 %v12047_v51, %v1627_v16  ;;  %v701_v50 = vld [vmem:[%s10495_s29 + $0x145] sm:$0xff] }
 0x279   : > { %v2456_v38 = vld [vmem:[#allocation3 + $0x111] sm:$0xff]  ;;  %3099 = vmatmul.mubr.f32.gmra.mrb[58].mxu0 %v2495_v28  ;;  %v1716_v21 = vadd.f32 %v1675_v33, %v1585_v18  ;;  %v2090_v59 = vld [vmem:[#allocation2 + $0x12f] sm:$0xff]  ;;  %v2050_v40 = vadd.f32 %v2009_v20, %v1968_v29  ;;  %v1010_v58 = vadd.f32 %v969_v3, %v879_v60  ;;  %v790_v27 = vld [vmem:[%s10495_s29 + $0x146] sm:$0xff]  ;;  %v1323_v44 = vmul.f32 %v12020_v36, %v12056_v12 }
 0x27a   : > { %2838 = vmatprep.mubr.f32.mxu1 %v2456_v38  ;;  %v12113_v39 = vmul.f32 %v1845_v15, %v1804_v47  ;;  %v2253_v63 = vmul.f32 0.25, %v2212_v57  ;;  %v3952_v23 = vld [vmem:[#allocation11 + $0x60] sm:$0xff]  ;;  %v1363_v0 = vadd.f32 %v1322_v56, %v1232_v35  ;;  %v2131_v33 = vadd.f32 %v2090_v59, %v2049_v7  ;;  %v2296_v20 = vld [vmem:[#allocation23 + $0x260] sm:$0xff]  ;;  %v3954_v57 = vld [vmem:[#allocation11 + $0x70] sm:$0xff] }
 0x27b   : > { %2839 = vmatmul.mubr.f32.gmra.mrb[62].mxu1 %v12004_v14  ;;  %v1192_v14 = vmul.f32 %v12008_v48, %v1143_v8  ;;  %v1764_v24 = vadd.f32 %v12090_v10, %v1716_v21  ;;  %v1366_v42 = vld [vmem:[%s10495_s29 + $0x161] sm:$0xff]  ;;  %v1102_v6 = vadd.f32 %v1061_v11, %v1010_v58  ;;  %v8412_v15 = vpack.c.bf16 %v3953_v54, %v3952_v23  ;;  %v1013_v56 = vld [vmem:[%s10495_s29 + $0x157] sm:$0xff]  ;;  %v1969_v60 = vld [vmem:[#allocation2 + $0x12d] sm:$0xff] }
 0x27c   : > { %1927 = vst [vmem:[#allocation2 + $0x138] sm:$0xff] %v12113_v39  ;;  %v12122_v22 = vmul.f32 %v2295_v13, %v2253_v63  ;;  %v1455_v9 = vadd.f32 %v1414_v53, %v1363_v0  ;;  %v1497_v1 = vld [vmem:[%s10495_s29 + $0x162] sm:$0xff]  ;;  %v749_v17 = vmul.f32 %v11984_v2, %v701_v50  ;;  %v2213_v41 = vadd.f32 %v2131_v33, %v12075_v25  ;;  %v1144_v3 = vld [vmem:[%s10495_s29 + $0x158] sm:$0xff]  ;;  %v2010_v63 = vld [vmem:[#allocation2 + $0x12e] sm:$0xff] }
 0x27d   : > { %v1805_v47 = vmax.f32 %v1764_v24, 0.0  ;;  %v839_v12 = vmul.f32 %v11987_v55, %v790_v27  ;;  %v970_v29 = vmul.f32 %v11991_v19, %v12066_v32  ;;  %v1233_v34 = vadd.f32 %v1192_v14, %v1102_v6  ;;  %v1628_v25 = vld [vmem:[%s10495_s29 + $0x163] sm:$0xff]  ;;  %8413 = vmatpush1.bf16.msra.mxu1 %v8412_v15  ;;  %v3955_v18 = vld [vmem:[#allocation11 + $0x78] sm:$0xff] }
 0x27e   : > { %v2537_v45 = vld [vmem:[#allocation3 + $0x11b] sm:$0xff]  ;;  %2377 = vst [vmem:[#allocation3 + $0x128] sm:$0xff] %v12122_v22  ;;  %v1586_v2 = vadd.f32 %v1545_v49, %v1455_v9  ;;  %v1415_v37 = vmul.f32 %v12033_v52, %v1366_v42  ;;  %v2254_v8 = vmul.f32 0.25, %v2213_v41  ;;  %v1062_v55 = vmul.f32 %v11999_v30, %v1013_v56  ;;  %8414 = vmatprep.subr.bf16.mxu1 %v13185_v26  ;;  %v1847_v50 = vld [vmem:[#allocation23 + $0x130] sm:$0xff]  ;;  %v2297_v42 = vld [vmem:[#allocation23 + $0x268] sm:$0xff] }
 0x27f   : > { %v2496_v16 = vld [vmem:[#allocation3 + $0x11a] sm:$0xff]  ;;  %3103 = vmatprep.mubr.f32.mxu0 %v2537_v45  ;;  %v12139_v4 = vmul.f32 %v1846_v31, %v1805_v47  ;;  %v880_v28 = vadd.f32 %v839_v12, %v749_v17  ;;  %v1364_v19 = vadd.f32 %v1323_v44, %v1233_v34  ;;  %v1546_v32 = vmul.f32 %v12037_v43, %v1497_v1  ;;  %v1498_v0 = vld [vmem:[%s10495_s29 + $0x16a] sm:$0xff] }
 0x280   : > { %v2457_v7 = vld [vmem:[#allocation3 + $0x119] sm:$0xff]  ;;  %3104 = vmatmul.mubr.f32.gmra.mrb[60].mxu0 %v2496_v16  ;;  %v1717_v38 = vadd.f32 %v1676_v46, %v1586_v2  ;;  %v12144_v53 = vmul.f32 %v2296_v20, %v2254_v8  ;;  %v1193_v13 = vmul.f32 %v12008_v48, %v1144_v3  ;;  %v2685_v30 = vpop.f32.mrb[0].mxu1  ;;  %v1677_v46 = vmul.f32 %v12047_v51, %v1628_v25  ;;  %v1367_v23 = vld [vmem:[%s10495_s29 + $0x169] sm:$0xff] }
 0x281   : > { %2843 = vmatprep.mubr.f32.mxu1 %v2457_v7  ;;  %1928 = vst [vmem:[#allocation2 + $0x140] sm:$0xff] %v12139_v4  ;;  %v1456_v49 = vadd.f32 %v1415_v37, %v1364_v19  ;;  %v2687_v54 = vpop.f32.mrb[1].mxu1  ;;  %v1324_v48 = vmul.f32 %v12020_v36, %v12095_v61  ;;  %v8415_v58 = vpack.c.bf16 %v3955_v18, %v3954_v57  ;;  %v1629_v1 = vld [vmem:[%s10495_s29 + $0x16b] sm:$0xff]  ;;  %v3956_v17 = vld [vmem:[#allocation11 + $0x80] sm:$0xff]  ;;  %v2298_v19 = vld [vmem:[#allocation23 + $0x270] sm:$0xff] }
 0x282   : > { %2844 = vmatmul.mubr.f32.gmra.mrb[64].mxu1 %v12059_v5  ;;  %v1011_v5 = vadd.f32 %v970_v29, %v880_v28  ;;  %v1765_v21 = vadd.f32 %v12090_v10, %v1717_v38  ;;  %2378 = vst [vmem:[#allocation3 + $0x130] sm:$0xff] %v12144_v53  ;;  %v2051_v31 = vadd.f32 %v2010_v63, %v1969_v60  ;;  %v3957_v56 = vld [vmem:[#allocation11 + $0x88] sm:$0xff]  ;;  %v3958_v12 = vld [vmem:[#allocation11 + $0x90] sm:$0xff] }
 0x283   : > { %v2091_v11 = vld [vmem:[#allocation2 + $0x137] sm:$0xff]  ;;  %v1587_v44 = vadd.f32 %v1546_v32, %v1456_v49  ;;  %v1416_v6 = vmul.f32 %v12033_v52, %v1367_v23  ;;  %v1547_v16 = vmul.f32 %v12037_v43, %v1498_v0  ;;  %8416 = vmatpush1.bf16.msra.mxu1 %v8415_v58  ;;  %v1678_v47 = vmul.f32 %v12047_v51, %v1629_v1  ;;  %v1849_v0 = vld [vmem:[#allocation23 + $0x140] sm:$0xff] }
 0x284   : > { %v2132_v35 = vadd.f32 %v2091_v11, %v2050_v40  ;;  %v1103_v59 = vadd.f32 %v1062_v55, %v1011_v5  ;;  %v1806_v24 = vmax.f32 %v1765_v21, 0.0  ;;  %8417 = vmatprep.subr.bf16.mxu1 %v13185_v26  ;;  %v1970_v20 = vld [vmem:[#allocation2 + $0x135] sm:$0xff]  ;;  %v8418_v37 = vpack.c.bf16 %v3957_v56, %v3956_v17  ;;  %v3961_v21 = vld [vmem:[#allocation11 + $0xa8] sm:$0xff] }
 0x285   : > { %v2538_v40 = vld [vmem:[#allocation3 + $0x123] sm:$0xff]  ;;  %v1718_v15 = vadd.f32 %v1677_v46, %v1587_v44  ;;  %v2011_v2 = vld [vmem:[#allocation2 + $0x136] sm:$0xff] }
 0x286   : > { %v2497_v14 = vld [vmem:[#allocation3 + $0x122] sm:$0xff]  ;;  %v2214_v33 = vadd.f32 %v2132_v35, %v12113_v39  ;;  %3108 = vmatprep.mubr.f32.mxu0 %v2538_v40  ;;  %v1234_v9 = vadd.f32 %v1193_v13, %v1103_v59  ;;  %v12160_v61 = vmul.f32 %v1847_v50, %v1806_v24  ;;  %v12162_v39 = vld [vmem:[#allocation9] ss:$0 sm:$0xff]  ;;  %v2052_v32 = vadd.f32 %v2011_v2, %v1970_v20 }
 0x287   : > { %v2458_v27 = vld [vmem:[#allocation3 + $0x121] sm:$0xff]  ;;  %3109 = vmatmul.mubr.f32.gmra.mrb[62].mxu0 %v2497_v14  ;;  %v1766_v52 = vadd.f32 %v12090_v10, %v1718_v15  ;;  %v3959_v43 = vld [vmem:[#allocation11 + $0x98] sm:$0xff]  ;;  %v2686_v3 = vadd.f32 %v12162_v39, %v2685_v30  ;;  %8419 = vmatpush1.bf16.msra.mxu1 %v8418_v37 }
 0x288   : > { %2848 = vmatprep.mubr.f32.mxu1 %v2458_v27  ;;  %v2255_v36 = vmul.f32 0.25, %v2214_v33  ;;  %v1365_v45 = vadd.f32 %v1324_v48, %v1234_v9  ;;  %v2092_v41 = vld [vmem:[#allocation2 + $0x13f] sm:$0xff]  ;;  %1929 = vst [vmem:[#allocation2 + $0x148] sm:$0xff] %v12160_v61  ;;  %v8421_v30 = vpack.c.bf16 %v3959_v43, %v3958_v12  ;;  %8420 = vmatprep.subr.bf16.mxu1 %v13185_v26  ;;  %v3963_v56 = vld [vmem:[#allocation11 + $0xb8] sm:$0xff] }
 0x289   : > { %2849 = vmatmul.mubr.f32.gmra.mrb[66].mxu1 %v12088_v62  ;;  %v1848_v62 = vld [vmem:[#allocation23 + $0x138] sm:$0xff]  ;;  %v2133_v29 = vadd.f32 %v2092_v41, %v2051_v31  ;;  %v2539_v8 = vld [vmem:[#allocation3 + $0x12b] sm:$0xff]  ;;  %v1807_v55 = vmax.f32 %v1766_v52, 0.0 }
 0x28a   : > { %v12165_v7 = vmul.f32 %v2297_v42, %v2255_v36  ;;  %v1457_v34 = vadd.f32 %v1416_v6, %v1365_v45  ;;  %v2498_v25 = vld [vmem:[#allocation3 + $0x12a] sm:$0xff]  ;;  %3113 = vmatprep.mubr.f32.mxu0 %v2539_v8  ;;  %v1971_v23 = vld [vmem:[#allocation2 + $0x13d] sm:$0xff]  ;;  %v3324_v52 = vld [vmem:[#allocation2 + $0x5] sm:$0xff] }
 0x28b   : > { %v2459_v28 = vld [vmem:[#allocation3 + $0x129] sm:$0xff]  ;;  %v2215_v51 = vadd.f32 %v2133_v29, %v12139_v4  ;;  %3114 = vmatmul.mubr.f32.gmra.mrb[64].mxu0 %v2498_v25  ;;  %v12175_v57 = vmul.f32 %v1848_v62, %v1807_v55  ;;  %v2690_v11 = vpop.f32.mrb[2].mxu1  ;;  %v3960_v4 = vld [vmem:[#allocation11 + $0xa0] sm:$0xff]  ;;  %8422 = vmatpush1.bf16.msra.mxu1 %v8421_v30  ;;  %v3965_v8 = vld [vmem:[#allocation11 + $0xc8] sm:$0xff] }
 0x28c   : > { %2379 = vst [vmem:[#allocation3 + $0x138] sm:$0xff] %v12165_v7  ;;  %2853 = vmatprep.mubr.f32.mxu1 %v2459_v28  ;;  %v1588_v38 = vadd.f32 %v1547_v16, %v1457_v34  ;;  %v2955_v18 = vpop.f32.mrb[0].mxu0  ;;  %v2692_v63 = vpop.f32.mrb[3].mxu1  ;;  %v2012_v54 = vld [vmem:[#allocation2 + $0x13e] sm:$0xff]  ;;  %v2691_v58 = vadd.f32 %v12162_v39, %v2690_v11  ;;  %v8424_v44 = vpack.c.bf16 %v3961_v21, %v3960_v4  ;;  %v3962_v36 = vld [vmem:[#allocation11 + $0xb0] sm:$0xff]  ;;  %v3203_v4 = vld [vmem:[#allocation23 + $0x2a0] sm:$0xff] }
 0x28d   : > { %2854 = vmatmul.mubr.f32.gmra.mrb[68].mxu1 %v12122_v22  ;;  %v2256_v5 = vmul.f32 0.25, %v2215_v51  ;;  %v2956_v35 = vadd.f32 %v2955_v18, %v2686_v3  ;;  %v2957_v60 = vpop.f32.mrb[1].mxu0  ;;  %1930 = vst [vmem:[#allocation2 + $0x150] sm:$0xff] %v12175_v57  ;;  %v3201_v22 = vld [vmem:[#allocation23 + $0x290] sm:$0xff]  ;;  %v2053_v9 = vadd.f32 %v2012_v54, %v1971_v23  ;;  %v2299_v6 = vld [vmem:[#allocation23 + $0x278] sm:$0xff]  ;;  %8423 = vmatprep.subr.bf16.mxu1 %v13185_v26  ;;  %v3325_v21 = vld [vmem:[#allocation2 + $0xd] sm:$0xff] }
 0x28e   : > { %v1719_v13 = vadd.f32 %v1678_v47, %v1588_v38  ;;  %v8427_v43 = vpack.c.bf16 %v3963_v56, %v3962_v36  ;;  %v3964_v3 = vld [vmem:[#allocation11 + $0xc0] sm:$0xff] }
 0x28f   : > { %v12179_v49 = vmul.f32 %v2298_v19, %v2256_v5  ;;  %v2093_v46 = vld [vmem:[#allocation2 + $0x147] sm:$0xff]  ;;  %v3159_v59 = vmax.f32 %v2956_v35, 0.0  ;;  %v2695_v40 = vpop.f32.mrb[4].mxu1  ;;  %8425 = vmatpush1.bf16.msra.mxu1 %v8424_v44 }
 0x290   : > { %v1767_v50 = vadd.f32 %v12090_v10, %v1719_v13  ;;  %v2134_v48 = vadd.f32 %v2093_v46, %v2052_v32  ;;  %v2697_v31 = vpop.f32.mrb[5].mxu1  ;;  %v1972_v20 = vld [vmem:[#allocation2 + $0x145] sm:$0xff]  ;;  %8426 = vmatprep.subr.bf16.mxu1 %v13185_v26  ;;  %v2696_v37 = vadd.f32 %v12162_v39, %v2695_v40 }
 0x291   : > { %2380 = vst [vmem:[#allocation3 + $0x140] sm:$0xff] %v12179_v49  ;;  %v12184_v42 = vmul.f32 %v3201_v22, %v3159_v59  ;;  %v2013_v2 = vld [vmem:[#allocation2 + $0x146] sm:$0xff]  ;;  %v3366_v22 = vld [vmem:[#allocation2 + $0xe] sm:$0xff] }
 0x292   : > { %v1808_v24 = vmax.f32 %v1767_v50, 0.0  ;;  %v2216_v10 = vadd.f32 %v2134_v48, %v12160_v61  ;;  %v3365_v61 = vld [vmem:[#allocation2 + $0x6] sm:$0xff]  ;;  %v2054_v18 = vadd.f32 %v2013_v2, %v1972_v20  ;;  %v3966_v50 = vld [vmem:[#allocation11 + $0xd0] sm:$0xff] }
 0x293   : > { %v2540_v14 = vld [vmem:[#allocation3 + $0x133] sm:$0xff]  ;;  %3283 = vst [vmem:[#allocation2 + $0x18] sm:$0xff] %v12184_v42  ;;  %v2960_v15 = vpop.f32.mrb[2].mxu0  ;;  %v2700_v41 = vpop.f32.mrb[6].mxu1  ;;  %v3406_v25 = vadd.f32 %v3365_v61, %v3324_v52  ;;  %v2300_v32 = vld [vmem:[#allocation23 + $0x280] sm:$0xff]  ;;  %8428 = vmatpush1.bf16.msra.mxu1 %v8427_v43  ;;  %v3204_v61 = vld [vmem:[#allocation23 + $0x2a8] sm:$0xff] }
 0x294   : > { %v2499_v27 = vld [vmem:[#allocation3 + $0x132] sm:$0xff]  ;;  %3118 = vmatprep.mubr.f32.mxu0 %v2540_v14  ;;  %v12188_v1 = vmul.f32 %v1849_v0, %v1808_v24  ;;  %v2257_v17 = vmul.f32 0.25, %v2216_v10  ;;  %v2961_v45 = vadd.f32 %v2960_v15, %v2691_v58  ;;  %v2962_v16 = vpop.f32.mrb[3].mxu0  ;;  %v2094_v62 = vld [vmem:[#allocation2 + $0x14f] sm:$0xff]  ;;  %v2702_v47 = vpop.f32.mrb[7].mxu1  ;;  %8429 = vmatprep.subr.bf16.mxu1 %v13185_v26  ;;  %v2701_v0 = vadd.f32 %v12162_v39, %v2700_v41 }
 0x295   : > { %v2460_v33 = vld [vmem:[#allocation3 + $0x131] sm:$0xff]  ;;  %3119 = vmatmul.mubr.f32.gmra.mrb[66].mxu0 %v2499_v27  ;;  %v2135_v29 = vadd.f32 %v2094_v62, %v2053_v9  ;;  %v3407_v14 = vadd.f32 %v3366_v22, %v3325_v21  ;;  %v3969_v16 = vld [vmem:[#allocation11 + $0xe8] sm:$0xff] }
 0x296   : > { %2858 = vmatprep.mubr.f32.mxu1 %v2460_v33  ;;  %1931 = vst [vmem:[#allocation2 + $0x158] sm:$0xff] %v12188_v1  ;;  %v12193_v12 = vmul.f32 %v2299_v6, %v2257_v17  ;;  %v3160_v34 = vmax.f32 %v2961_v45, 0.0  ;;  %v3653_v27 = vld [vmem:[#allocation23 + $0x3d8] sm:$0xff]  ;;  %v2301_v6 = vld [vmem:[#allocation23 + $0x288] sm:$0xff] }
 0x297   : > { %2859 = vmatmul.mubr.f32.gmra.mrb[70].mxu1 %v12144_v53  ;;  %v3202_v53 = vld [vmem:[#allocation23 + $0x298] sm:$0xff]  ;;  %v2217_v38 = vadd.f32 %v2135_v29, %v12175_v57  ;;  %v8430_v57 = vpack.c.bf16 %v3965_v8, %v3964_v3  ;;  %v3654_v3 = vld [vmem:[#allocation23 + $0x3e0] sm:$0xff] }
 0x298   : > { %v2541_v28 = vld [vmem:[#allocation3 + $0x13b] sm:$0xff]  ;;  %2381 = vst [vmem:[#allocation3 + $0x148] sm:$0xff] %v12193_v12  ;;  %v12199_v19 = vmul.f32 %v3202_v53, %v3160_v34  ;;  %v2965_v11 = vpop.f32.mrb[4].mxu0  ;;  %v3970_v34 = vld [vmem:[#allocation11 + $0xf0] sm:$0xff] }
 0x299   : > { %v2500_v55 = vld [vmem:[#allocation3 + $0x13a] sm:$0xff]  ;;  %3123 = vmatprep.mubr.f32.mxu0 %v2541_v28  ;;  %v2258_v13 = vmul.f32 0.25, %v2217_v38  ;;  %v2966_v30 = vadd.f32 %v2965_v11, %v2696_v37  ;;  %v2967_v35 = vpop.f32.mrb[5].mxu0  ;;  %8431 = vmatpush1.bf16.msra.mxu1 %v8430_v57  ;;  %v3971_v37 = vld [vmem:[#allocation11 + $0xf8] sm:$0xff] }
 0x29a   : > { %v2461_v51 = vld [vmem:[#allocation3 + $0x139] sm:$0xff]  ;;  %v2705_v5 = vpop.f32.mrb[8].mxu1  ;;  %3124 = vmatmul.mubr.f32.gmra.mrb[68].mxu0 %v2500_v55  ;;  %3284 = vst [vmem:[#allocation2 + $0x20] sm:$0xff] %v12199_v19  ;;  %v3447_v63 = vld [vmem:[#allocation2 + $0x17] sm:$0xff]  ;;  %8432 = vmatprep.subr.bf16.mxu1 %v13185_v26 }
 0x29b   : > { %2863 = vmatprep.mubr.f32.mxu1 %v2461_v51  ;;  %v2707_v60 = vpop.f32.mrb[9].mxu1  ;;  %v3488_v46 = vadd.f32 %v3447_v63, %v3406_v25  ;;  %v12203_v23 = vmul.f32 %v2300_v32, %v2258_v13  ;;  %v3161_v59 = vmax.f32 %v2966_v30, 0.0  ;;  %v3968_v45 = vld [vmem:[#allocation11 + $0xe0] sm:$0xff]  ;;  %v2706_v29 = vadd.f32 %v12162_v39, %v2705_v5  ;;  %v3367_v20 = vld [vmem:[#allocation2 + $0x16] sm:$0xff] }
 0x29c   : > { %2864 = vmatmul.mubr.f32.gmra.mrb[72].mxu1 %v12165_v7  ;;  %v3967_v7 = vld [vmem:[#allocation11 + $0xd8] sm:$0xff]  ;;  %v8436_v2 = vpack.c.bf16 %v3969_v16, %v3968_v45  ;;  %v8439_v60 = vpack.c.bf16 %v3971_v37, %v3970_v34 }
 0x29d   : > { %v2095_v54 = vld [vmem:[#allocation2 + $0x157] sm:$0xff]  ;;  %v3570_v58 = vadd.f32 %v3488_v46, %v12184_v42  ;;  %2382 = vst [vmem:[#allocation3 + $0x150] sm:$0xff] %v12203_v23  ;;  %v12209_v40 = vmul.f32 %v3203_v4, %v3161_v59  ;;  %v8433_v10 = vpack.c.bf16 %v3967_v7, %v3966_v50  ;;  %v3655_v7 = vld [vmem:[#allocation23 + $0x3e8] sm:$0xff] }
 0x29e   : > { %v2136_v48 = vadd.f32 %v2095_v54, %v2054_v18  ;;  %v3205_v30 = vld [vmem:[#allocation23 + $0x2b0] sm:$0xff] }
 0x29f   : > { %v2542_v33 = vld [vmem:[#allocation3 + $0x143] sm:$0xff]  ;;  %v3611_v9 = vmul.f32 0.25, %v3570_v58  ;;  %3285 = vst [vmem:[#allocation2 + $0x28] sm:$0xff] %v12209_v40  ;;  %8434 = vmatpush1.bf16.msra.mxu1 %v8433_v10 }
 0x2a0   : > { %v2501_v24 = vld [vmem:[#allocation3 + $0x142] sm:$0xff]  ;;  %v2218_v31 = vadd.f32 %v2136_v48, %v12188_v1  ;;  %3128 = vmatprep.mubr.f32.mxu0 %v2542_v33  ;;  %v2970_v42 = vpop.f32.mrb[6].mxu0  ;;  %8435 = vmatprep.subr.bf16.mxu1 %v13185_v26 }
 0x2a1   : > { %v2462_v44 = vld [vmem:[#allocation3 + $0x141] sm:$0xff]  ;;  %3129 = vmatmul.mubr.f32.gmra.mrb[70].mxu0 %v2501_v24  ;;  %v2971_v17 = vadd.f32 %v2970_v42, %v2701_v0  ;;  %v2972_v56 = vpop.f32.mrb[7].mxu0  ;;  %v3448_v1 = vld [vmem:[#allocation2 + $0x1f] sm:$0xff]  ;;  %v12214_v52 = vmul.f32 %v3653_v27, %v3611_v9 }
 0x2a2   : > { %2868 = vmatprep.mubr.f32.mxu1 %v2462_v44  ;;  %v2710_v36 = vpop.f32.mrb[10].mxu1  ;;  %v2259_v15 = vmul.f32 0.25, %v2218_v31  ;;  %v3489_v62 = vadd.f32 %v3448_v1, %v3407_v14  ;;  %v3327_v21 = vld [vmem:[#allocation2 + $0x1d] sm:$0xff] }
 0x2a3   : > { %2869 = vmatmul.mubr.f32.gmra.mrb[74].mxu1 %v12179_v49  ;;  %v2712_v41 = vpop.f32.mrb[11].mxu1  ;;  %v3162_v47 = vmax.f32 %v2971_v17, 0.0  ;;  %3735 = vst [vmem:[#allocation3 + $0x18] sm:$0xff] %v12214_v52  ;;  %v3326_v49 = vld [vmem:[#allocation2 + $0x15] sm:$0xff]  ;;  %v2711_v35 = vadd.f32 %v12162_v39, %v2710_v36  ;;  %v3368_v22 = vld [vmem:[#allocation2 + $0x1e] sm:$0xff] }
 0x2a4   : > { %v12217_v53 = vmul.f32 %v2301_v6, %v2259_v15  ;;  %v3571_v43 = vadd.f32 %v3489_v62, %v12199_v19  ;;  %v2543_v8 = vld [vmem:[#allocation3 + $0x14b] sm:$0xff]  ;;  %v3408_v18 = vadd.f32 %v3367_v20, %v3326_v49  ;;  %8437 = vmatpush1.bf16.msra.mxu1 %v8436_v2  ;;  %v3409_v31 = vadd.f32 %v3368_v22, %v3327_v21  ;;  %v2546_v15 = vld [vmem:[#allocation3 + $0x163] sm:$0xff] }
 0x2a5   : > { %v2502_v25 = vld [vmem:[#allocation3 + $0x14a] sm:$0xff]  ;;  %v3245_v55 = vmul.f32 %v3204_v61, %v3162_v47  ;;  %3133 = vmatprep.mubr.f32.mxu0 %v2543_v8  ;;  %8438 = vmatprep.subr.bf16.mxu1 %v13185_v26  ;;  %v3972_v61 = vld [vmem:[#allocation11 + $0x100] sm:$0xff]  ;;  %v3973_v62 = vld [vmem:[#allocation11 + $0x108] sm:$0xff] }
 0x2a6   : > { %2383 = vst [vmem:[#allocation3 + $0x158] sm:$0xff] %v12217_v53  ;;  %v2463_v28 = vld [vmem:[#allocation3 + $0x149] sm:$0xff]  ;;  %v2975_v51 = vpop.f32.mrb[8].mxu0  ;;  %v3612_v32 = vmul.f32 0.25, %v3571_v43  ;;  %3134 = vmatmul.mubr.f32.gmra.mrb[72].mxu0 %v2502_v25  ;;  %v3449_v13 = vld [vmem:[#allocation2 + $0x27] sm:$0xff]  ;;  %v8442_v43 = vpack.c.bf16 %v3973_v62, %v3972_v61  ;;  %v3980_v62 = vld [vmem:[#allocation11 + $0x140] sm:$0xff] }
 0x2a7   : > { %2873 = vmatprep.mubr.f32.mxu1 %v2463_v28  ;;  %3286 = vst [vmem:[#allocation2 + $0x30] sm:$0xff] %v3245_v55  ;;  %v2976_v11 = vadd.f32 %v2975_v51, %v2706_v29  ;;  %v2977_v5 = vpop.f32.mrb[9].mxu0  ;;  %v3490_v57 = vadd.f32 %v3449_v13, %v3408_v18  ;;  %v3328_v17 = vld [vmem:[#allocation2 + $0x25] sm:$0xff]  ;;  %v3656_v49 = vld [vmem:[#allocation23 + $0x3f0] sm:$0xff] }
 0x2a8   : > { %v2715_v38 = vpop.f32.mrb[12].mxu1  ;;  %2874 = vmatmul.mubr.f32.gmra.mrb[76].mxu1 %v12193_v12  ;;  %v12226_v63 = vmul.f32 %v3654_v3, %v3612_v32  ;;  %v3369_v56 = vld [vmem:[#allocation2 + $0x26] sm:$0xff]  ;;  %v2547_v20 = vld [vmem:[#allocation3 + $0x16b] sm:$0xff] }
 0x2a9   : > { %v2717_v19 = vpop.f32.mrb[13].mxu1  ;;  %v3163_v4 = vmax.f32 %v2976_v11, 0.0  ;;  %v3572_v12 = vadd.f32 %v3490_v57, %v12209_v40  ;;  %8440 = vmatpush1.bf16.msra.mxu1 %v8439_v60  ;;  %v3206_v40 = vld [vmem:[#allocation23 + $0x2b8] sm:$0xff]  ;;  %v2716_v41 = vadd.f32 %v12162_v39, %v2715_v38  ;;  %v2505_v47 = vld [vmem:[#allocation3 + $0x162] sm:$0xff]  ;;  %v3410_v29 = vadd.f32 %v3369_v56, %v3328_v17  ;;  %v3975_v32 = vld [vmem:[#allocation11 + $0x118] sm:$0xff] }
 0x2aa   : > { %3736 = vst [vmem:[#allocation3 + $0x20] sm:$0xff] %v12226_v63  ;;  %8441 = vmatprep.subr.bf16.mxu1 %v13185_v26  ;;  %v3974_v3 = vld [vmem:[#allocation11 + $0x110] sm:$0xff]  ;;  %v3207_v18 = vld [vmem:[#allocation23 + $0x2c0] sm:$0xff] }
 0x2ab   : > { %v12231_v46 = vmul.f32 %v3205_v30, %v3163_v4  ;;  %v2980_v54 = vpop.f32.mrb[10].mxu0  ;;  %v3613_v33 = vmul.f32 0.25, %v3572_v12  ;;  %v2506_v11 = vld [vmem:[#allocation3 + $0x16a] sm:$0xff]  ;;  %v8445_v60 = vpack.c.bf16 %v3975_v32, %v3974_v3  ;;  %v3976_v12 = vld [vmem:[#allocation11 + $0x120] sm:$0xff] }
 0x2ac   : > { %v2981_v58 = vadd.f32 %v2980_v54, %v2711_v35  ;;  %v2982_v14 = vpop.f32.mrb[11].mxu0  ;;  %v3657_v35 = vld [vmem:[#allocation23 + $0x3f8] sm:$0xff] }
 0x2ad   : > { %v12233_v50 = vpop.f32.mrb[14].mxu1  ;;  %v2544_v59 = vld [vmem:[#allocation3 + $0x153] sm:$0xff]  ;;  %v2545_v0 = vld [vmem:[#allocation3 + $0x15b] sm:$0xff]  ;;  %3287 = vst [vmem:[#allocation2 + $0x38] sm:$0xff] %v12231_v46  ;;  %v12237_v6 = vmul.f32 %v3655_v7, %v3613_v33 }
 0x2ae   : > { %v2503_v48 = vld [vmem:[#allocation3 + $0x152] sm:$0xff]  ;;  %v2722_v27 = vpop.f32.mrb[15].mxu1  ;;  %3138 = vmatprep.mubr.f32.mxu0 %v2544_v59  ;;  %v3450_v10 = vld [vmem:[#allocation2 + $0x2f] sm:$0xff]  ;;  %v3164_v9 = vmax.f32 %v2981_v58, 0.0  ;;  %v2504_v42 = vld [vmem:[#allocation3 + $0x15a] sm:$0xff]  ;;  %v2721_v22 = vadd.f32 %v12162_v39, %v12233_v50 }
 0x2af   : > { %v2464_v24 = vld [vmem:[#allocation3 + $0x151] sm:$0xff]  ;;  %v2465_v44 = vld [vmem:[#allocation3 + $0x159] sm:$0xff]  ;;  %3139 = vmatmul.mubr.f32.gmra.mrb[74].mxu0 %v2503_v48  ;;  %v3491_v36 = vadd.f32 %v3450_v10, %v3409_v31  ;;  %3737 = vst [vmem:[#allocation3 + $0x28] sm:$0xff] %v12237_v6  ;;  %v3329_v8 = vld [vmem:[#allocation2 + $0x2d] sm:$0xff] }
 0x2b0   : > { %2878 = vmatprep.mubr.f32.mxu1 %v2464_v24  ;;  %3143 = vmatprep.mubr.f32.mxu0 %v2545_v0  ;;  %v3247_v45 = vmul.f32 %v3206_v40, %v3164_v9  ;;  %v3370_v25 = vld [vmem:[#allocation2 + $0x2e] sm:$0xff]  ;;  %v3658_v33 = vld [vmem:[#allocation23 + $0x400] sm:$0xff] }
 0x2b1   : > { %2879 = vmatmul.mubr.f32.gmra.mrb[78].mxu1 %v12203_v23  ;;  %v3573_v16 = vadd.f32 %v3491_v36, %v3245_v55  ;;  %v3817_v1 = vld [vmem:[#allocation3 + $0x19] sm:$0xff]  ;;  %v3411_v30 = vadd.f32 %v3370_v25, %v3329_v8  ;;  %v3978_v24 = vld [vmem:[#allocation11 + $0x130] sm:$0xff]  ;;  %v3983_v8 = vld [vmem:[#allocation11 + $0x158] sm:$0xff] }
 0x2b2   : > { %2883 = vmatprep.mubr.f32.mxu1 %v2465_v44  ;;  %3288 = vst [vmem:[#allocation2 + $0x40] sm:$0xff] %v3247_v45  ;;  %v3979_v44 = vld [vmem:[#allocation11 + $0x138] sm:$0xff]  ;;  %v3208_v10 = vld [vmem:[#allocation23 + $0x2c8] sm:$0xff] }
 0x2b3   : > { %3144 = vmatmul.mubr.f32.gmra.mrb[76].mxu0 %v2504_v42  ;;  %v3614_v23 = vmul.f32 0.25, %v3573_v16  ;;  %v8451_v56 = vpack.c.bf16 %v3979_v44, %v3978_v24 }
 0x2b4   : > { %3148 = vmatprep.mubr.f32.mxu0 %v2546_v15  ;;  %v3451_v2 = vld [vmem:[#allocation2 + $0x37] sm:$0xff]  ;;  %v2985_v34 = vpop.f32.mrb[12].mxu0 }
 0x2b5   : > { %2884 = vmatmul.mubr.f32.gmra.mrb[80].mxu1 %v12217_v53  ;;  %v3492_v28 = vadd.f32 %v3451_v2, %v3410_v29  ;;  %v2986_v55 = vadd.f32 %v2985_v34, %v2716_v41  ;;  %v2987_v51 = vpop.f32.mrb[13].mxu0  ;;  %v12243_v53 = vmul.f32 %v3656_v49, %v3614_v23  ;;  %v3371_v31 = vld [vmem:[#allocation2 + $0x36] sm:$0xff] }
 0x2b6   : > { %v2725_v37 = vpop.f32.mrb[16].mxu1  ;;  %4075 = vmatprep.mubr.f32.mxu1 %v3817_v1  ;;  %v3818_v13 = vld [vmem:[#allocation3 + $0x21] sm:$0xff]  ;;  %v3209_v29 = vld [vmem:[#allocation23 + $0x2d0] sm:$0xff] }
 0x2b7   : > { %v2727_v38 = vpop.f32.mrb[17].mxu1  ;;  %3149 = vmatmul.mubr.f32.gmra.mrb[78].mxu0 %v2505_v47  ;;  %v3574_v5 = vadd.f32 %v3492_v28, %v12231_v46  ;;  %v3165_v19 = vmax.f32 %v2986_v55, 0.0  ;;  %3738 = vst [vmem:[#allocation3 + $0x30] sm:$0xff] %v12243_v53  ;;  %v3977_v46 = vld [vmem:[#allocation11 + $0x128] sm:$0xff]  ;;  %v2726_v50 = vadd.f32 %v12162_v39, %v2725_v37 }
 0x2b8   : > { %3153 = vmatprep.mubr.f32.mxu0 %v2547_v20  ;;  %v8448_v0 = vpack.c.bf16 %v3977_v46, %v3976_v12  ;;  %v3981_v47 = vld [vmem:[#allocation11 + $0x148] sm:$0xff]  ;;  %v3659_v38 = vld [vmem:[#allocation23 + $0x408] sm:$0xff] }
 0x2b9   : > { %4076 = vmatmul.mubr.f32.vlgmr.msra.gmra.mrb[82].mxu1 %v12214_v52  ;;  %v3615_v57 = vmul.f32 0.25, %v3574_v5  ;;  %v3452_v4 = vld [vmem:[#allocation2 + $0x3f] sm:$0xff]  ;;  %v3248_v21 = vmul.f32 %v3207_v18, %v3165_v19  ;;  %v8454_v37 = vpack.c.bf16 %v3981_v47, %v3980_v62 }
 0x2ba   : > { %8443 = vmatpush1.bf16.msra.mxu1 %v8442_v43  ;;  %4080 = vmatprep.mubr.f32.mxu1 %v3818_v13  ;;  %v3493_v52 = vadd.f32 %v3452_v4, %v3411_v30  ;;  %v3331_v25 = vld [vmem:[#allocation2 + $0x3d] sm:$0xff] }
 0x2bb   : > { %8444 = vmatprep.subr.bf16.mxu1 %v13185_v26  ;;  %3154 = vmatmul.mubr.f32.gmra.mrb[80].mxu0 %v2506_v11  ;;  %3289 = vst [vmem:[#allocation2 + $0x48] sm:$0xff] %v3248_v21  ;;  %v12252_v54 = vmul.f32 %v3657_v35, %v3615_v57  ;;  %v3372_v28 = vld [vmem:[#allocation2 + $0x3e] sm:$0xff] }
 0x2bc   : > { %v3575_v7 = vadd.f32 %v3493_v52, %v3247_v45  ;;  %v2990_v59 = vpop.f32.mrb[14].mxu0  ;;  %v3210_v19 = vld [vmem:[#allocation23 + $0x2d8] sm:$0xff]  ;;  %v3413_v30 = vadd.f32 %v3372_v28, %v3331_v25  ;;  %v3662_v25 = vld [vmem:[#allocation23 + $0x420] sm:$0xff] }
 0x2bd   : > { %4081 = vmatmul.mubr.f32.gmra.mrb[84].mxu1 %v12226_v63  ;;  %v2991_v58 = vadd.f32 %v2990_v59, %v2721_v22  ;;  %v2992_v14 = vpop.f32.mrb[15].mxu0  ;;  %3739 = vst [vmem:[#allocation3 + $0x38] sm:$0xff] %v12252_v54  ;;  %v3330_v63 = vld [vmem:[#allocation2 + $0x35] sm:$0xff]  ;;  %v3984_v4 = vld [vmem:[#allocation11 + $0x160] sm:$0xff] }
 0x2be   : > { %v2730_v48 = vpop.f32.mrb[18].mxu1  ;;  %8446 = vmatpush1.bf16.msra.mxu1 %v8445_v60  ;;  %v3616_v40 = vmul.f32 0.25, %v3575_v7  ;;  %v3819_v42 = vld [vmem:[#allocation3 + $0x29] sm:$0xff]  ;;  %v3412_v45 = vadd.f32 %v3371_v31, %v3330_v63 }
 0x2bf   : > { %v2732_v27 = vpop.f32.mrb[19].mxu1  ;;  %8447 = vmatprep.subr.bf16.mxu1 %v13185_v26  ;;  %v3166_v9 = vmax.f32 %v2991_v58, 0.0  ;;  %4085 = vmatprep.mubr.f32.mxu1 %v3819_v42  ;;  %v2731_v2 = vadd.f32 %v12162_v39, %v2730_v48  ;;  %v3660_v14 = vld [vmem:[#allocation23 + $0x410] sm:$0xff] }
 0x2c0   : > { %v2995_v36 = vpop.f32.mrb[16].mxu0  ;;  %v12259_v17 = vmul.f32 %v3658_v33, %v3616_v40 }
 0x2c1   : > { %v3249_v16 = vmul.f32 %v3208_v10, %v3166_v9  ;;  %v2996_v41 = vadd.f32 %v2995_v36, %v2726_v50  ;;  %v2997_v1 = vpop.f32.mrb[17].mxu0  ;;  %4086 = vmatmul.mubr.f32.gmra.mrb[86].mxu1 %v12237_v6  ;;  %v3982_v6 = vld [vmem:[#allocation11 + $0x150] sm:$0xff]  ;;  %v3211_v36 = vld [vmem:[#allocation23 + $0x2e0] sm:$0xff] }
 0x2c2   : > { %v12257_v15 = vpop.f32.mrb[20].mxu1  ;;  %8449 = vmatpush1.bf16.msra.mxu1 %v8448_v0  ;;  %v3453_v23 = vld [vmem:[#allocation2 + $0x47] sm:$0xff]  ;;  %3740 = vst [vmem:[#allocation3 + $0x40] sm:$0xff] %v12259_v17  ;;  %v8457_v13 = vpack.c.bf16 %v3983_v8, %v3982_v6 }
 0x2c3   : > { %v2737_v61 = vpop.f32.mrb[21].mxu1  ;;  %8450 = vmatprep.subr.bf16.mxu1 %v13185_v26  ;;  %v3494_v49 = vadd.f32 %v3453_v23, %v3412_v45  ;;  %3290 = vst [vmem:[#allocation2 + $0x50] sm:$0xff] %v3249_v16  ;;  %v3167_v20 = vmax.f32 %v2996_v41, 0.0  ;;  %v3332_v22 = vld [vmem:[#allocation2 + $0x45] sm:$0xff]  ;;  %v2736_v0 = vadd.f32 %v12162_v39, %v12257_v15  ;;  %v3986_v1 = vld [vmem:[#allocation11 + $0x170] sm:$0xff] }
 0x2c4   : > { %v3820_v34 = vld [vmem:[#allocation3 + $0x31] sm:$0xff] }
 0x2c5   : > { %v3576_v43 = vadd.f32 %v3494_v49, %v3248_v21  ;;  %v3250_v3 = vmul.f32 %v3209_v29, %v3167_v20  ;;  %4090 = vmatprep.mubr.f32.mxu1 %v3820_v34  ;;  %v3000_v55 = vpop.f32.mrb[18].mxu0  ;;  %v3985_v21 = vld [vmem:[#allocation11 + $0x168] sm:$0xff]  ;;  %v3661_v41 = vld [vmem:[#allocation23 + $0x418] sm:$0xff]  ;;  %v3987_v61 = vld [vmem:[#allocation11 + $0x178] sm:$0xff] }
 0x2c6   : > { %8452 = vmatpush1.bf16.msra.mxu1 %v8451_v56  ;;  %v3001_v18 = vadd.f32 %v3000_v55, %v2731_v2  ;;  %v3002_v11 = vpop.f32.mrb[19].mxu0  ;;  %v8460_v7 = vpack.c.bf16 %v3985_v21, %v3984_v4  ;;  %v8463_v29 = vpack.c.bf16 %v3987_v61, %v3986_v1 }
 0x2c7   : > { %8453 = vmatprep.subr.bf16.mxu1 %v13185_v26  ;;  %v2740_v51 = vpop.f32.mrb[22].mxu1  ;;  %4091 = vmatmul.mubr.f32.gmra.mrb[88].mxu1 %v12243_v53  ;;  %v3617_v32 = vmul.f32 0.25, %v3576_v43  ;;  %3291 = vst [vmem:[#allocation2 + $0x58] sm:$0xff] %v3250_v3  ;;  %v3373_v53 = vld [vmem:[#allocation2 + $0x46] sm:$0xff]  ;;  %v3212_v43 = vld [vmem:[#allocation23 + $0x2e8] sm:$0xff] }
 0x2c8   : > { %v2742_v5 = vpop.f32.mrb[23].mxu1  ;;  %v3168_v35 = vmax.f32 %v3001_v18, 0.0  ;;  %v3414_v48 = vadd.f32 %v3373_v53, %v3332_v22  ;;  %v2741_v10 = vadd.f32 %v12162_v39, %v2740_v51 }
 0x2c9   : > { %v3821_v60 = vld [vmem:[#allocation3 + $0x39] sm:$0xff]  ;;  %v12267_v57 = vmul.f32 %v3659_v38, %v3617_v32 }
 0x2ca   : > { %8455 = vmatpush1.bf16.msra.mxu1 %v8454_v37  ;;  %v3454_v12 = vld [vmem:[#allocation2 + $0x4f] sm:$0xff]  ;;  %4095 = vmatprep.mubr.f32.mxu1 %v3821_v60  ;;  %v3251_v52 = vmul.f32 %v3210_v19, %v3168_v35 }
 0x2cb   : > { %8456 = vmatprep.subr.bf16.mxu1 %v13185_v26  ;;  %v3495_v46 = vadd.f32 %v3454_v12, %v3413_v30  ;;  %4096 = vmatmul.mubr.f32.gmra.mrb[90].mxu1 %v12252_v54  ;;  %3741 = vst [vmem:[#allocation3 + $0x48] sm:$0xff] %v12267_v57  ;;  %v3333_v33 = vld [vmem:[#allocation2 + $0x4d] sm:$0xff]  ;;  %v3213_v30 = vld [vmem:[#allocation23 + $0x2f0] sm:$0xff] }
 0x2cc   : > { %3292 = vst [vmem:[#allocation2 + $0x60] sm:$0xff] %v3251_v52  ;;  %v3374_v24 = vld [vmem:[#allocation2 + $0x4e] sm:$0xff] }
 0x2cd   : > { %v3577_v59 = vadd.f32 %v3495_v46, %v3249_v16  ;;  %v3415_v45 = vadd.f32 %v3374_v24, %v3333_v33  ;;  %v3663_v33 = vld [vmem:[#allocation23 + $0x428] sm:$0xff] }
 0x2ce   : > { %8458 = vmatpush1.bf16.msra.mxu1 %v8457_v13  ;;  %v3455_v58 = vld [vmem:[#allocation2 + $0x57] sm:$0xff] }
 0x2cf   : > { %8459 = vmatprep.subr.bf16.mxu1 %v13185_v26  ;;  %v3618_v50 = vmul.f32 0.25, %v3577_v59  ;;  %v3496_v27 = vadd.f32 %v3455_v58, %v3414_v48  ;;  %v3334_v51 = vld [vmem:[#allocation2 + $0x55] sm:$0xff]  ;;  %v3989_v59 = vld [vmem:[#allocation11 + $0x188] sm:$0xff] }
 0x2d0   : > { %v3005_v44 = vpop.f32.mrb[20].mxu0  ;;  %v3375_v38 = vld [vmem:[#allocation2 + $0x56] sm:$0xff] }
 0x2d1   : > { %v2745_v54 = vpop.f32.mrb[24].mxu1  ;;  %v3578_v63 = vadd.f32 %v3496_v27, %v3250_v3  ;;  %v3006_v31 = vadd.f32 %v3005_v44, %v2736_v0  ;;  %v3007_v40 = vpop.f32.mrb[21].mxu0  ;;  %v12276_v42 = vmul.f32 %v3660_v14, %v3618_v50  ;;  %v3416_v19 = vadd.f32 %v3375_v38, %v3334_v51 }
 0x2d2   : > { %8461 = vmatpush1.bf16.msra.mxu1 %v8460_v7  ;;  %v2747_v9 = vpop.f32.mrb[25].mxu1  ;;  %v3822_v15 = vld [vmem:[#allocation3 + $0x41] sm:$0xff]  ;;  %v3988_v7 = vld [vmem:[#allocation11 + $0x180] sm:$0xff] }
 0x2d3   : > { %8462 = vmatprep.subr.bf16.mxu1 %v13185_v26  ;;  %v3619_v56 = vmul.f32 0.25, %v3578_v63  ;;  %v3169_v16 = vmax.f32 %v3006_v31, 0.0  ;;  %4100 = vmatprep.mubr.f32.mxu1 %v3822_v15  ;;  %3742 = vst [vmem:[#allocation3 + $0x50] sm:$0xff] %v12276_v42  ;;  %v3456_v62 = vld [vmem:[#allocation2 + $0x5f] sm:$0xff]  ;;  %v8466_v48 = vpack.c.bf16 %v3989_v59, %v3988_v7  ;;  %v12298_v7 = vld [vmem:[#allocation9] ss:$0 sm:$0xff] }
 0x2d4   : > { %v3010_v47 = vpop.f32.mrb[22].mxu0  ;;  %4101 = vmatmul.mubr.f32.gmra.mrb[92].mxu1 %v12259_v17  ;;  %v3497_v49 = vadd.f32 %v3456_v62, %v3415_v45  ;;  %v2746_v17 = vadd.f32 %v12162_v39, %v2745_v54  ;;  %v3335_v4 = vld [vmem:[#allocation2 + $0x5d] sm:$0xff] }
 0x2d5   : > { %v2750_v23 = vpop.f32.mrb[26].mxu1  ;;  %v3252_v20 = vmul.f32 %v3211_v36, %v3169_v16  ;;  %v3011_v2 = vadd.f32 %v3010_v47, %v2741_v10  ;;  %v3012_v34 = vpop.f32.mrb[23].mxu0  ;;  %v3702_v3 = vmul.f32 %v3661_v41, %v3619_v56  ;;  %v3376_v21 = vld [vmem:[#allocation2 + $0x5e] sm:$0xff]  ;;  %v3664_v16 = vld [vmem:[#allocation23 + $0x430] sm:$0xff] }
 0x2d6   : > { %v2752_v37 = vpop.f32.mrb[27].mxu1  ;;  %8464 = vmatpush1.bf16.msra.mxu1 %v8463_v29  ;;  %v3579_v6 = vadd.f32 %v3497_v49, %v3251_v52  ;;  %v2751_v46 = vadd.f32 %v12162_v39, %v2750_v23  ;;  %v3417_v0 = vadd.f32 %v3376_v21, %v3335_v4  ;;  %v3214_v40 = vld [vmem:[#allocation23 + $0x2f8] sm:$0xff] }
 0x2d7   : > { %3293 = vst [vmem:[#allocation2 + $0x68] sm:$0xff] %v3252_v20  ;;  %v3170_v8 = vmax.f32 %v3011_v2, 0.0  ;;  %8465 = vmatprep.subr.bf16.mxu1 %v13185_v26  ;;  %3743 = vst [vmem:[#allocation3 + $0x58] sm:$0xff] %v3702_v3  ;;  %v3215_v37 = vld [vmem:[#allocation23 + $0x300] sm:$0xff] }
 0x2d8   : > { %v3620_v28 = vmul.f32 0.25, %v3579_v6 }
 0x2d9   : > { %v3253_v55 = vmul.f32 %v3212_v43, %v3170_v8 }
 0x2da   : > { %v3823_v32 = vld [vmem:[#allocation3 + $0x49] sm:$0xff]  ;;  %v12283_v18 = vmul.f32 %v3662_v25, %v3620_v28  ;;  %8467 = vmatpush1.bf16.msra.mxu1 %v8466_v48 }
 0x2db   : > { %3294 = vst [vmem:[#allocation2 + $0x70] sm:$0xff] %v3253_v55  ;;  %4105 = vmatprep.mubr.f32.mxu1 %v3823_v32  ;;  %8468 = vmatprep.subr.bf16.mxu1 %v13185_v26 }
 0x2dc   : > { %v3015_v11 = vpop.f32.mrb[24].mxu0  ;;  %4106 = vmatmul.mubr.f32.gmra.mrb[94].mxu1 %v12267_v57  ;;  %3744 = vst [vmem:[#allocation3 + $0x60] sm:$0xff] %v12283_v18 }
 0x2dd   : > { %v3016_v13 = vadd.f32 %v3015_v11, %v2746_v17  ;;  %v3017_v35 = vpop.f32.mrb[25].mxu0  ;;  %v3665_v17 = vld [vmem:[#allocation23 + $0x438] sm:$0xff] }
 0x2de   : > { %v2755_v5 = vpop.f32.mrb[28].mxu1  ;;  %v3457_v22 = vld [vmem:[#allocation2 + $0x67] sm:$0xff]  ;;  %v3824_v52 = vld [vmem:[#allocation3 + $0x51] sm:$0xff] }
 0x2df   : > { %v2757_v60 = vpop.f32.mrb[29].mxu1  ;;  %v3498_v53 = vadd.f32 %v3457_v22, %v3416_v19  ;;  %v3171_v12 = vmax.f32 %v3016_v13, 0.0  ;;  %4110 = vmatprep.mubr.f32.mxu1 %v3824_v52  ;;  %v3377_v56 = vld [vmem:[#allocation2 + $0x66] sm:$0xff]  ;;  %v2756_v45 = vadd.f32 %v12162_v39, %v2755_v5  ;;  %v3990_v22 = vld [vmem:[#allocation11 + $0x190] sm:$0xff] }
 0x2e0   : > { %4111 = vmatmul.mubr.f32.gmra.mrb[96].mxu1 %v12276_v42  ;;  %v3336_v42 = vld [vmem:[#allocation2 + $0x65] sm:$0xff]  ;;  %v3216_v60 = vld [vmem:[#allocation23 + $0x308] sm:$0xff] }
 0x2e1   : > { %v3580_v57 = vadd.f32 %v3498_v53, %v3252_v20  ;;  %v3254_v58 = vmul.f32 %v3213_v30, %v3171_v12  ;;  %v3418_v61 = vadd.f32 %v3377_v56, %v3336_v42  ;;  %v3991_v53 = vld [vmem:[#allocation11 + $0x198] sm:$0xff] }
 0x2e2   : > { %v3458_v14 = vld [vmem:[#allocation2 + $0x6f] sm:$0xff]  ;;  %v2760_v27 = vpop.f32.mrb[30].mxu1  ;;  %v8469_v48 = vpack.c.bf16 %v3991_v53, %v3990_v22 }
 0x2e3   : > { %v3020_v50 = vpop.f32.mrb[26].mxu0  ;;  %v3621_v24 = vmul.f32 0.25, %v3580_v57  ;;  %v3499_v44 = vadd.f32 %v3458_v14, %v3417_v0  ;;  %3295 = vst [vmem:[#allocation2 + $0x78] sm:$0xff] %v3254_v58  ;;  %v2762_v31 = vpop.f32.mrb[31].mxu1  ;;  %v3825_v10 = vld [vmem:[#allocation3 + $0x59] sm:$0xff]  ;;  %v3337_v43 = vld [vmem:[#allocation2 + $0x6d] sm:$0xff]  ;;  %v2761_v8 = vadd.f32 %v12162_v39, %v2760_v27 }
 0x2e4   : > { %v3021_v54 = vadd.f32 %v3020_v50, %v2751_v46  ;;  %v3022_v63 = vpop.f32.mrb[27].mxu0  ;;  %4115 = vmatprep.mubr.f32.mxu1 %v3825_v10  ;;  %v3666_v57 = vld [vmem:[#allocation23 + $0x440] sm:$0xff]  ;;  %8470 = vmatpush1.bf16.msra.mxu1 %v8469_v48  ;;  %v3217_v31 = vld [vmem:[#allocation23 + $0x310] sm:$0xff] }
 0x2e5   : > { %v3581_v9 = vadd.f32 %v3499_v44, %v3253_v55  ;;  %v3704_v15 = vmul.f32 %v3663_v33, %v3621_v24  ;;  %4116 = vmatmul.mubr.f32.gmra.mrb[98].mxu1 %v3702_v3  ;;  %v3378_v3 = vld [vmem:[#allocation2 + $0x6e] sm:$0xff]  ;;  %8471 = vmatprep.subr.bf16.mxu1 %v13185_v26 }
 0x2e6   : > { %v3172_v36 = vmax.f32 %v3021_v54, 0.0  ;;  %v3419_v38 = vadd.f32 %v3378_v3, %v3337_v43 }
 0x2e7   : > { %v3622_v41 = vmul.f32 0.25, %v3581_v9  ;;  %3745 = vst [vmem:[#allocation3 + $0x68] sm:$0xff] %v3704_v15 }
 0x2e8   : > { %v3255_v1 = vmul.f32 %v3214_v40, %v3172_v36 }
 0x2e9   : > { %v2765_v47 = vpop.f32.mrb[32].mxu1  ;;  %v12291_v23 = vmul.f32 %v3664_v16, %v3622_v41  ;;  %v3667_v41 = vld [vmem:[#allocation23 + $0x448] sm:$0xff] }
 0x2ea   : > { %3296 = vst [vmem:[#allocation2 + $0x80] sm:$0xff] %v3255_v1  ;;  %v3459_v29 = vld [vmem:[#allocation2 + $0x77] sm:$0xff]  ;;  %v2767_v2 = vpop.f32.mrb[33].mxu1  ;;  %v2766_v59 = vadd.f32 %v12298_v7, %v2765_v47 }
 0x2eb   : > { %v3025_v62 = vpop.f32.mrb[28].mxu0  ;;  %v3500_v34 = vadd.f32 %v3459_v29, %v3418_v61  ;;  %3746 = vst [vmem:[#allocation3 + $0x70] sm:$0xff] %v12291_v23  ;;  %v3338_v12 = vld [vmem:[#allocation2 + $0x75] sm:$0xff] }
 0x2ec   : > { %v3026_v49 = vadd.f32 %v3025_v62, %v2756_v45  ;;  %v3027_v20 = vpop.f32.mrb[29].mxu0  ;;  %v3379_v46 = vld [vmem:[#allocation2 + $0x76] sm:$0xff] }
 0x2ed   : > { %v3582_v25 = vadd.f32 %v3500_v34, %v3254_v58  ;;  %v3420_v58 = vadd.f32 %v3379_v46, %v3338_v12  ;;  %v3218_v20 = vld [vmem:[#allocation23 + $0x318] sm:$0xff] }
 0x2ee   : > { %v3173_v6 = vmax.f32 %v3026_v49, 0.0  ;;  %v3826_v55 = vld [vmem:[#allocation3 + $0x61] sm:$0xff] }
 0x2ef   : > { %v3623_v51 = vmul.f32 0.25, %v3582_v25  ;;  %4120 = vmatprep.mubr.f32.mxu1 %v3826_v55  ;;  %v3668_v55 = vld [vmem:[#allocation23 + $0x450] sm:$0xff] }
 0x2f0   : > { %v3256_v28 = vmul.f32 %v3215_v37, %v3173_v6  ;;  %v3030_v32 = vpop.f32.mrb[30].mxu0  ;;  %4121 = vmatmul.mubr.f32.gmra.mrb[100].mxu1 %v12283_v18 }
 0x2f1   : > { %v3460_v5 = vld [vmem:[#allocation2 + $0x7f] sm:$0xff]  ;;  %v3031_v19 = vadd.f32 %v3030_v32, %v2761_v8  ;;  %v3032_v13 = vpop.f32.mrb[31].mxu0  ;;  %v12296_v4 = vmul.f32 %v3665_v17, %v3623_v51 }
 0x2f2   : > { %v2770_v11 = vpop.f32.mrb[34].mxu1  ;;  %3297 = vst [vmem:[#allocation2 + $0x88] sm:$0xff] %v3256_v28  ;;  %v3501_v35 = vadd.f32 %v3460_v5, %v3419_v38  ;;  %v3827_v21 = vld [vmem:[#allocation3 + $0x69] sm:$0xff]  ;;  %v3339_v10 = vld [vmem:[#allocation2 + $0x7d] sm:$0xff]  ;;  %v3219_v13 = vld [vmem:[#allocation23 + $0x320] sm:$0xff] }
 0x2f3   : > { %v2772_v30 = vpop.f32.mrb[35].mxu1  ;;  %v3174_v39 = vmax.f32 %v3031_v19, 0.0  ;;  %4125 = vmatprep.mubr.f32.mxu1 %v3827_v21  ;;  %3747 = vst [vmem:[#allocation3 + $0x78] sm:$0xff] %v12296_v4  ;;  %v2771_v40 = vadd.f32 %v12298_v7, %v2770_v11  ;;  %v3380_v9 = vld [vmem:[#allocation2 + $0x7e] sm:$0xff] }
 0x2f4   : > { %v3583_v52 = vadd.f32 %v3501_v35, %v3255_v1  ;;  %4126 = vmatmul.mubr.f32.gmra.mrb[102].mxu1 %v3704_v15  ;;  %v3421_v61 = vadd.f32 %v3380_v9, %v3339_v10 }
 0x2f5   : > { %v3257_v18 = vmul.f32 %v3216_v60, %v3174_v39 }
 0x2f6   : > { %v3624_v0 = vmul.f32 0.25, %v3583_v52  ;;  %v3993_v52 = vld [vmem:[#allocation11 + $0x1a8] sm:$0xff] }
 0x2f7   : > { %3298 = vst [vmem:[#allocation2 + $0x90] sm:$0xff] %v3257_v18  ;;  %v3035_v14 = vpop.f32.mrb[32].mxu0 }
 0x2f8   : > { %v3036_v33 = vadd.f32 %v3035_v14, %v2766_v59  ;;  %v3037_v24 = vpop.f32.mrb[33].mxu0  ;;  %v12303_v54 = vmul.f32 %v3666_v57, %v3624_v0  ;;  %v3669_v57 = vld [vmem:[#allocation23 + $0x458] sm:$0xff] }
 0x2f9   : > { %v2775_v50 = vpop.f32.mrb[36].mxu1  ;;  %v3461_v27 = vld [vmem:[#allocation2 + $0x87] sm:$0xff] }
 0x2fa   : > { %v2777_v44 = vpop.f32.mrb[37].mxu1  ;;  %v3502_v63 = vadd.f32 %v3461_v27, %v3420_v58  ;;  %v3175_v36 = vmax.f32 %v3036_v33, 0.0  ;;  %3748 = vst [vmem:[#allocation3 + $0x80] sm:$0xff] %v12303_v54  ;;  %v3828_v42 = vld [vmem:[#allocation3 + $0x71] sm:$0xff]  ;;  %v2776_v43 = vadd.f32 %v12298_v7, %v2775_v50  ;;  %v3340_v3 = vld [vmem:[#allocation2 + $0x85] sm:$0xff] }
 0x2fb   : > { %v3040_v45 = vpop.f32.mrb[34].mxu0  ;;  %4130 = vmatprep.mubr.f32.mxu1 %v3828_v42  ;;  %v3381_v6 = vld [vmem:[#allocation2 + $0x86] sm:$0xff]  ;;  %v3220_v44 = vld [vmem:[#allocation23 + $0x328] sm:$0xff] }
 0x2fc   : > { %v3584_v15 = vadd.f32 %v3502_v63, %v3256_v28  ;;  %v3258_v56 = vmul.f32 %v3217_v31, %v3175_v36  ;;  %v3041_v62 = vadd.f32 %v3040_v45, %v2771_v40  ;;  %v3042_v47 = vpop.f32.mrb[35].mxu0  ;;  %4131 = vmatmul.mubr.f32.gmra.mrb[104].mxu1 %v12291_v23  ;;  %v3422_v38 = vadd.f32 %v3381_v6, %v3340_v3  ;;  %v3670_v42 = vld [vmem:[#allocation23 + $0x460] sm:$0xff]  ;;  %v3221_v3 = vld [vmem:[#allocation23 + $0x330] sm:$0xff]  ;;  %v3671_v6 = vld [vmem:[#allocation23 + $0x468] sm:$0xff] }
 0x2fd   : > { %v2780_v16 = vpop.f32.mrb[38].mxu1 }
 0x2fe   : > { %v3625_v1 = vmul.f32 0.25, %v3584_v15  ;;  %v2782_v29 = vpop.f32.mrb[39].mxu1  ;;  %v3462_v49 = vld [vmem:[#allocation2 + $0x8f] sm:$0xff]  ;;  %3299 = vst [vmem:[#allocation2 + $0x98] sm:$0xff] %v3258_v56  ;;  %v3176_v34 = vmax.f32 %v3041_v62, 0.0  ;;  %v2781_v22 = vadd.f32 %v12298_v7, %v2780_v16 }
 0x2ff   : > { %v3503_v2 = vadd.f32 %v3462_v49, %v3421_v61  ;;  %v3341_v35 = vld [vmem:[#allocation2 + $0x8d] sm:$0xff] }
 0x300   : > { %v12308_v37 = vmul.f32 %v3667_v41, %v3625_v1  ;;  %v3259_v25 = vmul.f32 %v3218_v20, %v3176_v34  ;;  %v3382_v60 = vld [vmem:[#allocation2 + $0x8e] sm:$0xff] }
 0x301   : > { %v3585_v8 = vadd.f32 %v3503_v2, %v3257_v18  ;;  %v3829_v28 = vld [vmem:[#allocation3 + $0x79] sm:$0xff]  ;;  %v3423_v59 = vadd.f32 %v3382_v60, %v3341_v35 }
 0x302   : > { %3749 = vst [vmem:[#allocation3 + $0x88] sm:$0xff] %v12308_v37  ;;  %4135 = vmatprep.mubr.f32.mxu1 %v3829_v28  ;;  %3300 = vst [vmem:[#allocation2 + $0xa0] sm:$0xff] %v3259_v25  ;;  %v3045_v23 = vpop.f32.mrb[36].mxu0  ;;  %v3995_v28 = vld [vmem:[#allocation11 + $0x1b8] sm:$0xff]  ;;  %v3222_v60 = vld [vmem:[#allocation23 + $0x338] sm:$0xff] }
 0x303   : > { %v3626_v17 = vmul.f32 0.25, %v3585_v8  ;;  %4136 = vmatmul.mubr.f32.gmra.mrb[106].mxu1 %v12296_v4  ;;  %v3046_v32 = vadd.f32 %v3045_v23, %v2776_v43  ;;  %v3047_v11 = vpop.f32.mrb[37].mxu0  ;;  %v3992_v4 = vld [vmem:[#allocation11 + $0x1a0] sm:$0xff] }
 0x304   : > { %v2785_v51 = vpop.f32.mrb[40].mxu1  ;;  %v8472_v0 = vpack.c.bf16 %v3993_v52, %v3992_v4  ;;  %v3672_v4 = vld [vmem:[#allocation23 + $0x470] sm:$0xff] }
 0x305   : > { %v2787_v5 = vpop.f32.mrb[41].mxu1  ;;  %v3463_v19 = vld [vmem:[#allocation2 + $0x97] sm:$0xff]  ;;  %v12313_v30 = vmul.f32 %v3668_v55, %v3626_v17  ;;  %v3177_v21 = vmax.f32 %v3046_v32, 0.0  ;;  %v2786_v45 = vadd.f32 %v12298_v7, %v2785_v51 }
 0x306   : > { %v3504_v39 = vadd.f32 %v3463_v19, %v3422_v38  ;;  %8473 = vmatpush1.bf16.msra.mxu1 %v8472_v0  ;;  %v3342_v40 = vld [vmem:[#allocation2 + $0x95] sm:$0xff] }
 0x307   : > { %3750 = vst [vmem:[#allocation3 + $0x90] sm:$0xff] %v12313_v30  ;;  %v3260_v12 = vmul.f32 %v3219_v13, %v3177_v21  ;;  %8474 = vmatprep.subr.bf16.mxu1 %v13185_v26  ;;  %v3383_v10 = vld [vmem:[#allocation2 + $0x96] sm:$0xff] }
 0x308   : > { %v3586_v53 = vadd.f32 %v3504_v39, %v3258_v56  ;;  %v3050_v48 = vpop.f32.mrb[38].mxu0  ;;  %v3424_v16 = vadd.f32 %v3383_v10, %v3342_v40 }
 0x309   : > { %v3830_v46 = vld [vmem:[#allocation3 + $0x81] sm:$0xff]  ;;  %v3464_v14 = vld [vmem:[#allocation2 + $0x9f] sm:$0xff]  ;;  %3301 = vst [vmem:[#allocation2 + $0xa8] sm:$0xff] %v3260_v12  ;;  %v3051_v50 = vadd.f32 %v3050_v48, %v2781_v22  ;;  %v3052_v27 = vpop.f32.mrb[39].mxu0 }
 0x30a   : > { %v2790_v18 = vpop.f32.mrb[42].mxu1  ;;  %4140 = vmatprep.mubr.f32.mxu1 %v3830_v46  ;;  %v3627_v58 = vmul.f32 0.25, %v3586_v53  ;;  %v3505_v24 = vadd.f32 %v3464_v14, %v3423_v59  ;;  %v3343_v47 = vld [vmem:[#allocation2 + $0x9d] sm:$0xff]  ;;  %v3223_v14 = vld [vmem:[#allocation23 + $0x340] sm:$0xff] }
 0x30b   : > { %v2792_v33 = vpop.f32.mrb[43].mxu1  ;;  %4141 = vmatmul.mubr.f32.gmra.mrb[108].mxu1 %v12303_v54  ;;  %v3178_v63 = vmax.f32 %v3051_v50, 0.0  ;;  %v3384_v29 = vld [vmem:[#allocation2 + $0x9e] sm:$0xff]  ;;  %v2791_v2 = vadd.f32 %v12298_v7, %v2790_v18 }
 0x30c   : > { %v3710_v31 = vmul.f32 %v3669_v57, %v3627_v58  ;;  %v3587_v9 = vadd.f32 %v3505_v24, %v3259_v25  ;;  %v3994_v25 = vld [vmem:[#allocation11 + $0x1b0] sm:$0xff]  ;;  %v3425_v17 = vadd.f32 %v3384_v29, %v3343_v47 }
 0x30d   : > { %v3261_v36 = vmul.f32 %v3220_v44, %v3178_v63  ;;  %v8475_v38 = vpack.c.bf16 %v3995_v28, %v3994_v25  ;;  %v3998_v47 = vld [vmem:[#allocation11 + $0x1d0] sm:$0xff] }
 0x30e   : > { %v3831_v15 = vld [vmem:[#allocation3 + $0x89] sm:$0xff]  ;;  %3751 = vst [vmem:[#allocation3 + $0x98] sm:$0xff] %v3710_v31  ;;  %v3628_v56 = vmul.f32 0.25, %v3587_v9 }
 0x30f   : > { %4145 = vmatprep.mubr.f32.mxu1 %v3831_v15  ;;  %3302 = vst [vmem:[#allocation2 + $0xb0] sm:$0xff] %v3261_v36  ;;  %8476 = vmatpush1.bf16.msra.mxu1 %v8475_v38  ;;  %v4001_v38 = vld [vmem:[#allocation11 + $0x1e8] sm:$0xff] }
 0x310   : > { %4146 = vmatmul.mubr.f32.gmra.mrb[110].mxu1 %v12308_v37  ;;  %v3465_v54 = vld [vmem:[#allocation2 + $0xa7] sm:$0xff]  ;;  %v12321_v41 = vmul.f32 %v3670_v42, %v3628_v56  ;;  %8477 = vmatprep.subr.bf16.mxu1 %v13185_v26  ;;  %v3673_v56 = vld [vmem:[#allocation23 + $0x478] sm:$0xff] }
 0x311   : > { %v3506_v1 = vadd.f32 %v3465_v54, %v3424_v16  ;;  %v3344_v52 = vld [vmem:[#allocation2 + $0xa5] sm:$0xff] }
 0x312   : > { %v3055_v61 = vpop.f32.mrb[40].mxu0  ;;  %v2795_v62 = vpop.f32.mrb[44].mxu1  ;;  %3752 = vst [vmem:[#allocation3 + $0xa0] sm:$0xff] %v12321_v41 }
 0x313   : > { %v3056_v49 = vadd.f32 %v3055_v61, %v2786_v45  ;;  %v3057_v20 = vpop.f32.mrb[41].mxu0  ;;  %v2797_v34 = vpop.f32.mrb[45].mxu1  ;;  %v3588_v43 = vadd.f32 %v3506_v1, %v3260_v12  ;;  %v2796_v46 = vadd.f32 %v12298_v7, %v2795_v62  ;;  %v3996_v61 = vld [vmem:[#allocation11 + $0x1c0] sm:$0xff]  ;;  %v3997_v62 = vld [vmem:[#allocation11 + $0x1c8] sm:$0xff] }
 0x314   : > { %v3999_v34 = vld [vmem:[#allocation11 + $0x1d8] sm:$0xff] }
 0x315   : > { %v3179_v8 = vmax.f32 %v3056_v49, 0.0  ;;  %v3832_v37 = vld [vmem:[#allocation3 + $0x91] sm:$0xff]  ;;  %v3629_v55 = vmul.f32 0.25, %v3588_v43 }
 0x316   : > { %v3060_v23 = vpop.f32.mrb[42].mxu0  ;;  %4150 = vmatprep.mubr.f32.mxu1 %v3832_v37  ;;  %v3466_v32 = vld [vmem:[#allocation2 + $0xaf] sm:$0xff] }
 0x317   : > { %v3262_v11 = vmul.f32 %v3221_v3, %v3179_v8  ;;  %v3061_v5 = vadd.f32 %v3060_v23, %v2791_v2  ;;  %v3062_v19 = vpop.f32.mrb[43].mxu0  ;;  %4151 = vmatmul.mubr.f32.gmra.mrb[112].mxu1 %v12313_v30  ;;  %v3507_v35 = vadd.f32 %v3466_v32, %v3425_v17  ;;  %v12326_v39 = vmul.f32 %v3671_v6, %v3629_v55  ;;  %v3385_v30 = vld [vmem:[#allocation2 + $0xa6] sm:$0xff]  ;;  %v3386_v24 = vld [vmem:[#allocation2 + $0xae] sm:$0xff] }
 0x318   : > { %v2800_v51 = vpop.f32.mrb[46].mxu1  ;;  %v3426_v0 = vadd.f32 %v3385_v30, %v3344_v52  ;;  %v3345_v33 = vld [vmem:[#allocation2 + $0xad] sm:$0xff]  ;;  %v8478_v2 = vpack.c.bf16 %v3997_v62, %v3996_v61  ;;  %v8481_v17 = vpack.c.bf16 %v3999_v34, %v3998_v47  ;;  %v4003_v52 = vld [vmem:[#allocation11 + $0x1f8] sm:$0xff] }
 0x319   : > { %v2802_v13 = vpop.f32.mrb[47].mxu1  ;;  %3303 = vst [vmem:[#allocation2 + $0xb8] sm:$0xff] %v3262_v11  ;;  %v3180_v21 = vmax.f32 %v3061_v5, 0.0  ;;  %v3589_v22 = vadd.f32 %v3507_v35, %v3261_v36  ;;  %v3833_v53 = vld [vmem:[#allocation3 + $0x99] sm:$0xff]  ;;  %3753 = vst [vmem:[#allocation3 + $0xa8] sm:$0xff] %v12326_v39  ;;  %v3427_v36 = vadd.f32 %v3386_v24, %v3345_v33  ;;  %v3224_v3 = vld [vmem:[#allocation23 + $0x348] sm:$0xff] }
 0x31a   : > { %4155 = vmatprep.mubr.f32.mxu1 %v3833_v53  ;;  %v3674_v55 = vld [vmem:[#allocation23 + $0x480] sm:$0xff]  ;;  %8479 = vmatpush1.bf16.msra.mxu1 %v8478_v2  ;;  %v3676_v47 = vld [vmem:[#allocation23 + $0x490] sm:$0xff] }
 0x31b   : > { %v3263_v12 = vmul.f32 %v3222_v60, %v3180_v21  ;;  %v3630_v59 = vmul.f32 0.25, %v3589_v22  ;;  %4156 = vmatmul.mubr.f32.gmra.mrb[114].mxu1 %v3710_v31  ;;  %v2801_v31 = vadd.f32 %v12298_v7, %v2800_v51  ;;  %8480 = vmatprep.subr.bf16.mxu1 %v13185_v26  ;;  %v4000_v51 = vld [vmem:[#allocation11 + $0x1e0] sm:$0xff] }
 0x31c   : > { %v8484_v53 = vpack.c.bf16 %v4001_v38, %v4000_v51 }
 0x31d   : > { %3304 = vst [vmem:[#allocation2 + $0xc0] sm:$0xff] %v3263_v12  ;;  %v12331_v57 = vmul.f32 %v3672_v4, %v3630_v59  ;;  %v4002_v4 = vld [vmem:[#allocation11 + $0x1f0] sm:$0xff] }
 0x31e   : > { %8482 = vmatpush1.bf16.msra.mxu1 %v8481_v17  ;;  %v8487_v33 = vpack.c.bf16 %v4003_v52, %v4002_v4 }
 0x31f   : > { %v3065_v48 = vpop.f32.mrb[44].mxu0  ;;  %3754 = vst [vmem:[#allocation3 + $0xb0] sm:$0xff] %v12331_v57  ;;  %8483 = vmatprep.subr.bf16.mxu1 %v13185_v26 }
 0x320   : > { %v3066_v58 = vadd.f32 %v3065_v48, %v2796_v46  ;;  %v3067_v50 = vpop.f32.mrb[45].mxu0  ;;  %v3467_v44 = vld [vmem:[#allocation2 + $0xb7] sm:$0xff]  ;;  %v3834_v10 = vld [vmem:[#allocation3 + $0xa1] sm:$0xff] }
 0x321   : > { %v2805_v18 = vpop.f32.mrb[48].mxu1  ;;  %v3508_v63 = vadd.f32 %v3467_v44, %v3426_v0  ;;  %4160 = vmatprep.mubr.f32.mxu1 %v3834_v10  ;;  %v3387_v37 = vld [vmem:[#allocation2 + $0xb6] sm:$0xff] }
 0x322   : > { %v2807_v27 = vpop.f32.mrb[49].mxu1  ;;  %v3181_v40 = vmax.f32 %v3066_v58, 0.0  ;;  %4161 = vmatmul.mubr.f32.gmra.mrb[116].mxu1 %v12321_v41  ;;  %v3346_v41 = vld [vmem:[#allocation2 + $0xb5] sm:$0xff]  ;;  %v2806_v28 = vadd.f32 %v12298_v7, %v2805_v18 }
 0x323   : > { %v3590_v9 = vadd.f32 %v3508_v63, %v3262_v11  ;;  %v3428_v11 = vadd.f32 %v3387_v37, %v3346_v41  ;;  %v3675_v27 = vld [vmem:[#allocation23 + $0x488] sm:$0xff]  ;;  %8485 = vmatpush1.bf16.msra.mxu1 %v8484_v53  ;;  %v3227_v37 = vld [vmem:[#allocation23 + $0x360] sm:$0xff] }
 0x324   : > { %v3264_v15 = vmul.f32 %v3223_v14, %v3181_v40  ;;  %v3468_v42 = vld [vmem:[#allocation2 + $0xbf] sm:$0xff]  ;;  %8486 = vmatprep.subr.bf16.mxu1 %v13185_v26 }
 0x325   : > { %v3631_v45 = vmul.f32 0.25, %v3590_v9  ;;  %v3509_v16 = vadd.f32 %v3468_v42, %v3427_v36  ;;  %v3070_v54 = vpop.f32.mrb[46].mxu0  ;;  %v3347_v59 = vld [vmem:[#allocation2 + $0xbd] sm:$0xff] }
 0x326   : > { %3305 = vst [vmem:[#allocation2 + $0xc8] sm:$0xff] %v3264_v15  ;;  %v3071_v29 = vadd.f32 %v3070_v54, %v2801_v31  ;;  %v3072_v49 = vpop.f32.mrb[47].mxu0  ;;  %v3835_v6 = vld [vmem:[#allocation3 + $0xa9] sm:$0xff]  ;;  %v3388_v48 = vld [vmem:[#allocation2 + $0xbe] sm:$0xff] }
 0x327   : > { %v2810_v1 = vpop.f32.mrb[50].mxu1  ;;  %v3591_v43 = vadd.f32 %v3509_v16, %v3263_v12  ;;  %v12336_v8 = vmul.f32 %v3673_v56, %v3631_v45  ;;  %4165 = vmatprep.mubr.f32.mxu1 %v3835_v6  ;;  %v3225_v12 = vld [vmem:[#allocation23 + $0x350] sm:$0xff]  ;;  %v3429_v10 = vadd.f32 %v3388_v48, %v3347_v59  ;;  %v3226_v31 = vld [vmem:[#allocation23 + $0x358] sm:$0xff]  ;;  %8488 = vmatpush1.bf16.msra.mxu1 %v8487_v33  ;;  %v3228_v59 = vld [vmem:[#allocation23 + $0x368] sm:$0xff] }
 0x328   : > { %v2812_v20 = vpop.f32.mrb[51].mxu1  ;;  %v3182_v25 = vmax.f32 %v3071_v29, 0.0  ;;  %4166 = vmatmul.mubr.f32.gmra.mrb[118].mxu1 %v12326_v39  ;;  %v2811_v46 = vadd.f32 %v12298_v7, %v2810_v1  ;;  %8585 = vmatprep.subr.bf16.mxu1 %v13185_v26 }
 0x329   : > { %v3632_v23 = vmul.f32 0.25, %v3591_v43  ;;  %3755 = vst [vmem:[#allocation3 + $0xb8] sm:$0xff] %v12336_v8 }
 0x32a   : > { %v3265_v32 = vmul.f32 %v3224_v3, %v3182_v25 }
 0x32b   : > { %v3075_v5 = vpop.f32.mrb[48].mxu0  ;;  %v12342_v13 = vmul.f32 %v3674_v55, %v3632_v23 }
 0x32c   : > { %3306 = vst [vmem:[#allocation2 + $0xd0] sm:$0xff] %v3265_v32  ;;  %v3076_v60 = vadd.f32 %v3075_v5, %v2806_v28  ;;  %v3077_v21 = vpop.f32.mrb[49].mxu0 }
 0x32d   : > { %v2815_v19 = vpop.f32.mrb[52].mxu1  ;;  %v3469_v35 = vld [vmem:[#allocation2 + $0xc7] sm:$0xff]  ;;  %3756 = vst [vmem:[#allocation3 + $0xc0] sm:$0xff] %v12342_v13 }
 0x32e   : > { %v2817_v22 = vpop.f32.mrb[53].mxu1  ;;  %v3510_v39 = vadd.f32 %v3469_v35, %v3428_v11  ;;  %v3183_v30 = vmax.f32 %v3076_v60, 0.0  ;;  %v3348_v45 = vld [vmem:[#allocation2 + $0xc5] sm:$0xff]  ;;  %v2816_v61 = vadd.f32 %v12298_v7, %v2815_v19 }
 0x32f   : > { %v3389_v16 = vld [vmem:[#allocation2 + $0xc6] sm:$0xff] }
 0x330   : > { %v3592_v18 = vadd.f32 %v3510_v39, %v3264_v15  ;;  %v3266_v0 = vmul.f32 %v3225_v12, %v3183_v30  ;;  %v3080_v58 = vpop.f32.mrb[50].mxu0  ;;  %v3836_v50 = vld [vmem:[#allocation3 + $0xb1] sm:$0xff]  ;;  %v3430_v62 = vadd.f32 %v3389_v16, %v3348_v45  ;;  %v3679_v16 = vld [vmem:[#allocation23 + $0x4a8] sm:$0xff] }
 0x331   : > { %v3081_v44 = vadd.f32 %v3080_v58, %v2811_v46  ;;  %v3082_v63 = vpop.f32.mrb[51].mxu0  ;;  %4170 = vmatprep.mubr.f32.mxu1 %v3836_v50  ;;  %v3678_v46 = vld [vmem:[#allocation23 + $0x4a0] sm:$0xff] }
 0x332   : > { %v2820_v14 = vpop.f32.mrb[54].mxu1  ;;  %v3633_v24 = vmul.f32 0.25, %v3592_v18  ;;  %3307 = vst [vmem:[#allocation2 + $0xd8] sm:$0xff] %v3266_v0  ;;  %4171 = vmatmul.mubr.f32.gmra.mrb[120].mxu1 %v12331_v57  ;;  %v3229_v63 = vld [vmem:[#allocation23 + $0x370] sm:$0xff] }
 0x333   : > { %v2822_v40 = vpop.f32.mrb[55].mxu1  ;;  %v3470_v9 = vld [vmem:[#allocation2 + $0xcf] sm:$0xff]  ;;  %v3184_v36 = vmax.f32 %v3081_v44, 0.0  ;;  %v2821_v11 = vadd.f32 %v12298_v7, %v2820_v14 }
 0x334   : > { %v12349_v15 = vmul.f32 %v3675_v27, %v3633_v24  ;;  %v3511_v42 = vadd.f32 %v3470_v9, %v3429_v10  ;;  %v3837_v56 = vld [vmem:[#allocation3 + $0xb9] sm:$0xff]  ;;  %v3349_v2 = vld [vmem:[#allocation2 + $0xcd] sm:$0xff] }
 0x335   : > { %v3267_v54 = vmul.f32 %v3226_v31, %v3184_v36  ;;  %4175 = vmatprep.mubr.f32.mxu1 %v3837_v56  ;;  %v3390_v34 = vld [vmem:[#allocation2 + $0xce] sm:$0xff] }
 0x336   : > { %3757 = vst [vmem:[#allocation3 + $0xc8] sm:$0xff] %v12349_v15  ;;  %v3593_v1 = vadd.f32 %v3511_v42, %v3265_v32  ;;  %4176 = vmatmul.mubr.f32.gmra.mrb[122].mxu1 %v12336_v8  ;;  %v3431_v23 = vadd.f32 %v3390_v34, %v3349_v2  ;;  %v3677_v8 = vld [vmem:[#allocation23 + $0x498] sm:$0xff] }
 0x337   : > { %3308 = vst [vmem:[#allocation2 + $0xe0] sm:$0xff] %v3267_v54 }
 0x338   : > { %v3634_v57 = vmul.f32 0.25, %v3593_v1 }
 0x339   : > { %v3471_v29 = vld [vmem:[#allocation2 + $0xd7] sm:$0xff]  ;;  %v3085_v49 = vpop.f32.mrb[52].mxu0 }
 0x33a   : > { %v3512_v43 = vadd.f32 %v3471_v29, %v3430_v62  ;;  %v3086_v3 = vadd.f32 %v3085_v49, %v2816_v61  ;;  %v3087_v6 = vpop.f32.mrb[53].mxu0  ;;  %v3717_v25 = vmul.f32 %v3676_v47, %v3634_v57  ;;  %v3350_v4 = vld [vmem:[#allocation2 + $0xd5] sm:$0xff]  ;;  %v3230_v62 = vld [vmem:[#allocation23 + $0x378] sm:$0xff] }
 0x33b   : > { %v2825_v20 = vpop.f32.mrb[56].mxu1  ;;  %v3391_v52 = vld [vmem:[#allocation2 + $0xd6] sm:$0xff] }
 0x33c   : > { %v2827_v41 = vpop.f32.mrb[57].mxu1  ;;  %v3594_v28 = vadd.f32 %v3512_v43, %v3266_v0  ;;  %v3185_v55 = vmax.f32 %v3086_v3, 0.0  ;;  %3758 = vst [vmem:[#allocation3 + $0xd0] sm:$0xff] %v3717_v25  ;;  %v2826_v39 = vadd.f32 %v12298_v7, %v2825_v20  ;;  %v3432_v14 = vadd.f32 %v3391_v52, %v3350_v4 }
 0x33d   : > { %v3838_v17 = vld [vmem:[#allocation3 + $0xc1] sm:$0xff] }
 0x33e   : > { %4180 = vmatprep.mubr.f32.mxu1 %v3838_v17  ;;  %v3635_v51 = vmul.f32 0.25, %v3594_v28  ;;  %v3472_v38 = vld [vmem:[#allocation2 + $0xdf] sm:$0xff]  ;;  %v3268_v32 = vmul.f32 %v3227_v37, %v3185_v55 }
 0x33f   : > { %4181 = vmatmul.mubr.f32.gmra.mrb[124].mxu1 %v12342_v13  ;;  %v3513_v5 = vadd.f32 %v3472_v38, %v3431_v23  ;;  %v3351_v56 = vld [vmem:[#allocation2 + $0xdd] sm:$0xff] }
 0x340   : > { %3309 = vst [vmem:[#allocation2 + $0xe8] sm:$0xff] %v3268_v32  ;;  %v3718_v19 = vmul.f32 %v3677_v8, %v3635_v51  ;;  %v3392_v45 = vld [vmem:[#allocation2 + $0xde] sm:$0xff]  ;;  %v3680_v8 = vld [vmem:[#allocation23 + $0x4b0] sm:$0xff] }
 0x341   : > { %v3595_v35 = vadd.f32 %v3513_v5, %v3267_v54  ;;  %v3090_v60 = vpop.f32.mrb[54].mxu0  ;;  %v3433_v61 = vadd.f32 %v3392_v45, %v3351_v56 }
 0x342   : > { %v3091_v22 = vadd.f32 %v3090_v60, %v2821_v11  ;;  %v3092_v53 = vpop.f32.mrb[55].mxu0  ;;  %3759 = vst [vmem:[#allocation3 + $0xd8] sm:$0xff] %v3718_v19 }
 0x343   : > { %v2830_v21 = vpop.f32.mrb[58].mxu1  ;;  %v3636_v30 = vmul.f32 0.25, %v3595_v35  ;;  %v3839_v18 = vld [vmem:[#allocation3 + $0xc9] sm:$0xff]  ;;  %v3231_v35 = vld [vmem:[#allocation23 + $0x380] sm:$0xff] }
 0x344   : > { %v2832_v12 = vpop.f32.mrb[59].mxu1  ;;  %v3186_v48 = vmax.f32 %v3091_v22, 0.0  ;;  %4185 = vmatprep.mubr.f32.mxu1 %v3839_v18  ;;  %v2831_v42 = vadd.f32 %v12298_v7, %v2830_v21 }
 0x345   : > { %v3095_v13 = vpop.f32.mrb[56].mxu0  ;;  %v12358_v58 = vmul.f32 %v3678_v46, %v3636_v30  ;;  %4186 = vmatmul.mubr.f32.gmra.mrb[126].mxu1 %v12349_v15 }
 0x346   : > { %v3269_v50 = vmul.f32 %v3228_v59, %v3186_v48  ;;  %v3096_v27 = vadd.f32 %v3095_v13, %v2826_v39  ;;  %v3097_v33 = vpop.f32.mrb[57].mxu0 }
 0x347   : > { %v2835_v0 = vpop.f32.mrb[60].mxu1  ;;  %v3473_v44 = vld [vmem:[#allocation2 + $0xe7] sm:$0xff]  ;;  %3760 = vst [vmem:[#allocation3 + $0xe0] sm:$0xff] %v12358_v58 }
 0x348   : > { %v2837_v24 = vpop.f32.mrb[61].mxu1  ;;  %v3514_v40 = vadd.f32 %v3473_v44, %v3432_v14  ;;  %3310 = vst [vmem:[#allocation2 + $0xf0] sm:$0xff] %v3269_v50  ;;  %v3187_v10 = vmax.f32 %v3096_v27, 0.0  ;;  %v3352_v2 = vld [vmem:[#allocation2 + $0xe5] sm:$0xff]  ;;  %v2836_v41 = vadd.f32 %v12298_v7, %v2835_v0  ;;  %v3232_v33 = vld [vmem:[#allocation23 + $0x388] sm:$0xff] }
 0x349   : > { %v3840_v31 = vld [vmem:[#allocation3 + $0xd1] sm:$0xff]  ;;  %v3393_v34 = vld [vmem:[#allocation2 + $0xe6] sm:$0xff] }
 0x34a   : > { %v3596_v9 = vadd.f32 %v3514_v40, %v3268_v32  ;;  %v3270_v36 = vmul.f32 %v3229_v63, %v3187_v10  ;;  %4190 = vmatprep.mubr.f32.mxu1 %v3840_v31 }
 0x34b   : > { %4191 = vmatmul.mubr.f32.gmra.mrb[128].mxu1 %v3717_v25  ;;  %v3434_v25 = vadd.f32 %v3393_v34, %v3352_v2 }
 0x34c   : > { %v3637_v54 = vmul.f32 0.25, %v3596_v9  ;;  %3311 = vst [vmem:[#allocation2 + $0xf8] sm:$0xff] %v3270_v36  ;;  %v3100_v15 = vpop.f32.mrb[58].mxu0  ;;  %v3682_v9 = vld [vmem:[#allocation23 + $0x4c0] sm:$0xff] }
 0x34d   : > { %v3101_v57 = vadd.f32 %v3100_v15, %v2831_v42  ;;  %v3102_v47 = vpop.f32.mrb[59].mxu0 }
 0x34e   : > { %v2840_v1 = vpop.f32.mrb[62].mxu1  ;;  %v3841_v49 = vld [vmem:[#allocation3 + $0xd9] sm:$0xff]  ;;  %v12363_v20 = vmul.f32 %v3679_v16, %v3637_v54 }
 0x34f   : > { %v2842_v29 = vpop.f32.mrb[63].mxu1  ;;  %v3474_v43 = vld [vmem:[#allocation2 + $0xef] sm:$0xff]  ;;  %4195 = vmatprep.mubr.f32.mxu1 %v3841_v49  ;;  %v3188_v6 = vmax.f32 %v3101_v57, 0.0  ;;  %v2841_v12 = vadd.f32 %v12298_v7, %v2840_v1 }
 0x350   : > { %v3515_v3 = vadd.f32 %v3474_v43, %v3433_v61  ;;  %4196 = vmatmul.mubr.f32.gmra.mrb[130].mxu1 %v3718_v19  ;;  %3761 = vst [vmem:[#allocation3 + $0xe8] sm:$0xff] %v12363_v20  ;;  %v3681_v19 = vld [vmem:[#allocation23 + $0x4b8] sm:$0xff]  ;;  %v3353_v53 = vld [vmem:[#allocation2 + $0xed] sm:$0xff]  ;;  %v3233_v57 = vld [vmem:[#allocation23 + $0x390] sm:$0xff] }
 0x351   : > { %v3271_v28 = vmul.f32 %v3230_v62, %v3188_v6  ;;  %v3394_v39 = vld [vmem:[#allocation2 + $0xee] sm:$0xff] }
 0x352   : > { %v3597_v37 = vadd.f32 %v3515_v3, %v3269_v50  ;;  %v3435_v30 = vadd.f32 %v3394_v39, %v3353_v53  ;;  %v3683_v6 = vld [vmem:[#allocation23 + $0x4c8] sm:$0xff]  ;;  %v3684_v39 = vld [vmem:[#allocation23 + $0x4d0] sm:$0xff] }
 0x353   : > { %v3475_v55 = vld [vmem:[#allocation2 + $0xf7] sm:$0xff]  ;;  %v3105_v17 = vpop.f32.mrb[60].mxu0  ;;  %3312 = vst [vmem:[#allocation2 + $0x100] sm:$0xff] %v3271_v28 }
 0x354   : > { %v3638_v51 = vmul.f32 0.25, %v3597_v37  ;;  %v3516_v38 = vadd.f32 %v3475_v55, %v3434_v25  ;;  %v3106_v32 = vadd.f32 %v3105_v17, %v2836_v41  ;;  %v3107_v11 = vpop.f32.mrb[61].mxu0  ;;  %v3354_v24 = vld [vmem:[#allocation2 + $0xf5] sm:$0xff] }
 0x355   : > { %v2845_v23 = vpop.f32.mrb[64].mxu1  ;;  %v3395_v44 = vld [vmem:[#allocation2 + $0xf6] sm:$0xff] }
 0x356   : > { %v2847_v5 = vpop.f32.mrb[65].mxu1  ;;  %v3598_v60 = vadd.f32 %v3516_v38, %v3270_v36  ;;  %v3189_v21 = vmax.f32 %v3106_v32, 0.0  ;;  %v3721_v22 = vmul.f32 %v3680_v8, %v3638_v51  ;;  %v2846_v40 = vadd.f32 %v12298_v7, %v2845_v23  ;;  %v3234_v38 = vld [vmem:[#allocation23 + $0x398] sm:$0xff] }
 0x357   : > { %v3842_v46 = vld [vmem:[#allocation3 + $0xe1] sm:$0xff]  ;;  %v3436_v42 = vadd.f32 %v3395_v44, %v3354_v24 }
 0x358   : > { %v3639_v4 = vmul.f32 0.25, %v3598_v60  ;;  %v3272_v52 = vmul.f32 %v3231_v35, %v3189_v21  ;;  %4200 = vmatprep.mubr.f32.mxu1 %v3842_v46  ;;  %3762 = vst [vmem:[#allocation3 + $0xf0] sm:$0xff] %v3721_v22 }
 0x359   : > { %4201 = vmatmul.mubr.f32.gmra.mrb[132].mxu1 %v12358_v58 }
 0x35a   : > { %3313 = vst [vmem:[#allocation2 + $0x108] sm:$0xff] %v3272_v52  ;;  %v3110_v59 = vpop.f32.mrb[62].mxu0  ;;  %v12369_v18 = vmul.f32 %v3681_v19, %v3639_v4  ;;  %v3476_v13 = vld [vmem:[#allocation2 + $0xff] sm:$0xff] }
 0x35b   : > { %v3111_v0 = vadd.f32 %v3110_v59, %v2841_v12  ;;  %v3112_v14 = vpop.f32.mrb[63].mxu0  ;;  %v3517_v27 = vadd.f32 %v3476_v13, %v3435_v30  ;;  %v3355_v49 = vld [vmem:[#allocation2 + $0xfd] sm:$0xff]  ;;  %v3235_v13 = vld [vmem:[#allocation23 + $0x3a0] sm:$0xff] }
 0x35c   : > { %v2850_v48 = vpop.f32.mrb[66].mxu1  ;;  %3763 = vst [vmem:[#allocation3 + $0xf8] sm:$0xff] %v12369_v18  ;;  %v3396_v2 = vld [vmem:[#allocation2 + $0xfe] sm:$0xff] }
 0x35d   : > { %v2852_v50 = vpop.f32.mrb[67].mxu1  ;;  %v3190_v63 = vmax.f32 %v3111_v0, 0.0  ;;  %v3599_v58 = vadd.f32 %v3517_v27, %v3271_v28  ;;  %v2851_v43 = vadd.f32 %v12298_v7, %v2850_v48  ;;  %v3437_v37 = vadd.f32 %v3396_v2, %v3355_v49 }
 0x35e   : > { %v3115_v56 = vpop.f32.mrb[64].mxu0 }
 0x35f   : > { %v3273_v10 = vmul.f32 %v3232_v33, %v3190_v63  ;;  %v3843_v31 = vld [vmem:[#allocation3 + $0xe9] sm:$0xff]  ;;  %v3640_v36 = vmul.f32 0.25, %v3599_v58  ;;  %v3116_v54 = vadd.f32 %v3115_v56, %v2846_v40  ;;  %v3117_v15 = vpop.f32.mrb[65].mxu0 }
 0x360   : > { %v2855_v45 = vpop.f32.mrb[68].mxu1  ;;  %4205 = vmatprep.mubr.f32.mxu1 %v3843_v31 }
 0x361   : > { %v3477_v16 = vld [vmem:[#allocation2 + $0x107] sm:$0xff]  ;;  %3314 = vst [vmem:[#allocation2 + $0x110] sm:$0xff] %v3273_v10  ;;  %v2857_v1 = vpop.f32.mrb[69].mxu1  ;;  %4206 = vmatmul.mubr.f32.gmra.mrb[134].mxu1 %v12363_v20  ;;  %v3723_v62 = vmul.f32 %v3682_v9, %v3640_v36  ;;  %v3191_v47 = vmax.f32 %v3116_v54, 0.0  ;;  %v2856_v60 = vadd.f32 %v12298_v7, %v2855_v45 }
 0x362   : > { %v3518_v61 = vadd.f32 %v3477_v16, %v3436_v42  ;;  %v3356_v32 = vld [vmem:[#allocation2 + $0x105] sm:$0xff]  ;;  %v3236_v54 = vld [vmem:[#allocation23 + $0x3a8] sm:$0xff] }
 0x363   : > { %v3844_v29 = vld [vmem:[#allocation3 + $0xf1] sm:$0xff]  ;;  %3764 = vst [vmem:[#allocation3 + $0x100] sm:$0xff] %v3723_v62  ;;  %v3274_v3 = vmul.f32 %v3233_v57, %v3191_v47  ;;  %v3397_v11 = vld [vmem:[#allocation2 + $0x106] sm:$0xff] }
 0x364   : > { %v3600_v34 = vadd.f32 %v3518_v61, %v3272_v52  ;;  %4210 = vmatprep.mubr.f32.mxu1 %v3844_v29  ;;  %v3438_v53 = vadd.f32 %v3397_v11, %v3356_v32  ;;  %v3686_v29 = vld [vmem:[#allocation23 + $0x4e0] sm:$0xff]  ;;  %v9586_v32 = vld [vmem:[#allocation9] ss:$0 sm:$0xff] }
 0x365   : > { %4211 = vmatmul.mubr.f32.gmra.mrb[136].mxu1 %v3721_v22  ;;  %3315 = vst [vmem:[#allocation2 + $0x118] sm:$0xff] %v3274_v3 }
 0x366   : > { %v3641_v41 = vmul.f32 0.25, %v3600_v34 }
 0x368   : > { %v3120_v25 = vpop.f32.mrb[66].mxu0  ;;  %v3478_v28 = vld [vmem:[#allocation2 + $0x10f] sm:$0xff]  ;;  %v3724_v8 = vmul.f32 %v3683_v6, %v3641_v41 }
 0x369   : > { %v3121_v55 = vadd.f32 %v3120_v25, %v2851_v43  ;;  %v3122_v17 = vpop.f32.mrb[67].mxu0  ;;  %v3519_v51 = vadd.f32 %v3478_v28, %v3437_v37  ;;  %v3357_v14 = vld [vmem:[#allocation2 + $0x10d] sm:$0xff] }
 0x36a   : > { %v2860_v20 = vpop.f32.mrb[70].mxu1  ;;  %3765 = vst [vmem:[#allocation3 + $0x108] sm:$0xff] %v3724_v8  ;;  %v3845_v21 = vld [vmem:[#allocation3 + $0xf9] sm:$0xff]  ;;  %v3398_v50 = vld [vmem:[#allocation2 + $0x10e] sm:$0xff] }
 0x36b   : > { %v2862_v23 = vpop.f32.mrb[71].mxu1  ;;  %v3192_v5 = vmax.f32 %v3121_v55, 0.0  ;;  %v3601_v35 = vadd.f32 %v3519_v51, %v3273_v10  ;;  %4215 = vmatprep.mubr.f32.mxu1 %v3845_v21  ;;  %v2861_v44 = vadd.f32 %v12298_v7, %v2860_v20  ;;  %v3439_v58 = vadd.f32 %v3398_v50, %v3357_v14  ;;  %v3237_v55 = vld [vmem:[#allocation23 + $0x3b0] sm:$0xff] }
 0x36c   : > { %4216 = vmatmul.mubr.f32.gmra.mrb[138].mxu1 %v12369_v18  ;;  %v3479_v12 = vld [vmem:[#allocation2 + $0x117] sm:$0xff] }
 0x36d   : > { %v3275_v22 = vmul.f32 %v3234_v38, %v3192_v5  ;;  %v3642_v19 = vmul.f32 0.25, %v3601_v35  ;;  %v3125_v46 = vpop.f32.mrb[68].mxu0  ;;  %v3520_v52 = vadd.f32 %v3479_v12, %v3438_v53  ;;  %v3685_v18 = vld [vmem:[#allocation23 + $0x4d8] sm:$0xff]  ;;  %v3358_v15 = vld [vmem:[#allocation2 + $0x115] sm:$0xff] }
 0x36e   : > { %v3126_v30 = vadd.f32 %v3125_v46, %v2856_v60  ;;  %v3127_v59 = vpop.f32.mrb[69].mxu0  ;;  %v3399_v1 = vld [vmem:[#allocation2 + $0x116] sm:$0xff]  ;;  %v3687_v5 = vld [vmem:[#allocation23 + $0x4e8] sm:$0xff] }
 0x36f   : > { %3316 = vst [vmem:[#allocation2 + $0x120] sm:$0xff] %v3275_v22  ;;  %v2865_v4 = vpop.f32.mrb[72].mxu1  ;;  %v3725_v0 = vmul.f32 %v3684_v39, %v3642_v19  ;;  %v3602_v27 = vadd.f32 %v3520_v52, %v3274_v3  ;;  %v3440_v34 = vadd.f32 %v3399_v1, %v3358_v15  ;;  %v3238_v52 = vld [vmem:[#allocation23 + $0x3b8] sm:$0xff]  ;;  %v3240_v1 = vld [vmem:[#allocation23 + $0x3c8] sm:$0xff] }
 0x370   : > { %v2867_v48 = vpop.f32.mrb[73].mxu1  ;;  %v3193_v33 = vmax.f32 %v3126_v30, 0.0 }
 0x371   : > { %v3846_v24 = vld [vmem:[#allocation3 + $0x101] sm:$0xff]  ;;  %3766 = vst [vmem:[#allocation3 + $0x110] sm:$0xff] %v3725_v0  ;;  %v3643_v63 = vmul.f32 0.25, %v3602_v27 }
 0x372   : > { %4220 = vmatprep.mubr.f32.mxu1 %v3846_v24  ;;  %v3276_v40 = vmul.f32 %v3235_v13, %v3193_v33 }
 0x373   : > { %4221 = vmatmul.mubr.f32.gmra.mrb[140].mxu1 %v3723_v62  ;;  %v12378_v36 = vmul.f32 %v3685_v18, %v3643_v63  ;;  %v2866_v62 = vadd.f32 %v12298_v7, %v2865_v4  ;;  %v3688_v63 = vld [vmem:[#allocation23 + $0x4f0] sm:$0xff] }
 0x374   : > { %3317 = vst [vmem:[#allocation2 + $0x128] sm:$0xff] %v3276_v40  ;;  %v3130_v31 = vpop.f32.mrb[70].mxu0 }
 0x375   : > { %v3131_v56 = vadd.f32 %v3130_v31, %v2861_v44  ;;  %v3132_v45 = vpop.f32.mrb[71].mxu0  ;;  %3767 = vst [vmem:[#allocation3 + $0x118] sm:$0xff] %v12378_v36 }
 0x376   : > { %v3480_v10 = vld [vmem:[#allocation2 + $0x11f] sm:$0xff]  ;;  %v2870_v9 = vpop.f32.mrb[74].mxu1 }
 0x377   : > { %v3521_v42 = vadd.f32 %v3480_v10, %v3439_v58  ;;  %v2872_v16 = vpop.f32.mrb[75].mxu1  ;;  %v3194_v57 = vmax.f32 %v3131_v56, 0.0  ;;  %v3359_v23 = vld [vmem:[#allocation2 + $0x11d] sm:$0xff]  ;;  %v2871_v11 = vadd.f32 %v9586_v32, %v2870_v9  ;;  %v3239_v10 = vld [vmem:[#allocation23 + $0x3c0] sm:$0xff] }
 0x378   : > { %v3847_v47 = vld [vmem:[#allocation3 + $0x109] sm:$0xff]  ;;  %v3400_v51 = vld [vmem:[#allocation2 + $0x11e] sm:$0xff] }
 0x379   : > { %v3603_v61 = vadd.f32 %v3521_v42, %v3275_v22  ;;  %v3277_v2 = vmul.f32 %v3236_v54, %v3194_v57  ;;  %4225 = vmatprep.mubr.f32.mxu1 %v3847_v47  ;;  %v3135_v43 = vpop.f32.mrb[72].mxu0  ;;  %v3441_v60 = vadd.f32 %v3400_v51, %v3359_v23 }
 0x37a   : > { %4226 = vmatmul.mubr.f32.gmra.mrb[142].mxu1 %v3724_v8  ;;  %v3136_v41 = vadd.f32 %v3135_v43, %v2866_v62  ;;  %v3137_v37 = vpop.f32.mrb[73].mxu0 }
 0x37b   : > { %v3644_v49 = vmul.f32 0.25, %v3603_v61  ;;  %v2875_v3 = vpop.f32.mrb[76].mxu1  ;;  %v3481_v6 = vld [vmem:[#allocation2 + $0x127] sm:$0xff]  ;;  %3318 = vst [vmem:[#allocation2 + $0x130] sm:$0xff] %v3277_v2  ;;  %v3241_v37 = vld [vmem:[#allocation23 + $0x3d0] sm:$0xff] }
 0x37c   : > { %v2877_v25 = vpop.f32.mrb[77].mxu1  ;;  %v3522_v28 = vadd.f32 %v3481_v6, %v3440_v34  ;;  %v3195_v17 = vmax.f32 %v3136_v41, 0.0  ;;  %v3848_v7 = vld [vmem:[#allocation3 + $0x111] sm:$0xff]  ;;  %v2876_v39 = vadd.f32 %v9586_v32, %v2875_v3  ;;  %v3360_v59 = vld [vmem:[#allocation2 + $0x125] sm:$0xff] }
 0x37d   : > { %v12382_v20 = vmul.f32 %v3686_v29, %v3644_v49  ;;  %4230 = vmatprep.mubr.f32.mxu1 %v3848_v7  ;;  %v3401_v48 = vld [vmem:[#allocation2 + $0x126] sm:$0xff] }
 0x37e   : > { %v3604_v38 = vadd.f32 %v3522_v28, %v3276_v40  ;;  %v3278_v8 = vmul.f32 %v3237_v55, %v3195_v17  ;;  %4231 = vmatmul.mubr.f32.gmra.mrb[144].mxu1 %v3725_v0  ;;  %v3442_v58 = vadd.f32 %v3401_v48, %v3360_v59  ;;  %v5332_v28 = vld [vmem:[#allocation14] sm:$0xff]  ;;  %v5333_v55 = vld [vmem:[#allocation14 + $0x8] sm:$0xff] }
 0x37f   : > { %3768 = vst [vmem:[#allocation3 + $0x120] sm:$0xff] %v12382_v20 }
 0x380   : > { %v3645_v35 = vmul.f32 0.25, %v3604_v38  ;;  %3319 = vst [vmem:[#allocation2 + $0x138] sm:$0xff] %v3278_v8  ;;  %v8490_v38 = vpack.c.bf16 %v5333_v55, %v5332_v28  ;;  %v3860_v28 = vld [vmem:[#allocation3 + $0x3a] sm:$0xff]  ;;  %v3902_v55 = vld [vmem:[#allocation3 + $0x43] sm:$0xff] }
 0x382   : > { %v3140_v21 = vpop.f32.mrb[74].mxu0  ;;  %v3482_v22 = vld [vmem:[#allocation2 + $0x12f] sm:$0xff]  ;;  %v12385_v46 = vmul.f32 %v3687_v5, %v3645_v35  ;;  %8491 = vmatpush1.bf16.msra.mxu0 %v8490_v38 }
 0x383   : > { %v3141_v19 = vadd.f32 %v3140_v21, %v2871_v11  ;;  %v3142_v53 = vpop.f32.mrb[75].mxu0  ;;  %v3523_v4 = vadd.f32 %v3482_v22, %v3441_v60  ;;  %v3361_v62 = vld [vmem:[#allocation2 + $0x12d] sm:$0xff]  ;;  %8492 = vmatprep.subr.bf16.mxu0 %v13185_v26 }
 0x384   : > { %v2880_v12 = vpop.f32.mrb[78].mxu1  ;;  %3769 = vst [vmem:[#allocation3 + $0x128] sm:$0xff] %v12385_v46  ;;  %v3402_v47 = vld [vmem:[#allocation2 + $0x12e] sm:$0xff]  ;;  %v3690_v60 = vld [vmem:[#allocation23 + $0x500] sm:$0xff] }
 0x385   : > { %v2882_v30 = vpop.f32.mrb[79].mxu1  ;;  %v3196_v13 = vmax.f32 %v3141_v19, 0.0  ;;  %v3605_v0 = vadd.f32 %v3523_v4, %v3277_v2  ;;  %v2881_v44 = vadd.f32 %v9586_v32, %v2880_v12  ;;  %v3689_v2 = vld [vmem:[#allocation23 + $0x4f8] sm:$0xff]  ;;  %v3443_v3 = vadd.f32 %v3402_v47, %v3361_v62  ;;  %v3691_v4 = vld [vmem:[#allocation23 + $0x508] sm:$0xff] }
 0x386   : > { %v3849_v14 = vld [vmem:[#allocation3 + $0x119] sm:$0xff]  ;;  %v3145_v50 = vpop.f32.mrb[76].mxu0 }
 0x387   : > { %4235 = vmatprep.mubr.f32.mxu1 %v3849_v14  ;;  %v3279_v27 = vmul.f32 %v3238_v52, %v3196_v13  ;;  %v3146_v33 = vadd.f32 %v3145_v50, %v2876_v39  ;;  %v3147_v24 = vpop.f32.mrb[77].mxu0  ;;  %v3646_v40 = vmul.f32 0.25, %v3605_v0  ;;  %v3483_v9 = vld [vmem:[#allocation2 + $0x137] sm:$0xff] }
 0x388   : > { %v2885_v18 = vpop.f32.mrb[80].mxu1  ;;  %4236 = vmatmul.mubr.f32.gmra.mrb[146].mxu1 %v12378_v36  ;;  %v3524_v56 = vadd.f32 %v3483_v9, %v3442_v58  ;;  %v3362_v7 = vld [vmem:[#allocation2 + $0x135] sm:$0xff] }
 0x389   : > { %v2887_v31 = vpop.f32.mrb[81].mxu1  ;;  %3320 = vst [vmem:[#allocation2 + $0x140] sm:$0xff] %v3279_v27  ;;  %v3197_v42 = vmax.f32 %v3146_v33, 0.0  ;;  %v12389_v16 = vmul.f32 %v3688_v63, %v3646_v40  ;;  %v2886_v57 = vadd.f32 %v9586_v32, %v2885_v18  ;;  %v3403_v23 = vld [vmem:[#allocation2 + $0x136] sm:$0xff] }
 0x38a   : > { %v3150_v45 = vpop.f32.mrb[78].mxu0  ;;  %v3606_v36 = vadd.f32 %v3524_v56, %v3278_v8  ;;  %v3444_v5 = vadd.f32 %v3403_v23, %v3362_v7  ;;  %v5335_v18 = vld [vmem:[#allocation14 + $0x18] sm:$0xff]  ;;  %v5342_v23 = vld [vmem:[#allocation14 + $0x50] sm:$0xff] }
 0x38b   : > { %v3280_v54 = vmul.f32 %v3239_v10, %v3197_v42  ;;  %v3151_v15 = vadd.f32 %v3150_v45, %v2881_v44  ;;  %v3152_v61 = vpop.f32.mrb[79].mxu0  ;;  %v3850_v29 = vld [vmem:[#allocation3 + $0x121] sm:$0xff]  ;;  %3770 = vst [vmem:[#allocation3 + $0x130] sm:$0xff] %v12389_v16  ;;  %v3693_v42 = vld [vmem:[#allocation23 + $0x518] sm:$0xff]  ;;  %v3903_v7 = vld [vmem:[#allocation3 + $0x4b] sm:$0xff] }
 0x38c   : > { %4240 = vmatprep.mubr.f32.mxu1 %v3850_v29  ;;  %v3647_v34 = vmul.f32 0.25, %v3606_v36  ;;  %v5334_v44 = vld [vmem:[#allocation14 + $0x10] sm:$0xff]  ;;  %v5339_v29 = vld [vmem:[#allocation14 + $0x38] sm:$0xff] }
 0x38d   : > { %3321 = vst [vmem:[#allocation2 + $0x148] sm:$0xff] %v3280_v54  ;;  %v3198_v49 = vmax.f32 %v3151_v15, 0.0  ;;  %4241 = vmatmul.mubr.f32.gmra.mrb[148].mxu1 %v12382_v20  ;;  %v8493_v40 = vpack.c.bf16 %v5335_v18, %v5334_v44  ;;  %v5336_v15 = vld [vmem:[#allocation14 + $0x20] sm:$0xff]  ;;  %v5338_v36 = vld [vmem:[#allocation14 + $0x30] sm:$0xff] }
 0x38e   : > { %v3155_v43 = vpop.f32.mrb[80].mxu0  ;;  %v3730_v51 = vmul.f32 %v3689_v2, %v3647_v34  ;;  %v3899_v2 = vld [vmem:[#allocation3 + $0x2b] sm:$0xff]  ;;  %v3910_v44 = vld [vmem:[#allocation3 + $0x83] sm:$0xff]  ;;  %v5352_v18 = vld [vmem:[#allocation14 + $0xa0] sm:$0xff] }
 0x38f   : > { %v3281_v6 = vmul.f32 %v3240_v1, %v3198_v49  ;;  %v3156_v41 = vadd.f32 %v3155_v43, %v2886_v57  ;;  %v3157_v25 = vpop.f32.mrb[81].mxu0  ;;  %8494 = vmatpush1.bf16.msra.mxu0 %v8493_v40  ;;  %v5337_v1 = vld [vmem:[#allocation14 + $0x28] sm:$0xff]  ;;  %v8499_v49 = vpack.c.bf16 %v5339_v29, %v5338_v36  ;;  %v3858_v34 = vld [vmem:[#allocation3 + $0x2a] sm:$0xff]  ;;  %v3900_v43 = vld [vmem:[#allocation3 + $0x33] sm:$0xff] }
 0x390   : > { %v3484_v17 = vld [vmem:[#allocation2 + $0x13f] sm:$0xff]  ;;  %3771 = vst [vmem:[#allocation3 + $0x138] sm:$0xff] %v3730_v51  ;;  %8495 = vmatprep.subr.bf16.mxu0 %v13185_v26  ;;  %v8496_v61 = vpack.c.bf16 %v5337_v1, %v5336_v15  ;;  %v3914_v15 = vld [vmem:[#allocation3 + $0xa3] sm:$0xff] }
 0x391   : > { %v3525_v32 = vadd.f32 %v3484_v17, %v3443_v3  ;;  %3322 = vst [vmem:[#allocation2 + $0x150] sm:$0xff] %v3281_v6  ;;  %v3199_v11 = vmax.f32 %v3156_v41, 0.0  ;;  %v3363_v22 = vld [vmem:[#allocation2 + $0x13d] sm:$0xff]  ;;  %v3861_v17 = vld [vmem:[#allocation3 + $0x42] sm:$0xff] }
 0x392   : > { %v3851_v35 = vld [vmem:[#allocation3 + $0x129] sm:$0xff]  ;;  %v3404_v19 = vld [vmem:[#allocation2 + $0x13e] sm:$0xff] }
 0x393   : > { %v3607_v8 = vadd.f32 %v3525_v32, %v3279_v27  ;;  %v3282_v20 = vmul.f32 %v3241_v37, %v3199_v11  ;;  %4245 = vmatprep.mubr.f32.mxu1 %v3851_v35  ;;  %v3445_v52 = vadd.f32 %v3404_v19, %v3363_v22  ;;  %8497 = vmatpush1.bf16.msra.mxu0 %v8496_v61  ;;  %v3859_v3 = vld [vmem:[#allocation3 + $0x32] sm:$0xff]  ;;  %v5341_v37 = vld [vmem:[#allocation14 + $0x48] sm:$0xff]  ;;  %v3862_v32 = vld [vmem:[#allocation3 + $0x4a] sm:$0xff] }
 0x394   : > { %v3485_v21 = vld [vmem:[#allocation2 + $0x147] sm:$0xff]  ;;  %4246 = vmatmul.mubr.f32.gmra.mrb[150].mxu1 %v12385_v46  ;;  %v3692_v46 = vld [vmem:[#allocation23 + $0x510] sm:$0xff]  ;;  %8498 = vmatprep.subr.bf16.mxu0 %v13185_v26 }
 0x395   : > { %v3648_v53 = vmul.f32 0.25, %v3607_v8  ;;  %v3526_v39 = vadd.f32 %v3485_v21, %v3444_v5  ;;  %3323 = vst [vmem:[#allocation2 + $0x158] sm:$0xff] %v3282_v20  ;;  %v3364_v48 = vld [vmem:[#allocation2 + $0x145] sm:$0xff]  ;;  %v3904_v11 = vld [vmem:[#allocation3 + $0x53] sm:$0xff]  ;;  %v3915_v61 = vld [vmem:[#allocation3 + $0xab] sm:$0xff] }
 0x396   : > { %v3405_v13 = vld [vmem:[#allocation2 + $0x146] sm:$0xff]  ;;  %v3863_v8 = vld [vmem:[#allocation3 + $0x52] sm:$0xff] }
 0x397   : > { %v3608_v12 = vadd.f32 %v3526_v39, %v3280_v54  ;;  %v3731_v30 = vmul.f32 %v3690_v60, %v3648_v53  ;;  %v3852_v50 = vld [vmem:[#allocation3 + $0x131] sm:$0xff]  ;;  %v3446_v24 = vadd.f32 %v3405_v13, %v3364_v48  ;;  %8500 = vmatpush1.bf16.msra.mxu0 %v8499_v49  ;;  %v3905_v5 = vld [vmem:[#allocation3 + $0x5b] sm:$0xff]  ;;  %v3906_v35 = vld [vmem:[#allocation3 + $0x63] sm:$0xff] }
 0x398   : > { %v3486_v59 = vld [vmem:[#allocation2 + $0x14f] sm:$0xff]  ;;  %4250 = vmatprep.mubr.f32.mxu1 %v3852_v50  ;;  %8501 = vmatprep.subr.bf16.mxu0 %v13185_v26  ;;  %v5340_v41 = vld [vmem:[#allocation14 + $0x40] sm:$0xff] }
 0x399   : > { %v3649_v14 = vmul.f32 0.25, %v3608_v12  ;;  %v3527_v0 = vadd.f32 %v3486_v59, %v3445_v52  ;;  %3772 = vst [vmem:[#allocation3 + $0x140] sm:$0xff] %v3731_v30  ;;  %4251 = vmatmul.mubr.f32.gmra.mrb[152].mxu1 %v12389_v16  ;;  %v8502_v25 = vpack.c.bf16 %v5341_v37, %v5340_v41  ;;  %v5344_v60 = vld [vmem:[#allocation14 + $0x60] sm:$0xff]  ;;  %v5345_v21 = vld [vmem:[#allocation14 + $0x68] sm:$0xff]  ;;  %v3907_v53 = vld [vmem:[#allocation3 + $0x6b] sm:$0xff] }
 0x39a   : > { %v8508_v22 = vpack.c.bf16 %v5345_v21, %v5344_v60  ;;  %v3865_v19 = vld [vmem:[#allocation3 + $0x62] sm:$0xff]  ;;  %v3866_v39 = vld [vmem:[#allocation3 + $0x6a] sm:$0xff]  ;;  %v3908_v12 = vld [vmem:[#allocation3 + $0x73] sm:$0xff] }
 0x39b   : > { %v3732_v27 = vmul.f32 %v3691_v4, %v3649_v14  ;;  %v3609_v33 = vadd.f32 %v3527_v0, %v3281_v6  ;;  %v3901_v6 = vld [vmem:[#allocation3 + $0x3b] sm:$0xff]  ;;  %8503 = vmatpush1.bf16.msra.mxu0 %v8502_v25  ;;  %v5346_v4 = vld [vmem:[#allocation14 + $0x70] sm:$0xff]  ;;  %v5347_v52 = vld [vmem:[#allocation14 + $0x78] sm:$0xff] }
 0x39c   : > { %v3487_v63 = vld [vmem:[#allocation2 + $0x157] sm:$0xff]  ;;  %8504 = vmatprep.subr.bf16.mxu0 %v13185_v26  ;;  %v8511_v59 = vpack.c.bf16 %v5347_v52, %v5346_v4  ;;  %v5349_v48 = vld [vmem:[#allocation14 + $0x88] sm:$0xff]  ;;  %v5360_v4 = vld [vmem:[#allocation14 + $0xe0] sm:$0xff] }
 0x39d   : > { %3773 = vst [vmem:[#allocation3 + $0x148] sm:$0xff] %v3732_v27  ;;  %v3650_v58 = vmul.f32 0.25, %v3609_v33  ;;  %v3528_v10 = vadd.f32 %v3487_v63, %v3446_v24  ;;  %v3867_v13 = vld [vmem:[#allocation3 + $0x72] sm:$0xff]  ;;  %v3909_v0 = vld [vmem:[#allocation3 + $0x7b] sm:$0xff]  ;;  %v5350_v50 = vld [vmem:[#allocation14 + $0x90] sm:$0xff] }
 0x39e   : > { %v3868_v33 = vld [vmem:[#allocation3 + $0x7a] sm:$0xff]  ;;  %v3869_v63 = vld [vmem:[#allocation3 + $0x82] sm:$0xff]  ;;  %v3886_v60 = vld [vmem:[#allocation3 + $0x10a] sm:$0xff] }
 0x39f   : > { %v3733_v31 = vmul.f32 %v3692_v46, %v3650_v58  ;;  %v3610_v9 = vadd.f32 %v3528_v10, %v3282_v20  ;;  %v3864_v20 = vld [vmem:[#allocation3 + $0x5a] sm:$0xff]  ;;  %v3911_v58 = vld [vmem:[#allocation3 + $0x8b] sm:$0xff]  ;;  %v3873_v1 = vld [vmem:[#allocation3 + $0xa2] sm:$0xff] }
 0x3a0   : > { %v3853_v56 = vld [vmem:[#allocation3 + $0x139] sm:$0xff]  ;;  %v5354_v10 = vld [vmem:[#allocation14 + $0xb0] sm:$0xff] }
 0x3a1   : > { %3774 = vst [vmem:[#allocation3 + $0x150] sm:$0xff] %v3733_v31  ;;  %v3651_v45 = vmul.f32 0.25, %v3610_v9  ;;  %4255 = vmatprep.mubr.f32.mxu1 %v3853_v56  ;;  %v5353_v46 = vld [vmem:[#allocation14 + $0xa8] sm:$0xff]  ;;  %v3870_v9 = vld [vmem:[#allocation3 + $0x8a] sm:$0xff]  ;;  %v3912_v56 = vld [vmem:[#allocation3 + $0x93] sm:$0xff] }
 0x3a2   : > { %4256 = vmatmul.mubr.f32.gmra.mrb[154].mxu1 %v3730_v51  ;;  %v5343_v51 = vld [vmem:[#allocation14 + $0x58] sm:$0xff]  ;;  %v8520_v40 = vpack.c.bf16 %v5353_v46, %v5352_v18  ;;  %v3917_v36 = vld [vmem:[#allocation3 + $0xbb] sm:$0xff]  ;;  %v3918_v49 = vld [vmem:[#allocation3 + $0xc3] sm:$0xff] }
 0x3a3   : > { %v3734_v16 = vmul.f32 %v3693_v42, %v3651_v45  ;;  %v8505_v38 = vpack.c.bf16 %v5343_v51, %v5342_v23  ;;  %v3871_v45 = vld [vmem:[#allocation3 + $0x92] sm:$0xff]  ;;  %v3876_v29 = vld [vmem:[#allocation3 + $0xba] sm:$0xff]  ;;  %v3922_v25 = vld [vmem:[#allocation3 + $0xe3] sm:$0xff] }
 0x3a4   : > { %v3854_v54 = vld [vmem:[#allocation3 + $0x141] sm:$0xff]  ;;  %v3923_v23 = vld [vmem:[#allocation3 + $0xeb] sm:$0xff]  ;;  %v3928_v21 = vld [vmem:[#allocation3 + $0x113] sm:$0xff] }
 0x3a5   : > { %3775 = vst [vmem:[#allocation3 + $0x158] sm:$0xff] %v3734_v16  ;;  %4260 = vmatprep.mubr.f32.mxu1 %v3854_v54  ;;  %8506 = vmatpush1.bf16.msra.mxu0 %v8505_v38  ;;  %v3872_v54 = vld [vmem:[#allocation3 + $0x9a] sm:$0xff]  ;;  %v3882_v51 = vld [vmem:[#allocation3 + $0xea] sm:$0xff] }
 0x3a6   : > { %4261 = vmatmul.mubr.f32.gmra.mrb[156].mxu1 %v3731_v30  ;;  %8507 = vmatprep.subr.bf16.mxu0 %v13185_v26  ;;  %v5348_v30 = vld [vmem:[#allocation14 + $0x80] sm:$0xff]  ;;  %v5361_v52 = vld [vmem:[#allocation14 + $0xe8] sm:$0xff] }
 0x3a7   : > { %v8514_v14 = vpack.c.bf16 %v5349_v48, %v5348_v30  ;;  %v3921_v41 = vld [vmem:[#allocation3 + $0xdb] sm:$0xff]  ;;  %v3924_v38 = vld [vmem:[#allocation3 + $0xf3] sm:$0xff]  ;;  %v3930_v48 = vld [vmem:[#allocation3 + $0x123] sm:$0xff] }
 0x3a8   : > { %v3855_v57 = vld [vmem:[#allocation3 + $0x149] sm:$0xff]  ;;  %v3880_v37 = vld [vmem:[#allocation3 + $0xda] sm:$0xff] }
 0x3a9   : > { %4265 = vmatprep.mubr.f32.mxu1 %v3855_v57  ;;  %8509 = vmatpush1.bf16.msra.mxu0 %v8508_v22  ;;  %v3874_v57 = vld [vmem:[#allocation3 + $0xaa] sm:$0xff]  ;;  %v3888_v30 = vld [vmem:[#allocation3 + $0x11a] sm:$0xff] }
 0x3aa   : > { %4266 = vmatmul.mubr.f32.gmra.mrb[158].mxu1 %v3732_v27  ;;  %8510 = vmatprep.subr.bf16.mxu0 %v13185_v26  ;;  %v5351_v27 = vld [vmem:[#allocation14 + $0x98] sm:$0xff]  ;;  %v5358_v22 = vld [vmem:[#allocation14 + $0xd0] sm:$0xff]  ;;  %v3933_v18 = vld [vmem:[#allocation3 + $0x13b] sm:$0xff] }
 0x3ab   : > { %v8517_v24 = vpack.c.bf16 %v5351_v27, %v5350_v50  ;;  %v3931_v27 = vld [vmem:[#allocation3 + $0x12b] sm:$0xff]  ;;  %v3892_v46 = vld [vmem:[#allocation3 + $0x13a] sm:$0xff] }
 0x3ac   : > { %v3856_v62 = vld [vmem:[#allocation3 + $0x151] sm:$0xff]  ;;  %v3857_v47 = vld [vmem:[#allocation3 + $0x159] sm:$0xff] }
 0x3ad   : > { %4270 = vmatprep.mubr.f32.mxu1 %v3856_v62  ;;  %8512 = vmatpush1.bf16.msra.mxu0 %v8511_v59  ;;  %v3916_v62 = vld [vmem:[#allocation3 + $0xb3] sm:$0xff]  ;;  %v8532_v59 = vpack.c.bf16 %v5361_v52, %v5360_v4 }
 0x3ae   : > { %4271 = vmatmul.mubr.f32.gmra.mrb[160].mxu1 %v3733_v31  ;;  %8513 = vmatprep.subr.bf16.mxu0 %v13185_v26  ;;  %v5355_v31 = vld [vmem:[#allocation14 + $0xb8] sm:$0xff] }
 0x3af   : > { %4275 = vmatprep.mubr.f32.mxu1 %v3857_v47  ;;  %v8523_v42 = vpack.c.bf16 %v5355_v31, %v5354_v10  ;;  %v3875_v47 = vld [vmem:[#allocation3 + $0xb2] sm:$0xff]  ;;  %v3894_v10 = vld [vmem:[#allocation3 + $0x14a] sm:$0xff] }
 0x3b0   : > { %v3936_v31 = vld [vmem:[#allocation3 + $0x153] sm:$0xff] }
 0x3b1   : > { %8515 = vmatpush1.bf16.msra.mxu0 %v8514_v14  ;;  %v5363_v14 = vld [vmem:[#allocation14 + $0xf8] sm:$0xff] }
 0x3b2   : > { %4276 = vmatmul.mubr.f32.gmra.mrb[162].mxu1 %v3734_v16  ;;  %8516 = vmatprep.subr.bf16.mxu0 %v13185_v26  ;;  %v3913_v16 = vld [vmem:[#allocation3 + $0x9b] sm:$0xff] }
 0x3b3   : > { %4345 = vmatprep.mubr.f32.mxu1 %v3899_v2  ;;  %v3877_v2 = vld [vmem:[#allocation3 + $0xc2] sm:$0xff] }
 0x3b5   : > { %8518 = vmatpush1.bf16.msra.mxu0 %v8517_v24  ;;  %v3932_v24 = vld [vmem:[#allocation3 + $0x133] sm:$0xff] }
 0x3b6   : > { %4346 = vmatmul.mubr.f32.vlgmr.msra.gmra.mrb[82].mxu1 %v3858_v34  ;;  %8519 = vmatprep.subr.bf16.mxu0 %v13185_v26  ;;  %v3919_v34 = vld [vmem:[#allocation3 + $0xcb] sm:$0xff] }
 0x3b7   : > { %4350 = vmatprep.mubr.f32.mxu1 %v3900_v43  ;;  %v3878_v43 = vld [vmem:[#allocation3 + $0xca] sm:$0xff] }
 0x3b9   : > { %8521 = vmatpush1.bf16.msra.mxu0 %v8520_v40  ;;  %v3893_v40 = vld [vmem:[#allocation3 + $0x142] sm:$0xff] }
 0x3ba   : > { %4351 = vmatmul.mubr.f32.gmra.mrb[84].mxu1 %v3859_v3  ;;  %8522 = vmatprep.subr.bf16.mxu0 %v13185_v26  ;;  %v3920_v3 = vld [vmem:[#allocation3 + $0xd3] sm:$0xff] }
 0x3bb   : > { %4355 = vmatprep.mubr.f32.mxu1 %v3901_v6  ;;  %v3879_v6 = vld [vmem:[#allocation3 + $0xd2] sm:$0xff] }
 0x3bd   : > { %8524 = vmatpush1.bf16.msra.mxu0 %v8523_v42  ;;  %v3937_v42 = vld [vmem:[#allocation3 + $0x15b] sm:$0xff] }
 0x3be   : > { %4356 = vmatmul.mubr.f32.gmra.mrb[86].mxu1 %v3860_v28  ;;  %8525 = vmatprep.subr.bf16.mxu0 %v13185_v26  ;;  %v5356_v28 = vld [vmem:[#allocation14 + $0xc0] sm:$0xff] }
 0x3bf   : > { %4360 = vmatprep.mubr.f32.mxu1 %v3902_v55  ;;  %v5357_v55 = vld [vmem:[#allocation14 + $0xc8] sm:$0xff] }
 0x3c2   : > { %4361 = vmatmul.mubr.f32.gmra.mrb[88].mxu1 %v3861_v17  ;;  %v3881_v17 = vld [vmem:[#allocation3 + $0xe2] sm:$0xff] }
 0x3c3   : > { %4365 = vmatprep.mubr.f32.mxu1 %v3903_v7  ;;  %v8526_v7 = vpack.c.bf16 %v5357_v55, %v5356_v28  ;;  %v4595_v28 = vld [vmem:[#allocation23 + $0x530] sm:$0xff] }
 0x3c5   : > { %8527 = vmatpush1.bf16.msra.mxu0 %v8526_v7 }
 0x3c6   : > { %4366 = vmatmul.mubr.f32.gmra.mrb[90].mxu1 %v3862_v32  ;;  %8528 = vmatprep.subr.bf16.mxu0 %v13185_v26  ;;  %v3883_v32 = vld [vmem:[#allocation3 + $0xf2] sm:$0xff] }
 0x3c7   : > { %4370 = vmatprep.mubr.f32.mxu1 %v3904_v11  ;;  %v3925_v11 = vld [vmem:[#allocation3 + $0xfb] sm:$0xff] }
 0x3ca   : > { %4371 = vmatmul.mubr.f32.gmra.mrb[92].mxu1 %v3863_v8  ;;  %v3884_v8 = vld [vmem:[#allocation3 + $0xfa] sm:$0xff] }
 0x3cb   : > { %4375 = vmatprep.mubr.f32.mxu1 %v3905_v5  ;;  %v3926_v5 = vld [vmem:[#allocation3 + $0x103] sm:$0xff] }
 0x3ce   : > { %4376 = vmatmul.mubr.f32.gmra.mrb[94].mxu1 %v3864_v20  ;;  %v3885_v20 = vld [vmem:[#allocation3 + $0x102] sm:$0xff] }
 0x3cf   : > { %4380 = vmatprep.mubr.f32.mxu1 %v3906_v35  ;;  %v3927_v35 = vld [vmem:[#allocation3 + $0x10b] sm:$0xff] }
 0x3d2   : > { %4381 = vmatmul.mubr.f32.gmra.mrb[96].mxu1 %v3865_v19  ;;  %v5359_v19 = vld [vmem:[#allocation14 + $0xd8] sm:$0xff] }
 0x3d3   : > { %4385 = vmatprep.mubr.f32.mxu1 %v3907_v53  ;;  %v8529_v53 = vpack.c.bf16 %v5359_v19, %v5358_v22 }
 0x3d5   : > { %8530 = vmatpush1.bf16.msra.mxu0 %v8529_v53 }
 0x3d6   : > { %4386 = vmatmul.mubr.f32.gmra.mrb[98].mxu1 %v3866_v39  ;;  %v3887_v39 = vld [vmem:[#allocation3 + $0x112] sm:$0xff]  ;;  %8531 = vmatprep.subr.bf16.mxu0 %v13185_v26 }
 0x3d7   : > { %4390 = vmatprep.mubr.f32.mxu1 %v3908_v12  ;;  %v3929_v12 = vld [vmem:[#allocation3 + $0x11b] sm:$0xff] }
 0x3d9   : > { %8533 = vmatpush1.bf16.msra.mxu0 %v8532_v59 }
 0x3da   : > { %4391 = vmatmul.mubr.f32.gmra.mrb[100].mxu1 %v3867_v13  ;;  %8534 = vmatprep.subr.bf16.mxu0 %v13185_v26  ;;  %v5362_v13 = vld [vmem:[#allocation14 + $0xf0] sm:$0xff] }
 0x3db   : > { %4395 = vmatprep.mubr.f32.mxu1 %v3909_v0  ;;  %v3889_v0 = vld [vmem:[#allocation3 + $0x122] sm:$0xff]  ;;  %v8535_v50 = vpack.c.bf16 %v5363_v14, %v5362_v13 }
 0x3dd   : > { %8536 = vmatpush1.bf16.msra.mxu0 %v8535_v50 }
 0x3de   : > { %4396 = vmatmul.mubr.f32.gmra.mrb[102].mxu1 %v3868_v33  ;;  %8537 = vmatprep.subr.bf16.mxu0 %v13185_v26  ;;  %v3890_v33 = vld [vmem:[#allocation3 + $0x12a] sm:$0xff] }
 0x3df   : > { %4400 = vmatprep.mubr.f32.mxu1 %v3910_v44  ;;  %v3891_v44 = vld [vmem:[#allocation3 + $0x132] sm:$0xff] }
 0x3e2   : > { %4401 = vmatmul.mubr.f32.gmra.mrb[104].mxu1 %v3869_v63  ;;  %v3934_v63 = vld [vmem:[#allocation3 + $0x143] sm:$0xff] }
 0x3e3   : > { %4405 = vmatprep.mubr.f32.mxu1 %v3911_v58  ;;  %v3935_v58 = vld [vmem:[#allocation3 + $0x14b] sm:$0xff] }
 0x3e6   : > { %4406 = vmatmul.mubr.f32.gmra.mrb[106].mxu1 %v3870_v9  ;;  %v3895_v9 = vld [vmem:[#allocation3 + $0x152] sm:$0xff] }
 0x3e7   : > { %4410 = vmatprep.mubr.f32.mxu1 %v3912_v56  ;;  %v3938_v56 = vld [vmem:[#allocation3 + $0x163] sm:$0xff] }
 0x3ea   : > { %4411 = vmatmul.mubr.f32.gmra.mrb[108].mxu1 %v3871_v45  ;;  %v3896_v45 = vld [vmem:[#allocation3 + $0x15a] sm:$0xff] }
 0x3eb   : > { %4415 = vmatprep.mubr.f32.mxu1 %v3913_v16  ;;  %v3897_v16 = vld [vmem:[#allocation3 + $0x162] sm:$0xff] }
 0x3ee   : > { %4416 = vmatmul.mubr.f32.gmra.mrb[110].mxu1 %v3872_v54  ;;  %v3939_v54 = vld [vmem:[#allocation3 + $0x16b] sm:$0xff] }
 0x3ef   : > { %4420 = vmatprep.mubr.f32.mxu1 %v3914_v15  ;;  %v3898_v15 = vld [vmem:[#allocation3 + $0x16a] sm:$0xff] }
 0x3f2   : > { %4421 = vmatmul.mubr.f32.gmra.mrb[112].mxu1 %v3873_v1  ;;  %v12411_v1 = vld [vmem:[#allocation12] ss:$0 sm:$0xff] }
 0x3f3   : > { %4425 = vmatprep.mubr.f32.mxu1 %v3915_v61 }
 0x3f6   : > { %4426 = vmatmul.mubr.f32.gmra.mrb[114].mxu1 %v3874_v57 }
 0x3f7   : > { %4430 = vmatprep.mubr.f32.mxu1 %v3916_v62 }
 0x3fa   : > { %4431 = vmatmul.mubr.f32.gmra.mrb[116].mxu1 %v3875_v47  ;;  %v4593_v47 = vld [vmem:[#allocation23 + $0x520] sm:$0xff] }
 0x3fb   : > { %4435 = vmatprep.mubr.f32.mxu1 %v3917_v36 }
 0x3fe   : > { %4436 = vmatmul.mubr.f32.gmra.mrb[118].mxu1 %v3876_v29 }
 0x3ff   : > { %4440 = vmatprep.mubr.f32.mxu1 %v3918_v49 }
 0x402   : > { %4441 = vmatmul.mubr.f32.gmra.mrb[120].mxu1 %v3877_v2 }
 0x403   : > { %4445 = vmatprep.mubr.f32.mxu1 %v3919_v34 }
 0x406   : > { %4446 = vmatmul.mubr.f32.gmra.mrb[122].mxu1 %v3878_v43  ;;  %v4594_v43 = vld [vmem:[#allocation23 + $0x528] sm:$0xff] }
 0x407   : > { %4450 = vmatprep.mubr.f32.mxu1 %v3920_v3 }
 0x40a   : > { %4451 = vmatmul.mubr.f32.gmra.mrb[124].mxu1 %v3879_v6 }
 0x40b   : > { %4455 = vmatprep.mubr.f32.mxu1 %v3921_v41 }
 0x40e   : > { %4456 = vmatmul.mubr.f32.gmra.mrb[126].mxu1 %v3880_v37 }
 0x40f   : > { %4460 = vmatprep.mubr.f32.mxu1 %v3922_v25 }
 0x412   : > { %4461 = vmatmul.mubr.f32.gmra.mrb[128].mxu1 %v3881_v17 }
 0x413   : > { %4465 = vmatprep.mubr.f32.mxu1 %v3923_v23 }
 0x416   : > { %4466 = vmatmul.mubr.f32.gmra.mrb[130].mxu1 %v3882_v51 }
 0x417   : > { %4470 = vmatprep.mubr.f32.mxu1 %v3924_v38  ;;  %v4596_v38 = vld [vmem:[#allocation23 + $0x538] sm:$0xff] }
 0x41a   : > { %4471 = vmatmul.mubr.f32.gmra.mrb[132].mxu1 %v3883_v32 }
 0x41b   : > { %4475 = vmatprep.mubr.f32.mxu1 %v3925_v11 }
 0x41e   : > { %4476 = vmatmul.mubr.f32.gmra.mrb[134].mxu1 %v3884_v8 }
 0x41f   : > { %4480 = vmatprep.mubr.f32.mxu1 %v3926_v5 }
 0x422   : > { %4481 = vmatmul.mubr.f32.gmra.mrb[136].mxu1 %v3885_v20 }
 0x423   : > { %4485 = vmatprep.mubr.f32.mxu1 %v3927_v35  ;;  %v4597_v35 = vld [vmem:[#allocation23 + $0x540] sm:$0xff] }
 0x426   : > { %4486 = vmatmul.mubr.f32.gmra.mrb[138].mxu1 %v3886_v60 }
 0x427   : > { %4490 = vmatprep.mubr.f32.mxu1 %v3928_v21 }
 0x42a   : > { %4491 = vmatmul.mubr.f32.gmra.mrb[140].mxu1 %v3887_v39 }
 0x42b   : > { %4495 = vmatprep.mubr.f32.mxu1 %v3929_v12  ;;  %v4598_v12 = vld [vmem:[#allocation23 + $0x548] sm:$0xff] }
 0x42e   : > { %4496 = vmatmul.mubr.f32.gmra.mrb[142].mxu1 %v3888_v30 }
 0x42f   : > { %4500 = vmatprep.mubr.f32.mxu1 %v3930_v48 }
 0x432   : > { %4501 = vmatmul.mubr.f32.gmra.mrb[144].mxu1 %v3889_v0 }
 0x433   : > { %4505 = vmatprep.mubr.f32.mxu1 %v3931_v27 }
 0x436   : > { %4506 = vmatmul.mubr.f32.gmra.mrb[146].mxu1 %v3890_v33 }
 0x437   : > { %4510 = vmatprep.mubr.f32.mxu1 %v3932_v24 }
 0x43a   : > { %4511 = vmatmul.mubr.f32.gmra.mrb[148].mxu1 %v3891_v44 }
 0x43b   : > { %4515 = vmatprep.mubr.f32.mxu1 %v3933_v18 }
 0x43e   : > { %4516 = vmatmul.mubr.f32.gmra.mrb[150].mxu1 %v3892_v46 }
 0x43f   : > { %4520 = vmatprep.mubr.f32.mxu1 %v3934_v63 }
 0x442   : > { %4521 = vmatmul.mubr.f32.gmra.mrb[152].mxu1 %v3893_v40  ;;  %v4599_v40 = vld [vmem:[#allocation23 + $0x550] sm:$0xff] }
 0x443   : > { %4525 = vmatprep.mubr.f32.mxu1 %v3935_v58  ;;  %v5047_v58 = vld [vmem:[#allocation23 + $0x678] sm:$0xff] }
 0x446   : > { %4526 = vmatmul.mubr.f32.gmra.mrb[154].mxu1 %v3894_v10 }
 0x447   : > { %4530 = vmatprep.mubr.f32.mxu1 %v3936_v31 }
 0x44a   : > { %4531 = vmatmul.mubr.f32.gmra.mrb[156].mxu1 %v3895_v9 }
 0x44b   : > { %4535 = vmatprep.mubr.f32.mxu1 %v3937_v42 }
 0x44e   : > { %4536 = vmatmul.mubr.f32.gmra.mrb[158].mxu1 %v3896_v45 }
 0x44f   : > { %4540 = vmatprep.mubr.f32.mxu1 %v3938_v56 }
 0x452   : > { %4541 = vmatmul.mubr.f32.gmra.mrb[160].mxu1 %v3897_v16 }
 0x453   : > { %4545 = vmatprep.mubr.f32.mxu1 %v3939_v54 }
 0x456   : > { %4546 = vmatmul.mubr.f32.gmra.mrb[162].mxu1 %v3898_v15 }
 0x489   : > { %v4347_v61 = vpop.f32.mrb[82].mxu1 }
 0x48a   : > { %v8859_v57 = vadd.f32 %v12411_v1, %v4347_v61  ;;  %v4349_v62 = vpop.f32.mrb[83].mxu1 }
 0x48c   : > { %v4551_v36 = vmax.f32 %v8859_v57, 0.0 }
 0x48d   : > { %v4352_v29 = vpop.f32.mrb[84].mxu1 }
 0x48e   : > { %v4634_v49 = vmul.f32 %v4593_v47, %v4551_v36  ;;  %v8860_v2 = vadd.f32 %v12411_v1, %v4352_v29  ;;  %v4354_v34 = vpop.f32.mrb[85].mxu1  ;;  %v4600_v36 = vld [vmem:[#allocation23 + $0x558] sm:$0xff]  ;;  %v5048_v29 = vld [vmem:[#allocation23 + $0x680] sm:$0xff] }
 0x490   : > { %4675 = vst [vmem:[#allocation2 + $0x18] sm:$0xff] %v4634_v49  ;;  %v4552_v3 = vmax.f32 %v8860_v2, 0.0 }
 0x491   : > { %v4357_v6 = vpop.f32.mrb[86].mxu1 }
 0x492   : > { %v4635_v41 = vmul.f32 %v4594_v43, %v4552_v3  ;;  %v8861_v37 = vadd.f32 %v12411_v1, %v4357_v6  ;;  %v4359_v25 = vpop.f32.mrb[87].mxu1 }
 0x494   : > { %4676 = vst [vmem:[#allocation2 + $0x20] sm:$0xff] %v4635_v41  ;;  %v4553_v55 = vmax.f32 %v8861_v37, 0.0 }
 0x495   : > { %v4362_v17 = vpop.f32.mrb[88].mxu1 }
 0x496   : > { %v4636_v7 = vmul.f32 %v4595_v28, %v4553_v55  ;;  %v8862_v23 = vadd.f32 %v12411_v1, %v4362_v17  ;;  %v4364_v51 = vpop.f32.mrb[89].mxu1 }
 0x497   : > { %v4718_v60 = vld [vmem:[#allocation2 + $0x15] sm:$0xff] }
 0x498   : > { %4677 = vst [vmem:[#allocation2 + $0x28] sm:$0xff] %v4636_v7  ;;  %v4554_v32 = vmax.f32 %v8862_v23, 0.0  ;;  %v4759_v21 = vld [vmem:[#allocation2 + $0x16] sm:$0xff]  ;;  %v4601_v23 = vld [vmem:[#allocation23 + $0x560] sm:$0xff]  ;;  %v5049_v51 = vld [vmem:[#allocation23 + $0x688] sm:$0xff] }
 0x499   : > { %v4367_v11 = vpop.f32.mrb[90].mxu1  ;;  %v4800_v52 = vadd.f32 %v4759_v21, %v4718_v60 }
 0x49a   : > { %v4637_v8 = vmul.f32 %v4596_v38, %v4554_v32  ;;  %v8863_v5 = vadd.f32 %v12411_v1, %v4367_v11  ;;  %v4369_v20 = vpop.f32.mrb[91].mxu1 }
 0x49b   : > { %v4719_v30 = vld [vmem:[#allocation2 + $0x1d] sm:$0xff] }
 0x49c   : > { %4678 = vst [vmem:[#allocation2 + $0x30] sm:$0xff] %v4637_v8  ;;  %v4555_v22 = vmax.f32 %v8863_v5, 0.0  ;;  %v4760_v59 = vld [vmem:[#allocation2 + $0x1e] sm:$0xff] }
 0x49d   : > { %v4372_v19 = vpop.f32.mrb[92].mxu1  ;;  %v4801_v50 = vadd.f32 %v4760_v59, %v4719_v30  ;;  %v5364_v59 = vld [vmem:[#allocation14 + $0x100] sm:$0xff] }
 0x49e   : > { %v4638_v53 = vmul.f32 %v4597_v35, %v4555_v22  ;;  %v8864_v39 = vadd.f32 %v12411_v1, %v4372_v19  ;;  %v4374_v4 = vpop.f32.mrb[93].mxu1 }
 0x49f   : > { %v4841_v48 = vld [vmem:[#allocation2 + $0x27] sm:$0xff]  ;;  %v5050_v4 = vld [vmem:[#allocation23 + $0x690] sm:$0xff] }
 0x4a0   : > { %4679 = vst [vmem:[#allocation2 + $0x38] sm:$0xff] %v4638_v53  ;;  %v4556_v13 = vmax.f32 %v8864_v39, 0.0  ;;  %v4882_v14 = vadd.f32 %v4841_v48, %v4800_v52  ;;  %v4720_v27 = vld [vmem:[#allocation2 + $0x25] sm:$0xff] }
 0x4a1   : > { %v4377_v0 = vpop.f32.mrb[94].mxu1  ;;  %v4761_v33 = vld [vmem:[#allocation2 + $0x26] sm:$0xff] }
 0x4a2   : > { %v4639_v24 = vmul.f32 %v4598_v12, %v4556_v13  ;;  %v8865_v44 = vadd.f32 %v12411_v1, %v4377_v0  ;;  %v4379_v18 = vpop.f32.mrb[95].mxu1  ;;  %v4964_v46 = vadd.f32 %v4882_v14, %v4636_v7  ;;  %v4802_v42 = vadd.f32 %v4761_v33, %v4720_v27  ;;  %v4602_v12 = vld [vmem:[#allocation23 + $0x568] sm:$0xff] }
 0x4a3   : > { %v4842_v63 = vld [vmem:[#allocation2 + $0x2f] sm:$0xff] }
 0x4a4   : > { %v4883_v10 = vadd.f32 %v4842_v63, %v4801_v50  ;;  %4680 = vst [vmem:[#allocation2 + $0x40] sm:$0xff] %v4639_v24  ;;  %v4557_v31 = vmax.f32 %v8865_v44, 0.0  ;;  %v5005_v9 = vmul.f32 0.25, %v4964_v46  ;;  %v4721_v45 = vld [vmem:[#allocation2 + $0x2d] sm:$0xff]  ;;  %v4603_v18 = vld [vmem:[#allocation23 + $0x570] sm:$0xff] }
 0x4a5   : > { %v4382_v56 = vpop.f32.mrb[96].mxu1  ;;  %v4762_v16 = vld [vmem:[#allocation2 + $0x2e] sm:$0xff] }
 0x4a6   : > { %v4965_v54 = vadd.f32 %v4883_v10, %v4637_v8  ;;  %v4640_v15 = vmul.f32 %v4599_v40, %v4557_v31  ;;  %v8866_v61 = vadd.f32 %v12411_v1, %v4382_v56  ;;  %v4384_v57 = vpop.f32.mrb[97].mxu1  ;;  %v5088_v62 = vmul.f32 %v5047_v58, %v5005_v9  ;;  %v5365_v48 = vld [vmem:[#allocation14 + $0x108] sm:$0xff]  ;;  %v5051_v10 = vld [vmem:[#allocation23 + $0x698] sm:$0xff]  ;;  %v5366_v31 = vld [vmem:[#allocation14 + $0x110] sm:$0xff] }
 0x4a7   : > { %v4843_v47 = vld [vmem:[#allocation2 + $0x37] sm:$0xff]  ;;  %v4803_v43 = vadd.f32 %v4762_v16, %v4721_v45  ;;  %v8538_v58 = vpack.c.bf16 %v5365_v48, %v5364_v59 }
 0x4a8   : > { %v4884_v49 = vadd.f32 %v4843_v47, %v4802_v42  ;;  %4681 = vst [vmem:[#allocation2 + $0x48] sm:$0xff] %v4640_v15  ;;  %v4558_v2 = vmax.f32 %v8866_v61, 0.0  ;;  %v5006_v34 = vmul.f32 0.25, %v4965_v54  ;;  %5129 = vst [vmem:[#allocation3 + $0x28] sm:$0xff] %v5088_v62  ;;  %v4722_v6 = vld [vmem:[#allocation2 + $0x35] sm:$0xff] }
 0x4a9   : > { %v4387_v3 = vpop.f32.mrb[98].mxu1  ;;  %v4763_v41 = vld [vmem:[#allocation2 + $0x36] sm:$0xff] }
 0x4aa   : > { %v4966_v37 = vadd.f32 %v4884_v49, %v4638_v53  ;;  %v4641_v25 = vmul.f32 %v4600_v36, %v4558_v2  ;;  %v8867_v28 = vadd.f32 %v12411_v1, %v4387_v3  ;;  %v4389_v55 = vpop.f32.mrb[99].mxu1  ;;  %v5089_v17 = vmul.f32 %v5048_v29, %v5006_v34  ;;  %v5367_v54 = vld [vmem:[#allocation14 + $0x118] sm:$0xff] }
 0x4ab   : > { %v4844_v7 = vld [vmem:[#allocation2 + $0x3f] sm:$0xff]  ;;  %v4804_v8 = vadd.f32 %v4763_v41, %v4722_v6  ;;  %v8541_v3 = vpack.c.bf16 %v5367_v54, %v5366_v31 }
 0x4ac   : > { %v4885_v38 = vadd.f32 %v4844_v7, %v4803_v43  ;;  %4682 = vst [vmem:[#allocation2 + $0x50] sm:$0xff] %v4641_v25  ;;  %v4559_v32 = vmax.f32 %v8867_v28, 0.0  ;;  %5130 = vst [vmem:[#allocation3 + $0x30] sm:$0xff] %v5089_v17  ;;  %v5007_v11 = vmul.f32 0.25, %v4966_v37  ;;  %v4723_v20 = vld [vmem:[#allocation2 + $0x3d] sm:$0xff]  ;;  %v5052_v6 = vld [vmem:[#allocation23 + $0x6a0] sm:$0xff] }
 0x4ad   : > { %v4392_v5 = vpop.f32.mrb[100].mxu1  ;;  %v4764_v35 = vld [vmem:[#allocation2 + $0x3e] sm:$0xff]  ;;  %v5369_v7 = vld [vmem:[#allocation14 + $0x128] sm:$0xff] }
 0x4ae   : > { %v4967_v60 = vadd.f32 %v4885_v38, %v4639_v24  ;;  %v12422_v21 = vmul.f32 %v4601_v23, %v4559_v32  ;;  %v8868_v22 = vadd.f32 %v12411_v1, %v4392_v5  ;;  %v4394_v19 = vpop.f32.mrb[101].mxu1  ;;  %v5090_v53 = vmul.f32 %v5049_v51, %v5007_v11  ;;  %v4604_v49 = vld [vmem:[#allocation23 + $0x578] sm:$0xff] }
 0x4af   : > { %v4845_v39 = vld [vmem:[#allocation2 + $0x47] sm:$0xff]  ;;  %v4805_v14 = vadd.f32 %v4764_v35, %v4723_v20  ;;  %v5371_v59 = vld [vmem:[#allocation14 + $0x138] sm:$0xff] }
 0x4b0   : > { %v4886_v52 = vadd.f32 %v4845_v39, %v4804_v8  ;;  %4683 = vst [vmem:[#allocation2 + $0x58] sm:$0xff] %v12422_v21  ;;  %v4560_v30 = vmax.f32 %v8868_v22, 0.0  ;;  %5131 = vst [vmem:[#allocation3 + $0x38] sm:$0xff] %v5090_v53  ;;  %v5008_v13 = vmul.f32 0.25, %v4967_v60  ;;  %v4724_v50 = vld [vmem:[#allocation2 + $0x45] sm:$0xff]  ;;  %v5053_v19 = vld [vmem:[#allocation23 + $0x6a8] sm:$0xff] }
 0x4b1   : > { %v4397_v0 = vpop.f32.mrb[102].mxu1  ;;  %v4765_v27 = vld [vmem:[#allocation2 + $0x46] sm:$0xff]  ;;  %v5370_v39 = vld [vmem:[#allocation14 + $0x130] sm:$0xff] }
 0x4b2   : > { %v4968_v33 = vadd.f32 %v4886_v52, %v4640_v15  ;;  %v12426_v24 = vmul.f32 %v4602_v12, %v4560_v30  ;;  %v8869_v44 = vadd.f32 %v12411_v1, %v4397_v0  ;;  %v4399_v46 = vpop.f32.mrb[103].mxu1  ;;  %v5091_v63 = vmul.f32 %v5050_v4, %v5008_v13  ;;  %v5368_v41 = vld [vmem:[#allocation14 + $0x120] sm:$0xff] }
 0x4b3   : > { %v4846_v40 = vld [vmem:[#allocation2 + $0x4f] sm:$0xff]  ;;  %v4806_v15 = vadd.f32 %v4765_v27, %v4724_v50  ;;  %v4605_v20 = vld [vmem:[#allocation23 + $0x580] sm:$0xff]  ;;  %v8544_v53 = vpack.c.bf16 %v5369_v7, %v5368_v41 }
 0x4b4   : > { %v4887_v9 = vadd.f32 %v4846_v40, %v4805_v14  ;;  %4684 = vst [vmem:[#allocation2 + $0x60] sm:$0xff] %v12426_v24  ;;  %v4561_v42 = vmax.f32 %v8869_v44, 0.0  ;;  %v5209_v56 = vld [vmem:[#allocation3 + $0x2c] sm:$0xff]  ;;  %5132 = vst [vmem:[#allocation3 + $0x40] sm:$0xff] %v5091_v63  ;;  %v5009_v16 = vmul.f32 0.25, %v4968_v33 }
 0x4b5   : > { %v5168_v45 = vld [vmem:[#allocation3 + $0x2b] sm:$0xff]  ;;  %5467 = vmatprep.mubr.f32.mxu0 %v5209_v56  ;;  %v4402_v61 = vpop.f32.mrb[104].mxu1 }
 0x4b6   : > { %v4725_v57 = vld [vmem:[#allocation2 + $0x4d] sm:$0xff]  ;;  %v4969_v47 = vadd.f32 %v4887_v9, %v4641_v25  ;;  %v12430_v36 = vmul.f32 %v4603_v18, %v4561_v42  ;;  %v8870_v29 = vadd.f32 %v12411_v1, %v4402_v61  ;;  %5468 = vmatmul.mubr.f32.vlgmr.msra.gmra.mrb[82].mxu0 %v5168_v45  ;;  %v4404_v2 = vpop.f32.mrb[105].mxu1  ;;  %v5092_v34 = vmul.f32 %v5051_v10, %v5009_v16  ;;  %v5054_v40 = vld [vmem:[#allocation23 + $0x6b0] sm:$0xff]  ;;  %v5372_v10 = vld [vmem:[#allocation14 + $0x140] sm:$0xff] }
 0x4b7   : > { %v4766_v62 = vld [vmem:[#allocation2 + $0x4e] sm:$0xff]  ;;  %v4847_v43 = vld [vmem:[#allocation2 + $0x57] sm:$0xff]  ;;  %8539 = vmatpush1.bf16.msra.mxu0 %v8538_v58  ;;  %v8547_v58 = vpack.c.bf16 %v5371_v59, %v5370_v39 }
 0x4b8   : > { %v4888_v37 = vadd.f32 %v4847_v43, %v4806_v15  ;;  %4685 = vst [vmem:[#allocation2 + $0x68] sm:$0xff] %v12430_v36  ;;  %v4562_v28 = vmax.f32 %v8870_v29, 0.0  ;;  %v5210_v55 = vld [vmem:[#allocation3 + $0x34] sm:$0xff]  ;;  %8540 = vmatprep.subr.bf16.mxu0 %v13185_v26  ;;  %5133 = vst [vmem:[#allocation3 + $0x48] sm:$0xff] %v5092_v34  ;;  %v5010_v25 = vmul.f32 0.25, %v4969_v47  ;;  %v4807_v23 = vadd.f32 %v4766_v62, %v4725_v57  ;;  %v4606_v44 = vld [vmem:[#allocation23 + $0x588] sm:$0xff] }
 0x4b9   : > { %v5169_v17 = vld [vmem:[#allocation3 + $0x33] sm:$0xff]  ;;  %5472 = vmatprep.mubr.f32.mxu0 %v5210_v55  ;;  %v4407_v51 = vpop.f32.mrb[106].mxu1  ;;  %v5373_v45 = vld [vmem:[#allocation14 + $0x148] sm:$0xff] }
 0x4ba   : > { %v4726_v38 = vld [vmem:[#allocation2 + $0x55] sm:$0xff]  ;;  %v4970_v11 = vadd.f32 %v4888_v37, %v12422_v21  ;;  %v12436_v8 = vmul.f32 %v4604_v49, %v4562_v28  ;;  %v8871_v5 = vadd.f32 %v12411_v1, %v4407_v51  ;;  %5473 = vmatmul.mubr.f32.gmra.mrb[84].mxu0 %v5169_v17  ;;  %v4409_v35 = vpop.f32.mrb[107].mxu1  ;;  %v5093_v60 = vmul.f32 %v5052_v6, %v5010_v25  ;;  %v5055_v43 = vld [vmem:[#allocation23 + $0x6b8] sm:$0xff] }
 0x4bb   : > { %v4767_v32 = vld [vmem:[#allocation2 + $0x56] sm:$0xff]  ;;  %v4848_v22 = vld [vmem:[#allocation2 + $0x5f] sm:$0xff]  ;;  %8542 = vmatpush1.bf16.msra.mxu0 %v8541_v3  ;;  %v8550_v3 = vpack.c.bf16 %v5373_v45, %v5372_v10 }
 0x4bc   : > { %v4889_v12 = vadd.f32 %v4848_v22, %v4807_v23  ;;  %4686 = vst [vmem:[#allocation2 + $0x70] sm:$0xff] %v12436_v8  ;;  %v4563_v4 = vmax.f32 %v8871_v5, 0.0  ;;  %v5211_v52 = vld [vmem:[#allocation3 + $0x3c] sm:$0xff]  ;;  %5134 = vst [vmem:[#allocation3 + $0x50] sm:$0xff] %v5093_v60  ;;  %v5011_v21 = vmul.f32 0.25, %v4970_v11  ;;  %8543 = vmatprep.subr.bf16.mxu0 %v13185_v26  ;;  %v4808_v48 = vadd.f32 %v4767_v32, %v4726_v38  ;;  %v4607_v29 = vld [vmem:[#allocation23 + $0x590] sm:$0xff] }
 0x4bd   : > { %v5170_v30 = vld [vmem:[#allocation3 + $0x3b] sm:$0xff]  ;;  %5477 = vmatprep.mubr.f32.mxu0 %v5211_v52  ;;  %v4412_v13 = vpop.f32.mrb[108].mxu1  ;;  %v5374_v6 = vld [vmem:[#allocation14 + $0x150] sm:$0xff]  ;;  %v5375_v17 = vld [vmem:[#allocation14 + $0x158] sm:$0xff] }
 0x4be   : > { %v4727_v14 = vld [vmem:[#allocation2 + $0x5d] sm:$0xff]  ;;  %v4971_v50 = vadd.f32 %v4889_v12, %v12426_v24  ;;  %v12442_v27 = vmul.f32 %v4605_v20, %v4563_v4  ;;  %v8872_v33 = vadd.f32 %v12411_v1, %v4412_v13  ;;  %5478 = vmatmul.mubr.f32.gmra.mrb[86].mxu0 %v5170_v30  ;;  %v4414_v18 = vpop.f32.mrb[109].mxu1  ;;  %v5094_v46 = vmul.f32 %v5053_v19, %v5011_v21  ;;  %v5056_v22 = vld [vmem:[#allocation23 + $0x6c0] sm:$0xff] }
 0x4bf   : > { %v4768_v0 = vld [vmem:[#allocation2 + $0x5e] sm:$0xff]  ;;  %v4849_v63 = vld [vmem:[#allocation2 + $0x67] sm:$0xff]  ;;  %8545 = vmatpush1.bf16.msra.mxu0 %v8544_v53  ;;  %v8553_v19 = vpack.c.bf16 %v5375_v17, %v5374_v6 }
 0x4c0   : > { %v4890_v31 = vadd.f32 %v4849_v63, %v4808_v48  ;;  %4687 = vst [vmem:[#allocation2 + $0x78] sm:$0xff] %v12442_v27  ;;  %v4564_v9 = vmax.f32 %v8872_v33, 0.0  ;;  %v5212_v42 = vld [vmem:[#allocation3 + $0x44] sm:$0xff]  ;;  %5135 = vst [vmem:[#allocation3 + $0x58] sm:$0xff] %v5094_v46  ;;  %v5012_v24 = vmul.f32 0.25, %v4971_v50  ;;  %8546 = vmatprep.subr.bf16.mxu0 %v13185_v26  ;;  %v4809_v16 = vadd.f32 %v4768_v0, %v4727_v14  ;;  %v4608_v5 = vld [vmem:[#allocation23 + $0x598] sm:$0xff] }
 0x4c1   : > { %v5171_v56 = vld [vmem:[#allocation3 + $0x43] sm:$0xff]  ;;  %5482 = vmatprep.mubr.f32.mxu0 %v5212_v42  ;;  %v4417_v54 = vpop.f32.mrb[110].mxu1  ;;  %v5376_v53 = vld [vmem:[#allocation14 + $0x160] sm:$0xff] }
 0x4c2   : > { %v4728_v15 = vld [vmem:[#allocation2 + $0x65] sm:$0xff]  ;;  %v4972_v57 = vadd.f32 %v4890_v31, %v12430_v36  ;;  %v12448_v62 = vmul.f32 %v4606_v44, %v4564_v9  ;;  %v8873_v47 = vadd.f32 %v12411_v1, %v4417_v54  ;;  %5483 = vmatmul.mubr.f32.gmra.mrb[88].mxu0 %v5171_v56  ;;  %v4419_v49 = vpop.f32.mrb[111].mxu1  ;;  %v5095_v2 = vmul.f32 %v5054_v40, %v5012_v24  ;;  %v5057_v63 = vld [vmem:[#allocation23 + $0x6c8] sm:$0xff]  ;;  %v5379_v56 = vld [vmem:[#allocation14 + $0x178] sm:$0xff] }
 0x4c3   : > { %v4769_v61 = vld [vmem:[#allocation2 + $0x66] sm:$0xff]  ;;  %v4850_v34 = vld [vmem:[#allocation2 + $0x6f] sm:$0xff]  ;;  %8548 = vmatpush1.bf16.msra.mxu0 %v8547_v58 }
 0x4c4   : > { %v4891_v41 = vadd.f32 %v4850_v34, %v4809_v16  ;;  %4688 = vst [vmem:[#allocation2 + $0x80] sm:$0xff] %v12448_v62  ;;  %v4565_v37 = vmax.f32 %v8873_v47, 0.0  ;;  %v5213_v28 = vld [vmem:[#allocation3 + $0x4c] sm:$0xff]  ;;  %5136 = vst [vmem:[#allocation3 + $0x60] sm:$0xff] %v5095_v2  ;;  %v5013_v36 = vmul.f32 0.25, %v4972_v57  ;;  %8549 = vmatprep.subr.bf16.mxu0 %v13185_v26  ;;  %v4810_v25 = vadd.f32 %v4769_v61, %v4728_v15  ;;  %v5377_v30 = vld [vmem:[#allocation14 + $0x168] sm:$0xff] }
 0x4c5   : > { %v5172_v55 = vld [vmem:[#allocation3 + $0x4b] sm:$0xff]  ;;  %5487 = vmatprep.mubr.f32.mxu0 %v5213_v28  ;;  %v4422_v7 = vpop.f32.mrb[112].mxu1  ;;  %v4609_v33 = vld [vmem:[#allocation23 + $0x5a0] sm:$0xff]  ;;  %v8556_v40 = vpack.c.bf16 %v5377_v30, %v5376_v53 }
 0x4c6   : > { %v4729_v23 = vld [vmem:[#allocation2 + $0x6d] sm:$0xff]  ;;  %v4973_v38 = vadd.f32 %v4891_v41, %v12436_v8  ;;  %v12454_v32 = vmul.f32 %v4607_v29, %v4565_v37  ;;  %v8874_v11 = vadd.f32 %v12411_v1, %v4422_v7  ;;  %5488 = vmatmul.mubr.f32.gmra.mrb[90].mxu0 %v5172_v55  ;;  %v4424_v20 = vpop.f32.mrb[113].mxu1  ;;  %v5096_v35 = vmul.f32 %v5055_v43, %v5013_v36  ;;  %v5058_v34 = vld [vmem:[#allocation23 + $0x6d0] sm:$0xff] }
 0x4c7   : > { %v4770_v51 = vld [vmem:[#allocation2 + $0x6e] sm:$0xff]  ;;  %v4851_v60 = vld [vmem:[#allocation2 + $0x77] sm:$0xff]  ;;  %8551 = vmatpush1.bf16.msra.mxu0 %v8550_v3  ;;  %v5380_v3 = vld [vmem:[#allocation14 + $0x180] sm:$0xff] }
 0x4c8   : > { %v4892_v39 = vadd.f32 %v4851_v60, %v4810_v25  ;;  %4689 = vst [vmem:[#allocation2 + $0x88] sm:$0xff] %v12454_v32  ;;  %v4566_v12 = vmax.f32 %v8874_v11, 0.0  ;;  %v5214_v4 = vld [vmem:[#allocation3 + $0x54] sm:$0xff]  ;;  %5137 = vst [vmem:[#allocation3 + $0x68] sm:$0xff] %v5096_v35  ;;  %v5014_v8 = vmul.f32 0.25, %v4973_v38  ;;  %8552 = vmatprep.subr.bf16.mxu0 %v13185_v26  ;;  %v4811_v21 = vadd.f32 %v4770_v51, %v4729_v23  ;;  %v5378_v58 = vld [vmem:[#allocation14 + $0x170] sm:$0xff] }
 0x4c9   : > { %v5173_v52 = vld [vmem:[#allocation3 + $0x53] sm:$0xff]  ;;  %5492 = vmatprep.mubr.f32.mxu0 %v5214_v4  ;;  %v4427_v59 = vpop.f32.mrb[114].mxu1  ;;  %v4610_v47 = vld [vmem:[#allocation23 + $0x5a8] sm:$0xff]  ;;  %v8559_v43 = vpack.c.bf16 %v5379_v56, %v5378_v58 }
 0x4ca   : > { %v4730_v48 = vld [vmem:[#allocation2 + $0x75] sm:$0xff]  ;;  %v4974_v14 = vadd.f32 %v4892_v39, %v12442_v27  ;;  %v12460_v0 = vmul.f32 %v4608_v5, %v4566_v12  ;;  %v8875_v50 = vadd.f32 %v12411_v1, %v4427_v59  ;;  %5493 = vmatmul.mubr.f32.gmra.mrb[92].mxu0 %v5173_v52  ;;  %v4429_v44 = vpop.f32.mrb[115].mxu1  ;;  %v5097_v18 = vmul.f32 %v5056_v22, %v5014_v8  ;;  %v5381_v55 = vld [vmem:[#allocation14 + $0x188] sm:$0xff]  ;;  %v5059_v60 = vld [vmem:[#allocation23 + $0x6d8] sm:$0xff] }
 0x4cb   : > { %v4771_v13 = vld [vmem:[#allocation2 + $0x76] sm:$0xff]  ;;  %v4852_v46 = vld [vmem:[#allocation2 + $0x7f] sm:$0xff]  ;;  %8554 = vmatpush1.bf16.msra.mxu0 %v8553_v19  ;;  %v8562_v22 = vpack.c.bf16 %v5381_v55, %v5380_v3 }
 0x4cc   : > { %v4893_v10 = vadd.f32 %v4852_v46, %v4811_v21  ;;  %4690 = vst [vmem:[#allocation2 + $0x90] sm:$0xff] %v12460_v0  ;;  %v4567_v31 = vmax.f32 %v8875_v50, 0.0  ;;  %v5215_v9 = vld [vmem:[#allocation3 + $0x5c] sm:$0xff]  ;;  %5138 = vst [vmem:[#allocation3 + $0x70] sm:$0xff] %v5097_v18  ;;  %v5015_v27 = vmul.f32 0.25, %v4974_v14  ;;  %8555 = vmatprep.subr.bf16.mxu0 %v13185_v26  ;;  %v4812_v24 = vadd.f32 %v4771_v13, %v4730_v48  ;;  %v4611_v11 = vld [vmem:[#allocation23 + $0x5b0] sm:$0xff] }
 0x4cd   : > { %v5174_v42 = vld [vmem:[#allocation3 + $0x5b] sm:$0xff]  ;;  %5497 = vmatprep.mubr.f32.mxu0 %v5215_v9  ;;  %v4432_v45 = vpop.f32.mrb[116].mxu1  ;;  %v5382_v19 = vld [vmem:[#allocation14 + $0x190] sm:$0xff]  ;;  %v5383_v52 = vld [vmem:[#allocation14 + $0x198] sm:$0xff] }
 0x4ce   : > { %v4731_v16 = vld [vmem:[#allocation2 + $0x7d] sm:$0xff]  ;;  %v4975_v15 = vadd.f32 %v4893_v10, %v12448_v62  ;;  %v12466_v61 = vmul.f32 %v4609_v33, %v4567_v31  ;;  %v8876_v57 = vadd.f32 %v12411_v1, %v4432_v45  ;;  %5498 = vmatmul.mubr.f32.gmra.mrb[94].mxu0 %v5174_v42  ;;  %v4434_v29 = vpop.f32.mrb[117].mxu1  ;;  %v5098_v49 = vmul.f32 %v5057_v63, %v5015_v27  ;;  %v5060_v46 = vld [vmem:[#allocation23 + $0x6e0] sm:$0xff] }
 0x4cf   : > { %v4772_v54 = vld [vmem:[#allocation2 + $0x7e] sm:$0xff]  ;;  %v4853_v2 = vld [vmem:[#allocation2 + $0x87] sm:$0xff]  ;;  %8557 = vmatpush1.bf16.msra.mxu0 %v8556_v40  ;;  %v8565_v63 = vpack.c.bf16 %v5383_v52, %v5382_v19 }
 0x4d0   : > { %v4894_v6 = vadd.f32 %v4853_v2, %v4812_v24  ;;  %4691 = vst [vmem:[#allocation2 + $0x98] sm:$0xff] %v12466_v61  ;;  %v4568_v41 = vmax.f32 %v8876_v57, 0.0  ;;  %v5216_v37 = vld [vmem:[#allocation3 + $0x64] sm:$0xff]  ;;  %5139 = vst [vmem:[#allocation3 + $0x78] sm:$0xff] %v5098_v49  ;;  %v5016_v62 = vmul.f32 0.25, %v4975_v15  ;;  %8558 = vmatprep.subr.bf16.mxu0 %v13185_v26  ;;  %v4813_v36 = vadd.f32 %v4772_v54, %v4731_v16  ;;  %v4612_v50 = vld [vmem:[#allocation23 + $0x5b8] sm:$0xff] }
 0x4d1   : > { %v5175_v28 = vld [vmem:[#allocation3 + $0x63] sm:$0xff]  ;;  %5502 = vmatprep.mubr.f32.mxu0 %v5216_v37  ;;  %v4437_v17 = vpop.f32.mrb[118].mxu1  ;;  %v5384_v40 = vld [vmem:[#allocation14 + $0x1a0] sm:$0xff] }
 0x4d2   : > { %v4732_v25 = vld [vmem:[#allocation2 + $0x85] sm:$0xff]  ;;  %v4976_v23 = vadd.f32 %v4894_v6, %v12454_v32  ;;  %v12472_v51 = vmul.f32 %v4610_v47, %v4568_v41  ;;  %v8877_v38 = vadd.f32 %v12411_v1, %v4437_v17  ;;  %5503 = vmatmul.mubr.f32.gmra.mrb[96].mxu0 %v5175_v28  ;;  %v4439_v5 = vpop.f32.mrb[119].mxu1  ;;  %v5099_v20 = vmul.f32 %v5058_v34, %v5016_v62  ;;  %v5061_v2 = vld [vmem:[#allocation23 + $0x6e8] sm:$0xff]  ;;  %v5387_v28 = vld [vmem:[#allocation14 + $0x1b8] sm:$0xff] }
 0x4d3   : > { %v4773_v7 = vld [vmem:[#allocation2 + $0x86] sm:$0xff]  ;;  %v4854_v35 = vld [vmem:[#allocation2 + $0x8f] sm:$0xff]  ;;  %8560 = vmatpush1.bf16.msra.mxu0 %v8559_v43 }
 0x4d4   : > { %v4895_v53 = vadd.f32 %v4854_v35, %v4813_v36  ;;  %4692 = vst [vmem:[#allocation2 + $0xa0] sm:$0xff] %v12472_v51  ;;  %v4569_v39 = vmax.f32 %v8877_v38, 0.0  ;;  %v5217_v12 = vld [vmem:[#allocation3 + $0x6c] sm:$0xff]  ;;  %5140 = vst [vmem:[#allocation3 + $0x80] sm:$0xff] %v5099_v20  ;;  %v5017_v32 = vmul.f32 0.25, %v4976_v23  ;;  %8561 = vmatprep.subr.bf16.mxu0 %v13185_v26  ;;  %v4814_v8 = vadd.f32 %v4773_v7, %v4732_v25  ;;  %v5385_v42 = vld [vmem:[#allocation14 + $0x1a8] sm:$0xff] }
 0x4d5   : > { %v5176_v4 = vld [vmem:[#allocation3 + $0x6b] sm:$0xff]  ;;  %5507 = vmatprep.mubr.f32.mxu0 %v5217_v12  ;;  %v4442_v30 = vpop.f32.mrb[120].mxu1  ;;  %v4613_v57 = vld [vmem:[#allocation23 + $0x5c0] sm:$0xff]  ;;  %v8568_v34 = vpack.c.bf16 %v5385_v42, %v5384_v40 }
 0x4d6   : > { %v4733_v21 = vld [vmem:[#allocation2 + $0x8d] sm:$0xff]  ;;  %v4977_v48 = vadd.f32 %v4895_v53, %v12460_v0  ;;  %v12478_v13 = vmul.f32 %v4611_v11, %v4569_v39  ;;  %v8878_v14 = vadd.f32 %v12411_v1, %v4442_v30  ;;  %5508 = vmatmul.mubr.f32.gmra.mrb[98].mxu0 %v5176_v4  ;;  %v4444_v33 = vpop.f32.mrb[121].mxu1  ;;  %v5100_v44 = vmul.f32 %v5059_v60, %v5017_v32  ;;  %v5062_v35 = vld [vmem:[#allocation23 + $0x6f0] sm:$0xff] }
 0x4d7   : > { %v4774_v59 = vld [vmem:[#allocation2 + $0x8e] sm:$0xff]  ;;  %v4855_v18 = vld [vmem:[#allocation2 + $0x97] sm:$0xff]  ;;  %8563 = vmatpush1.bf16.msra.mxu0 %v8562_v22  ;;  %v5388_v22 = vld [vmem:[#allocation14 + $0x1c0] sm:$0xff] }
 0x4d8   : > { %v4896_v58 = vadd.f32 %v4855_v18, %v4814_v8  ;;  %4693 = vst [vmem:[#allocation2 + $0xa8] sm:$0xff] %v12478_v13  ;;  %v4570_v10 = vmax.f32 %v8878_v14, 0.0  ;;  %v5218_v31 = vld [vmem:[#allocation3 + $0x74] sm:$0xff]  ;;  %5141 = vst [vmem:[#allocation3 + $0x88] sm:$0xff] %v5100_v44  ;;  %v5018_v0 = vmul.f32 0.25, %v4977_v48  ;;  %8564 = vmatprep.subr.bf16.mxu0 %v13185_v26  ;;  %v4815_v27 = vadd.f32 %v4774_v59, %v4733_v21  ;;  %v5386_v43 = vld [vmem:[#allocation14 + $0x1b0] sm:$0xff] }
 0x4d9   : > { %v5177_v9 = vld [vmem:[#allocation3 + $0x73] sm:$0xff]  ;;  %5512 = vmatprep.mubr.f32.mxu0 %v5218_v31  ;;  %v4447_v56 = vpop.f32.mrb[122].mxu1  ;;  %v4614_v38 = vld [vmem:[#allocation23 + $0x5c8] sm:$0xff]  ;;  %v8571_v60 = vpack.c.bf16 %v5387_v28, %v5386_v43 }
 0x4da   : > { %v4734_v24 = vld [vmem:[#allocation2 + $0x95] sm:$0xff]  ;;  %v4978_v16 = vadd.f32 %v4896_v58, %v12466_v61  ;;  %v12484_v54 = vmul.f32 %v4612_v50, %v4570_v10  ;;  %v8879_v15 = vadd.f32 %v12411_v1, %v4447_v56  ;;  %5513 = vmatmul.mubr.f32.gmra.mrb[100].mxu0 %v5177_v9  ;;  %v4449_v47 = vpop.f32.mrb[123].mxu1  ;;  %v5101_v29 = vmul.f32 %v5060_v46, %v5018_v0  ;;  %v5389_v4 = vld [vmem:[#allocation14 + $0x1c8] sm:$0xff]  ;;  %v5063_v18 = vld [vmem:[#allocation23 + $0x6f8] sm:$0xff] }
 0x4db   : > { %v4775_v45 = vld [vmem:[#allocation2 + $0x96] sm:$0xff]  ;;  %v4856_v49 = vld [vmem:[#allocation2 + $0x9f] sm:$0xff]  ;;  %8566 = vmatpush1.bf16.msra.mxu0 %v8565_v63  ;;  %v8574_v46 = vpack.c.bf16 %v5389_v4, %v5388_v22 }
 0x4dc   : > { %v4897_v3 = vadd.f32 %v4856_v49, %v4815_v27  ;;  %4694 = vst [vmem:[#allocation2 + $0xb0] sm:$0xff] %v12484_v54  ;;  %v4571_v6 = vmax.f32 %v8879_v15, 0.0  ;;  %v5219_v41 = vld [vmem:[#allocation3 + $0x7c] sm:$0xff]  ;;  %5142 = vst [vmem:[#allocation3 + $0x90] sm:$0xff] %v5101_v29  ;;  %v5019_v61 = vmul.f32 0.25, %v4978_v16  ;;  %8567 = vmatprep.subr.bf16.mxu0 %v13185_v26  ;;  %v4816_v62 = vadd.f32 %v4775_v45, %v4734_v24  ;;  %v4615_v14 = vld [vmem:[#allocation23 + $0x5d0] sm:$0xff] }
 0x4dd   : > { %v5178_v37 = vld [vmem:[#allocation3 + $0x7b] sm:$0xff]  ;;  %5517 = vmatprep.mubr.f32.mxu0 %v5219_v41  ;;  %v4452_v55 = vpop.f32.mrb[124].mxu1  ;;  %v5390_v63 = vld [vmem:[#allocation14 + $0x1d0] sm:$0xff]  ;;  %v5391_v9 = vld [vmem:[#allocation14 + $0x1d8] sm:$0xff] }
 0x4de   : > { %v4735_v36 = vld [vmem:[#allocation2 + $0x9d] sm:$0xff]  ;;  %v4979_v25 = vadd.f32 %v4897_v3, %v12472_v51  ;;  %v12490_v7 = vmul.f32 %v4613_v57, %v4571_v6  ;;  %v8880_v23 = vadd.f32 %v12411_v1, %v4452_v55  ;;  %5518 = vmatmul.mubr.f32.gmra.mrb[102].mxu0 %v5178_v37  ;;  %v4454_v11 = vpop.f32.mrb[125].mxu1  ;;  %v5102_v5 = vmul.f32 %v5061_v2, %v5019_v61  ;;  %v5064_v49 = vld [vmem:[#allocation23 + $0x700] sm:$0xff] }
 0x4df   : > { %v4776_v17 = vld [vmem:[#allocation2 + $0x9e] sm:$0xff]  ;;  %v4857_v20 = vld [vmem:[#allocation2 + $0xa7] sm:$0xff]  ;;  %8569 = vmatpush1.bf16.msra.mxu0 %v8568_v34  ;;  %v8577_v2 = vpack.c.bf16 %v5391_v9, %v5390_v63 }
 0x4e0   : > { %v4898_v19 = vadd.f32 %v4857_v20, %v4816_v62  ;;  %4695 = vst [vmem:[#allocation2 + $0xb8] sm:$0xff] %v12490_v7  ;;  %v4572_v53 = vmax.f32 %v8880_v23, 0.0  ;;  %v5220_v39 = vld [vmem:[#allocation3 + $0x84] sm:$0xff]  ;;  %5143 = vst [vmem:[#allocation3 + $0x98] sm:$0xff] %v5102_v5  ;;  %v5020_v51 = vmul.f32 0.25, %v4979_v25  ;;  %8570 = vmatprep.subr.bf16.mxu0 %v13185_v26  ;;  %v4817_v32 = vadd.f32 %v4776_v17, %v4735_v36  ;;  %v4616_v15 = vld [vmem:[#allocation23 + $0x5d8] sm:$0xff] }
 0x4e1   : > { %v5179_v12 = vld [vmem:[#allocation3 + $0x83] sm:$0xff]  ;;  %5522 = vmatprep.mubr.f32.mxu0 %v5220_v39  ;;  %v4457_v52 = vpop.f32.mrb[126].mxu1  ;;  %v5392_v34 = vld [vmem:[#allocation14 + $0x1e0] sm:$0xff] }
 0x4e2   : > { %v4736_v8 = vld [vmem:[#allocation2 + $0xa5] sm:$0xff]  ;;  %v4980_v21 = vadd.f32 %v4898_v19, %v12478_v13  ;;  %v12496_v59 = vmul.f32 %v4614_v38, %v4572_v53  ;;  %v8881_v48 = vadd.f32 %v12411_v1, %v4457_v52  ;;  %5523 = vmatmul.mubr.f32.gmra.mrb[104].mxu0 %v5179_v12  ;;  %v4459_v50 = vpop.f32.mrb[127].mxu1  ;;  %v5103_v33 = vmul.f32 %v5062_v35, %v5020_v51  ;;  %v5065_v20 = vld [vmem:[#allocation23 + $0x708] sm:$0xff]  ;;  %v5395_v12 = vld [vmem:[#allocation14 + $0x1f8] sm:$0xff] }
 0x4e3   : > { %v4777_v30 = vld [vmem:[#allocation2 + $0xa6] sm:$0xff]  ;;  %v4858_v44 = vld [vmem:[#allocation2 + $0xaf] sm:$0xff]  ;;  %8572 = vmatpush1.bf16.msra.mxu0 %v8571_v60 }
 0x4e4   : > { %v4899_v40 = vadd.f32 %v4858_v44, %v4817_v32  ;;  %4696 = vst [vmem:[#allocation2 + $0xc0] sm:$0xff] %v12496_v59  ;;  %v4573_v58 = vmax.f32 %v8881_v48, 0.0  ;;  %v5221_v10 = vld [vmem:[#allocation3 + $0x8c] sm:$0xff]  ;;  %5144 = vst [vmem:[#allocation3 + $0xa0] sm:$0xff] %v5103_v33  ;;  %v5021_v13 = vmul.f32 0.25, %v4980_v21  ;;  %8573 = vmatprep.subr.bf16.mxu0 %v13185_v26  ;;  %v4818_v0 = vadd.f32 %v4777_v30, %v4736_v8  ;;  %v5393_v37 = vld [vmem:[#allocation14 + $0x1e8] sm:$0xff] }
 0x4e5   : > { %v5180_v31 = vld [vmem:[#allocation3 + $0x8b] sm:$0xff]  ;;  %5527 = vmatprep.mubr.f32.mxu0 %v5221_v10  ;;  %v4462_v42 = vpop.f32.mrb[128].mxu1  ;;  %v4617_v23 = vld [vmem:[#allocation23 + $0x5e0] sm:$0xff]  ;;  %v8580_v35 = vpack.c.bf16 %v5393_v37, %v5392_v34 }
 0x4e6   : > { %v4737_v27 = vld [vmem:[#allocation2 + $0xad] sm:$0xff]  ;;  %v4981_v24 = vadd.f32 %v4899_v40, %v12484_v54  ;;  %v12502_v45 = vmul.f32 %v4615_v14, %v4573_v58  ;;  %v8882_v16 = vadd.f32 %v12411_v1, %v4462_v42  ;;  %5528 = vmatmul.mubr.f32.gmra.mrb[106].mxu0 %v5180_v31  ;;  %v4464_v57 = vpop.f32.mrb[129].mxu1  ;;  %v5104_v47 = vmul.f32 %v5063_v18, %v5021_v13  ;;  %v5066_v44 = vld [vmem:[#allocation23 + $0x710] sm:$0xff]  ;;  %v12522_v42 = vld [vmem:[#allocation12] ss:$0 sm:$0xff] }
 0x4e7   : > { %v4778_v56 = vld [vmem:[#allocation2 + $0xae] sm:$0xff]  ;;  %v4859_v29 = vld [vmem:[#allocation2 + $0xb7] sm:$0xff]  ;;  %8575 = vmatpush1.bf16.msra.mxu0 %v8574_v46 }
 0x4e8   : > { %v4900_v43 = vadd.f32 %v4859_v29, %v4818_v0  ;;  %4697 = vst [vmem:[#allocation2 + $0xc8] sm:$0xff] %v12502_v45  ;;  %v4574_v3 = vmax.f32 %v8882_v16, 0.0  ;;  %v5222_v6 = vld [vmem:[#allocation3 + $0x94] sm:$0xff]  ;;  %5145 = vst [vmem:[#allocation3 + $0xa8] sm:$0xff] %v5104_v47  ;;  %v5022_v54 = vmul.f32 0.25, %v4981_v24  ;;  %8576 = vmatprep.subr.bf16.mxu0 %v13185_v26  ;;  %v4819_v61 = vadd.f32 %v4778_v56, %v4737_v27  ;;  %v5394_v60 = vld [vmem:[#allocation14 + $0x1f0] sm:$0xff] }
 0x4e9   : > { %v5181_v41 = vld [vmem:[#allocation3 + $0x93] sm:$0xff]  ;;  %5532 = vmatprep.mubr.f32.mxu0 %v5222_v6  ;;  %v4467_v28 = vpop.f32.mrb[130].mxu1  ;;  %v4618_v33 = vld [vmem:[#allocation23 + $0x5e8] sm:$0xff]  ;;  %v8583_v18 = vpack.c.bf16 %v5395_v12, %v5394_v60 }
 0x4ea   : > { %v4738_v62 = vld [vmem:[#allocation2 + $0xb5] sm:$0xff]  ;;  %v4982_v36 = vadd.f32 %v4900_v43, %v12490_v7  ;;  %v12508_v17 = vmul.f32 %v4616_v15, %v4574_v3  ;;  %v8883_v25 = vadd.f32 %v12411_v1, %v4467_v28  ;;  %5533 = vmatmul.mubr.f32.gmra.mrb[108].mxu0 %v5181_v41  ;;  %v4469_v38 = vpop.f32.mrb[131].mxu1  ;;  %v5105_v11 = vmul.f32 %v5064_v49, %v5022_v54  ;;  %v5067_v57 = vld [vmem:[#allocation23 + $0x718] sm:$0xff] }
 0x4eb   : > { %v4779_v55 = vld [vmem:[#allocation2 + $0xb6] sm:$0xff]  ;;  %v4860_v5 = vld [vmem:[#allocation2 + $0xbf] sm:$0xff]  ;;  %8578 = vmatpush1.bf16.msra.mxu0 %v8577_v2 }
 0x4ec   : > { %v4901_v22 = vadd.f32 %v4860_v5, %v4819_v61  ;;  %4698 = vst [vmem:[#allocation2 + $0xd0] sm:$0xff] %v12508_v17  ;;  %v4575_v19 = vmax.f32 %v8883_v25, 0.0  ;;  %v5223_v53 = vld [vmem:[#allocation3 + $0x9c] sm:$0xff]  ;;  %5146 = vst [vmem:[#allocation3 + $0xb0] sm:$0xff] %v5105_v11  ;;  %v5023_v7 = vmul.f32 0.25, %v4982_v36  ;;  %8579 = vmatprep.subr.bf16.mxu0 %v13185_v26  ;;  %v4820_v51 = vadd.f32 %v4779_v55, %v4738_v62  ;;  %v4619_v15 = vld [vmem:[#allocation23 + $0x5f0] sm:$0xff] }
 0x4ed   : > { %v5182_v39 = vld [vmem:[#allocation3 + $0x9b] sm:$0xff]  ;;  %5537 = vmatprep.mubr.f32.mxu0 %v5223_v53  ;;  %v4472_v4 = vpop.f32.mrb[132].mxu1 }
 0x4ee   : > { %v4739_v32 = vld [vmem:[#allocation2 + $0xbd] sm:$0xff]  ;;  %v4983_v8 = vadd.f32 %v4901_v22, %v12496_v59  ;;  %v12514_v30 = vmul.f32 %v4617_v23, %v4575_v19  ;;  %v8884_v21 = vadd.f32 %v12411_v1, %v4472_v4  ;;  %5538 = vmatmul.mubr.f32.gmra.mrb[110].mxu0 %v5182_v39  ;;  %v4474_v48 = vpop.f32.mrb[133].mxu1  ;;  %v5106_v14 = vmul.f32 %v5065_v20, %v5023_v7  ;;  %v5068_v36 = vld [vmem:[#allocation23 + $0x720] sm:$0xff]  ;;  %v5069_v4 = vld [vmem:[#allocation23 + $0x728] sm:$0xff] }
 0x4ef   : > { %v4780_v52 = vld [vmem:[#allocation2 + $0xbe] sm:$0xff]  ;;  %v4861_v50 = vld [vmem:[#allocation2 + $0xc7] sm:$0xff]  ;;  %8581 = vmatpush1.bf16.msra.mxu0 %v8580_v35 }
 0x4f0   : > { %v4902_v46 = vadd.f32 %v4861_v50, %v4820_v51  ;;  %4699 = vst [vmem:[#allocation2 + $0xd8] sm:$0xff] %v12514_v30  ;;  %v4576_v63 = vmax.f32 %v8884_v21, 0.0  ;;  %v5224_v40 = vld [vmem:[#allocation3 + $0xa4] sm:$0xff]  ;;  %5147 = vst [vmem:[#allocation3 + $0xb8] sm:$0xff] %v5106_v14  ;;  %v5024_v59 = vmul.f32 0.25, %v4983_v8  ;;  %8582 = vmatprep.subr.bf16.mxu0 %v13185_v26  ;;  %v4821_v10 = vadd.f32 %v4780_v52, %v4739_v32  ;;  %v4620_v55 = vld [vmem:[#allocation23 + $0x5f8] sm:$0xff] }
 0x4f1   : > { %v5183_v58 = vld [vmem:[#allocation3 + $0xa3] sm:$0xff]  ;;  %5542 = vmatprep.mubr.f32.mxu0 %v5224_v40  ;;  %v4477_v1 = vpop.f32.mrb[134].mxu1 }
 0x4f2   : > { %v4740_v31 = vld [vmem:[#allocation2 + $0xc5] sm:$0xff]  ;;  %v4984_v9 = vadd.f32 %v4902_v46, %v12502_v45  ;;  %v12520_v0 = vmul.f32 %v4618_v33, %v4576_v63  ;;  %v8885_v27 = vadd.f32 %v12522_v42, %v4477_v1  ;;  %5543 = vmatmul.mubr.f32.gmra.mrb[112].mxu0 %v5183_v58  ;;  %v4479_v56 = vpop.f32.mrb[135].mxu1  ;;  %v5107_v24 = vmul.f32 %v5066_v44, %v5024_v59  ;;  %v4622_v59 = vld [vmem:[#allocation23 + $0x608] sm:$0xff] }
 0x4f3   : > { %v4781_v13 = vld [vmem:[#allocation2 + $0xc6] sm:$0xff]  ;;  %v4862_v16 = vld [vmem:[#allocation2 + $0xcf] sm:$0xff]  ;;  %8584 = vmatpush1.bf16.msra.mxu0 %v8583_v18 }
 0x4f4   : > { %v4903_v47 = vadd.f32 %v4862_v16, %v4821_v10  ;;  %4700 = vst [vmem:[#allocation2 + $0xe0] sm:$0xff] %v12520_v0  ;;  %v4577_v29 = vmax.f32 %v8885_v27, 0.0  ;;  %v5225_v49 = vld [vmem:[#allocation3 + $0xac] sm:$0xff]  ;;  %5148 = vst [vmem:[#allocation3 + $0xc0] sm:$0xff] %v5107_v24  ;;  %v5025_v45 = vmul.f32 0.25, %v4984_v9  ;;  %8681 = vmatprep.subr.bf16.mxu0 %v13185_v26  ;;  %v4822_v34 = vadd.f32 %v4781_v13, %v4740_v31  ;;  %v4621_v51 = vld [vmem:[#allocation23 + $0x600] sm:$0xff] }
 0x4f5   : > { %v5184_v2 = vld [vmem:[#allocation3 + $0xab] sm:$0xff]  ;;  %5547 = vmatprep.mubr.f32.mxu0 %v5225_v49  ;;  %v4482_v43 = vpop.f32.mrb[136].mxu1 }
 0x4f6   : > { %v4741_v3 = vld [vmem:[#allocation2 + $0xcd] sm:$0xff]  ;;  %v4985_v41 = vadd.f32 %v4903_v47, %v12508_v17  ;;  %v4660_v54 = vmul.f32 %v4619_v15, %v4577_v29  ;;  %v8886_v37 = vadd.f32 %v12522_v42, %v4482_v43  ;;  %5548 = vmatmul.mubr.f32.gmra.mrb[114].mxu0 %v5184_v2  ;;  %v4484_v61 = vpop.f32.mrb[137].mxu1  ;;  %v5108_v28 = vmul.f32 %v5067_v57, %v5025_v45  ;;  %v5070_v10 = vld [vmem:[#allocation23 + $0x730] sm:$0xff] }
 0x4f7   : > { %v4782_v6 = vld [vmem:[#allocation2 + $0xce] sm:$0xff]  ;;  %v4863_v62 = vld [vmem:[#allocation2 + $0xd7] sm:$0xff] }
 0x4f8   : > { %v4904_v25 = vadd.f32 %v4863_v62, %v4822_v34  ;;  %4701 = vst [vmem:[#allocation2 + $0xe8] sm:$0xff] %v4660_v54  ;;  %v4578_v23 = vmax.f32 %v8886_v37, 0.0  ;;  %v5226_v38 = vld [vmem:[#allocation3 + $0xb4] sm:$0xff]  ;;  %5149 = vst [vmem:[#allocation3 + $0xc8] sm:$0xff] %v5108_v28  ;;  %v5026_v5 = vmul.f32 0.25, %v4985_v41  ;;  %v4823_v20 = vadd.f32 %v4782_v6, %v4741_v3 }
 0x4f9   : > { %v5185_v11 = vld [vmem:[#allocation3 + $0xb3] sm:$0xff]  ;;  %5552 = vmatprep.mubr.f32.mxu0 %v5226_v38  ;;  %v4487_v35 = vpop.f32.mrb[138].mxu1 }
 0x4fa   : > { %v4742_v17 = vld [vmem:[#allocation2 + $0xd5] sm:$0xff]  ;;  %v4986_v22 = vadd.f32 %v4904_v25, %v12514_v30  ;;  %v4661_v19 = vmul.f32 %v4620_v55, %v4578_v23  ;;  %v8887_v53 = vadd.f32 %v12522_v42, %v4487_v35  ;;  %5553 = vmatmul.mubr.f32.gmra.mrb[116].mxu0 %v5185_v11  ;;  %v4489_v39 = vpop.f32.mrb[139].mxu1  ;;  %v5109_v7 = vmul.f32 %v5068_v36, %v5026_v5  ;;  %v5071_v34 = vld [vmem:[#allocation23 + $0x738] sm:$0xff] }
 0x4fb   : > { %v4783_v60 = vld [vmem:[#allocation2 + $0xd6] sm:$0xff]  ;;  %v4864_v12 = vld [vmem:[#allocation2 + $0xdf] sm:$0xff] }
 0x4fc   : > { %v4905_v32 = vadd.f32 %v4864_v12, %v4823_v20  ;;  %4702 = vst [vmem:[#allocation2 + $0xf0] sm:$0xff] %v4661_v19  ;;  %v4579_v52 = vmax.f32 %v8887_v53, 0.0  ;;  %v5227_v8 = vld [vmem:[#allocation3 + $0xbc] sm:$0xff]  ;;  %5150 = vst [vmem:[#allocation3 + $0xd0] sm:$0xff] %v5109_v7  ;;  %v5027_v48 = vmul.f32 0.25, %v4986_v22  ;;  %v4824_v14 = vadd.f32 %v4783_v60, %v4742_v17  ;;  %v4623_v45 = vld [vmem:[#allocation23 + $0x610] sm:$0xff] }
 0x4fd   : > { %v5186_v21 = vld [vmem:[#allocation3 + $0xbb] sm:$0xff]  ;;  %5557 = vmatprep.mubr.f32.mxu0 %v5227_v8  ;;  %v4492_v50 = vpop.f32.mrb[140].mxu1 }
 0x4fe   : > { %v4743_v30 = vld [vmem:[#allocation2 + $0xdd] sm:$0xff]  ;;  %v4987_v44 = vadd.f32 %v4905_v32, %v12520_v0  ;;  %v4662_v18 = vmul.f32 %v4621_v51, %v4579_v52  ;;  %v8888_v46 = vadd.f32 %v12522_v42, %v4492_v50  ;;  %5558 = vmatmul.mubr.f32.gmra.mrb[118].mxu0 %v5186_v21  ;;  %v4494_v63 = vpop.f32.mrb[141].mxu1  ;;  %v5110_v40 = vmul.f32 %v5069_v4, %v5027_v48  ;;  %v5072_v20 = vld [vmem:[#allocation23 + $0x740] sm:$0xff] }
 0x4ff   : > { %v4784_v33 = vld [vmem:[#allocation2 + $0xde] sm:$0xff]  ;;  %v4865_v58 = vld [vmem:[#allocation2 + $0xe7] sm:$0xff] }
 0x500   : > { %v4906_v1 = vadd.f32 %v4865_v58, %v4824_v14  ;;  %4703 = vst [vmem:[#allocation2 + $0xf8] sm:$0xff] %v4662_v18  ;;  %v4580_v31 = vmax.f32 %v8888_v46, 0.0  ;;  %v5228_v13 = vld [vmem:[#allocation3 + $0xc4] sm:$0xff]  ;;  %5151 = vst [vmem:[#allocation3 + $0xd8] sm:$0xff] %v5110_v40  ;;  %v5028_v27 = vmul.f32 0.25, %v4987_v44  ;;  %v4825_v56 = vadd.f32 %v4784_v33, %v4743_v30  ;;  %v4624_v5 = vld [vmem:[#allocation23 + $0x618] sm:$0xff] }
 0x501   : > { %v5187_v9 = vld [vmem:[#allocation3 + $0xc3] sm:$0xff]  ;;  %5562 = vmatprep.mubr.f32.mxu0 %v5228_v13  ;;  %v4497_v24 = vpop.f32.mrb[142].mxu1 }
 0x502   : > { %v4744_v0 = vld [vmem:[#allocation2 + $0xe5] sm:$0xff]  ;;  %v4988_v15 = vadd.f32 %v4906_v1, %v4660_v54  ;;  %v4663_v57 = vmul.f32 %v4622_v59, %v4580_v31  ;;  %v8889_v47 = vadd.f32 %v12522_v42, %v4497_v24  ;;  %5563 = vmatmul.mubr.f32.gmra.mrb[120].mxu0 %v5187_v9  ;;  %v4499_v29 = vpop.f32.mrb[143].mxu1  ;;  %v5111_v49 = vmul.f32 %v5070_v10, %v5028_v27  ;;  %v5073_v14 = vld [vmem:[#allocation23 + $0x748] sm:$0xff] }
 0x503   : > { %v4785_v16 = vld [vmem:[#allocation2 + $0xe6] sm:$0xff]  ;;  %v4866_v2 = vld [vmem:[#allocation2 + $0xef] sm:$0xff] }
 0x504   : > { %v4907_v43 = vadd.f32 %v4866_v2, %v4825_v56  ;;  %4704 = vst [vmem:[#allocation2 + $0x100] sm:$0xff] %v4663_v57  ;;  %v4581_v3 = vmax.f32 %v8889_v47, 0.0  ;;  %v5229_v6 = vld [vmem:[#allocation3 + $0xcc] sm:$0xff]  ;;  %5152 = vst [vmem:[#allocation3 + $0xe0] sm:$0xff] %v5111_v49  ;;  %v5029_v37 = vmul.f32 0.25, %v4988_v15  ;;  %v4826_v61 = vadd.f32 %v4785_v16, %v4744_v0  ;;  %v4625_v48 = vld [vmem:[#allocation23 + $0x620] sm:$0xff] }
 0x505   : > { %v5188_v41 = vld [vmem:[#allocation3 + $0xcb] sm:$0xff]  ;;  %5567 = vmatprep.mubr.f32.mxu0 %v5229_v6  ;;  %v4502_v28 = vpop.f32.mrb[144].mxu1  ;;  %v6272_v29 = vld [vmem:[#allocation17] sm:$0xff]  ;;  %v6273_v2 = vld [vmem:[#allocation17 + $0x8] sm:$0xff] }
 0x506   : > { %v4745_v54 = vld [vmem:[#allocation2 + $0xed] sm:$0xff]  ;;  %v4989_v55 = vadd.f32 %v4907_v43, %v4661_v19  ;;  %v12534_v36 = vmul.f32 %v4623_v45, %v4581_v3  ;;  %v8890_v25 = vadd.f32 %v12522_v42, %v4502_v28  ;;  %5568 = vmatmul.mubr.f32.gmra.mrb[122].mxu0 %v5188_v41  ;;  %v4504_v23 = vpop.f32.mrb[145].mxu1  ;;  %v5112_v38 = vmul.f32 %v5071_v34, %v5029_v37  ;;  %v5074_v56 = vld [vmem:[#allocation23 + $0x750] sm:$0xff] }
 0x507   : > { %v4786_v62 = vld [vmem:[#allocation2 + $0xee] sm:$0xff]  ;;  %v4867_v11 = vld [vmem:[#allocation2 + $0xf7] sm:$0xff] }
 0x508   : > { %v4908_v35 = vadd.f32 %v4867_v11, %v4826_v61  ;;  %4705 = vst [vmem:[#allocation2 + $0x108] sm:$0xff] %v12534_v36  ;;  %v4582_v17 = vmax.f32 %v8890_v25, 0.0  ;;  %v5230_v60 = vld [vmem:[#allocation3 + $0xd4] sm:$0xff]  ;;  %5153 = vst [vmem:[#allocation3 + $0xe8] sm:$0xff] %v5112_v38  ;;  %v5030_v53 = vmul.f32 0.25, %v4989_v55  ;;  %v4827_v39 = vadd.f32 %v4786_v62, %v4745_v54  ;;  %v4626_v27 = vld [vmem:[#allocation23 + $0x628] sm:$0xff] }
 0x509   : > { %v5189_v22 = vld [vmem:[#allocation3 + $0xd3] sm:$0xff]  ;;  %5572 = vmatprep.mubr.f32.mxu0 %v5230_v60  ;;  %v4507_v19 = vpop.f32.mrb[146].mxu1  ;;  %v8586_v62 = vpack.c.bf16 %v6273_v2, %v6272_v29 }
 0x50a   : > { %v4746_v7 = vld [vmem:[#allocation2 + $0xf5] sm:$0xff]  ;;  %v4990_v51 = vadd.f32 %v4908_v35, %v4662_v18  ;;  %v12538_v4 = vmul.f32 %v4624_v5, %v4582_v17  ;;  %v8891_v32 = vadd.f32 %v12522_v42, %v4507_v19  ;;  %5573 = vmatmul.mubr.f32.gmra.mrb[124].mxu0 %v5189_v22  ;;  %v4509_v52 = vpop.f32.mrb[147].mxu1  ;;  %v5113_v8 = vmul.f32 %v5072_v20, %v5030_v53  ;;  %v5075_v54 = vld [vmem:[#allocation23 + $0x758] sm:$0xff] }
 0x50b   : > { %v4787_v12 = vld [vmem:[#allocation2 + $0xf6] sm:$0xff]  ;;  %v4868_v21 = vld [vmem:[#allocation2 + $0xff] sm:$0xff]  ;;  %8587 = vmatpush1.bf16.msra.mxu1 %v8586_v62 }
 0x50c   : > { %v4909_v50 = vadd.f32 %v4868_v21, %v4827_v39  ;;  %4706 = vst [vmem:[#allocation2 + $0x110] sm:$0xff] %v12538_v4  ;;  %v4583_v30 = vmax.f32 %v8891_v32, 0.0  ;;  %v5231_v33 = vld [vmem:[#allocation3 + $0xdc] sm:$0xff]  ;;  %5154 = vst [vmem:[#allocation3 + $0xf0] sm:$0xff] %v5113_v8  ;;  %v5031_v46 = vmul.f32 0.25, %v4990_v51  ;;  %v4828_v63 = vadd.f32 %v4787_v12, %v4746_v7  ;;  %v4627_v28 = vld [vmem:[#allocation23 + $0x630] sm:$0xff]  ;;  %8588 = vmatprep.subr.bf16.mxu1 %v13185_v26 }
 0x50d   : > { %v5190_v44 = vld [vmem:[#allocation3 + $0xdb] sm:$0xff]  ;;  %5577 = vmatprep.mubr.f32.mxu0 %v5231_v33  ;;  %v4512_v18 = vpop.f32.mrb[148].mxu1 }
 0x50e   : > { %v4747_v40 = vld [vmem:[#allocation2 + $0xfd] sm:$0xff]  ;;  %v4991_v59 = vadd.f32 %v4909_v50, %v4663_v57  ;;  %v12542_v10 = vmul.f32 %v4625_v48, %v4583_v30  ;;  %v8892_v1 = vadd.f32 %v12522_v42, %v4512_v18  ;;  %5578 = vmatmul.mubr.f32.gmra.mrb[126].mxu0 %v5190_v44  ;;  %v4514_v31 = vpop.f32.mrb[149].mxu1  ;;  %v5114_v13 = vmul.f32 %v5073_v14, %v5031_v46  ;;  %v5076_v12 = vld [vmem:[#allocation23 + $0x760] sm:$0xff] }
 0x50f   : > { %v4788_v58 = vld [vmem:[#allocation2 + $0xfe] sm:$0xff]  ;;  %v4869_v9 = vld [vmem:[#allocation2 + $0x107] sm:$0xff] }
 0x510   : > { %v4910_v24 = vadd.f32 %v4869_v9, %v4828_v63  ;;  %4707 = vst [vmem:[#allocation2 + $0x118] sm:$0xff] %v12542_v10  ;;  %v4584_v0 = vmax.f32 %v8892_v1, 0.0  ;;  %v5232_v16 = vld [vmem:[#allocation3 + $0xe4] sm:$0xff]  ;;  %5155 = vst [vmem:[#allocation3 + $0xf8] sm:$0xff] %v5114_v13  ;;  %v5032_v47 = vmul.f32 0.25, %v4991_v59  ;;  %v4829_v57 = vadd.f32 %v4788_v58, %v4747_v40  ;;  %v4628_v7 = vld [vmem:[#allocation23 + $0x638] sm:$0xff] }
 0x511   : > { %v5191_v15 = vld [vmem:[#allocation3 + $0xe3] sm:$0xff]  ;;  %5582 = vmatprep.mubr.f32.mxu0 %v5232_v16  ;;  %v4517_v49 = vpop.f32.mrb[150].mxu1 }
 0x512   : > { %v4748_v45 = vld [vmem:[#allocation2 + $0x105] sm:$0xff]  ;;  %v4992_v43 = vadd.f32 %v4910_v24, %v12534_v36  ;;  %v12547_v3 = vmul.f32 %v4626_v27, %v4584_v0  ;;  %v8893_v6 = vadd.f32 %v12522_v42, %v4517_v49  ;;  %5583 = vmatmul.mubr.f32.gmra.mrb[128].mxu0 %v5191_v15  ;;  %v4519_v41 = vpop.f32.mrb[151].mxu1  ;;  %v5115_v37 = vmul.f32 %v5074_v56, %v5032_v47  ;;  %v5077_v58 = vld [vmem:[#allocation23 + $0x768] sm:$0xff]  ;;  %v6275_v24 = vld [vmem:[#allocation17 + $0x18] sm:$0xff] }
 0x513   : > { %v4789_v34 = vld [vmem:[#allocation2 + $0x106] sm:$0xff]  ;;  %v4870_v61 = vld [vmem:[#allocation2 + $0x10f] sm:$0xff] }
 0x514   : > { %v4911_v55 = vadd.f32 %v4870_v61, %v4829_v57  ;;  %4708 = vst [vmem:[#allocation2 + $0x120] sm:$0xff] %v12547_v3  ;;  %v4585_v25 = vmax.f32 %v8893_v6, 0.0  ;;  %v5233_v23 = vld [vmem:[#allocation3 + $0xec] sm:$0xff]  ;;  %5156 = vst [vmem:[#allocation3 + $0x100] sm:$0xff] %v5115_v37  ;;  %v5033_v11 = vmul.f32 0.25, %v4992_v43  ;;  %v4830_v36 = vadd.f32 %v4789_v34, %v4748_v45  ;;  %v4629_v40 = vld [vmem:[#allocation23 + $0x640] sm:$0xff] }
 0x515   : > { %v5192_v38 = vld [vmem:[#allocation3 + $0xeb] sm:$0xff]  ;;  %5587 = vmatprep.mubr.f32.mxu0 %v5233_v23  ;;  %v4522_v5 = vpop.f32.mrb[152].mxu1 }
 0x516   : > { %v4749_v20 = vld [vmem:[#allocation2 + $0x10d] sm:$0xff]  ;;  %v4993_v17 = vadd.f32 %v4911_v55, %v12538_v4  ;;  %v12552_v60 = vmul.f32 %v4627_v28, %v4585_v25  ;;  %v8894_v22 = vadd.f32 %v12522_v42, %v4522_v5  ;;  %5588 = vmatmul.mubr.f32.gmra.mrb[130].mxu0 %v5192_v38  ;;  %v4524_v53 = vpop.f32.mrb[153].mxu1  ;;  %v5116_v39 = vmul.f32 %v5075_v54, %v5033_v11  ;;  %v5078_v34 = vld [vmem:[#allocation23 + $0x770] sm:$0xff] }
 0x517   : > { %v4790_v35 = vld [vmem:[#allocation2 + $0x10e] sm:$0xff]  ;;  %v4871_v19 = vld [vmem:[#allocation2 + $0x117] sm:$0xff] }
 0x518   : > { %v4912_v51 = vadd.f32 %v4871_v19, %v4830_v36  ;;  %4709 = vst [vmem:[#allocation2 + $0x128] sm:$0xff] %v12552_v60  ;;  %v4586_v32 = vmax.f32 %v8894_v22, 0.0  ;;  %v5234_v52 = vld [vmem:[#allocation3 + $0xf4] sm:$0xff]  ;;  %5157 = vst [vmem:[#allocation3 + $0x108] sm:$0xff] %v5116_v39  ;;  %v5034_v4 = vmul.f32 0.25, %v4993_v17  ;;  %v4831_v21 = vadd.f32 %v4790_v35, %v4749_v20  ;;  %v6274_v27 = vld [vmem:[#allocation17 + $0x10] sm:$0xff] }
 0x519   : > { %v5193_v8 = vld [vmem:[#allocation3 + $0xf3] sm:$0xff]  ;;  %5592 = vmatprep.mubr.f32.mxu0 %v5234_v52  ;;  %v4527_v48 = vpop.f32.mrb[154].mxu1  ;;  %v4630_v45 = vld [vmem:[#allocation23 + $0x648] sm:$0xff]  ;;  %v8589_v43 = vpack.c.bf16 %v6275_v24, %v6274_v27  ;;  %v4633_v27 = vld [vmem:[#allocation23 + $0x660] sm:$0xff] }
 0x51a   : > { %v4750_v14 = vld [vmem:[#allocation2 + $0x115] sm:$0xff]  ;;  %v4994_v30 = vadd.f32 %v4912_v51, %v12542_v10  ;;  %v12558_v33 = vmul.f32 %v4628_v7, %v4586_v32  ;;  %v8895_v44 = vadd.f32 %v12522_v42, %v4527_v48  ;;  %5593 = vmatmul.mubr.f32.gmra.mrb[132].mxu0 %v5193_v8  ;;  %v4529_v46 = vpop.f32.mrb[155].mxu1  ;;  %v5117_v63 = vmul.f32 %v5076_v12, %v5034_v4  ;;  %v5079_v35 = vld [vmem:[#allocation23 + $0x778] sm:$0xff] }
 0x51b   : > { %v4791_v50 = vld [vmem:[#allocation2 + $0x116] sm:$0xff]  ;;  %v4872_v18 = vld [vmem:[#allocation2 + $0x11f] sm:$0xff]  ;;  %8590 = vmatpush1.bf16.msra.mxu1 %v8589_v43  ;;  %v5081_v24 = vld [vmem:[#allocation23 + $0x788] sm:$0xff] }
 0x51c   : > { %v4913_v59 = vadd.f32 %v4872_v18, %v4831_v21  ;;  %4710 = vst [vmem:[#allocation2 + $0x130] sm:$0xff] %v12558_v33  ;;  %v4587_v1 = vmax.f32 %v8895_v44, 0.0  ;;  %v5235_v31 = vld [vmem:[#allocation3 + $0xfc] sm:$0xff]  ;;  %5158 = vst [vmem:[#allocation3 + $0x110] sm:$0xff] %v5117_v63  ;;  %v5035_v9 = vmul.f32 0.25, %v4994_v30  ;;  %v4832_v10 = vadd.f32 %v4791_v50, %v4750_v14  ;;  %v4631_v20 = vld [vmem:[#allocation23 + $0x650] sm:$0xff]  ;;  %8591 = vmatprep.subr.bf16.mxu1 %v13185_v26 }
 0x51d   : > { %v5194_v13 = vld [vmem:[#allocation3 + $0xfb] sm:$0xff]  ;;  %5597 = vmatprep.mubr.f32.mxu0 %v5235_v31  ;;  %v4532_v56 = vpop.f32.mrb[156].mxu1 }
 0x51e   : > { %v4751_v0 = vld [vmem:[#allocation2 + $0x11d] sm:$0xff]  ;;  %v4995_v15 = vadd.f32 %v4913_v59, %v12547_v3  ;;  %v12563_v47 = vmul.f32 %v4629_v40, %v4587_v1  ;;  %v8896_v29 = vadd.f32 %v12522_v42, %v4532_v56  ;;  %5598 = vmatmul.mubr.f32.gmra.mrb[134].mxu0 %v5194_v13  ;;  %v4534_v57 = vpop.f32.mrb[157].mxu1  ;;  %v5118_v49 = vmul.f32 %v5077_v58, %v5035_v9  ;;  %v6277_v14 = vld [vmem:[#allocation17 + $0x28] sm:$0xff] }
 0x51f   : > { %v4792_v16 = vld [vmem:[#allocation2 + $0x11e] sm:$0xff]  ;;  %v4873_v2 = vld [vmem:[#allocation2 + $0x127] sm:$0xff] }
 0x520   : > { %v4914_v6 = vadd.f32 %v4873_v2, %v4832_v10  ;;  %4711 = vst [vmem:[#allocation2 + $0x138] sm:$0xff] %v12563_v47  ;;  %v4588_v41 = vmax.f32 %v8896_v29, 0.0  ;;  %v5236_v37 = vld [vmem:[#allocation3 + $0x104] sm:$0xff]  ;;  %5159 = vst [vmem:[#allocation3 + $0x118] sm:$0xff] %v5118_v49  ;;  %v5036_v28 = vmul.f32 0.25, %v4995_v15  ;;  %v4833_v3 = vadd.f32 %v4792_v16, %v4751_v0  ;;  %v6276_v48 = vld [vmem:[#allocation17 + $0x20] sm:$0xff] }
 0x521   : > { %v5195_v61 = vld [vmem:[#allocation3 + $0x103] sm:$0xff]  ;;  %5602 = vmatprep.mubr.f32.mxu0 %v5236_v37  ;;  %v4537_v54 = vpop.f32.mrb[158].mxu1  ;;  %v4632_v30 = vld [vmem:[#allocation23 + $0x658] sm:$0xff]  ;;  %v8592_v46 = vpack.c.bf16 %v6277_v14, %v6276_v48 }
 0x522   : > { %v4752_v62 = vld [vmem:[#allocation2 + $0x125] sm:$0xff]  ;;  %v4996_v25 = vadd.f32 %v4914_v6, %v12552_v60  ;;  %v12568_v23 = vmul.f32 %v4630_v45, %v4588_v41  ;;  %v8897_v38 = vadd.f32 %v12522_v42, %v4537_v54  ;;  %5603 = vmatmul.mubr.f32.gmra.mrb[136].mxu0 %v5195_v61  ;;  %v4539_v11 = vpop.f32.mrb[159].mxu1  ;;  %v5119_v36 = vmul.f32 %v5078_v34, %v5036_v28  ;;  %v5082_v6 = vld [vmem:[#allocation23 + $0x790] sm:$0xff] }
 0x523   : > { %v4793_v55 = vld [vmem:[#allocation2 + $0x126] sm:$0xff]  ;;  %v4874_v5 = vld [vmem:[#allocation2 + $0x12f] sm:$0xff]  ;;  %8593 = vmatpush1.bf16.msra.mxu1 %v8592_v46  ;;  %v5083_v11 = vld [vmem:[#allocation23 + $0x798] sm:$0xff] }
 0x524   : > { %v4915_v17 = vadd.f32 %v4874_v5, %v4833_v3  ;;  %4712 = vst [vmem:[#allocation2 + $0x140] sm:$0xff] %v12568_v23  ;;  %v4589_v22 = vmax.f32 %v8897_v38, 0.0  ;;  %v5237_v53 = vld [vmem:[#allocation3 + $0x10c] sm:$0xff]  ;;  %5160 = vst [vmem:[#allocation3 + $0x120] sm:$0xff] %v5119_v36  ;;  %v5037_v60 = vmul.f32 0.25, %v4996_v25  ;;  %v4834_v19 = vadd.f32 %v4793_v55, %v4752_v62  ;;  %v5080_v44 = vld [vmem:[#allocation23 + $0x780] sm:$0xff]  ;;  %8594 = vmatprep.subr.bf16.mxu1 %v13185_v26 }
 0x525   : > { %v5196_v39 = vld [vmem:[#allocation3 + $0x10b] sm:$0xff]  ;;  %5607 = vmatprep.mubr.f32.mxu0 %v5237_v53  ;;  %v4542_v12 = vpop.f32.mrb[160].mxu1 }
 0x526   : > { %v4753_v7 = vld [vmem:[#allocation2 + $0x12d] sm:$0xff]  ;;  %v4997_v32 = vadd.f32 %v4915_v17, %v12558_v33  ;;  %v4672_v52 = vmul.f32 %v4631_v20, %v4589_v22  ;;  %v8898_v8 = vadd.f32 %v12522_v42, %v4542_v12  ;;  %5608 = vmatmul.mubr.f32.gmra.mrb[138].mxu0 %v5196_v39  ;;  %v4544_v4 = vpop.f32.mrb[161].mxu1  ;;  %v5120_v21 = vmul.f32 %v5079_v35, %v5037_v60  ;;  %v6279_v25 = vld [vmem:[#allocation17 + $0x38] sm:$0xff] }
 0x527   : > { %v4794_v51 = vld [vmem:[#allocation2 + $0x12e] sm:$0xff]  ;;  %v4875_v50 = vld [vmem:[#allocation2 + $0x137] sm:$0xff]  ;;  %v5084_v12 = vld [vmem:[#allocation23 + $0x7a0] sm:$0xff] }
 0x528   : > { %v4916_v63 = vadd.f32 %v4875_v50, %v4834_v19  ;;  %4713 = vst [vmem:[#allocation2 + $0x148] sm:$0xff] %v4672_v52  ;;  %v4590_v18 = vmax.f32 %v8898_v8, 0.0  ;;  %v5238_v40 = vld [vmem:[#allocation3 + $0x114] sm:$0xff]  ;;  %5161 = vst [vmem:[#allocation3 + $0x128] sm:$0xff] %v5120_v21  ;;  %v5038_v59 = vmul.f32 0.25, %v4997_v32  ;;  %v4835_v33 = vadd.f32 %v4794_v51, %v4753_v7  ;;  %v6278_v55 = vld [vmem:[#allocation17 + $0x30] sm:$0xff] }
 0x529   : > { %v5197_v58 = vld [vmem:[#allocation3 + $0x113] sm:$0xff]  ;;  %5612 = vmatprep.mubr.f32.mxu0 %v5238_v40  ;;  %v4547_v1 = vpop.f32.mrb[162].mxu1  ;;  %v8595_v35 = vpack.c.bf16 %v6279_v25, %v6278_v55 }
 0x52a   : > { %v4998_v31 = vadd.f32 %v4916_v63, %v12563_v47  ;;  %v4673_v13 = vmul.f32 %v4632_v30, %v4590_v18  ;;  %v8899_v9 = vadd.f32 %v12522_v42, %v4547_v1  ;;  %5613 = vmatmul.mubr.f32.gmra.mrb[140].mxu0 %v5197_v58  ;;  %v4549_v10 = vpop.f32.mrb[163].mxu1  ;;  %v5121_v56 = vmul.f32 %v5080_v44, %v5038_v59  ;;  %v4754_v16 = vld [vmem:[#allocation2 + $0x135] sm:$0xff]  ;;  %v6280_v50 = vld [vmem:[#allocation17 + $0x40] sm:$0xff]  ;;  %v6281_v30 = vld [vmem:[#allocation17 + $0x48] sm:$0xff] }
 0x52b   : > { %v4876_v0 = vld [vmem:[#allocation2 + $0x13f] sm:$0xff]  ;;  %v4795_v15 = vld [vmem:[#allocation2 + $0x136] sm:$0xff]  ;;  %8596 = vmatpush1.bf16.msra.mxu1 %v8595_v35  ;;  %v5085_v44 = vld [vmem:[#allocation23 + $0x7a8] sm:$0xff]  ;;  %v8598_v18 = vpack.c.bf16 %v6281_v30, %v6280_v50 }
 0x52c   : > { %v4917_v29 = vadd.f32 %v4876_v0, %v4835_v33  ;;  %4714 = vst [vmem:[#allocation2 + $0x150] sm:$0xff] %v4673_v13  ;;  %v4591_v57 = vmax.f32 %v8899_v9, 0.0  ;;  %v5239_v49 = vld [vmem:[#allocation3 + $0x11c] sm:$0xff]  ;;  %5162 = vst [vmem:[#allocation3 + $0x130] sm:$0xff] %v5121_v56  ;;  %v5039_v47 = vmul.f32 0.25, %v4998_v31  ;;  %v4836_v45 = vadd.f32 %v4795_v15, %v4754_v16  ;;  %8597 = vmatprep.subr.bf16.mxu1 %v13185_v26  ;;  %v6283_v9 = vld [vmem:[#allocation17 + $0x58] sm:$0xff] }
 0x52d   : > { %v5198_v2 = vld [vmem:[#allocation3 + $0x11b] sm:$0xff]  ;;  %5617 = vmatprep.mubr.f32.mxu0 %v5239_v49  ;;  %v5248_v0 = vld [vmem:[#allocation3 + $0x164] sm:$0xff]  ;;  %v5249_v49 = vld [vmem:[#allocation3 + $0x16c] sm:$0xff] }
 0x52e   : > { %v4999_v42 = vadd.f32 %v4917_v29, %v12568_v23  ;;  %v4674_v34 = vmul.f32 %v4633_v27, %v4591_v57  ;;  %5618 = vmatmul.mubr.f32.gmra.mrb[142].mxu0 %v5198_v2  ;;  %v5122_v43 = vmul.f32 %v5081_v24, %v5039_v47  ;;  %v4755_v37 = vld [vmem:[#allocation2 + $0x13d] sm:$0xff]  ;;  %v5207_v15 = vld [vmem:[#allocation3 + $0x163] sm:$0xff]  ;;  %v5208_v47 = vld [vmem:[#allocation3 + $0x16b] sm:$0xff] }
 0x52f   : > { %v4877_v41 = vld [vmem:[#allocation2 + $0x147] sm:$0xff]  ;;  %v4796_v61 = vld [vmem:[#allocation2 + $0x13e] sm:$0xff]  ;;  %8599 = vmatpush1.bf16.msra.mxu1 %v8598_v18  ;;  %v5301_v30 = vld [vmem:[#allocation3 + $0x8e] sm:$0xff] }
 0x530   : > { %v4918_v28 = vadd.f32 %v4877_v41, %v4836_v45  ;;  %4715 = vst [vmem:[#allocation2 + $0x158] sm:$0xff] %v4674_v34  ;;  %v5240_v3 = vld [vmem:[#allocation3 + $0x124] sm:$0xff]  ;;  %5163 = vst [vmem:[#allocation3 + $0x138] sm:$0xff] %v5122_v43  ;;  %v5040_v62 = vmul.f32 0.25, %v4999_v42  ;;  %v4837_v23 = vadd.f32 %v4796_v61, %v4755_v37  ;;  %8600 = vmatprep.subr.bf16.mxu1 %v13185_v26  ;;  %v6284_v29 = vld [vmem:[#allocation17 + $0x60] sm:$0xff] }
 0x531   : > { %v5199_v54 = vld [vmem:[#allocation3 + $0x123] sm:$0xff]  ;;  %5622 = vmatprep.mubr.f32.mxu0 %v5240_v3  ;;  %v5293_v61 = vld [vmem:[#allocation3 + $0x4e] sm:$0xff]  ;;  %v5294_v3 = vld [vmem:[#allocation3 + $0x56] sm:$0xff] }
 0x532   : > { %v5000_v38 = vadd.f32 %v4918_v28, %v4672_v52  ;;  %v4756_v36 = vld [vmem:[#allocation2 + $0x145] sm:$0xff]  ;;  %5623 = vmatmul.mubr.f32.gmra.mrb[144].mxu0 %v5199_v54  ;;  %v5123_v20 = vmul.f32 %v5082_v6, %v5040_v62  ;;  %v6286_v45 = vld [vmem:[#allocation17 + $0x70] sm:$0xff]  ;;  %v5253_v25 = vld [vmem:[#allocation3 + $0x55] sm:$0xff] }
 0x533   : > { %v4797_v5 = vld [vmem:[#allocation2 + $0x146] sm:$0xff]  ;;  %v4878_v17 = vld [vmem:[#allocation2 + $0x14f] sm:$0xff]  ;;  %v6291_v35 = vld [vmem:[#allocation17 + $0x98] sm:$0xff] }
 0x534   : > { %v5241_v22 = vld [vmem:[#allocation3 + $0x12c] sm:$0xff]  ;;  %v5041_v39 = vmul.f32 0.25, %v5000_v38  ;;  %v4919_v60 = vadd.f32 %v4878_v17, %v4837_v23  ;;  %5164 = vst [vmem:[#allocation3 + $0x140] sm:$0xff] %v5123_v20  ;;  %v4838_v51 = vadd.f32 %v4797_v5, %v4756_v36  ;;  %v6285_v57 = vld [vmem:[#allocation17 + $0x68] sm:$0xff]  ;;  %v6288_v54 = vld [vmem:[#allocation17 + $0x80] sm:$0xff] }
 0x535   : > { %v5200_v53 = vld [vmem:[#allocation3 + $0x12b] sm:$0xff]  ;;  %5627 = vmatprep.mubr.f32.mxu0 %v5241_v22  ;;  %v8604_v2 = vpack.c.bf16 %v6285_v57, %v6284_v29  ;;  %v5291_v42 = vld [vmem:[#allocation3 + $0x3e] sm:$0xff]  ;;  %v5265_v29 = vld [vmem:[#allocation3 + $0xb5] sm:$0xff] }
 0x536   : > { %v5124_v19 = vmul.f32 %v5083_v11, %v5041_v39  ;;  %v5001_v7 = vadd.f32 %v4919_v60, %v4673_v13  ;;  %5628 = vmatmul.mubr.f32.gmra.mrb[146].mxu0 %v5200_v53  ;;  %v6282_v13 = vld [vmem:[#allocation17 + $0x50] sm:$0xff]  ;;  %v5250_v6 = vld [vmem:[#allocation3 + $0x3d] sm:$0xff]  ;;  %v5257_v39 = vld [vmem:[#allocation3 + $0x75] sm:$0xff] }
 0x537   : > { %v4879_v32 = vld [vmem:[#allocation2 + $0x157] sm:$0xff]  ;;  %v8601_v27 = vpack.c.bf16 %v6283_v9, %v6282_v13  ;;  %v5292_v41 = vld [vmem:[#allocation3 + $0x46] sm:$0xff]  ;;  %v5295_v38 = vld [vmem:[#allocation3 + $0x5e] sm:$0xff] }
 0x538   : > { %v5242_v52 = vld [vmem:[#allocation3 + $0x134] sm:$0xff]  ;;  %5165 = vst [vmem:[#allocation3 + $0x148] sm:$0xff] %v5124_v19  ;;  %v5042_v4 = vmul.f32 0.25, %v5001_v7  ;;  %v4920_v21 = vadd.f32 %v4879_v32, %v4838_v51  ;;  %v5251_v37 = vld [vmem:[#allocation3 + $0x45] sm:$0xff]  ;;  %v5254_v11 = vld [vmem:[#allocation3 + $0x5d] sm:$0xff] }
 0x539   : > { %v5201_v8 = vld [vmem:[#allocation3 + $0x133] sm:$0xff]  ;;  %5632 = vmatprep.mubr.f32.mxu0 %v5242_v52  ;;  %8602 = vmatpush1.bf16.msra.mxu1 %v8601_v27  ;;  %v6289_v62 = vld [vmem:[#allocation17 + $0x88] sm:$0xff]  ;;  %v6290_v20 = vld [vmem:[#allocation17 + $0x90] sm:$0xff] }
 0x53a   : > { %v5125_v48 = vmul.f32 %v5084_v12, %v5042_v4  ;;  %v5002_v14 = vadd.f32 %v4920_v21, %v4674_v34  ;;  %5633 = vmatmul.mubr.f32.gmra.mrb[148].mxu0 %v5201_v8  ;;  %8603 = vmatprep.subr.bf16.mxu1 %v13185_v26  ;;  %v6287_v34 = vld [vmem:[#allocation17 + $0x78] sm:$0xff]  ;;  %v8610_v55 = vpack.c.bf16 %v6289_v62, %v6288_v54  ;;  %v5296_v23 = vld [vmem:[#allocation3 + $0x66] sm:$0xff]  ;;  %v5299_v60 = vld [vmem:[#allocation3 + $0x7e] sm:$0xff] }
 0x53b   : > { %v5243_v46 = vld [vmem:[#allocation3 + $0x13c] sm:$0xff]  ;;  %v8607_v43 = vpack.c.bf16 %v6287_v34, %v6286_v45  ;;  %v5252_v28 = vld [vmem:[#allocation3 + $0x4d] sm:$0xff]  ;;  %v5255_v36 = vld [vmem:[#allocation3 + $0x65] sm:$0xff]  ;;  %v8613_v17 = vpack.c.bf16 %v6291_v35, %v6290_v20 }
 0x53c   : > { %v5202_v63 = vld [vmem:[#allocation3 + $0x13b] sm:$0xff]  ;;  %5166 = vst [vmem:[#allocation3 + $0x150] sm:$0xff] %v5125_v48  ;;  %v5043_v40 = vmul.f32 0.25, %v5002_v14  ;;  %5637 = vmatprep.mubr.f32.mxu0 %v5243_v46  ;;  %v5297_v5 = vld [vmem:[#allocation3 + $0x6e] sm:$0xff]  ;;  %v5300_v32 = vld [vmem:[#allocation3 + $0x86] sm:$0xff] }
 0x53d   : > { %8605 = vmatpush1.bf16.msra.mxu1 %v8604_v2  ;;  %v5256_v22 = vld [vmem:[#allocation3 + $0x6d] sm:$0xff]  ;;  %v5298_v53 = vld [vmem:[#allocation3 + $0x76] sm:$0xff]  ;;  %v6293_v7 = vld [vmem:[#allocation17 + $0xa8] sm:$0xff] }
 0x53e   : > { %v5126_v58 = vmul.f32 %v5085_v44, %v5043_v40  ;;  %5638 = vmatmul.mubr.f32.gmra.mrb[150].mxu0 %v5202_v63  ;;  %8606 = vmatprep.subr.bf16.mxu1 %v13185_v26  ;;  %v6292_v19 = vld [vmem:[#allocation17 + $0xa0] sm:$0xff]  ;;  %v6294_v52 = vld [vmem:[#allocation17 + $0xb0] sm:$0xff]  ;;  %v6295_v8 = vld [vmem:[#allocation17 + $0xb8] sm:$0xff] }
 0x53f   : > { %v5244_v59 = vld [vmem:[#allocation3 + $0x144] sm:$0xff]  ;;  %v8616_v12 = vpack.c.bf16 %v6293_v7, %v6292_v19  ;;  %v6296_v4 = vld [vmem:[#allocation17 + $0xc0] sm:$0xff]  ;;  %v8619_v21 = vpack.c.bf16 %v6295_v8, %v6294_v52  ;;  %v6299_v46 = vld [vmem:[#allocation17 + $0xd8] sm:$0xff] }
 0x540   : > { %v5203_v33 = vld [vmem:[#allocation3 + $0x143] sm:$0xff]  ;;  %5167 = vst [vmem:[#allocation3 + $0x158] sm:$0xff] %v5126_v58  ;;  %5642 = vmatprep.mubr.f32.mxu0 %v5244_v59  ;;  %v5260_v63 = vld [vmem:[#allocation3 + $0x8d] sm:$0xff]  ;;  %v5302_v40 = vld [vmem:[#allocation3 + $0x96] sm:$0xff] }
 0x541   : > { %8608 = vmatpush1.bf16.msra.mxu1 %v8607_v43  ;;  %v5258_v51 = vld [vmem:[#allocation3 + $0x7d] sm:$0xff]  ;;  %v5259_v14 = vld [vmem:[#allocation3 + $0x85] sm:$0xff]  ;;  %v6303_v9 = vld [vmem:[#allocation17 + $0xf8] sm:$0xff] }
 0x542   : > { %5643 = vmatmul.mubr.f32.gmra.mrb[152].mxu0 %v5203_v33  ;;  %8609 = vmatprep.subr.bf16.mxu1 %v13185_v26  ;;  %v6297_v48 = vld [vmem:[#allocation17 + $0xc8] sm:$0xff]  ;;  %v6298_v44 = vld [vmem:[#allocation17 + $0xd0] sm:$0xff]  ;;  %v6300_v58 = vld [vmem:[#allocation17 + $0xe0] sm:$0xff] }
 0x543   : > { %v5245_v1 = vld [vmem:[#allocation3 + $0x14c] sm:$0xff]  ;;  %v8622_v50 = vpack.c.bf16 %v6297_v48, %v6296_v4  ;;  %v8625_v18 = vpack.c.bf16 %v6299_v46, %v6298_v44  ;;  %v6301_v59 = vld [vmem:[#allocation17 + $0xe8] sm:$0xff]  ;;  %v5261_v33 = vld [vmem:[#allocation3 + $0x95] sm:$0xff] }
 0x544   : > { %v5204_v31 = vld [vmem:[#allocation3 + $0x14b] sm:$0xff]  ;;  %5647 = vmatprep.mubr.f32.mxu0 %v5245_v1  ;;  %v8628_v1 = vpack.c.bf16 %v6301_v59, %v6300_v58  ;;  %v5262_v27 = vld [vmem:[#allocation3 + $0x9d] sm:$0xff]  ;;  %v5269_v43 = vld [vmem:[#allocation3 + $0xd5] sm:$0xff] }
 0x545   : > { %8611 = vmatpush1.bf16.msra.mxu1 %v8610_v55  ;;  %v6302_v13 = vld [vmem:[#allocation17 + $0xf0] sm:$0xff]  ;;  %v5307_v57 = vld [vmem:[#allocation3 + $0xbe] sm:$0xff]  ;;  %v5310_v34 = vld [vmem:[#allocation3 + $0xd6] sm:$0xff] }
 0x546   : > { %5648 = vmatmul.mubr.f32.gmra.mrb[154].mxu0 %v5204_v31  ;;  %8612 = vmatprep.subr.bf16.mxu1 %v13185_v26  ;;  %v5303_v31 = vld [vmem:[#allocation3 + $0x9e] sm:$0xff]  ;;  %v5308_v2 = vld [vmem:[#allocation3 + $0xc6] sm:$0xff]  ;;  %v5314_v54 = vld [vmem:[#allocation3 + $0xf6] sm:$0xff] }
 0x547   : > { %v5246_v10 = vld [vmem:[#allocation3 + $0x154] sm:$0xff]  ;;  %v5247_v24 = vld [vmem:[#allocation3 + $0x15c] sm:$0xff]  ;;  %v6306_v19 = vld [vmem:[#allocation17 + $0x110] sm:$0xff] }
 0x548   : > { %v5205_v56 = vld [vmem:[#allocation3 + $0x153] sm:$0xff]  ;;  %5652 = vmatprep.mubr.f32.mxu0 %v5246_v10  ;;  %v5206_v16 = vld [vmem:[#allocation3 + $0x15b] sm:$0xff]  ;;  %v8631_v10 = vpack.c.bf16 %v6303_v9, %v6302_v13  ;;  %v5320_v8 = vld [vmem:[#allocation3 + $0x126] sm:$0xff] }
 0x549   : > { %8614 = vmatpush1.bf16.msra.mxu1 %v8613_v17  ;;  %v5268_v45 = vld [vmem:[#allocation3 + $0xcd] sm:$0xff]  ;;  %v5273_v62 = vld [vmem:[#allocation3 + $0xf5] sm:$0xff]  ;;  %v6149_v55 = vld [vmem:[#allocation2 + $0x6] sm:$0xff] }
 0x54a   : > { %5653 = vmatmul.mubr.f32.gmra.mrb[156].mxu0 %v5205_v56  ;;  %8615 = vmatprep.subr.bf16.mxu1 %v13185_v26  ;;  %v5304_v56 = vld [vmem:[#allocation3 + $0xa6] sm:$0xff]  ;;  %v6304_v20 = vld [vmem:[#allocation17 + $0x100] sm:$0xff]  ;;  %v6307_v7 = vld [vmem:[#allocation17 + $0x118] sm:$0xff] }
 0x54b   : > { %5657 = vmatprep.mubr.f32.mxu0 %v5247_v24  ;;  %v5263_v24 = vld [vmem:[#allocation3 + $0xa5] sm:$0xff]  ;;  %6407 = vmatprep.mubr.f32.mxu1 %v6149_v55  ;;  %v5278_v52 = vld [vmem:[#allocation3 + $0x11d] sm:$0xff]  ;;  %v5281_v46 = vld [vmem:[#allocation3 + $0x135] sm:$0xff] }
 0x54c   : > { %v6305_v35 = vld [vmem:[#allocation17 + $0x108] sm:$0xff]  ;;  %v6308_v48 = vld [vmem:[#allocation17 + $0x120] sm:$0xff]  ;;  %v5284_v13 = vld [vmem:[#allocation3 + $0x14d] sm:$0xff] }
 0x54d   : > { %8617 = vmatpush1.bf16.msra.mxu1 %v8616_v12  ;;  %v5275_v17 = vld [vmem:[#allocation3 + $0x105] sm:$0xff]  ;;  %v5277_v12 = vld [vmem:[#allocation3 + $0x115] sm:$0xff]  ;;  %v5282_v58 = vld [vmem:[#allocation3 + $0x13d] sm:$0xff] }
 0x54e   : > { %5658 = vmatmul.mubr.f32.gmra.mrb[158].mxu0 %v5206_v16  ;;  %8618 = vmatprep.subr.bf16.mxu1 %v13185_v26  ;;  %v5264_v16 = vld [vmem:[#allocation3 + $0xad] sm:$0xff]  ;;  %v5279_v4 = vld [vmem:[#allocation3 + $0x125] sm:$0xff]  ;;  %v5322_v44 = vld [vmem:[#allocation3 + $0x136] sm:$0xff] }
 0x54f   : > { %5662 = vmatprep.mubr.f32.mxu0 %v5248_v0  ;;  %v5305_v0 = vld [vmem:[#allocation3 + $0xae] sm:$0xff]  ;;  %v5326_v9 = vld [vmem:[#allocation3 + $0x156] sm:$0xff]  ;;  %v6321_v55 = vld [vmem:[#allocation17 + $0x188] sm:$0xff] }
 0x551   : > { %8620 = vmatpush1.bf16.msra.mxu1 %v8619_v21  ;;  %v5321_v21 = vld [vmem:[#allocation3 + $0x12e] sm:$0xff] }
 0x552   : > { %5663 = vmatmul.mubr.f32.gmra.mrb[160].mxu0 %v5207_v15  ;;  %8621 = vmatprep.subr.bf16.mxu1 %v13185_v26  ;;  %v5306_v15 = vld [vmem:[#allocation3 + $0xb6] sm:$0xff] }
 0x553   : > { %5667 = vmatprep.mubr.f32.mxu0 %v5249_v49  ;;  %v5266_v49 = vld [vmem:[#allocation3 + $0xbd] sm:$0xff] }
 0x555   : > { %8623 = vmatpush1.bf16.msra.mxu1 %v8622_v50  ;;  %v5280_v50 = vld [vmem:[#allocation3 + $0x12d] sm:$0xff] }
 0x556   : > { %5668 = vmatmul.mubr.f32.gmra.mrb[162].mxu0 %v5208_v47  ;;  %8624 = vmatprep.subr.bf16.mxu1 %v13185_v26  ;;  %v5267_v47 = vld [vmem:[#allocation3 + $0xc5] sm:$0xff] }
 0x557   : > { %5737 = vmatprep.mubr.f32.mxu0 %v5291_v42  ;;  %v5309_v42 = vld [vmem:[#allocation3 + $0xce] sm:$0xff] }
 0x559   : > { %8626 = vmatpush1.bf16.msra.mxu1 %v8625_v18  ;;  %v6310_v18 = vld [vmem:[#allocation17 + $0x130] sm:$0xff] }
 0x55a   : > { %5738 = vmatmul.mubr.f32.vlgmr.msra.gmra.mrb[82].mxu0 %v5250_v6  ;;  %8627 = vmatprep.subr.bf16.mxu1 %v13185_v26  ;;  %v5311_v6 = vld [vmem:[#allocation3 + $0xde] sm:$0xff] }
 0x55b   : > { %5742 = vmatprep.mubr.f32.mxu0 %v5292_v41  ;;  %v5270_v41 = vld [vmem:[#allocation3 + $0xdd] sm:$0xff] }
 0x55d   : > { %8629 = vmatpush1.bf16.msra.mxu1 %v8628_v1  ;;  %v5283_v1 = vld [vmem:[#allocation3 + $0x145] sm:$0xff] }
 0x55e   : > { %5743 = vmatmul.mubr.f32.gmra.mrb[84].mxu0 %v5251_v37  ;;  %8630 = vmatprep.subr.bf16.mxu1 %v13185_v26  ;;  %v5312_v37 = vld [vmem:[#allocation3 + $0xe6] sm:$0xff] }
 0x55f   : > { %5747 = vmatprep.mubr.f32.mxu0 %v5293_v61  ;;  %v5271_v61 = vld [vmem:[#allocation3 + $0xe5] sm:$0xff] }
 0x561   : > { %8632 = vmatpush1.bf16.msra.mxu1 %v8631_v10  ;;  %v6313_v10 = vld [vmem:[#allocation17 + $0x148] sm:$0xff] }
 0x562   : > { %5748 = vmatmul.mubr.f32.gmra.mrb[86].mxu0 %v5252_v28  ;;  %8633 = vmatprep.subr.bf16.mxu1 %v13185_v26  ;;  %v5313_v28 = vld [vmem:[#allocation3 + $0xee] sm:$0xff] }
 0x563   : > { %5752 = vmatprep.mubr.f32.mxu0 %v5294_v3  ;;  %v5272_v3 = vld [vmem:[#allocation3 + $0xed] sm:$0xff] }
 0x566   : > { %5753 = vmatmul.mubr.f32.gmra.mrb[88].mxu0 %v5253_v25  ;;  %v5315_v25 = vld [vmem:[#allocation3 + $0xfe] sm:$0xff] }
 0x567   : > { %5757 = vmatprep.mubr.f32.mxu0 %v5295_v38  ;;  %v6108_v38 = vld [vmem:[#allocation2 + $0x5] sm:$0xff] }
 0x568   : > { %6408 = vmatmul.mubr.f32.vlgmr.msra.gmra.mrb[164].mxu1 %v6108_v38  ;;  %v6322_v38 = vld [vmem:[#allocation17 + $0x190] sm:$0xff] }
 0x56a   : > { %5758 = vmatmul.mubr.f32.gmra.mrb[90].mxu0 %v5254_v11  ;;  %v5274_v11 = vld [vmem:[#allocation3 + $0xfd] sm:$0xff] }
 0x56b   : > { %5762 = vmatprep.mubr.f32.mxu0 %v5296_v23  ;;  %v6150_v23 = vld [vmem:[#allocation2 + $0xe] sm:$0xff] }
 0x56c   : > { %6412 = vmatprep.mubr.f32.mxu1 %v6150_v23 }
 0x56e   : > { %5763 = vmatmul.mubr.f32.gmra.mrb[92].mxu0 %v5255_v36  ;;  %v5316_v36 = vld [vmem:[#allocation3 + $0x106] sm:$0xff] }
 0x56f   : > { %5767 = vmatprep.mubr.f32.mxu0 %v5297_v5  ;;  %v6109_v5 = vld [vmem:[#allocation2 + $0xd] sm:$0xff] }
 0x570   : > { %6413 = vmatmul.mubr.f32.gmra.mrb[166].mxu1 %v6109_v5  ;;  %v6325_v5 = vld [vmem:[#allocation17 + $0x1a8] sm:$0xff] }
 0x572   : > { %5768 = vmatmul.mubr.f32.gmra.mrb[94].mxu0 %v5256_v22  ;;  %v8634_v22 = vpack.c.bf16 %v6305_v35, %v6304_v20  ;;  %v12603_v35 = vld [vmem:[#allocation15] ss:$0 sm:$0xff] }
 0x573   : > { %5772 = vmatprep.mubr.f32.mxu0 %v5298_v53  ;;  %v5317_v53 = vld [vmem:[#allocation3 + $0x10e] sm:$0xff] }
 0x574   : > { %8635 = vmatpush1.bf16.msra.mxu1 %v8634_v22  ;;  %v6327_v22 = vld [vmem:[#allocation17 + $0x1b8] sm:$0xff] }
 0x575   : > { %8636 = vmatprep.subr.bf16.mxu1 %v13185_v26 }
 0x576   : > { %5773 = vmatmul.mubr.f32.gmra.mrb[96].mxu0 %v5257_v39  ;;  %v5276_v39 = vld [vmem:[#allocation3 + $0x10d] sm:$0xff] }
 0x577   : > { %5777 = vmatprep.mubr.f32.mxu0 %v5299_v60  ;;  %v5318_v60 = vld [vmem:[#allocation3 + $0x116] sm:$0xff] }
 0x57a   : > { %5778 = vmatmul.mubr.f32.gmra.mrb[98].mxu0 %v5258_v51  ;;  %v8637_v51 = vpack.c.bf16 %v6307_v7, %v6306_v19  ;;  %v5985_v7 = vld [vmem:[#allocation23 + $0x7b0] sm:$0xff] }
 0x57b   : > { %5782 = vmatprep.mubr.f32.mxu0 %v5300_v32  ;;  %v5319_v32 = vld [vmem:[#allocation3 + $0x11e] sm:$0xff] }
 0x57c   : > { %8638 = vmatpush1.bf16.msra.mxu1 %v8637_v51 }
 0x57d   : > { %8639 = vmatprep.subr.bf16.mxu1 %v13185_v26 }
 0x57e   : > { %5783 = vmatmul.mubr.f32.gmra.mrb[100].mxu0 %v5259_v14  ;;  %v6309_v14 = vld [vmem:[#allocation17 + $0x128] sm:$0xff] }
 0x57f   : > { %5787 = vmatprep.mubr.f32.mxu0 %v5301_v30  ;;  %v8640_v30 = vpack.c.bf16 %v6309_v14, %v6308_v48  ;;  %v6328_v48 = vld [vmem:[#allocation17 + $0x1c0] sm:$0xff]  ;;  %v6329_v14 = vld [vmem:[#allocation17 + $0x1c8] sm:$0xff] }
 0x581   : > { %8641 = vmatpush1.bf16.msra.mxu1 %v8640_v30  ;;  %v8670_v30 = vpack.c.bf16 %v6329_v14, %v6328_v48 }
 0x582   : > { %5788 = vmatmul.mubr.f32.gmra.mrb[102].mxu0 %v5260_v63  ;;  %8642 = vmatprep.subr.bf16.mxu1 %v13185_v26  ;;  %v5323_v63 = vld [vmem:[#allocation3 + $0x13e] sm:$0xff] }
 0x583   : > { %5792 = vmatprep.mubr.f32.mxu0 %v5302_v40  ;;  %v6311_v40 = vld [vmem:[#allocation17 + $0x138] sm:$0xff] }
 0x584   : > { %v8643_v59 = vpack.c.bf16 %v6311_v40, %v6310_v18  ;;  %v5987_v18 = vld [vmem:[#allocation23 + $0x7c0] sm:$0xff] }
 0x586   : > { %5793 = vmatmul.mubr.f32.gmra.mrb[104].mxu0 %v5261_v33  ;;  %v5324_v33 = vld [vmem:[#allocation3 + $0x146] sm:$0xff]  ;;  %8644 = vmatpush1.bf16.msra.mxu1 %v8643_v59 }
 0x587   : > { %5797 = vmatprep.mubr.f32.mxu0 %v5303_v31  ;;  %8645 = vmatprep.subr.bf16.mxu1 %v13185_v26  ;;  %v5325_v31 = vld [vmem:[#allocation3 + $0x14e] sm:$0xff] }
 0x58a   : > { %5798 = vmatmul.mubr.f32.gmra.mrb[106].mxu0 %v5262_v27  ;;  %v6312_v27 = vld [vmem:[#allocation17 + $0x140] sm:$0xff] }
 0x58b   : > { %5802 = vmatprep.mubr.f32.mxu0 %v5304_v56  ;;  %v5285_v56 = vld [vmem:[#allocation3 + $0x155] sm:$0xff] }
 0x58e   : > { %5803 = vmatmul.mubr.f32.gmra.mrb[108].mxu0 %v5263_v24  ;;  %v8646_v24 = vpack.c.bf16 %v6313_v10, %v6312_v27 }
 0x58f   : > { %5807 = vmatprep.mubr.f32.mxu0 %v5305_v0  ;;  %v5327_v0 = vld [vmem:[#allocation3 + $0x15e] sm:$0xff] }
 0x590   : > { %8647 = vmatpush1.bf16.msra.mxu1 %v8646_v24 }
 0x591   : > { %8648 = vmatprep.subr.bf16.mxu1 %v13185_v26 }
 0x592   : > { %5808 = vmatmul.mubr.f32.gmra.mrb[110].mxu0 %v5264_v16  ;;  %v5328_v16 = vld [vmem:[#allocation3 + $0x166] sm:$0xff] }
 0x593   : > { %5812 = vmatprep.mubr.f32.mxu0 %v5306_v15  ;;  %v5286_v15 = vld [vmem:[#allocation3 + $0x15d] sm:$0xff] }
 0x596   : > { %5813 = vmatmul.mubr.f32.gmra.mrb[112].mxu0 %v5265_v29  ;;  %v5287_v29 = vld [vmem:[#allocation3 + $0x165] sm:$0xff] }
 0x597   : > { %5817 = vmatprep.mubr.f32.mxu0 %v5307_v57  ;;  %v5329_v57 = vld [vmem:[#allocation3 + $0x16e] sm:$0xff] }
 0x59a   : > { %5818 = vmatmul.mubr.f32.gmra.mrb[114].mxu0 %v5266_v49  ;;  %v5288_v49 = vld [vmem:[#allocation3 + $0x16d] sm:$0xff] }
 0x59b   : > { %5822 = vmatprep.mubr.f32.mxu0 %v5308_v2  ;;  %v5330_v2 = vld [vmem:[#allocation3 + $0x176] sm:$0xff] }
 0x59e   : > { %5823 = vmatmul.mubr.f32.gmra.mrb[116].mxu0 %v5267_v47  ;;  %v6314_v47 = vld [vmem:[#allocation17 + $0x150] sm:$0xff] }
 0x59f   : > { %5827 = vmatprep.mubr.f32.mxu0 %v5309_v42  ;;  %v6315_v42 = vld [vmem:[#allocation17 + $0x158] sm:$0xff] }
 0x5a2   : > { %5828 = vmatmul.mubr.f32.gmra.mrb[118].mxu0 %v5268_v45  ;;  %v8649_v45 = vpack.c.bf16 %v6315_v42, %v6314_v47 }
 0x5a3   : > { %5832 = vmatprep.mubr.f32.mxu0 %v5310_v34  ;;  %v5289_v34 = vld [vmem:[#allocation3 + $0x175] sm:$0xff] }
 0x5a4   : > { %8650 = vmatpush1.bf16.msra.mxu1 %v8649_v45 }
 0x5a5   : > { %8651 = vmatprep.subr.bf16.mxu1 %v13185_v26 }
 0x5a6   : > { %5833 = vmatmul.mubr.f32.gmra.mrb[120].mxu0 %v5269_v43  ;;  %v5331_v43 = vld [vmem:[#allocation3 + $0x17e] sm:$0xff] }
 0x5a7   : > { %5837 = vmatprep.mubr.f32.mxu0 %v5311_v6  ;;  %v5290_v6 = vld [vmem:[#allocation3 + $0x17d] sm:$0xff] }
 0x5aa   : > { %5838 = vmatmul.mubr.f32.gmra.mrb[122].mxu0 %v5270_v41  ;;  %v6316_v41 = vld [vmem:[#allocation17 + $0x160] sm:$0xff] }
 0x5ab   : > { %5842 = vmatprep.mubr.f32.mxu0 %v5312_v37  ;;  %v6317_v37 = vld [vmem:[#allocation17 + $0x168] sm:$0xff] }
 0x5ae   : > { %5843 = vmatmul.mubr.f32.gmra.mrb[124].mxu0 %v5271_v61  ;;  %v8652_v61 = vpack.c.bf16 %v6317_v37, %v6316_v41 }
 0x5af   : > { %5847 = vmatprep.mubr.f32.mxu0 %v5313_v28  ;;  %v6318_v28 = vld [vmem:[#allocation17 + $0x170] sm:$0xff] }
 0x5b0   : > { %8653 = vmatpush1.bf16.msra.mxu1 %v8652_v61 }
 0x5b1   : > { %8654 = vmatprep.subr.bf16.mxu1 %v13185_v26 }
 0x5b2   : > { %5848 = vmatmul.mubr.f32.gmra.mrb[126].mxu0 %v5272_v3  ;;  %v6319_v3 = vld [vmem:[#allocation17 + $0x178] sm:$0xff] }
 0x5b3   : > { %5852 = vmatprep.mubr.f32.mxu0 %v5314_v54  ;;  %v8655_v54 = vpack.c.bf16 %v6319_v3, %v6318_v28 }
 0x5b5   : > { %8656 = vmatpush1.bf16.msra.mxu1 %v8655_v54 }
 0x5b6   : > { %5853 = vmatmul.mubr.f32.gmra.mrb[128].mxu0 %v5273_v62  ;;  %8657 = vmatprep.subr.bf16.mxu1 %v13185_v26  ;;  %v6320_v62 = vld [vmem:[#allocation17 + $0x180] sm:$0xff] }
 0x5b7   : > { %5857 = vmatprep.mubr.f32.mxu0 %v5315_v25  ;;  %v8658_v25 = vpack.c.bf16 %v6321_v55, %v6320_v62  ;;  %v5991_v55 = vld [vmem:[#allocation23 + $0x7e0] sm:$0xff] }
 0x5b9   : > { %8659 = vmatpush1.bf16.msra.mxu1 %v8658_v25 }
 0x5ba   : > { %5858 = vmatmul.mubr.f32.gmra.mrb[130].mxu0 %v5274_v11  ;;  %8660 = vmatprep.subr.bf16.mxu1 %v13185_v26  ;;  %v6323_v11 = vld [vmem:[#allocation17 + $0x198] sm:$0xff] }
 0x5bb   : > { %5862 = vmatprep.mubr.f32.mxu0 %v5316_v36  ;;  %v8661_v23 = vpack.c.bf16 %v6323_v11, %v6322_v38  ;;  %v6324_v36 = vld [vmem:[#allocation17 + $0x1a0] sm:$0xff] }
 0x5bc   : > { %v8664_v20 = vpack.c.bf16 %v6325_v5, %v6324_v36 }
 0x5bd   : > { %8662 = vmatpush1.bf16.msra.mxu1 %v8661_v23 }
 0x5be   : > { %5863 = vmatmul.mubr.f32.gmra.mrb[132].mxu0 %v5275_v17  ;;  %8663 = vmatprep.subr.bf16.mxu1 %v13185_v26  ;;  %v6326_v17 = vld [vmem:[#allocation17 + $0x1b0] sm:$0xff] }
 0x5bf   : > { %5867 = vmatprep.mubr.f32.mxu0 %v5317_v53 }
 0x5c1   : > { %8665 = vmatpush1.bf16.msra.mxu1 %v8664_v20 }
 0x5c2   : > { %5868 = vmatmul.mubr.f32.gmra.mrb[134].mxu0 %v5276_v39  ;;  %8666 = vmatprep.subr.bf16.mxu1 %v13185_v26  ;;  %v8667_v39 = vpack.c.bf16 %v6327_v22, %v6326_v17  ;;  %v5992_v17 = vld [vmem:[#allocation23 + $0x7e8] sm:$0xff] }
 0x5c3   : > { %5872 = vmatprep.mubr.f32.mxu0 %v5318_v60 }
 0x5c5   : > { %8668 = vmatpush1.bf16.msra.mxu1 %v8667_v39 }
 0x5c6   : > { %5873 = vmatmul.mubr.f32.gmra.mrb[136].mxu0 %v5277_v12  ;;  %8669 = vmatprep.subr.bf16.mxu1 %v13185_v26 }
 0x5c7   : > { %5877 = vmatprep.mubr.f32.mxu0 %v5319_v32 }
 0x5c9   : > { %8671 = vmatpush1.bf16.msra.mxu1 %v8670_v30 }
 0x5ca   : > { %5878 = vmatmul.mubr.f32.gmra.mrb[138].mxu0 %v5278_v52  ;;  %8672 = vmatprep.subr.bf16.mxu1 %v13185_v26 }
 0x5cb   : > { %5882 = vmatprep.mubr.f32.mxu0 %v5320_v8 }
 0x5ce   : > { %5883 = vmatmul.mubr.f32.gmra.mrb[140].mxu0 %v5279_v4  ;;  %v5986_v4 = vld [vmem:[#allocation23 + $0x7b8] sm:$0xff] }
 0x5cf   : > { %5887 = vmatprep.mubr.f32.mxu0 %v5321_v21 }
 0x5d2   : > { %5888 = vmatmul.mubr.f32.gmra.mrb[142].mxu0 %v5280_v50 }
 0x5d3   : > { %5892 = vmatprep.mubr.f32.mxu0 %v5322_v44 }
 0x5d6   : > { %5893 = vmatmul.mubr.f32.gmra.mrb[144].mxu0 %v5281_v46 }
 0x5d7   : > { %5897 = vmatprep.mubr.f32.mxu0 %v5323_v63 }
 0x5da   : > { %5898 = vmatmul.mubr.f32.gmra.mrb[146].mxu0 %v5282_v58 }
 0x5db   : > { %5902 = vmatprep.mubr.f32.mxu0 %v5324_v33 }
 0x5de   : > { %5903 = vmatmul.mubr.f32.gmra.mrb[148].mxu0 %v5283_v1 }
 0x5df   : > { %5907 = vmatprep.mubr.f32.mxu0 %v5325_v31  ;;  %v5988_v31 = vld [vmem:[#allocation23 + $0x7c8] sm:$0xff] }
 0x5e2   : > { %5908 = vmatmul.mubr.f32.gmra.mrb[150].mxu0 %v5284_v13 }
 0x5e3   : > { %5912 = vmatprep.mubr.f32.mxu0 %v5326_v9 }
 0x5e6   : > { %5913 = vmatmul.mubr.f32.gmra.mrb[152].mxu0 %v5285_v56 }
 0x5e7   : > { %5917 = vmatprep.mubr.f32.mxu0 %v5327_v0 }
 0x5ea   : > { %5918 = vmatmul.mubr.f32.gmra.mrb[154].mxu0 %v5286_v15 }
 0x5eb   : > { %5922 = vmatprep.mubr.f32.mxu0 %v5328_v16  ;;  %v5989_v16 = vld [vmem:[#allocation23 + $0x7d0] sm:$0xff] }
 0x5ee   : > { %5923 = vmatmul.mubr.f32.gmra.mrb[156].mxu0 %v5287_v29 }
 0x5ef   : > { %5927 = vmatprep.mubr.f32.mxu0 %v5329_v57 }
 0x5f2   : > { %5928 = vmatmul.mubr.f32.gmra.mrb[158].mxu0 %v5288_v49  ;;  %v6330_v49 = vld [vmem:[#allocation17 + $0x1d0] sm:$0xff] }
 0x5f3   : > { %5932 = vmatprep.mubr.f32.mxu0 %v5330_v2  ;;  %v6331_v2 = vld [vmem:[#allocation17 + $0x1d8] sm:$0xff] }
 0x5f4   : > { %v8673_v42 = vpack.c.bf16 %v6331_v2, %v6330_v49 }
 0x5f6   : > { %5933 = vmatmul.mubr.f32.gmra.mrb[160].mxu0 %v5289_v34  ;;  %8674 = vmatpush1.bf16.msra.mxu1 %v8673_v42 }
 0x5f7   : > { %5937 = vmatprep.mubr.f32.mxu0 %v5331_v43  ;;  %8675 = vmatprep.subr.bf16.mxu1 %v13185_v26 }
 0x5fa   : > { %5938 = vmatmul.mubr.f32.gmra.mrb[162].mxu0 %v5290_v6  ;;  %v5990_v6 = vld [vmem:[#allocation23 + $0x7d8] sm:$0xff] }
 0x62d   : > { %v5739_v53 = vpop.f32.mrb[82].mxu0 }
 0x62e   : > { %v8900_v60 = vadd.f32 %v12603_v35, %v5739_v53  ;;  %v5741_v19 = vpop.f32.mrb[83].mxu0 }
 0x62f   : > { %v6333_v19 = vld [vmem:[#allocation17 + $0x1e8] sm:$0xff] }
 0x630   : > { %v5943_v12 = vmax.f32 %v8900_v60, 0.0  ;;  %v6332_v60 = vld [vmem:[#allocation17 + $0x1e0] sm:$0xff] }
 0x631   : > { %v5744_v51 = vpop.f32.mrb[84].mxu0 }
 0x632   : > { %v12607_v32 = vmul.f32 %v5985_v7, %v5943_v12  ;;  %v8901_v52 = vadd.f32 %v12603_v35, %v5744_v51  ;;  %v5746_v8 = vpop.f32.mrb[85].mxu0  ;;  %v8676_v12 = vpack.c.bf16 %v6333_v19, %v6332_v60 }
 0x634   : > { %v5944_v21 = vmax.f32 %v8901_v52, 0.0  ;;  %6067 = vst [vmem:[#allocation2 + $0x18] sm:$0xff] %v12607_v32  ;;  %8677 = vmatpush1.bf16.msra.mxu1 %v8676_v12 }
 0x635   : > { %v5749_v50 = vpop.f32.mrb[86].mxu0  ;;  %8678 = vmatprep.subr.bf16.mxu1 %v13185_v26 }
 0x636   : > { %v12611_v44 = vmul.f32 %v5986_v4, %v5944_v21  ;;  %v8902_v46 = vadd.f32 %v12603_v35, %v5749_v50  ;;  %v5751_v63 = vpop.f32.mrb[87].mxu0  ;;  %v5993_v4 = vld [vmem:[#allocation23 + $0x7f0] sm:$0xff] }
 0x638   : > { %v5945_v40 = vmax.f32 %v8902_v46, 0.0  ;;  %6068 = vst [vmem:[#allocation2 + $0x20] sm:$0xff] %v12611_v44 }
 0x639   : > { %v5754_v58 = vpop.f32.mrb[88].mxu0 }
 0x63a   : > { %v6028_v59 = vmul.f32 %v5987_v18, %v5945_v40  ;;  %v8903_v33 = vadd.f32 %v12603_v35, %v5754_v58  ;;  %v5756_v1 = vpop.f32.mrb[89].mxu0  ;;  %v5994_v18 = vld [vmem:[#allocation23 + $0x7f8] sm:$0xff] }
 0x63b   : > { %v6151_v13 = vld [vmem:[#allocation2 + $0x16] sm:$0xff] }
 0x63c   : > { %v6110_v9 = vld [vmem:[#allocation2 + $0x15] sm:$0xff]  ;;  %6069 = vst [vmem:[#allocation2 + $0x28] sm:$0xff] %v6028_v59  ;;  %v5946_v27 = vmax.f32 %v8903_v33, 0.0  ;;  %6417 = vmatprep.mubr.f32.mxu1 %v6151_v13 }
 0x63d   : > { %v5759_v10 = vpop.f32.mrb[90].mxu0  ;;  %6418 = vmatmul.mubr.f32.gmra.mrb[168].mxu1 %v6110_v9  ;;  %v6334_v33 = vld [vmem:[#allocation17 + $0x1f0] sm:$0xff]  ;;  %v6335_v1 = vld [vmem:[#allocation17 + $0x1f8] sm:$0xff] }
 0x63e   : > { %v12617_v56 = vmul.f32 %v5988_v31, %v5946_v27  ;;  %v8904_v24 = vadd.f32 %v12603_v35, %v5759_v10  ;;  %v5761_v0 = vpop.f32.mrb[91].mxu0  ;;  %v8679_v13 = vpack.c.bf16 %v6335_v1, %v6334_v33  ;;  %v6001_v1 = vld [vmem:[#allocation23 + $0x830] sm:$0xff] }
 0x63f   : > { %v6152_v15 = vld [vmem:[#allocation2 + $0x1e] sm:$0xff] }
 0x640   : > { %v6111_v29 = vld [vmem:[#allocation2 + $0x1d] sm:$0xff]  ;;  %6070 = vst [vmem:[#allocation2 + $0x30] sm:$0xff] %v12617_v56  ;;  %v5947_v57 = vmax.f32 %v8904_v24, 0.0  ;;  %6422 = vmatprep.mubr.f32.mxu1 %v6152_v15  ;;  %v5995_v24 = vld [vmem:[#allocation23 + $0x800] sm:$0xff]  ;;  %8680 = vmatpush1.bf16.msra.mxu1 %v8679_v13 }
 0x641   : > { %v5764_v47 = vpop.f32.mrb[92].mxu0  ;;  %6423 = vmatmul.mubr.f32.gmra.mrb[170].mxu1 %v6111_v29 }
 0x642   : > { %v12621_v45 = vmul.f32 %v5989_v16, %v5947_v57  ;;  %v8905_v34 = vadd.f32 %v12603_v35, %v5764_v47  ;;  %v5766_v43 = vpop.f32.mrb[93].mxu0  ;;  %v5996_v47 = vld [vmem:[#allocation23 + $0x808] sm:$0xff] }
 0x643   : > { %v6153_v41 = vld [vmem:[#allocation2 + $0x26] sm:$0xff] }
 0x644   : > { %v6112_v37 = vld [vmem:[#allocation2 + $0x25] sm:$0xff]  ;;  %6071 = vst [vmem:[#allocation2 + $0x38] sm:$0xff] %v12621_v45  ;;  %v5948_v61 = vmax.f32 %v8905_v34, 0.0  ;;  %6427 = vmatprep.mubr.f32.mxu1 %v6153_v41 }
 0x645   : > { %v5769_v28 = vpop.f32.mrb[94].mxu0  ;;  %6428 = vmatmul.mubr.f32.gmra.mrb[172].mxu1 %v6112_v37 }
 0x646   : > { %v12626_v3 = vmul.f32 %v5990_v6, %v5948_v61  ;;  %v8906_v54 = vadd.f32 %v12603_v35, %v5769_v28  ;;  %v5771_v62 = vpop.f32.mrb[95].mxu0  ;;  %v5997_v28 = vld [vmem:[#allocation23 + $0x810] sm:$0xff] }
 0x647   : > { %v6154_v25 = vld [vmem:[#allocation2 + $0x2e] sm:$0xff] }
 0x648   : > { %v6113_v38 = vld [vmem:[#allocation2 + $0x2d] sm:$0xff]  ;;  %6072 = vst [vmem:[#allocation2 + $0x40] sm:$0xff] %v12626_v3  ;;  %v5949_v11 = vmax.f32 %v8906_v54, 0.0  ;;  %6432 = vmatprep.mubr.f32.mxu1 %v6154_v25 }
 0x649   : > { %v5774_v23 = vpop.f32.mrb[96].mxu0  ;;  %6433 = vmatmul.mubr.f32.gmra.mrb[174].mxu1 %v6113_v38 }
 0x64a   : > { %v12630_v36 = vmul.f32 %v5991_v55, %v5949_v11  ;;  %v8907_v5 = vadd.f32 %v12603_v35, %v5774_v23  ;;  %v5776_v20 = vpop.f32.mrb[97].mxu0 }
 0x64b   : > { %v6155_v22 = vld [vmem:[#allocation2 + $0x36] sm:$0xff] }
 0x64c   : > { %v6114_v53 = vld [vmem:[#allocation2 + $0x35] sm:$0xff]  ;;  %6073 = vst [vmem:[#allocation2 + $0x48] sm:$0xff] %v12630_v36  ;;  %v5950_v39 = vmax.f32 %v8907_v5, 0.0  ;;  %6437 = vmatprep.mubr.f32.mxu1 %v6155_v22  ;;  %v5998_v5 = vld [vmem:[#allocation23 + $0x818] sm:$0xff] }
 0x64d   : > { %v5779_v7 = vpop.f32.mrb[98].mxu0  ;;  %6438 = vmatmul.mubr.f32.gmra.mrb[176].mxu1 %v6114_v53 }
 0x64e   : > { %v12634_v51 = vmul.f32 %v5992_v17, %v5950_v39  ;;  %v8908_v52 = vadd.f32 %v12603_v35, %v5779_v7  ;;  %v5781_v8 = vpop.f32.mrb[99].mxu0  ;;  %v5999_v7 = vld [vmem:[#allocation23 + $0x820] sm:$0xff] }
 0x64f   : > { %v6156_v21 = vld [vmem:[#allocation2 + $0x3e] sm:$0xff] }
 0x650   : > { %v6115_v48 = vld [vmem:[#allocation2 + $0x3d] sm:$0xff]  ;;  %6074 = vst [vmem:[#allocation2 + $0x50] sm:$0xff] %v12634_v51  ;;  %v5951_v14 = vmax.f32 %v8908_v52, 0.0  ;;  %6442 = vmatprep.mubr.f32.mxu1 %v6156_v21 }
 0x651   : > { %v5784_v50 = vpop.f32.mrb[100].mxu0  ;;  %6443 = vmatmul.mubr.f32.gmra.mrb[178].mxu1 %v6115_v48 }
 0x652   : > { %v12639_v30 = vmul.f32 %v5993_v4, %v5951_v14  ;;  %v8909_v46 = vadd.f32 %v12603_v35, %v5784_v50  ;;  %v5786_v63 = vpop.f32.mrb[101].mxu0  ;;  %v6000_v50 = vld [vmem:[#allocation23 + $0x828] sm:$0xff] }
 0x653   : > { %v6157_v40 = vld [vmem:[#allocation2 + $0x46] sm:$0xff] }
 0x654   : > { %v6116_v58 = vld [vmem:[#allocation2 + $0x45] sm:$0xff]  ;;  %6075 = vst [vmem:[#allocation2 + $0x58] sm:$0xff] %v12639_v30  ;;  %v5952_v59 = vmax.f32 %v8909_v46, 0.0  ;;  %6447 = vmatprep.mubr.f32.mxu1 %v6157_v40 }
 0x655   : > { %v5789_v31 = vpop.f32.mrb[102].mxu0  ;;  %6448 = vmatmul.mubr.f32.gmra.mrb[180].mxu1 %v6116_v58 }
 0x656   : > { %v12643_v9 = vmul.f32 %v5994_v18, %v5952_v59  ;;  %v8910_v27 = vadd.f32 %v12603_v35, %v5789_v31  ;;  %v5791_v10 = vpop.f32.mrb[103].mxu0 }
 0x657   : > { %v6158_v0 = vld [vmem:[#allocation2 + $0x4e] sm:$0xff] }
 0x658   : > { %v6117_v16 = vld [vmem:[#allocation2 + $0x4d] sm:$0xff]  ;;  %6076 = vst [vmem:[#allocation2 + $0x60] sm:$0xff] %v12643_v9  ;;  %v5953_v15 = vmax.f32 %v8910_v27, 0.0  ;;  %6452 = vmatprep.mubr.f32.mxu1 %v6158_v0 }
 0x659   : > { %v5794_v29 = vpop.f32.mrb[104].mxu0  ;;  %6453 = vmatmul.mubr.f32.gmra.mrb[182].mxu1 %v6117_v16 }
 0x65a   : > { %v12647_v57 = vmul.f32 %v5995_v24, %v5953_v15  ;;  %v8911_v49 = vadd.f32 %v12603_v35, %v5794_v29  ;;  %v5796_v2 = vpop.f32.mrb[105].mxu0  ;;  %v6002_v15 = vld [vmem:[#allocation23 + $0x838] sm:$0xff] }
 0x65b   : > { %v6159_v42 = vld [vmem:[#allocation2 + $0x56] sm:$0xff] }
 0x65c   : > { %v6118_v34 = vld [vmem:[#allocation2 + $0x55] sm:$0xff]  ;;  %6077 = vst [vmem:[#allocation2 + $0x68] sm:$0xff] %v12647_v57  ;;  %v5954_v43 = vmax.f32 %v8911_v49, 0.0  ;;  %6457 = vmatprep.mubr.f32.mxu1 %v6159_v42 }
 0x65d   : > { %v5799_v6 = vpop.f32.mrb[106].mxu0  ;;  %6458 = vmatmul.mubr.f32.gmra.mrb[184].mxu1 %v6118_v34 }
 0x65e   : > { %v12651_v41 = vmul.f32 %v5996_v47, %v5954_v43  ;;  %v8912_v37 = vadd.f32 %v12603_v35, %v5799_v6  ;;  %v5801_v61 = vpop.f32.mrb[107].mxu0  ;;  %v6003_v6 = vld [vmem:[#allocation23 + $0x840] sm:$0xff] }
 0x65f   : > { %v6160_v54 = vld [vmem:[#allocation2 + $0x5e] sm:$0xff] }
 0x660   : > { %v6119_v62 = vld [vmem:[#allocation2 + $0x5d] sm:$0xff]  ;;  %6078 = vst [vmem:[#allocation2 + $0x70] sm:$0xff] %v12651_v41  ;;  %v5955_v55 = vmax.f32 %v8912_v37, 0.0  ;;  %6462 = vmatprep.mubr.f32.mxu1 %v6160_v54 }
 0x661   : > { %v5804_v25 = vpop.f32.mrb[108].mxu0  ;;  %6463 = vmatmul.mubr.f32.gmra.mrb[186].mxu1 %v6119_v62 }
 0x662   : > { %v12655_v38 = vmul.f32 %v5997_v28, %v5955_v55  ;;  %v8913_v11 = vadd.f32 %v12603_v35, %v5804_v25  ;;  %v5806_v23 = vpop.f32.mrb[109].mxu0 }
 0x663   : > { %v6161_v20 = vld [vmem:[#allocation2 + $0x66] sm:$0xff] }
 0x664   : > { %v6120_v17 = vld [vmem:[#allocation2 + $0x65] sm:$0xff]  ;;  %6079 = vst [vmem:[#allocation2 + $0x78] sm:$0xff] %v12655_v38  ;;  %v5956_v22 = vmax.f32 %v8913_v11, 0.0  ;;  %6467 = vmatprep.mubr.f32.mxu1 %v6161_v20  ;;  %v6004_v11 = vld [vmem:[#allocation23 + $0x848] sm:$0xff] }
 0x665   : > { %v5809_v53 = vpop.f32.mrb[110].mxu0  ;;  %6468 = vmatmul.mubr.f32.gmra.mrb[188].mxu1 %v6120_v17 }
 0x666   : > { %v12659_v39 = vmul.f32 %v5998_v5, %v5956_v22  ;;  %v8914_v60 = vadd.f32 %v12603_v35, %v5809_v53  ;;  %v5811_v19 = vpop.f32.mrb[111].mxu0 }
 0x667   : > { %v6162_v12 = vld [vmem:[#allocation2 + $0x6e] sm:$0xff]  ;;  %v6005_v19 = vld [vmem:[#allocation23 + $0x850] sm:$0xff] }
 0x668   : > { %v6121_v52 = vld [vmem:[#allocation2 + $0x6d] sm:$0xff]  ;;  %6080 = vst [vmem:[#allocation2 + $0x80] sm:$0xff] %v12659_v39  ;;  %v5957_v8 = vmax.f32 %v8914_v60, 0.0  ;;  %6472 = vmatprep.mubr.f32.mxu1 %v6162_v12 }
 0x669   : > { %v5814_v4 = vpop.f32.mrb[112].mxu0  ;;  %6473 = vmatmul.mubr.f32.gmra.mrb[190].mxu1 %v6121_v52 }
 0x66a   : > { %v12663_v21 = vmul.f32 %v5999_v7, %v5957_v8  ;;  %v8915_v48 = vadd.f32 %v12603_v35, %v5814_v4  ;;  %v5816_v14 = vpop.f32.mrb[113].mxu0 }
 0x66b   : > { %v6163_v46 = vld [vmem:[#allocation2 + $0x76] sm:$0xff] }
 0x66c   : > { %v6122_v63 = vld [vmem:[#allocation2 + $0x75] sm:$0xff]  ;;  %6081 = vst [vmem:[#allocation2 + $0x88] sm:$0xff] %v12663_v21  ;;  %v5958_v18 = vmax.f32 %v8915_v48, 0.0  ;;  %6477 = vmatprep.mubr.f32.mxu1 %v6163_v46 }
 0x66d   : > { %v5819_v40 = vpop.f32.mrb[114].mxu0  ;;  %6478 = vmatmul.mubr.f32.gmra.mrb[192].mxu1 %v6122_v63 }
 0x66e   : > { %v12667_v58 = vmul.f32 %v6000_v50, %v5958_v18  ;;  %v8916_v59 = vadd.f32 %v12603_v35, %v5819_v40  ;;  %v5821_v33 = vpop.f32.mrb[115].mxu0  ;;  %v6006_v50 = vld [vmem:[#allocation23 + $0x858] sm:$0xff] }
 0x66f   : > { %v6164_v31 = vld [vmem:[#allocation2 + $0x7e] sm:$0xff] }
 0x670   : > { %v6123_v13 = vld [vmem:[#allocation2 + $0x7d] sm:$0xff]  ;;  %6082 = vst [vmem:[#allocation2 + $0x90] sm:$0xff] %v12667_v58  ;;  %v5959_v27 = vmax.f32 %v8916_v59, 0.0  ;;  %6482 = vmatprep.mubr.f32.mxu1 %v6164_v31  ;;  %v6007_v31 = vld [vmem:[#allocation23 + $0x860] sm:$0xff] }
 0x671   : > { %v5824_v10 = vpop.f32.mrb[116].mxu0  ;;  %6483 = vmatmul.mubr.f32.gmra.mrb[194].mxu1 %v6123_v13 }
 0x672   : > { %v12671_v24 = vmul.f32 %v6001_v1, %v5959_v27  ;;  %v8917_v0 = vadd.f32 %v12603_v35, %v5824_v10  ;;  %v5826_v16 = vpop.f32.mrb[117].mxu0 }
 0x673   : > { %v6165_v29 = vld [vmem:[#allocation2 + $0x86] sm:$0xff] }
 0x674   : > { %v6124_v49 = vld [vmem:[#allocation2 + $0x85] sm:$0xff]  ;;  %6083 = vst [vmem:[#allocation2 + $0x98] sm:$0xff] %v12671_v24  ;;  %v5960_v2 = vmax.f32 %v8917_v0, 0.0  ;;  %6487 = vmatprep.mubr.f32.mxu1 %v6165_v29 }
 0x675   : > { %v5829_v47 = vpop.f32.mrb[118].mxu0  ;;  %6488 = vmatmul.mubr.f32.gmra.mrb[196].mxu1 %v6124_v49  ;;  %v6008_v49 = vld [vmem:[#allocation23 + $0x868] sm:$0xff] }
 0x676   : > { %v12675_v42 = vmul.f32 %v6002_v15, %v5960_v2  ;;  %v8918_v34 = vadd.f32 %v12603_v35, %v5829_v47  ;;  %v5831_v43 = vpop.f32.mrb[119].mxu0 }
 0x677   : > { %v6166_v37 = vld [vmem:[#allocation2 + $0x8e] sm:$0xff] }
 0x678   : > { %v6125_v61 = vld [vmem:[#allocation2 + $0x8d] sm:$0xff]  ;;  %6084 = vst [vmem:[#allocation2 + $0xa0] sm:$0xff] %v12675_v42  ;;  %v5961_v28 = vmax.f32 %v8918_v34, 0.0  ;;  %6492 = vmatprep.mubr.f32.mxu1 %v6166_v37 }
 0x679   : > { %v5834_v54 = vpop.f32.mrb[120].mxu0  ;;  %6493 = vmatmul.mubr.f32.gmra.mrb[198].mxu1 %v6125_v61 }
 0x67a   : > { %v12679_v62 = vmul.f32 %v6003_v6, %v5961_v28  ;;  %v8919_v55 = vadd.f32 %v12603_v35, %v5834_v54  ;;  %v5836_v25 = vpop.f32.mrb[121].mxu0  ;;  %v7212_v28 = vld [vmem:[#allocation20] sm:$0xff]  ;;  %v7213_v54 = vld [vmem:[#allocation20 + $0x8] sm:$0xff] }
 0x67b   : > { %v6167_v23 = vld [vmem:[#allocation2 + $0x96] sm:$0xff] }
 0x67c   : > { %v6126_v5 = vld [vmem:[#allocation2 + $0x95] sm:$0xff]  ;;  %6085 = vst [vmem:[#allocation2 + $0xa8] sm:$0xff] %v12679_v62  ;;  %v5962_v20 = vmax.f32 %v8919_v55, 0.0  ;;  %6497 = vmatprep.mubr.f32.mxu1 %v6167_v23  ;;  %v8682_v23 = vpack.c.bf16 %v7213_v54, %v7212_v28 }
 0x67d   : > { %v5839_v17 = vpop.f32.mrb[122].mxu0  ;;  %6498 = vmatmul.mubr.f32.gmra.mrb[200].mxu1 %v6126_v5  ;;  %v6009_v55 = vld [vmem:[#allocation23 + $0x870] sm:$0xff] }
 0x67e   : > { %v12683_v22 = vmul.f32 %v6004_v11, %v5962_v20  ;;  %v8920_v53 = vadd.f32 %v12603_v35, %v5839_v17  ;;  %v5841_v60 = vpop.f32.mrb[123].mxu0  ;;  %8683 = vmatpush1.bf16.msra.mxu0 %v8682_v23 }
 0x67f   : > { %v6168_v7 = vld [vmem:[#allocation2 + $0x9e] sm:$0xff]  ;;  %8684 = vmatprep.subr.bf16.mxu0 %v13185_v26 }
 0x680   : > { %v6127_v12 = vld [vmem:[#allocation2 + $0x9d] sm:$0xff]  ;;  %6086 = vst [vmem:[#allocation2 + $0xb0] sm:$0xff] %v12683_v22  ;;  %v5963_v52 = vmax.f32 %v8920_v53, 0.0  ;;  %6502 = vmatprep.mubr.f32.mxu1 %v6168_v7 }
 0x681   : > { %v5844_v8 = vpop.f32.mrb[124].mxu0  ;;  %6503 = vmatmul.mubr.f32.gmra.mrb[202].mxu1 %v6127_v12 }
 0x682   : > { %v12687_v4 = vmul.f32 %v6005_v19, %v5963_v52  ;;  %v8921_v48 = vadd.f32 %v12603_v35, %v5844_v8  ;;  %v5846_v14 = vpop.f32.mrb[125].mxu0  ;;  %v6010_v19 = vld [vmem:[#allocation23 + $0x878] sm:$0xff] }
 0x683   : > { %v6169_v46 = vld [vmem:[#allocation2 + $0xa6] sm:$0xff] }
 0x684   : > { %v6128_v63 = vld [vmem:[#allocation2 + $0xa5] sm:$0xff]  ;;  %6087 = vst [vmem:[#allocation2 + $0xb8] sm:$0xff] %v12687_v4  ;;  %v5964_v18 = vmax.f32 %v8921_v48, 0.0  ;;  %6507 = vmatprep.mubr.f32.mxu1 %v6169_v46 }
 0x685   : > { %v5849_v40 = vpop.f32.mrb[126].mxu0  ;;  %6508 = vmatmul.mubr.f32.gmra.mrb[204].mxu1 %v6128_v63  ;;  %v6011_v46 = vld [vmem:[#allocation23 + $0x880] sm:$0xff] }
 0x686   : > { %v12691_v59 = vmul.f32 %v6006_v50, %v5964_v18  ;;  %v8922_v33 = vadd.f32 %v12603_v35, %v5849_v40  ;;  %v5851_v1 = vpop.f32.mrb[127].mxu0 }
 0x687   : > { %v6170_v13 = vld [vmem:[#allocation2 + $0xae] sm:$0xff] }
 0x688   : > { %v6129_v27 = vld [vmem:[#allocation2 + $0xad] sm:$0xff]  ;;  %6088 = vst [vmem:[#allocation2 + $0xc0] sm:$0xff] %v12691_v59  ;;  %v5965_v10 = vmax.f32 %v8922_v33, 0.0  ;;  %6512 = vmatprep.mubr.f32.mxu1 %v6170_v13 }
 0x689   : > { %v5854_v0 = vpop.f32.mrb[128].mxu0  ;;  %6513 = vmatmul.mubr.f32.gmra.mrb[206].mxu1 %v6129_v27  ;;  %v7214_v27 = vld [vmem:[#allocation20 + $0x10] sm:$0xff] }
 0x68a   : > { %v12695_v16 = vmul.f32 %v6007_v31, %v5965_v10  ;;  %v8923_v15 = vadd.f32 %v12603_v35, %v5854_v0  ;;  %v5856_v29 = vpop.f32.mrb[129].mxu0  ;;  %v7215_v10 = vld [vmem:[#allocation20 + $0x18] sm:$0xff]  ;;  %v6012_v0 = vld [vmem:[#allocation23 + $0x888] sm:$0xff] }
 0x68b   : > { %v6171_v2 = vld [vmem:[#allocation2 + $0xb6] sm:$0xff] }
 0x68c   : > { %v6130_v47 = vld [vmem:[#allocation2 + $0xb5] sm:$0xff]  ;;  %6089 = vst [vmem:[#allocation2 + $0xc8] sm:$0xff] %v12695_v16  ;;  %v5966_v34 = vmax.f32 %v8923_v15, 0.0  ;;  %6517 = vmatprep.mubr.f32.mxu1 %v6171_v2 }
 0x68d   : > { %v5859_v43 = vpop.f32.mrb[130].mxu0  ;;  %6518 = vmatmul.mubr.f32.gmra.mrb[208].mxu1 %v6130_v47 }
 0x68e   : > { %v12699_v6 = vmul.f32 %v6008_v49, %v5966_v34  ;;  %v8924_v37 = vadd.f32 %v12603_v35, %v5859_v43  ;;  %v5861_v61 = vpop.f32.mrb[131].mxu0  ;;  %v8685_v49 = vpack.c.bf16 %v7215_v10, %v7214_v27 }
 0x68f   : > { %v6172_v25 = vld [vmem:[#allocation2 + $0xbe] sm:$0xff]  ;;  %v6013_v61 = vld [vmem:[#allocation23 + $0x890] sm:$0xff] }
 0x690   : > { %v6131_v11 = vld [vmem:[#allocation2 + $0xbd] sm:$0xff]  ;;  %6090 = vst [vmem:[#allocation2 + $0xd0] sm:$0xff] %v12699_v6  ;;  %v5967_v5 = vmax.f32 %v8924_v37, 0.0  ;;  %6522 = vmatprep.mubr.f32.mxu1 %v6172_v25  ;;  %8686 = vmatpush1.bf16.msra.mxu0 %v8685_v49 }
 0x691   : > { %v5864_v20 = vpop.f32.mrb[132].mxu0  ;;  %6523 = vmatmul.mubr.f32.gmra.mrb[210].mxu1 %v6131_v11  ;;  %8687 = vmatprep.subr.bf16.mxu0 %v13185_v26 }
 0x692   : > { %v12703_v17 = vmul.f32 %v6009_v55, %v5967_v5  ;;  %v8925_v53 = vadd.f32 %v12603_v35, %v5864_v20  ;;  %v5866_v60 = vpop.f32.mrb[133].mxu0  ;;  %v6014_v20 = vld [vmem:[#allocation23 + $0x898] sm:$0xff] }
 0x693   : > { %v6173_v7 = vld [vmem:[#allocation2 + $0xc6] sm:$0xff] }
 0x694   : > { %v6132_v12 = vld [vmem:[#allocation2 + $0xc5] sm:$0xff]  ;;  %6091 = vst [vmem:[#allocation2 + $0xd8] sm:$0xff] %v12703_v17  ;;  %v5968_v52 = vmax.f32 %v8925_v53, 0.0  ;;  %6527 = vmatprep.mubr.f32.mxu1 %v6173_v7 }
 0x695   : > { %v5869_v8 = vpop.f32.mrb[134].mxu0  ;;  %6528 = vmatmul.mubr.f32.gmra.mrb[212].mxu1 %v6132_v12  ;;  %v7216_v12 = vld [vmem:[#allocation20 + $0x20] sm:$0xff] }
 0x696   : > { %v12708_v48 = vmul.f32 %v6010_v19, %v5968_v52  ;;  %v8926_v14 = vadd.f32 %v12603_v35, %v5869_v8  ;;  %v5871_v50 = vpop.f32.mrb[135].mxu0  ;;  %v7217_v52 = vld [vmem:[#allocation20 + $0x28] sm:$0xff] }
 0x697   : > { %v6174_v63 = vld [vmem:[#allocation2 + $0xce] sm:$0xff] }
 0x698   : > { %v6133_v18 = vld [vmem:[#allocation2 + $0xcd] sm:$0xff]  ;;  %6092 = vst [vmem:[#allocation2 + $0xe0] sm:$0xff] %v12708_v48  ;;  %v5969_v40 = vmax.f32 %v8926_v14, 0.0  ;;  %6532 = vmatprep.mubr.f32.mxu1 %v6174_v63 }
 0x699   : > { %v5874_v33 = vpop.f32.mrb[136].mxu0  ;;  %6533 = vmatmul.mubr.f32.gmra.mrb[214].mxu1 %v6133_v18  ;;  %v6015_v63 = vld [vmem:[#allocation23 + $0x8a0] sm:$0xff] }
 0x69a   : > { %v12712_v1 = vmul.f32 %v6011_v46, %v5969_v40  ;;  %v8927_v31 = vadd.f32 %v12603_v35, %v5874_v33  ;;  %v5876_v13 = vpop.f32.mrb[137].mxu0  ;;  %v8688_v46 = vpack.c.bf16 %v7217_v52, %v7216_v12 }
 0x69b   : > { %v6175_v15 = vld [vmem:[#allocation2 + $0xd6] sm:$0xff] }
 0x69c   : > { %v6134_v29 = vld [vmem:[#allocation2 + $0xd5] sm:$0xff]  ;;  %6093 = vst [vmem:[#allocation2 + $0xe8] sm:$0xff] %v12712_v1  ;;  %v5970_v2 = vmax.f32 %v8927_v31, 0.0  ;;  %6537 = vmatprep.mubr.f32.mxu1 %v6175_v15  ;;  %8689 = vmatpush1.bf16.msra.mxu0 %v8688_v46 }
 0x69d   : > { %v5879_v47 = vpop.f32.mrb[138].mxu0  ;;  %6538 = vmatmul.mubr.f32.gmra.mrb[216].mxu1 %v6134_v29  ;;  %8690 = vmatprep.subr.bf16.mxu0 %v13185_v26 }
 0x69e   : > { %v12716_v34 = vmul.f32 %v6012_v0, %v5970_v2  ;;  %v8928_v43 = vadd.f32 %v12603_v35, %v5879_v47  ;;  %v5881_v37 = vpop.f32.mrb[139].mxu0  ;;  %v6016_v0 = vld [vmem:[#allocation23 + $0x8a8] sm:$0xff] }
 0x69f   : > { %v6176_v28 = vld [vmem:[#allocation2 + $0xde] sm:$0xff] }
 0x6a0   : > { %v6135_v54 = vld [vmem:[#allocation2 + $0xdd] sm:$0xff]  ;;  %6094 = vst [vmem:[#allocation2 + $0xf0] sm:$0xff] %v12716_v34  ;;  %v5971_v55 = vmax.f32 %v8928_v43, 0.0  ;;  %6542 = vmatprep.mubr.f32.mxu1 %v6176_v28 }
 0x6a1   : > { %v5884_v25 = vpop.f32.mrb[140].mxu0  ;;  %6543 = vmatmul.mubr.f32.gmra.mrb[218].mxu1 %v6135_v54  ;;  %v7219_v28 = vld [vmem:[#allocation20 + $0x38] sm:$0xff] }
 0x6a2   : > { %v12721_v11 = vmul.f32 %v6013_v61, %v5971_v55  ;;  %v8929_v23 = vadd.f32 %v12603_v35, %v5884_v25  ;;  %v5886_v5 = vpop.f32.mrb[141].mxu0  ;;  %v7218_v61 = vld [vmem:[#allocation20 + $0x30] sm:$0xff] }
 0x6a3   : > { %v6177_v53 = vld [vmem:[#allocation2 + $0xe6] sm:$0xff]  ;;  %v6017_v54 = vld [vmem:[#allocation23 + $0x8b0] sm:$0xff] }
 0x6a4   : > { %v6136_v60 = vld [vmem:[#allocation2 + $0xe5] sm:$0xff]  ;;  %6095 = vst [vmem:[#allocation2 + $0xf8] sm:$0xff] %v12721_v11  ;;  %v5972_v19 = vmax.f32 %v8929_v23, 0.0  ;;  %6547 = vmatprep.mubr.f32.mxu1 %v6177_v53  ;;  %v8691_v23 = vpack.c.bf16 %v7219_v28, %v7218_v61 }
 0x6a5   : > { %v5889_v7 = vpop.f32.mrb[142].mxu0  ;;  %6548 = vmatmul.mubr.f32.gmra.mrb[220].mxu1 %v6136_v60 }
 0x6a6   : > { %v12725_v8 = vmul.f32 %v6014_v20, %v5972_v19  ;;  %v8930_v14 = vadd.f32 %v12603_v35, %v5889_v7  ;;  %v5891_v50 = vpop.f32.mrb[143].mxu0  ;;  %8692 = vmatpush1.bf16.msra.mxu0 %v8691_v23  ;;  %v6018_v7 = vld [vmem:[#allocation23 + $0x8b8] sm:$0xff] }
 0x6a7   : > { %v6178_v18 = vld [vmem:[#allocation2 + $0xee] sm:$0xff]  ;;  %8693 = vmatprep.subr.bf16.mxu0 %v13185_v26 }
 0x6a8   : > { %v6137_v40 = vld [vmem:[#allocation2 + $0xed] sm:$0xff]  ;;  %6096 = vst [vmem:[#allocation2 + $0x100] sm:$0xff] %v12725_v8  ;;  %v5973_v33 = vmax.f32 %v8930_v14, 0.0  ;;  %6552 = vmatprep.mubr.f32.mxu1 %v6178_v18 }
 0x6a9   : > { %v5894_v31 = vpop.f32.mrb[144].mxu0  ;;  %6553 = vmatmul.mubr.f32.gmra.mrb[222].mxu1 %v6137_v40  ;;  %v6019_v40 = vld [vmem:[#allocation23 + $0x8c0] sm:$0xff] }
 0x6aa   : > { %v12730_v13 = vmul.f32 %v6015_v63, %v5973_v33  ;;  %v8931_v27 = vadd.f32 %v12603_v35, %v5894_v31  ;;  %v5896_v10 = vpop.f32.mrb[145].mxu0 }
 0x6ab   : > { %v6179_v15 = vld [vmem:[#allocation2 + $0xf6] sm:$0xff] }
 0x6ac   : > { %v6138_v29 = vld [vmem:[#allocation2 + $0xf5] sm:$0xff]  ;;  %6097 = vst [vmem:[#allocation2 + $0x108] sm:$0xff] %v12730_v13  ;;  %v5974_v49 = vmax.f32 %v8931_v27, 0.0  ;;  %6557 = vmatprep.mubr.f32.mxu1 %v6179_v15  ;;  %v7221_v15 = vld [vmem:[#allocation20 + $0x48] sm:$0xff] }
 0x6ad   : > { %v5899_v2 = vpop.f32.mrb[146].mxu0  ;;  %6558 = vmatmul.mubr.f32.gmra.mrb[224].mxu1 %v6138_v29 }
 0x6ae   : > { %v12734_v47 = vmul.f32 %v6016_v0, %v5974_v49  ;;  %v8932_v43 = vadd.f32 %v12603_v35, %v5899_v2  ;;  %v5901_v37 = vpop.f32.mrb[147].mxu0  ;;  %v7220_v0 = vld [vmem:[#allocation20 + $0x40] sm:$0xff] }
 0x6af   : > { %v6180_v55 = vld [vmem:[#allocation2 + $0xfe] sm:$0xff]  ;;  %v6020_v37 = vld [vmem:[#allocation23 + $0x8c8] sm:$0xff] }
 0x6b0   : > { %v6139_v25 = vld [vmem:[#allocation2 + $0xfd] sm:$0xff]  ;;  %6098 = vst [vmem:[#allocation2 + $0x110] sm:$0xff] %v12734_v47  ;;  %v5975_v5 = vmax.f32 %v8932_v43, 0.0  ;;  %6562 = vmatprep.mubr.f32.mxu1 %v6180_v55  ;;  %v8694_v43 = vpack.c.bf16 %v7221_v15, %v7220_v0 }
 0x6b1   : > { %v5904_v20 = vpop.f32.mrb[148].mxu0  ;;  %6563 = vmatmul.mubr.f32.gmra.mrb[226].mxu1 %v6139_v25 }
 0x6b2   : > { %v12738_v53 = vmul.f32 %v6017_v54, %v5975_v5  ;;  %v8933_v60 = vadd.f32 %v12603_v35, %v5904_v20  ;;  %v5906_v19 = vpop.f32.mrb[149].mxu0  ;;  %8695 = vmatpush1.bf16.msra.mxu0 %v8694_v43  ;;  %v6021_v20 = vld [vmem:[#allocation23 + $0x8d0] sm:$0xff]  ;;  %v6023_v43 = vld [vmem:[#allocation23 + $0x8e0] sm:$0xff] }
 0x6b3   : > { %v6181_v12 = vld [vmem:[#allocation2 + $0x106] sm:$0xff]  ;;  %8696 = vmatprep.subr.bf16.mxu0 %v13185_v26 }
 0x6b4   : > { %v6140_v52 = vld [vmem:[#allocation2 + $0x105] sm:$0xff]  ;;  %6099 = vst [vmem:[#allocation2 + $0x118] sm:$0xff] %v12738_v53  ;;  %v5976_v14 = vmax.f32 %v8933_v60, 0.0  ;;  %6567 = vmatprep.mubr.f32.mxu1 %v6181_v12 }
 0x6b5   : > { %v5909_v50 = vpop.f32.mrb[150].mxu0  ;;  %6568 = vmatmul.mubr.f32.gmra.mrb[228].mxu1 %v6140_v52 }
 0x6b6   : > { %v12743_v46 = vmul.f32 %v6018_v7, %v5976_v14  ;;  %v8934_v63 = vadd.f32 %v12603_v35, %v5909_v50  ;;  %v5911_v18 = vpop.f32.mrb[151].mxu0 }
 0x6b7   : > { %v6182_v33 = vld [vmem:[#allocation2 + $0x10e] sm:$0xff]  ;;  %v7223_v18 = vld [vmem:[#allocation20 + $0x58] sm:$0xff] }
 0x6b8   : > { %v6141_v31 = vld [vmem:[#allocation2 + $0x10d] sm:$0xff]  ;;  %6100 = vst [vmem:[#allocation2 + $0x120] sm:$0xff] %v12743_v46  ;;  %v5977_v27 = vmax.f32 %v8934_v63, 0.0  ;;  %6572 = vmatprep.mubr.f32.mxu1 %v6182_v33 }
 0x6b9   : > { %v5914_v10 = vpop.f32.mrb[152].mxu0  ;;  %6573 = vmatmul.mubr.f32.gmra.mrb[230].mxu1 %v6141_v31  ;;  %v7222_v63 = vld [vmem:[#allocation20 + $0x50] sm:$0xff] }
 0x6ba   : > { %v12747_v29 = vmul.f32 %v6019_v40, %v5977_v27  ;;  %v8935_v49 = vadd.f32 %v12603_v35, %v5914_v10  ;;  %v5916_v2 = vpop.f32.mrb[153].mxu0  ;;  %v6022_v40 = vld [vmem:[#allocation23 + $0x8d8] sm:$0xff]  ;;  %v8697_v27 = vpack.c.bf16 %v7223_v18, %v7222_v63 }
 0x6bb   : > { %v6183_v61 = vld [vmem:[#allocation2 + $0x116] sm:$0xff]  ;;  %v7224_v18 = vld [vmem:[#allocation20 + $0x60] sm:$0xff] }
 0x6bc   : > { %v6142_v28 = vld [vmem:[#allocation2 + $0x115] sm:$0xff]  ;;  %6101 = vst [vmem:[#allocation2 + $0x128] sm:$0xff] %v12747_v29  ;;  %v5978_v54 = vmax.f32 %v8935_v49, 0.0  ;;  %6577 = vmatprep.mubr.f32.mxu1 %v6183_v61  ;;  %8698 = vmatpush1.bf16.msra.mxu0 %v8697_v27 }
 0x6bd   : > { %v5919_v55 = vpop.f32.mrb[154].mxu0  ;;  %6578 = vmatmul.mubr.f32.gmra.mrb[232].mxu1 %v6142_v28  ;;  %8699 = vmatprep.subr.bf16.mxu0 %v13185_v26 }
 0x6be   : > { %v12752_v25 = vmul.f32 %v6020_v37, %v5978_v54  ;;  %v8936_v23 = vadd.f32 %v12603_v35, %v5919_v55  ;;  %v5921_v5 = vpop.f32.mrb[155].mxu0 }
 0x6bf   : > { %v6184_v60 = vld [vmem:[#allocation2 + $0x11e] sm:$0xff] }
 0x6c0   : > { %v6143_v19 = vld [vmem:[#allocation2 + $0x11d] sm:$0xff]  ;;  %6102 = vst [vmem:[#allocation2 + $0x130] sm:$0xff] %v12752_v25  ;;  %v5979_v7 = vmax.f32 %v8936_v23, 0.0  ;;  %6582 = vmatprep.mubr.f32.mxu1 %v6184_v60 }
 0x6c1   : > { %v5924_v12 = vpop.f32.mrb[156].mxu0  ;;  %6583 = vmatmul.mubr.f32.gmra.mrb[234].mxu1 %v6143_v19 }
 0x6c2   : > { %v12756_v52 = vmul.f32 %v6021_v20, %v5979_v7  ;;  %v8937_v14 = vadd.f32 %v12603_v35, %v5924_v12  ;;  %v5926_v50 = vpop.f32.mrb[157].mxu0  ;;  %v6024_v20 = vld [vmem:[#allocation23 + $0x8e8] sm:$0xff] }
 0x6c3   : > { %v6185_v33 = vld [vmem:[#allocation2 + $0x126] sm:$0xff] }
 0x6c4   : > { %v6144_v31 = vld [vmem:[#allocation2 + $0x125] sm:$0xff]  ;;  %6103 = vst [vmem:[#allocation2 + $0x138] sm:$0xff] %v12756_v52  ;;  %v5980_v10 = vmax.f32 %v8937_v14, 0.0  ;;  %6587 = vmatprep.mubr.f32.mxu1 %v6185_v33  ;;  %v6025_v33 = vld [vmem:[#allocation23 + $0x8f0] sm:$0xff] }
 0x6c5   : > { %v5929_v0 = vpop.f32.mrb[158].mxu0  ;;  %6588 = vmatmul.mubr.f32.gmra.mrb[236].mxu1 %v6144_v31 }
 0x6c6   : > { %v12760_v15 = vmul.f32 %v6022_v40, %v5980_v10  ;;  %v8938_v49 = vadd.f32 %v12603_v35, %v5929_v0  ;;  %v5931_v2 = vpop.f32.mrb[159].mxu0  ;;  %v7225_v40 = vld [vmem:[#allocation20 + $0x68] sm:$0xff] }
 0x6c7   : > { %v6186_v37 = vld [vmem:[#allocation2 + $0x12e] sm:$0xff]  ;;  %v8700_v10 = vpack.c.bf16 %v7225_v40, %v7224_v18  ;;  %v7232_v18 = vld [vmem:[#allocation20 + $0xa0] sm:$0xff] }
 0x6c8   : > { %v6145_v61 = vld [vmem:[#allocation2 + $0x12d] sm:$0xff]  ;;  %6104 = vst [vmem:[#allocation2 + $0x140] sm:$0xff] %v12760_v15  ;;  %v5981_v28 = vmax.f32 %v8938_v49, 0.0  ;;  %6592 = vmatprep.mubr.f32.mxu1 %v6186_v37  ;;  %v7227_v37 = vld [vmem:[#allocation20 + $0x78] sm:$0xff] }
 0x6c9   : > { %v5934_v54 = vpop.f32.mrb[160].mxu0  ;;  %6593 = vmatmul.mubr.f32.gmra.mrb[238].mxu1 %v6145_v61  ;;  %8701 = vmatpush1.bf16.msra.mxu0 %v8700_v10  ;;  %v7236_v10 = vld [vmem:[#allocation20 + $0xc0] sm:$0xff] }
 0x6ca   : > { %v12765_v55 = vmul.f32 %v6023_v43, %v5981_v28  ;;  %v8939_v23 = vadd.f32 %v12603_v35, %v5934_v54  ;;  %v5936_v5 = vpop.f32.mrb[161].mxu0  ;;  %8702 = vmatprep.subr.bf16.mxu0 %v13185_v26  ;;  %v6190_v28 = vld [vmem:[#allocation2 + $0x17] sm:$0xff]  ;;  %v6191_v54 = vld [vmem:[#allocation2 + $0x1f] sm:$0xff] }
 0x6cb   : > { %v6187_v60 = vld [vmem:[#allocation2 + $0x136] sm:$0xff]  ;;  %v6192_v5 = vld [vmem:[#allocation2 + $0x27] sm:$0xff] }
 0x6cc   : > { %v6146_v19 = vld [vmem:[#allocation2 + $0x135] sm:$0xff]  ;;  %6105 = vst [vmem:[#allocation2 + $0x148] sm:$0xff] %v12765_v55  ;;  %v5982_v7 = vmax.f32 %v8939_v23, 0.0  ;;  %6597 = vmatprep.mubr.f32.mxu1 %v6187_v60  ;;  %v6233_v23 = vld [vmem:[#allocation2 + $0x28] sm:$0xff] }
 0x6cd   : > { %v5939_v12 = vpop.f32.mrb[162].mxu0  ;;  %6598 = vmatmul.mubr.f32.gmra.mrb[240].mxu1 %v6146_v19  ;;  %v6193_v19 = vld [vmem:[#allocation2 + $0x2f] sm:$0xff] }
 0x6ce   : > { %v12769_v14 = vmul.f32 %v6024_v20, %v5982_v7  ;;  %v8940_v50 = vadd.f32 %v12603_v35, %v5939_v12  ;;  %v5941_v63 = vpop.f32.mrb[163].mxu0  ;;  %v7226_v35 = vld [vmem:[#allocation20 + $0x70] sm:$0xff]  ;;  %v7228_v20 = vld [vmem:[#allocation20 + $0x80] sm:$0xff] }
 0x6cf   : > { %v6188_v31 = vld [vmem:[#allocation2 + $0x13e] sm:$0xff]  ;;  %v8703_v61 = vpack.c.bf16 %v7227_v37, %v7226_v35  ;;  %v7230_v12 = vld [vmem:[#allocation20 + $0x90] sm:$0xff]  ;;  %v6196_v63 = vld [vmem:[#allocation2 + $0x47] sm:$0xff] }
 0x6d0   : > { %v6147_v27 = vld [vmem:[#allocation2 + $0x13d] sm:$0xff]  ;;  %6106 = vst [vmem:[#allocation2 + $0x150] sm:$0xff] %v12769_v14  ;;  %v5983_v0 = vmax.f32 %v8940_v50, 0.0  ;;  %6602 = vmatprep.mubr.f32.mxu1 %v6188_v31  ;;  %v7234_v31 = vld [vmem:[#allocation20 + $0xb0] sm:$0xff]  ;;  %v6200_v35 = vld [vmem:[#allocation2 + $0x67] sm:$0xff] }
 0x6d1   : > { %6603 = vmatmul.mubr.f32.gmra.mrb[242].mxu1 %v6147_v27  ;;  %8704 = vmatpush1.bf16.msra.mxu0 %v8703_v61  ;;  %v6195_v7 = vld [vmem:[#allocation2 + $0x3f] sm:$0xff]  ;;  %v7241_v61 = vld [vmem:[#allocation20 + $0xe8] sm:$0xff] }
 0x6d2   : > { %v12773_v49 = vmul.f32 %v6025_v33, %v5983_v0  ;;  %8705 = vmatprep.subr.bf16.mxu0 %v13185_v26  ;;  %v7231_v50 = vld [vmem:[#allocation20 + $0x98] sm:$0xff]  ;;  %v7237_v0 = vld [vmem:[#allocation20 + $0xc8] sm:$0xff] }
 0x6d3   : > { %v6189_v2 = vld [vmem:[#allocation2 + $0x146] sm:$0xff]  ;;  %v6198_v33 = vld [vmem:[#allocation2 + $0x57] sm:$0xff] }
 0x6d4   : > { %v6148_v43 = vld [vmem:[#allocation2 + $0x145] sm:$0xff]  ;;  %6107 = vst [vmem:[#allocation2 + $0x158] sm:$0xff] %v12773_v49  ;;  %6607 = vmatprep.mubr.f32.mxu1 %v6189_v2  ;;  %v8718_v2 = vpack.c.bf16 %v7237_v0, %v7236_v10  ;;  %v6225_v0 = vld [vmem:[#allocation2 + $0x12f] sm:$0xff] }
 0x6d5   : > { %6608 = vmatmul.mubr.f32.gmra.mrb[244].mxu1 %v6148_v43  ;;  %v7239_v43 = vld [vmem:[#allocation20 + $0xd8] sm:$0xff]  ;;  %v7252_v10 = vld [vmem:[#allocation20 + $0x140] sm:$0xff] }
 0x6d6   : > { %6677 = vmatprep.mubr.f32.mxu1 %v12607_v32  ;;  %v7229_v32 = vld [vmem:[#allocation20 + $0x88] sm:$0xff] }
 0x6d7   : > { %v8706_v60 = vpack.c.bf16 %v7229_v32, %v7228_v20  ;;  %v6205_v32 = vld [vmem:[#allocation2 + $0x8f] sm:$0xff] }
 0x6d9   : > { %6678 = vmatmul.mubr.f32.vlgmr.msra.gmra.mrb[164].mxu1 %v6190_v28  ;;  %8707 = vmatpush1.bf16.msra.mxu0 %v8706_v60  ;;  %v6201_v28 = vld [vmem:[#allocation2 + $0x6f] sm:$0xff]  ;;  %v6206_v60 = vld [vmem:[#allocation2 + $0x97] sm:$0xff] }
 0x6da   : > { %6682 = vmatprep.mubr.f32.mxu1 %v12611_v44  ;;  %8708 = vmatprep.subr.bf16.mxu0 %v13185_v26  ;;  %v6194_v44 = vld [vmem:[#allocation2 + $0x37] sm:$0xff] }
 0x6dd   : > { %6683 = vmatmul.mubr.f32.gmra.mrb[166].mxu1 %v6191_v54 }
 0x6de   : > { %6687 = vmatprep.mubr.f32.mxu1 %v6233_v23  ;;  %v7243_v23 = vld [vmem:[#allocation20 + $0xf8] sm:$0xff] }
 0x6e1   : > { %6688 = vmatmul.mubr.f32.gmra.mrb[168].mxu1 %v6192_v5  ;;  %v6202_v5 = vld [vmem:[#allocation2 + $0x77] sm:$0xff] }
 0x6e2   : > { %6692 = vmatprep.mubr.f32.mxu1 %v12617_v56  ;;  %v8709_v56 = vpack.c.bf16 %v7231_v50, %v7230_v12  ;;  %v7245_v12 = vld [vmem:[#allocation20 + $0x108] sm:$0xff]  ;;  %v6215_v50 = vld [vmem:[#allocation2 + $0xdf] sm:$0xff] }
 0x6e4   : > { %8710 = vmatpush1.bf16.msra.mxu0 %v8709_v56  ;;  %v7246_v56 = vld [vmem:[#allocation20 + $0x110] sm:$0xff] }
 0x6e5   : > { %6693 = vmatmul.mubr.f32.gmra.mrb[170].mxu1 %v6193_v19  ;;  %8711 = vmatprep.subr.bf16.mxu0 %v13185_v26  ;;  %v6208_v19 = vld [vmem:[#allocation2 + $0xa7] sm:$0xff] }
 0x6e6   : > { %6697 = vmatprep.mubr.f32.mxu1 %v12621_v45  ;;  %v6197_v45 = vld [vmem:[#allocation2 + $0x4f] sm:$0xff] }
 0x6e9   : > { %6698 = vmatmul.mubr.f32.gmra.mrb[172].mxu1 %v6194_v44  ;;  %v7089_v44 = vld [vmem:[#allocation3 + $0x6] sm:$0xff] }
 0x6ea   : > { %6702 = vmatprep.mubr.f32.mxu1 %v12626_v3  ;;  %v7233_v3 = vld [vmem:[#allocation20 + $0xa8] sm:$0xff]  ;;  %7347 = vmatprep.mubr.f32.mxu0 %v7089_v44 }
 0x6eb   : > { %v8712_v40 = vpack.c.bf16 %v7233_v3, %v7232_v18  ;;  %v7248_v3 = vld [vmem:[#allocation20 + $0x120] sm:$0xff] }
 0x6ed   : > { %6703 = vmatmul.mubr.f32.gmra.mrb[174].mxu1 %v6195_v7  ;;  %8713 = vmatpush1.bf16.msra.mxu0 %v8712_v40  ;;  %v7090_v7 = vld [vmem:[#allocation3 + $0xe] sm:$0xff]  ;;  %v6220_v40 = vld [vmem:[#allocation2 + $0x107] sm:$0xff] }
 0x6ee   : > { %6707 = vmatprep.mubr.f32.mxu1 %v12630_v36  ;;  %v7235_v36 = vld [vmem:[#allocation20 + $0xb8] sm:$0xff]  ;;  %8714 = vmatprep.subr.bf16.mxu0 %v13185_v26 }
 0x6ef   : > { %v8715_v27 = vpack.c.bf16 %v7235_v36, %v7234_v31  ;;  %v7250_v31 = vld [vmem:[#allocation20 + $0x130] sm:$0xff] }
 0x6f0   : > { %v6222_v36 = vld [vmem:[#allocation2 + $0x117] sm:$0xff] }
 0x6f1   : > { %6708 = vmatmul.mubr.f32.gmra.mrb[176].mxu1 %v6196_v63  ;;  %8716 = vmatpush1.bf16.msra.mxu0 %v8715_v27  ;;  %v7247_v63 = vld [vmem:[#allocation20 + $0x118] sm:$0xff] }
 0x6f2   : > { %6712 = vmatprep.mubr.f32.mxu1 %v12634_v51  ;;  %v6199_v51 = vld [vmem:[#allocation2 + $0x5f] sm:$0xff]  ;;  %8717 = vmatprep.subr.bf16.mxu0 %v13185_v26  ;;  %v8733_v18 = vpack.c.bf16 %v7247_v63, %v7246_v56 }
 0x6f5   : > { %6713 = vmatmul.mubr.f32.gmra.mrb[178].mxu1 %v6197_v45  ;;  %8719 = vmatpush1.bf16.msra.mxu0 %v8718_v2  ;;  %v6217_v45 = vld [vmem:[#allocation2 + $0xef] sm:$0xff]  ;;  %v6227_v2 = vld [vmem:[#allocation2 + $0x13f] sm:$0xff] }
 0x6f6   : > { %6717 = vmatprep.mubr.f32.mxu1 %v12639_v30  ;;  %v7238_v30 = vld [vmem:[#allocation20 + $0xd0] sm:$0xff]  ;;  %8720 = vmatprep.subr.bf16.mxu0 %v13185_v26 }
 0x6f7   : > { %v8721_v37 = vpack.c.bf16 %v7239_v43, %v7238_v30  ;;  %v6228_v30 = vld [vmem:[#allocation2 + $0x147] sm:$0xff] }
 0x6f9   : > { %6718 = vmatmul.mubr.f32.gmra.mrb[180].mxu1 %v6198_v33  ;;  %8722 = vmatpush1.bf16.msra.mxu0 %v8721_v37  ;;  %v6230_v37 = vld [vmem:[#allocation2 + $0x157] sm:$0xff] }
 0x6fa   : > { %6722 = vmatprep.mubr.f32.mxu1 %v12643_v9  ;;  %v7240_v9 = vld [vmem:[#allocation20 + $0xe0] sm:$0xff]  ;;  %8723 = vmatprep.subr.bf16.mxu0 %v13185_v26 }
 0x6fb   : > { %v8724_v54 = vpack.c.bf16 %v7241_v61, %v7240_v9  ;;  %v7259_v61 = vld [vmem:[#allocation20 + $0x178] sm:$0xff] }
 0x6fd   : > { %6723 = vmatmul.mubr.f32.gmra.mrb[182].mxu1 %v6199_v51  ;;  %8725 = vmatpush1.bf16.msra.mxu0 %v8724_v54  ;;  %v7261_v54 = vld [vmem:[#allocation20 + $0x188] sm:$0xff] }
 0x6fe   : > { %6727 = vmatprep.mubr.f32.mxu1 %v12647_v57  ;;  %v7242_v57 = vld [vmem:[#allocation20 + $0xf0] sm:$0xff]  ;;  %8726 = vmatprep.subr.bf16.mxu0 %v13185_v26 }
 0x6ff   : > { %v8727_v20 = vpack.c.bf16 %v7243_v23, %v7242_v57  ;;  %v7263_v23 = vld [vmem:[#allocation20 + $0x198] sm:$0xff] }
 0x701   : > { %6728 = vmatmul.mubr.f32.gmra.mrb[184].mxu1 %v6200_v35  ;;  %8728 = vmatpush1.bf16.msra.mxu0 %v8727_v20  ;;  %v7256_v35 = vld [vmem:[#allocation20 + $0x160] sm:$0xff] }
 0x702   : > { %6732 = vmatprep.mubr.f32.mxu1 %v12651_v41  ;;  %v6203_v41 = vld [vmem:[#allocation2 + $0x7f] sm:$0xff]  ;;  %8729 = vmatprep.subr.bf16.mxu0 %v13185_v26 }
 0x703   : > { %v7264_v20 = vld [vmem:[#allocation20 + $0x1a0] sm:$0xff] }
 0x705   : > { %6733 = vmatmul.mubr.f32.gmra.mrb[186].mxu1 %v6201_v28 }
 0x706   : > { %6737 = vmatprep.mubr.f32.mxu1 %v12655_v38  ;;  %v6204_v38 = vld [vmem:[#allocation2 + $0x87] sm:$0xff] }
 0x709   : > { %6738 = vmatmul.mubr.f32.gmra.mrb[188].mxu1 %v6202_v5 }
 0x70a   : > { %6742 = vmatprep.mubr.f32.mxu1 %v12659_v39  ;;  %v6207_v39 = vld [vmem:[#allocation2 + $0x9f] sm:$0xff] }
 0x70d   : > { %6743 = vmatmul.mubr.f32.gmra.mrb[190].mxu1 %v6203_v41  ;;  %v7265_v41 = vld [vmem:[#allocation20 + $0x1a8] sm:$0xff] }
 0x70e   : > { %6747 = vmatprep.mubr.f32.mxu1 %v12663_v21  ;;  %v6209_v21 = vld [vmem:[#allocation2 + $0xaf] sm:$0xff] }
 0x711   : > { %6748 = vmatmul.mubr.f32.gmra.mrb[192].mxu1 %v6204_v38  ;;  %v8760_v38 = vpack.c.bf16 %v7265_v41, %v7264_v20 }
 0x712   : > { %6752 = vmatprep.mubr.f32.mxu1 %v12667_v58  ;;  %v6210_v58 = vld [vmem:[#allocation2 + $0xb7] sm:$0xff] }
 0x715   : > { %6753 = vmatmul.mubr.f32.gmra.mrb[194].mxu1 %v6205_v32  ;;  %v12837_v32 = vld [vmem:[#allocation18] ss:$0 sm:$0xff] }
 0x716   : > { %6757 = vmatprep.mubr.f32.mxu1 %v12671_v24  ;;  %v6211_v24 = vld [vmem:[#allocation2 + $0xbf] sm:$0xff] }
 0x719   : > { %6758 = vmatmul.mubr.f32.gmra.mrb[196].mxu1 %v6206_v60  ;;  %v7266_v60 = vld [vmem:[#allocation20 + $0x1b0] sm:$0xff] }
 0x71a   : > { %6762 = vmatprep.mubr.f32.mxu1 %v12675_v42  ;;  %v6212_v42 = vld [vmem:[#allocation2 + $0xc7] sm:$0xff] }
 0x71d   : > { %6763 = vmatmul.mubr.f32.gmra.mrb[198].mxu1 %v6207_v39  ;;  %v7267_v39 = vld [vmem:[#allocation20 + $0x1b8] sm:$0xff] }
 0x71e   : > { %6767 = vmatprep.mubr.f32.mxu1 %v12679_v62  ;;  %v6213_v62 = vld [vmem:[#allocation2 + $0xcf] sm:$0xff] }
 0x721   : > { %6768 = vmatmul.mubr.f32.gmra.mrb[200].mxu1 %v6208_v19 }
 0x722   : > { %6772 = vmatprep.mubr.f32.mxu1 %v12683_v22  ;;  %v7048_v22 = vld [vmem:[#allocation3 + $0x5] sm:$0xff] }
 0x723   : > { %7348 = vmatmul.mubr.f32.vlgmr.msra.gmra.mrb[164].mxu0 %v7048_v22 }
 0x724   : > { %7352 = vmatprep.mubr.f32.mxu0 %v7090_v7 }
 0x725   : > { %6773 = vmatmul.mubr.f32.gmra.mrb[202].mxu1 %v6209_v21  ;;  %v8763_v21 = vpack.c.bf16 %v7267_v39, %v7266_v60  ;;  %v6932_v60 = vld [vmem:[#allocation23 + $0x930] sm:$0xff] }
 0x726   : > { %6777 = vmatprep.mubr.f32.mxu1 %v12687_v4  ;;  %v6214_v4 = vld [vmem:[#allocation2 + $0xd7] sm:$0xff] }
 0x729   : > { %6778 = vmatmul.mubr.f32.gmra.mrb[204].mxu1 %v6210_v58 }
 0x72a   : > { %6782 = vmatprep.mubr.f32.mxu1 %v12691_v59  ;;  %v7049_v59 = vld [vmem:[#allocation3 + $0xd] sm:$0xff] }
 0x72b   : > { %7353 = vmatmul.mubr.f32.gmra.mrb[166].mxu0 %v7049_v59  ;;  %v6926_v59 = vld [vmem:[#allocation23 + $0x900] sm:$0xff] }
 0x72d   : > { %6783 = vmatmul.mubr.f32.gmra.mrb[206].mxu1 %v6211_v24 }
 0x72e   : > { %6787 = vmatprep.mubr.f32.mxu1 %v12695_v16  ;;  %v7244_v16 = vld [vmem:[#allocation20 + $0x100] sm:$0xff] }
 0x731   : > { %6788 = vmatmul.mubr.f32.gmra.mrb[208].mxu1 %v6212_v42  ;;  %v6925_v42 = vld [vmem:[#allocation23 + $0x8f8] sm:$0xff] }
 0x732   : > { %6792 = vmatprep.mubr.f32.mxu1 %v12699_v6  ;;  %v8730_v6 = vpack.c.bf16 %v7245_v12, %v7244_v16  ;;  %v7268_v12 = vld [vmem:[#allocation20 + $0x1c0] sm:$0xff] }
 0x734   : > { %8731 = vmatpush1.bf16.msra.mxu0 %v8730_v6 }
 0x735   : > { %6793 = vmatmul.mubr.f32.gmra.mrb[210].mxu1 %v6213_v62  ;;  %8732 = vmatprep.subr.bf16.mxu0 %v13185_v26 }
 0x736   : > { %6797 = vmatprep.mubr.f32.mxu1 %v12703_v17  ;;  %v6216_v17 = vld [vmem:[#allocation2 + $0xe7] sm:$0xff] }
 0x738   : > { %8734 = vmatpush1.bf16.msra.mxu0 %v8733_v18  ;;  %v6927_v18 = vld [vmem:[#allocation23 + $0x908] sm:$0xff] }
 0x739   : > { %6798 = vmatmul.mubr.f32.gmra.mrb[212].mxu1 %v6214_v4  ;;  %8735 = vmatprep.subr.bf16.mxu0 %v13185_v26 }
 0x73a   : > { %6802 = vmatprep.mubr.f32.mxu1 %v12708_v48  ;;  %v6218_v48 = vld [vmem:[#allocation2 + $0xf7] sm:$0xff] }
 0x73d   : > { %6803 = vmatmul.mubr.f32.gmra.mrb[214].mxu1 %v6215_v50  ;;  %v7269_v50 = vld [vmem:[#allocation20 + $0x1c8] sm:$0xff] }
 0x73e   : > { %6807 = vmatprep.mubr.f32.mxu1 %v12712_v1  ;;  %v6219_v1 = vld [vmem:[#allocation2 + $0xff] sm:$0xff] }
 0x741   : > { %6808 = vmatmul.mubr.f32.gmra.mrb[216].mxu1 %v6216_v17  ;;  %v8766_v17 = vpack.c.bf16 %v7269_v50, %v7268_v12 }
 0x742   : > { %6812 = vmatprep.mubr.f32.mxu1 %v12716_v34  ;;  %v7249_v34 = vld [vmem:[#allocation20 + $0x128] sm:$0xff] }
 0x743   : > { %v8736_v33 = vpack.c.bf16 %v7249_v34, %v7248_v3 }
 0x745   : > { %6813 = vmatmul.mubr.f32.gmra.mrb[218].mxu1 %v6217_v45  ;;  %8737 = vmatpush1.bf16.msra.mxu0 %v8736_v33  ;;  %v6928_v33 = vld [vmem:[#allocation23 + $0x910] sm:$0xff] }
 0x746   : > { %6817 = vmatprep.mubr.f32.mxu1 %v12721_v11  ;;  %8738 = vmatprep.subr.bf16.mxu0 %v13185_v26  ;;  %v6221_v11 = vld [vmem:[#allocation2 + $0x10f] sm:$0xff] }
 0x749   : > { %6818 = vmatmul.mubr.f32.gmra.mrb[220].mxu1 %v6218_v48 }
 0x74a   : > { %6822 = vmatprep.mubr.f32.mxu1 %v12725_v8  ;;  %v7251_v8 = vld [vmem:[#allocation20 + $0x138] sm:$0xff] }
 0x74b   : > { %v8739_v27 = vpack.c.bf16 %v7251_v8, %v7250_v31 }
 0x74d   : > { %6823 = vmatmul.mubr.f32.gmra.mrb[222].mxu1 %v6219_v1  ;;  %8740 = vmatpush1.bf16.msra.mxu0 %v8739_v27 }
 0x74e   : > { %6827 = vmatprep.mubr.f32.mxu1 %v12730_v13  ;;  %8741 = vmatprep.subr.bf16.mxu0 %v13185_v26  ;;  %v6223_v13 = vld [vmem:[#allocation2 + $0x11f] sm:$0xff] }
 0x751   : > { %6828 = vmatmul.mubr.f32.gmra.mrb[224].mxu1 %v6220_v40 }
 0x752   : > { %6832 = vmatprep.mubr.f32.mxu1 %v12734_v47  ;;  %v6224_v47 = vld [vmem:[#allocation2 + $0x127] sm:$0xff] }
 0x755   : > { %6833 = vmatmul.mubr.f32.gmra.mrb[226].mxu1 %v6221_v11 }
 0x756   : > { %6837 = vmatprep.mubr.f32.mxu1 %v12738_v53  ;;  %v7253_v53 = vld [vmem:[#allocation20 + $0x148] sm:$0xff] }
 0x757   : > { %v8742_v51 = vpack.c.bf16 %v7253_v53, %v7252_v10  ;;  %v6929_v10 = vld [vmem:[#allocation23 + $0x918] sm:$0xff] }
 0x759   : > { %6838 = vmatmul.mubr.f32.gmra.mrb[228].mxu1 %v6222_v36  ;;  %8743 = vmatpush1.bf16.msra.mxu0 %v8742_v51 }
 0x75a   : > { %6842 = vmatprep.mubr.f32.mxu1 %v12743_v46  ;;  %8744 = vmatprep.subr.bf16.mxu0 %v13185_v26  ;;  %v6226_v46 = vld [vmem:[#allocation2 + $0x137] sm:$0xff] }
 0x75d   : > { %6843 = vmatmul.mubr.f32.gmra.mrb[230].mxu1 %v6223_v13 }
 0x75e   : > { %6847 = vmatprep.mubr.f32.mxu1 %v12747_v29  ;;  %v7254_v29 = vld [vmem:[#allocation20 + $0x150] sm:$0xff] }
 0x761   : > { %6848 = vmatmul.mubr.f32.gmra.mrb[232].mxu1 %v6224_v47 }
 0x762   : > { %6852 = vmatprep.mubr.f32.mxu1 %v12752_v25  ;;  %v7255_v25 = vld [vmem:[#allocation20 + $0x158] sm:$0xff] }
 0x763   : > { %v8745_v43 = vpack.c.bf16 %v7255_v25, %v7254_v29 }
 0x765   : > { %6853 = vmatmul.mubr.f32.gmra.mrb[234].mxu1 %v6225_v0  ;;  %8746 = vmatpush1.bf16.msra.mxu0 %v8745_v43 }
 0x766   : > { %6857 = vmatprep.mubr.f32.mxu1 %v12756_v52  ;;  %8747 = vmatprep.subr.bf16.mxu0 %v13185_v26  ;;  %v6229_v52 = vld [vmem:[#allocation2 + $0x14f] sm:$0xff] }
 0x769   : > { %6858 = vmatmul.mubr.f32.gmra.mrb[236].mxu1 %v6226_v46  ;;  %v7270_v46 = vld [vmem:[#allocation20 + $0x1d0] sm:$0xff] }
 0x76a   : > { %6862 = vmatprep.mubr.f32.mxu1 %v12760_v15  ;;  %v7257_v15 = vld [vmem:[#allocation20 + $0x168] sm:$0xff] }
 0x76b   : > { %v8748_v9 = vpack.c.bf16 %v7257_v15, %v7256_v35  ;;  %v6930_v35 = vld [vmem:[#allocation23 + $0x920] sm:$0xff] }
 0x76d   : > { %6863 = vmatmul.mubr.f32.gmra.mrb[238].mxu1 %v6227_v2  ;;  %8749 = vmatpush1.bf16.msra.mxu0 %v8748_v9  ;;  %v7271_v2 = vld [vmem:[#allocation20 + $0x1d8] sm:$0xff] }
 0x76e   : > { %6867 = vmatprep.mubr.f32.mxu1 %v12765_v55  ;;  %8750 = vmatprep.subr.bf16.mxu0 %v13185_v26  ;;  %v7258_v55 = vld [vmem:[#allocation20 + $0x170] sm:$0xff]  ;;  %v8769_v25 = vpack.c.bf16 %v7271_v2, %v7270_v46 }
 0x76f   : > { %v8751_v28 = vpack.c.bf16 %v7259_v61, %v7258_v55 }
 0x771   : > { %6868 = vmatmul.mubr.f32.gmra.mrb[240].mxu1 %v6228_v30  ;;  %8752 = vmatpush1.bf16.msra.mxu0 %v8751_v28 }
 0x772   : > { %6872 = vmatprep.mubr.f32.mxu1 %v12769_v14  ;;  %8753 = vmatprep.subr.bf16.mxu0 %v13185_v26  ;;  %v7260_v14 = vld [vmem:[#allocation20 + $0x180] sm:$0xff] }
 0x773   : > { %v8754_v57 = vpack.c.bf16 %v7261_v54, %v7260_v14  ;;  %v6931_v54 = vld [vmem:[#allocation23 + $0x928] sm:$0xff] }
 0x775   : > { %6873 = vmatmul.mubr.f32.gmra.mrb[242].mxu1 %v6229_v52  ;;  %8755 = vmatpush1.bf16.msra.mxu0 %v8754_v57 }
 0x776   : > { %6877 = vmatprep.mubr.f32.mxu1 %v12773_v49  ;;  %8756 = vmatprep.subr.bf16.mxu0 %v13185_v26  ;;  %v7262_v49 = vld [vmem:[#allocation20 + $0x190] sm:$0xff] }
 0x777   : > { %v8757_v5 = vpack.c.bf16 %v7263_v23, %v7262_v49 }
 0x779   : > { %6878 = vmatmul.mubr.f32.gmra.mrb[244].mxu1 %v6230_v37  ;;  %8758 = vmatpush1.bf16.msra.mxu0 %v8757_v5 }
 0x77a   : > { %8759 = vmatprep.subr.bf16.mxu0 %v13185_v26 }
 0x77d   : > { %8761 = vmatpush1.bf16.msra.mxu0 %v8760_v38 }
 0x77e   : > { %8762 = vmatprep.subr.bf16.mxu0 %v13185_v26 }
 0x781   : > { %8764 = vmatpush1.bf16.msra.mxu0 %v8763_v21 }
 0x782   : > { %8765 = vmatprep.subr.bf16.mxu0 %v13185_v26 }
 0x785   : > { %8767 = vmatpush1.bf16.msra.mxu0 %v8766_v17 }
 0x786   : > { %8768 = vmatprep.subr.bf16.mxu0 %v13185_v26 }
 0x789   : > { %8770 = vmatpush1.bf16.msra.mxu0 %v8769_v25 }
 0x78a   : > { %8771 = vmatprep.subr.bf16.mxu0 %v13185_v26 }
 0x7ac   : > { %v6679_v19 = vpop.f32.mrb[164].mxu1 }
 0x7ad   : > { %v8941_v58 = vadd.f32 %v12837_v32, %v6679_v19  ;;  %v6681_v24 = vpop.f32.mrb[165].mxu1 }
 0x7ae   : > { %v7273_v24 = vld [vmem:[#allocation20 + $0x1e8] sm:$0xff] }
 0x7af   : > { %v6883_v62 = vmax.f32 %v8941_v58, 0.0  ;;  %v7272_v58 = vld [vmem:[#allocation20 + $0x1e0] sm:$0xff] }
 0x7b0   : > { %v6684_v44 = vpop.f32.mrb[166].mxu1 }
 0x7b1   : > { %v6966_v22 = vmul.f32 %v6925_v42, %v6883_v62  ;;  %v8942_v4 = vadd.f32 %v12837_v32, %v6684_v44  ;;  %v6686_v7 = vpop.f32.mrb[167].mxu1  ;;  %v8772_v62 = vpack.c.bf16 %v7273_v24, %v7272_v58 }
 0x7b2   : > { %v6933_v7 = vld [vmem:[#allocation23 + $0x938] sm:$0xff] }
 0x7b3   : > { %7007 = vst [vmem:[#allocation3 + $0x18] sm:$0xff] %v6966_v22  ;;  %v6884_v16 = vmax.f32 %v8942_v4, 0.0  ;;  %8773 = vmatpush1.bf16.msra.mxu0 %v8772_v62 }
 0x7b4   : > { %v6689_v6 = vpop.f32.mrb[168].mxu1  ;;  %8774 = vmatprep.subr.bf16.mxu0 %v13185_v26 }
 0x7b5   : > { %v6967_v56 = vmul.f32 %v6926_v59, %v6884_v16  ;;  %v8943_v63 = vadd.f32 %v12837_v32, %v6689_v6  ;;  %v6691_v45 = vpop.f32.mrb[169].mxu1 }
 0x7b7   : > { %7008 = vst [vmem:[#allocation3 + $0x20] sm:$0xff] %v6967_v56  ;;  %v6885_v48 = vmax.f32 %v8943_v63, 0.0  ;;  %v6934_v63 = vld [vmem:[#allocation23 + $0x940] sm:$0xff] }
 0x7b8   : > { %v6694_v1 = vpop.f32.mrb[170].mxu1 }
 0x7b9   : > { %v6968_v3 = vmul.f32 %v6927_v18, %v6885_v48  ;;  %v8944_v34 = vadd.f32 %v12837_v32, %v6694_v1  ;;  %v6696_v40 = vpop.f32.mrb[171].mxu1  ;;  %v7274_v1 = vld [vmem:[#allocation20 + $0x1f0] sm:$0xff] }
 0x7ba   : > { %v7091_v11 = vld [vmem:[#allocation3 + $0x16] sm:$0xff] }
 0x7bb   : > { %v7050_v31 = vld [vmem:[#allocation3 + $0x15] sm:$0xff]  ;;  %7009 = vst [vmem:[#allocation3 + $0x28] sm:$0xff] %v6968_v3  ;;  %v6886_v8 = vmax.f32 %v8944_v34, 0.0  ;;  %7357 = vmatprep.mubr.f32.mxu0 %v7091_v11 }
 0x7bc   : > { %v6699_v36 = vpop.f32.mrb[172].mxu1  ;;  %7358 = vmatmul.mubr.f32.gmra.mrb[168].mxu0 %v7050_v31  ;;  %v7275_v3 = vld [vmem:[#allocation20 + $0x1f8] sm:$0xff]  ;;  %v6935_v31 = vld [vmem:[#allocation23 + $0x948] sm:$0xff] }
 0x7bd   : > { %v12845_v27 = vmul.f32 %v6928_v33, %v6886_v8  ;;  %v8945_v13 = vadd.f32 %v12837_v32, %v6699_v36  ;;  %v6701_v47 = vpop.f32.mrb[173].mxu1  ;;  %v8775_v40 = vpack.c.bf16 %v7275_v3, %v7274_v1 }
 0x7be   : > { %v7092_v53 = vld [vmem:[#allocation3 + $0x1e] sm:$0xff] }
 0x7bf   : > { %v7051_v0 = vld [vmem:[#allocation3 + $0x1d] sm:$0xff]  ;;  %7010 = vst [vmem:[#allocation3 + $0x30] sm:$0xff] %v12845_v27  ;;  %v6887_v51 = vmax.f32 %v8945_v13, 0.0  ;;  %7362 = vmatprep.mubr.f32.mxu0 %v7092_v53  ;;  %8776 = vmatpush1.bf16.msra.mxu0 %v8775_v40 }
 0x7c0   : > { %v6704_v29 = vpop.f32.mrb[174].mxu1  ;;  %7363 = vmatmul.mubr.f32.gmra.mrb[170].mxu0 %v7051_v0 }
 0x7c1   : > { %v12849_v30 = vmul.f32 %v6929_v10, %v6887_v51  ;;  %v8946_v43 = vadd.f32 %v12837_v32, %v6704_v29  ;;  %v6706_v52 = vpop.f32.mrb[175].mxu1  ;;  %v6936_v51 = vld [vmem:[#allocation23 + $0x950] sm:$0xff] }
 0x7c2   : > { %v7093_v15 = vld [vmem:[#allocation3 + $0x26] sm:$0xff] }
 0x7c3   : > { %v7052_v37 = vld [vmem:[#allocation3 + $0x25] sm:$0xff]  ;;  %7011 = vst [vmem:[#allocation3 + $0x38] sm:$0xff] %v12849_v30  ;;  %v6888_v9 = vmax.f32 %v8946_v43, 0.0  ;;  %7367 = vmatprep.mubr.f32.mxu0 %v7093_v15  ;;  %v6937_v15 = vld [vmem:[#allocation23 + $0x958] sm:$0xff] }
 0x7c4   : > { %v6709_v55 = vpop.f32.mrb[176].mxu1  ;;  %7368 = vmatmul.mubr.f32.gmra.mrb[172].mxu0 %v7052_v37 }
 0x7c5   : > { %v12854_v61 = vmul.f32 %v6930_v35, %v6888_v9  ;;  %v8947_v28 = vadd.f32 %v12837_v32, %v6709_v55  ;;  %v6711_v14 = vpop.f32.mrb[177].mxu1 }
 0x7c6   : > { %v7094_v57 = vld [vmem:[#allocation3 + $0x2e] sm:$0xff] }
 0x7c7   : > { %v7053_v49 = vld [vmem:[#allocation3 + $0x2d] sm:$0xff]  ;;  %7012 = vst [vmem:[#allocation3 + $0x40] sm:$0xff] %v12854_v61  ;;  %v6889_v23 = vmax.f32 %v8947_v28, 0.0  ;;  %7372 = vmatprep.mubr.f32.mxu0 %v7094_v57 }
 0x7c8   : > { %v6714_v5 = vpop.f32.mrb[178].mxu1  ;;  %7373 = vmatmul.mubr.f32.gmra.mrb[174].mxu0 %v7053_v49  ;;  %v6938_v49 = vld [vmem:[#allocation23 + $0x960] sm:$0xff] }
 0x7c9   : > { %v12858_v20 = vmul.f32 %v6931_v54, %v6889_v23  ;;  %v8948_v41 = vadd.f32 %v12837_v32, %v6714_v5  ;;  %v6716_v38 = vpop.f32.mrb[179].mxu1 }
 0x7ca   : > { %v7095_v39 = vld [vmem:[#allocation3 + $0x36] sm:$0xff] }
 0x7cb   : > { %v7054_v19 = vld [vmem:[#allocation3 + $0x35] sm:$0xff]  ;;  %7013 = vst [vmem:[#allocation3 + $0x48] sm:$0xff] %v12858_v20  ;;  %v6890_v21 = vmax.f32 %v8948_v41, 0.0  ;;  %7377 = vmatprep.mubr.f32.mxu0 %v7095_v39 }
 0x7cc   : > { %v6719_v42 = vpop.f32.mrb[180].mxu1  ;;  %7378 = vmatmul.mubr.f32.gmra.mrb[176].mxu0 %v7054_v19 }
 0x7cd   : > { %v12862_v44 = vmul.f32 %v6932_v60, %v6890_v21  ;;  %v8949_v22 = vadd.f32 %v12837_v32, %v6719_v42  ;;  %v6721_v4 = vpop.f32.mrb[181].mxu1  ;;  %v6939_v21 = vld [vmem:[#allocation23 + $0x968] sm:$0xff] }
 0x7ce   : > { %v7096_v59 = vld [vmem:[#allocation3 + $0x3e] sm:$0xff] }
 0x7cf   : > { %v7055_v16 = vld [vmem:[#allocation3 + $0x3d] sm:$0xff]  ;;  %7014 = vst [vmem:[#allocation3 + $0x50] sm:$0xff] %v12862_v44  ;;  %v6891_v12 = vmax.f32 %v8949_v22, 0.0  ;;  %7382 = vmatprep.mubr.f32.mxu0 %v7096_v59  ;;  %v6940_v59 = vld [vmem:[#allocation23 + $0x970] sm:$0xff] }
 0x7d0   : > { %v6724_v50 = vpop.f32.mrb[182].mxu1  ;;  %7383 = vmatmul.mubr.f32.gmra.mrb[178].mxu0 %v7055_v16 }
 0x7d1   : > { %v12867_v6 = vmul.f32 %v6933_v7, %v6891_v12  ;;  %v8950_v17 = vadd.f32 %v12837_v32, %v6724_v50  ;;  %v6726_v56 = vpop.f32.mrb[183].mxu1 }
 0x7d2   : > { %v7097_v45 = vld [vmem:[#allocation3 + $0x46] sm:$0xff] }
 0x7d3   : > { %v7056_v18 = vld [vmem:[#allocation3 + $0x45] sm:$0xff]  ;;  %7015 = vst [vmem:[#allocation3 + $0x58] sm:$0xff] %v12867_v6  ;;  %v6892_v48 = vmax.f32 %v8950_v17, 0.0  ;;  %7387 = vmatprep.mubr.f32.mxu0 %v7097_v45 }
 0x7d4   : > { %v6729_v34 = vpop.f32.mrb[184].mxu1  ;;  %7388 = vmatmul.mubr.f32.gmra.mrb[180].mxu0 %v7056_v18  ;;  %v6941_v18 = vld [vmem:[#allocation23 + $0x978] sm:$0xff] }
 0x7d5   : > { %v12871_v26 = vmul.f32 %v6934_v63, %v6892_v48  ;;  %v8951_v33 = vadd.f32 %v12837_v32, %v6729_v34  ;;  %v6731_v11 = vpop.f32.mrb[185].mxu1 }
 0x7d6   : > { %v7098_v8 = vld [vmem:[#allocation3 + $0x4e] sm:$0xff] }
 0x7d7   : > { %v7057_v36 = vld [vmem:[#allocation3 + $0x4d] sm:$0xff]  ;;  %7016 = vst [vmem:[#allocation3 + $0x60] sm:$0xff] %v12871_v26  ;;  %v6893_v13 = vmax.f32 %v8951_v33, 0.0  ;;  %7392 = vmatprep.mubr.f32.mxu0 %v7098_v8 }
 0x7d8   : > { %v6734_v47 = vpop.f32.mrb[186].mxu1  ;;  %7393 = vmatmul.mubr.f32.gmra.mrb[182].mxu0 %v7057_v36 }
 0x7d9   : > { %v12875_v10 = vmul.f32 %v6935_v31, %v6893_v13  ;;  %v8952_v53 = vadd.f32 %v12837_v32, %v6734_v47  ;;  %v6736_v0 = vpop.f32.mrb[187].mxu1  ;;  %v6942_v31 = vld [vmem:[#allocation23 + $0x980] sm:$0xff] }
 0x7da   : > { %v7099_v46 = vld [vmem:[#allocation3 + $0x56] sm:$0xff] }
 0x7db   : > { %v7058_v2 = vld [vmem:[#allocation3 + $0x55] sm:$0xff]  ;;  %7017 = vst [vmem:[#allocation3 + $0x68] sm:$0xff] %v12875_v10  ;;  %v6894_v29 = vmax.f32 %v8952_v53, 0.0  ;;  %7397 = vmatprep.mubr.f32.mxu0 %v7099_v46  ;;  %v6943_v46 = vld [vmem:[#allocation23 + $0x988] sm:$0xff] }
 0x7dc   : > { %v6739_v25 = vpop.f32.mrb[188].mxu1  ;;  %7398 = vmatmul.mubr.f32.gmra.mrb[184].mxu0 %v7058_v2 }
 0x7dd   : > { %v12879_v43 = vmul.f32 %v6936_v51, %v6894_v29  ;;  %v8953_v52 = vadd.f32 %v12837_v32, %v6739_v25  ;;  %v6741_v35 = vpop.f32.mrb[189].mxu1 }
 0x7de   : > { %v7100_v37 = vld [vmem:[#allocation3 + $0x5e] sm:$0xff] }
 0x7df   : > { %v7059_v9 = vld [vmem:[#allocation3 + $0x5d] sm:$0xff]  ;;  %7018 = vst [vmem:[#allocation3 + $0x70] sm:$0xff] %v12879_v43  ;;  %v6895_v55 = vmax.f32 %v8953_v52, 0.0  ;;  %7402 = vmatprep.mubr.f32.mxu0 %v7100_v37 }
 0x7e0   : > { %v6744_v28 = vpop.f32.mrb[190].mxu1  ;;  %7403 = vmatmul.mubr.f32.gmra.mrb[186].mxu0 %v7059_v9  ;;  %v6944_v9 = vld [vmem:[#allocation23 + $0x990] sm:$0xff] }
 0x7e1   : > { %v12883_v14 = vmul.f32 %v6937_v15, %v6895_v55  ;;  %v8954_v54 = vadd.f32 %v12837_v32, %v6744_v28  ;;  %v6746_v57 = vpop.f32.mrb[191].mxu1 }
 0x7e2   : > { %v7101_v23 = vld [vmem:[#allocation3 + $0x66] sm:$0xff] }
 0x7e3   : > { %v7060_v5 = vld [vmem:[#allocation3 + $0x65] sm:$0xff]  ;;  %7019 = vst [vmem:[#allocation3 + $0x78] sm:$0xff] %v12883_v14  ;;  %v6896_v41 = vmax.f32 %v8954_v54, 0.0  ;;  %7407 = vmatprep.mubr.f32.mxu0 %v7101_v23 }
 0x7e4   : > { %v6749_v38 = vpop.f32.mrb[192].mxu1  ;;  %7408 = vmatmul.mubr.f32.gmra.mrb[188].mxu0 %v7060_v5 }
 0x7e5   : > { %v12887_v60 = vmul.f32 %v6938_v49, %v6896_v41  ;;  %v8955_v39 = vadd.f32 %v12837_v32, %v6749_v38  ;;  %v6751_v19 = vpop.f32.mrb[193].mxu1  ;;  %v6945_v41 = vld [vmem:[#allocation23 + $0x998] sm:$0xff] }
 0x7e6   : > { %v7102_v58 = vld [vmem:[#allocation3 + $0x6e] sm:$0xff] }
 0x7e7   : > { %v7061_v24 = vld [vmem:[#allocation3 + $0x6d] sm:$0xff]  ;;  %7020 = vst [vmem:[#allocation3 + $0x80] sm:$0xff] %v12887_v60  ;;  %v6897_v42 = vmax.f32 %v8955_v39, 0.0  ;;  %7412 = vmatprep.mubr.f32.mxu0 %v7102_v58 }
 0x7e8   : > { %v6754_v62 = vpop.f32.mrb[194].mxu1  ;;  %7413 = vmatmul.mubr.f32.gmra.mrb[190].mxu0 %v7061_v24 }
 0x7e9   : > { %v12891_v22 = vmul.f32 %v6939_v21, %v6897_v42  ;;  %v8956_v4 = vadd.f32 %v12837_v32, %v6754_v62  ;;  %v6756_v7 = vpop.f32.mrb[195].mxu1  ;;  %v6946_v62 = vld [vmem:[#allocation23 + $0x9a0] sm:$0xff] }
 0x7ea   : > { %v7103_v16 = vld [vmem:[#allocation3 + $0x76] sm:$0xff] }
 0x7eb   : > { %v7062_v12 = vld [vmem:[#allocation3 + $0x75] sm:$0xff]  ;;  %7021 = vst [vmem:[#allocation3 + $0x88] sm:$0xff] %v12891_v22  ;;  %v6898_v50 = vmax.f32 %v8956_v4, 0.0  ;;  %7417 = vmatprep.mubr.f32.mxu0 %v7103_v16 }
 0x7ec   : > { %v6759_v17 = vpop.f32.mrb[196].mxu1  ;;  %7418 = vmatmul.mubr.f32.gmra.mrb[192].mxu0 %v7062_v12 }
 0x7ed   : > { %v12895_v56 = vmul.f32 %v6940_v59, %v6898_v50  ;;  %v8957_v63 = vadd.f32 %v12837_v32, %v6759_v17  ;;  %v6761_v45 = vpop.f32.mrb[197].mxu1 }
 0x7ee   : > { %v7104_v48 = vld [vmem:[#allocation3 + $0x7e] sm:$0xff] }
 0x7ef   : > { %v7063_v1 = vld [vmem:[#allocation3 + $0x7d] sm:$0xff]  ;;  %7022 = vst [vmem:[#allocation3 + $0x90] sm:$0xff] %v12895_v56  ;;  %v6899_v3 = vmax.f32 %v8957_v63, 0.0  ;;  %7422 = vmatprep.mubr.f32.mxu0 %v7104_v48  ;;  %v6947_v63 = vld [vmem:[#allocation23 + $0x9a8] sm:$0xff] }
 0x7f0   : > { %v6764_v34 = vpop.f32.mrb[198].mxu1  ;;  %7423 = vmatmul.mubr.f32.gmra.mrb[194].mxu0 %v7063_v1 }
 0x7f1   : > { %v12899_v40 = vmul.f32 %v6941_v18, %v6899_v3  ;;  %v8958_v33 = vadd.f32 %v12837_v32, %v6764_v34  ;;  %v6766_v11 = vpop.f32.mrb[199].mxu1 }
 0x7f2   : > { %v7105_v8 = vld [vmem:[#allocation3 + $0x86] sm:$0xff]  ;;  %v6948_v11 = vld [vmem:[#allocation23 + $0x9b0] sm:$0xff] }
 0x7f3   : > { %v7064_v36 = vld [vmem:[#allocation3 + $0x85] sm:$0xff]  ;;  %7023 = vst [vmem:[#allocation3 + $0x98] sm:$0xff] %v12899_v40  ;;  %v6900_v13 = vmax.f32 %v8958_v33, 0.0  ;;  %7427 = vmatprep.mubr.f32.mxu0 %v7105_v8 }
 0x7f4   : > { %v6769_v47 = vpop.f32.mrb[200].mxu1  ;;  %7428 = vmatmul.mubr.f32.gmra.mrb[196].mxu0 %v7064_v36 }
 0x7f5   : > { %v12903_v53 = vmul.f32 %v6942_v31, %v6900_v13  ;;  %v8959_v0 = vadd.f32 %v12837_v32, %v6769_v47  ;;  %v6771_v51 = vpop.f32.mrb[201].mxu1 }
 0x7f6   : > { %v7106_v2 = vld [vmem:[#allocation3 + $0x8e] sm:$0xff] }
 0x7f7   : > { %v7065_v29 = vld [vmem:[#allocation3 + $0x8d] sm:$0xff]  ;;  %7024 = vst [vmem:[#allocation3 + $0xa0] sm:$0xff] %v12903_v53  ;;  %v6901_v25 = vmax.f32 %v8959_v0, 0.0  ;;  %7432 = vmatprep.mubr.f32.mxu0 %v7106_v2 }
 0x7f8   : > { %v6774_v52 = vpop.f32.mrb[202].mxu1  ;;  %7433 = vmatmul.mubr.f32.gmra.mrb[198].mxu0 %v7065_v29 }
 0x7f9   : > { %v12907_v35 = vmul.f32 %v6943_v46, %v6901_v25  ;;  %v8960_v15 = vadd.f32 %v12837_v32, %v6774_v52  ;;  %v6776_v37 = vpop.f32.mrb[203].mxu1  ;;  %v6949_v46 = vld [vmem:[#allocation23 + $0x9b8] sm:$0xff] }
 0x7fa   : > { %v7107_v55 = vld [vmem:[#allocation3 + $0x96] sm:$0xff] }
 0x7fb   : > { %v7066_v28 = vld [vmem:[#allocation3 + $0x95] sm:$0xff]  ;;  %7025 = vst [vmem:[#allocation3 + $0xa8] sm:$0xff] %v12907_v35  ;;  %v6902_v54 = vmax.f32 %v8960_v15, 0.0  ;;  %7437 = vmatprep.mubr.f32.mxu0 %v7107_v55  ;;  %v6950_v55 = vld [vmem:[#allocation23 + $0x9c0] sm:$0xff] }
 0x7fc   : > { %v6779_v57 = vpop.f32.mrb[204].mxu1  ;;  %7438 = vmatmul.mubr.f32.gmra.mrb[200].mxu0 %v7066_v28 }
 0x7fd   : > { %v12911_v49 = vmul.f32 %v6944_v9, %v6902_v54  ;;  %v8961_v23 = vadd.f32 %v12837_v32, %v6779_v57  ;;  %v6781_v5 = vpop.f32.mrb[205].mxu1 }
 0x7fe   : > { %v7108_v38 = vld [vmem:[#allocation3 + $0x9e] sm:$0xff] }
 0x7ff   : > { %v7067_v39 = vld [vmem:[#allocation3 + $0x9d] sm:$0xff]  ;;  %7026 = vst [vmem:[#allocation3 + $0xb0] sm:$0xff] %v12911_v49  ;;  %v6903_v19 = vmax.f32 %v8961_v23, 0.0  ;;  %7442 = vmatprep.mubr.f32.mxu0 %v7108_v38 }
 0x800   : > { %v6784_v21 = vpop.f32.mrb[206].mxu1  ;;  %7443 = vmatmul.mubr.f32.gmra.mrb[202].mxu0 %v7067_v39  ;;  %v6951_v39 = vld [vmem:[#allocation23 + $0x9c8] sm:$0xff] }
 0x801   : > { %v12915_v58 = vmul.f32 %v6945_v41, %v6903_v19  ;;  %v8962_v24 = vadd.f32 %v12837_v32, %v6784_v21  ;;  %v6786_v42 = vpop.f32.mrb[207].mxu1 }
 0x802   : > { %v7109_v4 = vld [vmem:[#allocation3 + $0xa6] sm:$0xff] }
 0x803   : > { %v7068_v7 = vld [vmem:[#allocation3 + $0xa5] sm:$0xff]  ;;  %7027 = vst [vmem:[#allocation3 + $0xb8] sm:$0xff] %v12915_v58  ;;  %v6904_v59 = vmax.f32 %v8962_v24, 0.0  ;;  %7447 = vmatprep.mubr.f32.mxu0 %v7109_v4 }
 0x804   : > { %v6789_v16 = vpop.f32.mrb[208].mxu1  ;;  %7448 = vmatmul.mubr.f32.gmra.mrb[204].mxu0 %v7068_v7 }
 0x805   : > { %v12919_v12 = vmul.f32 %v6946_v62, %v6904_v59  ;;  %v8963_v50 = vadd.f32 %v12837_v32, %v6789_v16  ;;  %v6791_v17 = vpop.f32.mrb[209].mxu1  ;;  %v6952_v59 = vld [vmem:[#allocation23 + $0x9d0] sm:$0xff] }
 0x806   : > { %v7110_v45 = vld [vmem:[#allocation3 + $0xae] sm:$0xff] }
 0x807   : > { %v7069_v18 = vld [vmem:[#allocation3 + $0xad] sm:$0xff]  ;;  %7028 = vst [vmem:[#allocation3 + $0xc0] sm:$0xff] %v12919_v12  ;;  %v6905_v48 = vmax.f32 %v8963_v50, 0.0  ;;  %7452 = vmatprep.mubr.f32.mxu0 %v7110_v45 }
 0x808   : > { %v6794_v1 = vpop.f32.mrb[210].mxu1  ;;  %7453 = vmatmul.mubr.f32.gmra.mrb[206].mxu0 %v7069_v18 }
 0x809   : > { %v12923_v3 = vmul.f32 %v6947_v63, %v6905_v48  ;;  %v8964_v34 = vadd.f32 %v12837_v32, %v6794_v1  ;;  %v6796_v33 = vpop.f32.mrb[211].mxu1  ;;  %v6953_v1 = vld [vmem:[#allocation23 + $0x9d8] sm:$0xff] }
 0x80a   : > { %v7111_v31 = vld [vmem:[#allocation3 + $0xb6] sm:$0xff] }
 0x80b   : > { %v7070_v8 = vld [vmem:[#allocation3 + $0xb5] sm:$0xff]  ;;  %7029 = vst [vmem:[#allocation3 + $0xc8] sm:$0xff] %v12923_v3  ;;  %v6906_v36 = vmax.f32 %v8964_v34, 0.0  ;;  %7457 = vmatprep.mubr.f32.mxu0 %v7111_v31 }
 0x80c   : > { %v6799_v13 = vpop.f32.mrb[212].mxu1  ;;  %7458 = vmatmul.mubr.f32.gmra.mrb[208].mxu0 %v7070_v8 }
 0x80d   : > { %v12927_v47 = vmul.f32 %v6948_v11, %v6906_v36  ;;  %v8965_v0 = vadd.f32 %v12837_v32, %v6799_v13  ;;  %v6801_v51 = vpop.f32.mrb[213].mxu1 }
 0x80e   : > { %v7112_v2 = vld [vmem:[#allocation3 + $0xbe] sm:$0xff] }
 0x80f   : > { %v7071_v29 = vld [vmem:[#allocation3 + $0xbd] sm:$0xff]  ;;  %7030 = vst [vmem:[#allocation3 + $0xd0] sm:$0xff] %v12927_v47  ;;  %v6907_v25 = vmax.f32 %v8965_v0, 0.0  ;;  %7462 = vmatprep.mubr.f32.mxu0 %v7112_v2 }
 0x810   : > { %v6804_v52 = vpop.f32.mrb[214].mxu1  ;;  %7463 = vmatmul.mubr.f32.gmra.mrb[210].mxu0 %v7071_v29  ;;  %v6954_v0 = vld [vmem:[#allocation23 + $0x9e0] sm:$0xff] }
 0x811   : > { %v12931_v15 = vmul.f32 %v6949_v46, %v6907_v25  ;;  %v8966_v37 = vadd.f32 %v12837_v32, %v6804_v52  ;;  %v6806_v9 = vpop.f32.mrb[215].mxu1 }
 0x812   : > { %v7113_v28 = vld [vmem:[#allocation3 + $0xc6] sm:$0xff] }
 0x813   : > { %v7072_v54 = vld [vmem:[#allocation3 + $0xc5] sm:$0xff]  ;;  %7031 = vst [vmem:[#allocation3 + $0xd8] sm:$0xff] %v12931_v15  ;;  %v6908_v57 = vmax.f32 %v8966_v37, 0.0  ;;  %7467 = vmatprep.mubr.f32.mxu0 %v7113_v28 }
 0x814   : > { %v6809_v23 = vpop.f32.mrb[216].mxu1  ;;  %7468 = vmatmul.mubr.f32.gmra.mrb[212].mxu0 %v7072_v54  ;;  %v6955_v9 = vld [vmem:[#allocation23 + $0x9e8] sm:$0xff] }
 0x815   : > { %v12935_v5 = vmul.f32 %v6950_v55, %v6908_v57  ;;  %v8967_v41 = vadd.f32 %v12837_v32, %v6809_v23  ;;  %v6811_v38 = vpop.f32.mrb[217].mxu1 }
 0x816   : > { %v7114_v19 = vld [vmem:[#allocation3 + $0xce] sm:$0xff] }
 0x817   : > { %v7073_v21 = vld [vmem:[#allocation3 + $0xcd] sm:$0xff]  ;;  %7032 = vst [vmem:[#allocation3 + $0xe0] sm:$0xff] %v12935_v5  ;;  %v6909_v24 = vmax.f32 %v8967_v41, 0.0  ;;  %7472 = vmatprep.mubr.f32.mxu0 %v7114_v19 }
 0x818   : > { %v6814_v42 = vpop.f32.mrb[218].mxu1  ;;  %7473 = vmatmul.mubr.f32.gmra.mrb[214].mxu0 %v7073_v21 }
 0x819   : > { %v12939_v62 = vmul.f32 %v6951_v39, %v6909_v24  ;;  %v8968_v4 = vadd.f32 %v12837_v32, %v6814_v42  ;;  %v6816_v7 = vpop.f32.mrb[219].mxu1  ;;  %v6956_v39 = vld [vmem:[#allocation23 + $0x9f0] sm:$0xff] }
 0x81a   : > { %v7115_v16 = vld [vmem:[#allocation3 + $0xd6] sm:$0xff] }
 0x81b   : > { %v7074_v50 = vld [vmem:[#allocation3 + $0xd5] sm:$0xff]  ;;  %7033 = vst [vmem:[#allocation3 + $0xe8] sm:$0xff] %v12939_v62  ;;  %v6910_v17 = vmax.f32 %v8968_v4, 0.0  ;;  %7477 = vmatprep.mubr.f32.mxu0 %v7115_v16 }
 0x81c   : > { %v6819_v63 = vpop.f32.mrb[220].mxu1  ;;  %7478 = vmatmul.mubr.f32.gmra.mrb[216].mxu0 %v7074_v50  ;;  %v6957_v16 = vld [vmem:[#allocation23 + $0x9f8] sm:$0xff] }
 0x81d   : > { %v12943_v45 = vmul.f32 %v6952_v59, %v6910_v17  ;;  %v8969_v18 = vadd.f32 %v12837_v32, %v6819_v63  ;;  %v6821_v48 = vpop.f32.mrb[221].mxu1 }
 0x81e   : > { %v7116_v34 = vld [vmem:[#allocation3 + $0xde] sm:$0xff] }
 0x81f   : > { %v7075_v33 = vld [vmem:[#allocation3 + $0xdd] sm:$0xff]  ;;  %7034 = vst [vmem:[#allocation3 + $0xf0] sm:$0xff] %v12943_v45  ;;  %v6911_v11 = vmax.f32 %v8969_v18, 0.0  ;;  %7482 = vmatprep.mubr.f32.mxu0 %v7116_v34 }
 0x820   : > { %v6824_v31 = vpop.f32.mrb[222].mxu1  ;;  %7483 = vmatmul.mubr.f32.gmra.mrb[218].mxu0 %v7075_v33  ;;  %v6958_v33 = vld [vmem:[#allocation23 + $0xa00] sm:$0xff] }
 0x821   : > { %v12947_v8 = vmul.f32 %v6953_v1, %v6911_v11  ;;  %v8970_v36 = vadd.f32 %v12837_v32, %v6824_v31  ;;  %v6826_v13 = vpop.f32.mrb[223].mxu1 }
 0x822   : > { %v7117_v51 = vld [vmem:[#allocation3 + $0xe6] sm:$0xff] }
 0x823   : > { %v7076_v46 = vld [vmem:[#allocation3 + $0xe5] sm:$0xff]  ;;  %7035 = vst [vmem:[#allocation3 + $0xf8] sm:$0xff] %v12947_v8  ;;  %v6912_v2 = vmax.f32 %v8970_v36, 0.0  ;;  %7487 = vmatprep.mubr.f32.mxu0 %v7117_v51 }
 0x824   : > { %v6829_v29 = vpop.f32.mrb[224].mxu1  ;;  %7488 = vmatmul.mubr.f32.gmra.mrb[220].mxu0 %v7076_v46 }
 0x825   : > { %v12951_v25 = vmul.f32 %v6954_v0, %v6912_v2  ;;  %v8971_v52 = vadd.f32 %v12837_v32, %v6829_v29  ;;  %v6831_v37 = vpop.f32.mrb[225].mxu1  ;;  %v6959_v2 = vld [vmem:[#allocation23 + $0xa08] sm:$0xff] }
 0x826   : > { %v7118_v55 = vld [vmem:[#allocation3 + $0xee] sm:$0xff] }
 0x827   : > { %v7077_v28 = vld [vmem:[#allocation3 + $0xed] sm:$0xff]  ;;  %7036 = vst [vmem:[#allocation3 + $0x100] sm:$0xff] %v12951_v25  ;;  %v6913_v54 = vmax.f32 %v8971_v52, 0.0  ;;  %7492 = vmatprep.mubr.f32.mxu0 %v7118_v55 }
 0x828   : > { %v6834_v57 = vpop.f32.mrb[226].mxu1  ;;  %7493 = vmatmul.mubr.f32.gmra.mrb[222].mxu0 %v7077_v28 }
 0x829   : > { %v12955_v23 = vmul.f32 %v6955_v9, %v6913_v54  ;;  %v8972_v41 = vadd.f32 %v12837_v32, %v6834_v57  ;;  %v6836_v38 = vpop.f32.mrb[227].mxu1  ;;  %v6960_v57 = vld [vmem:[#allocation23 + $0xa10] sm:$0xff] }
 0x82a   : > { %v7119_v19 = vld [vmem:[#allocation3 + $0xf6] sm:$0xff] }
 0x82b   : > { %v7078_v21 = vld [vmem:[#allocation3 + $0xf5] sm:$0xff]  ;;  %7037 = vst [vmem:[#allocation3 + $0x108] sm:$0xff] %v12955_v23  ;;  %v6914_v24 = vmax.f32 %v8972_v41, 0.0  ;;  %7497 = vmatprep.mubr.f32.mxu0 %v7119_v19 }
 0x82c   : > { %v6839_v42 = vpop.f32.mrb[228].mxu1  ;;  %7498 = vmatmul.mubr.f32.gmra.mrb[224].mxu0 %v7078_v21 }
 0x82d   : > { %v12959_v4 = vmul.f32 %v6956_v39, %v6914_v24  ;;  %v8973_v7 = vadd.f32 %v12837_v32, %v6839_v42  ;;  %v6841_v59 = vpop.f32.mrb[229].mxu1 }
 0x82e   : > { %v7120_v50 = vld [vmem:[#allocation3 + $0xfe] sm:$0xff] }
 0x82f   : > { %v7079_v17 = vld [vmem:[#allocation3 + $0xfd] sm:$0xff]  ;;  %7038 = vst [vmem:[#allocation3 + $0x110] sm:$0xff] %v12959_v4  ;;  %v6915_v63 = vmax.f32 %v8973_v7, 0.0  ;;  %7502 = vmatprep.mubr.f32.mxu0 %v7120_v50 }
 0x830   : > { %v6844_v18 = vpop.f32.mrb[230].mxu1  ;;  %7503 = vmatmul.mubr.f32.gmra.mrb[226].mxu0 %v7079_v17  ;;  %v6961_v7 = vld [vmem:[#allocation23 + $0xa18] sm:$0xff] }
 0x831   : > { %v12963_v48 = vmul.f32 %v6957_v16, %v6915_v63  ;;  %v8974_v1 = vadd.f32 %v12837_v32, %v6844_v18  ;;  %v6846_v34 = vpop.f32.mrb[231].mxu1 }
 0x832   : > { %v7121_v11 = vld [vmem:[#allocation3 + $0x106] sm:$0xff]  ;;  %v6962_v34 = vld [vmem:[#allocation23 + $0xa20] sm:$0xff] }
 0x833   : > { %v7080_v31 = vld [vmem:[#allocation3 + $0x105] sm:$0xff]  ;;  %7039 = vst [vmem:[#allocation3 + $0x118] sm:$0xff] %v12963_v48  ;;  %v6916_v36 = vmax.f32 %v8974_v1, 0.0  ;;  %7507 = vmatprep.mubr.f32.mxu0 %v7121_v11 }
 0x834   : > { %v6849_v13 = vpop.f32.mrb[232].mxu1  ;;  %7508 = vmatmul.mubr.f32.gmra.mrb[228].mxu0 %v7080_v31 }
 0x835   : > { %v12967_v0 = vmul.f32 %v6958_v33, %v6916_v36  ;;  %v8975_v51 = vadd.f32 %v12837_v32, %v6849_v13  ;;  %v6851_v46 = vpop.f32.mrb[233].mxu1 }
 0x836   : > { %v7122_v29 = vld [vmem:[#allocation3 + $0x10e] sm:$0xff] }
 0x837   : > { %v7081_v52 = vld [vmem:[#allocation3 + $0x10d] sm:$0xff]  ;;  %7040 = vst [vmem:[#allocation3 + $0x120] sm:$0xff] %v12967_v0  ;;  %v6917_v37 = vmax.f32 %v8975_v51, 0.0  ;;  %7512 = vmatprep.mubr.f32.mxu0 %v7122_v29 }
 0x838   : > { %v6854_v9 = vpop.f32.mrb[234].mxu1  ;;  %7513 = vmatmul.mubr.f32.gmra.mrb[230].mxu0 %v7081_v52 }
 0x839   : > { %v12971_v55 = vmul.f32 %v6959_v2, %v6917_v37  ;;  %v8976_v28 = vadd.f32 %v12837_v32, %v6854_v9  ;;  %v6856_v54 = vpop.f32.mrb[235].mxu1  ;;  %v6963_v2 = vld [vmem:[#allocation23 + $0xa28] sm:$0xff] }
 0x83a   : > { %v7123_v41 = vld [vmem:[#allocation3 + $0x116] sm:$0xff] }
 0x83b   : > { %v7082_v38 = vld [vmem:[#allocation3 + $0x115] sm:$0xff]  ;;  %7041 = vst [vmem:[#allocation3 + $0x128] sm:$0xff] %v12971_v55  ;;  %v6918_v39 = vmax.f32 %v8976_v28, 0.0  ;;  %7517 = vmatprep.mubr.f32.mxu0 %v7123_v41 }
 0x83c   : > { %v6859_v19 = vpop.f32.mrb[236].mxu1  ;;  %7518 = vmatmul.mubr.f32.gmra.mrb[232].mxu0 %v7082_v38  ;;  %v6964_v41 = vld [vmem:[#allocation23 + $0xa30] sm:$0xff] }
 0x83d   : > { %v12975_v21 = vmul.f32 %v6960_v57, %v6918_v39  ;;  %v8977_v24 = vadd.f32 %v12837_v32, %v6859_v19  ;;  %v6861_v42 = vpop.f32.mrb[237].mxu1 }
 0x83e   : > { %v7124_v59 = vld [vmem:[#allocation3 + $0x11e] sm:$0xff] }
 0x83f   : > { %v7083_v16 = vld [vmem:[#allocation3 + $0x11d] sm:$0xff]  ;;  %7042 = vst [vmem:[#allocation3 + $0x130] sm:$0xff] %v12975_v21  ;;  %v6919_v50 = vmax.f32 %v8977_v24, 0.0  ;;  %7522 = vmatprep.mubr.f32.mxu0 %v7124_v59 }
 0x840   : > { %v6864_v17 = vpop.f32.mrb[238].mxu1  ;;  %7523 = vmatmul.mubr.f32.gmra.mrb[234].mxu0 %v7083_v16  ;;  %v6965_v16 = vld [vmem:[#allocation23 + $0xa38] sm:$0xff] }
 0x841   : > { %v12979_v63 = vmul.f32 %v6961_v7, %v6919_v50  ;;  %v8978_v18 = vadd.f32 %v12837_v32, %v6864_v17  ;;  %v6866_v1 = vpop.f32.mrb[239].mxu1 }
 0x842   : > { %v7125_v33 = vld [vmem:[#allocation3 + $0x126] sm:$0xff] }
 0x843   : > { %v7084_v11 = vld [vmem:[#allocation3 + $0x125] sm:$0xff]  ;;  %7043 = vst [vmem:[#allocation3 + $0x138] sm:$0xff] %v12979_v63  ;;  %v6920_v31 = vmax.f32 %v8978_v18, 0.0  ;;  %7527 = vmatprep.mubr.f32.mxu0 %v7125_v33 }
 0x844   : > { %v6869_v36 = vpop.f32.mrb[240].mxu1  ;;  %7528 = vmatmul.mubr.f32.gmra.mrb[236].mxu0 %v7084_v11  ;;  %v7171_v11 = vld [vmem:[#allocation3 + $0x18] sm:$0xff] }
 0x845   : > { %v12983_v13 = vmul.f32 %v6962_v34, %v6920_v31  ;;  %v8979_v51 = vadd.f32 %v12837_v32, %v6869_v36  ;;  %v6871_v46 = vpop.f32.mrb[241].mxu1  ;;  %v7172_v31 = vld [vmem:[#allocation3 + $0x20] sm:$0xff] }
 0x846   : > { %v7126_v29 = vld [vmem:[#allocation3 + $0x12e] sm:$0xff]  ;;  %v7131_v36 = vld [vmem:[#allocation3 + $0x1f] sm:$0xff] }
 0x847   : > { %v7085_v52 = vld [vmem:[#allocation3 + $0x12d] sm:$0xff]  ;;  %7044 = vst [vmem:[#allocation3 + $0x140] sm:$0xff] %v12983_v13  ;;  %v6921_v37 = vmax.f32 %v8979_v51, 0.0  ;;  %7531 = vmatprep.mubr.f32.mxu0 %v7126_v29  ;;  %v7134_v29 = vld [vmem:[#allocation3 + $0x37] sm:$0xff] }
 0x848   : > { %v6874_v9 = vpop.f32.mrb[242].mxu1  ;;  %7532 = vmatmul.mubr.f32.gmra.mrb[238].mxu0 %v7085_v52  ;;  %v7173_v51 = vld [vmem:[#allocation3 + $0x28] sm:$0xff]  ;;  %v7135_v52 = vld [vmem:[#allocation3 + $0x3f] sm:$0xff] }
 0x849   : > { %v12987_v28 = vmul.f32 %v6963_v2, %v6921_v37  ;;  %v8980_v54 = vadd.f32 %v12837_v32, %v6874_v9  ;;  %v6876_v57 = vpop.f32.mrb[243].mxu1  ;;  %v7132_v46 = vld [vmem:[#allocation3 + $0x27] sm:$0xff]  ;;  %v7133_v2 = vld [vmem:[#allocation3 + $0x2f] sm:$0xff] }
 0x84a   : > { %v7127_v38 = vld [vmem:[#allocation3 + $0x136] sm:$0xff]  ;;  %v7136_v37 = vld [vmem:[#allocation3 + $0x47] sm:$0xff] }
 0x84b   : > { %v7086_v39 = vld [vmem:[#allocation3 + $0x135] sm:$0xff]  ;;  %7045 = vst [vmem:[#allocation3 + $0x148] sm:$0xff] %v12987_v28  ;;  %v6922_v19 = vmax.f32 %v8980_v54, 0.0  ;;  %7535 = vmatprep.mubr.f32.mxu0 %v7127_v38 }
 0x84c   : > { %v6879_v24 = vpop.f32.mrb[244].mxu1  ;;  %7536 = vmatmul.mubr.f32.gmra.mrb[240].mxu0 %v7086_v39  ;;  %v7137_v9 = vld [vmem:[#allocation3 + $0x4f] sm:$0xff] }
 0x84d   : > { %v12991_v42 = vmul.f32 %v6964_v41, %v6922_v19  ;;  %v8981_v7 = vadd.f32 %v12837_v32, %v6879_v24  ;;  %v6881_v59 = vpop.f32.mrb[245].mxu1  ;;  %v7130_v32 = vld [vmem:[#allocation3 + $0x17] sm:$0xff] }
 0x84e   : > { %v7128_v50 = vld [vmem:[#allocation3 + $0x13e] sm:$0xff] }
 0x84f   : > { %v7087_v17 = vld [vmem:[#allocation3 + $0x13d] sm:$0xff]  ;;  %7046 = vst [vmem:[#allocation3 + $0x150] sm:$0xff] %v12991_v42  ;;  %v6923_v18 = vmax.f32 %v8981_v7, 0.0  ;;  %7539 = vmatprep.mubr.f32.mxu0 %v7128_v50  ;;  %v13036_v7 = vld [vmem:[#allocation21] ss:$0 sm:$0xff] }
 0x850   : > { %7540 = vmatmul.mubr.f32.gmra.mrb[242].mxu0 %v7087_v17 }
 0x851   : > { %v12995_v1 = vmul.f32 %v6965_v16, %v6923_v18 }
 0x852   : > { %v7129_v34 = vld [vmem:[#allocation3 + $0x146] sm:$0xff] }
 0x853   : > { %v7088_v33 = vld [vmem:[#allocation3 + $0x145] sm:$0xff]  ;;  %7047 = vst [vmem:[#allocation3 + $0x158] sm:$0xff] %v12995_v1  ;;  %7543 = vmatprep.mubr.f32.mxu0 %v7129_v34 }
 0x854   : > { %7544 = vmatmul.mubr.f32.gmra.mrb[244].mxu0 %v7088_v33 }
 0x855   : > { %7612 = vmatprep.mubr.f32.mxu0 %v7171_v11 }
 0x858   : > { %7613 = vmatmul.mubr.f32.vlgmr.msra.gmra.mrb[164].mxu0 %v7130_v32 }
 0x859   : > { %7617 = vmatprep.mubr.f32.mxu0 %v7172_v31 }
 0x85c   : > { %7618 = vmatmul.mubr.f32.gmra.mrb[166].mxu0 %v7131_v36 }
 0x85d   : > { %7622 = vmatprep.mubr.f32.mxu0 %v7173_v51 }
 0x860   : > { %7623 = vmatmul.mubr.f32.gmra.mrb[168].mxu0 %v7132_v46 }
 0x861   : > { %7627 = vmatprep.mubr.f32.mxu0 %v12845_v27  ;;  %v7138_v27 = vld [vmem:[#allocation3 + $0x57] sm:$0xff] }
 0x864   : > { %7628 = vmatmul.mubr.f32.gmra.mrb[170].mxu0 %v7133_v2 }
 0x865   : > { %7632 = vmatprep.mubr.f32.mxu0 %v12849_v30  ;;  %v7139_v30 = vld [vmem:[#allocation3 + $0x5f] sm:$0xff] }
 0x868   : > { %7633 = vmatmul.mubr.f32.gmra.mrb[172].mxu0 %v7134_v29 }
 0x869   : > { %7637 = vmatprep.mubr.f32.mxu0 %v12854_v61  ;;  %v7140_v61 = vld [vmem:[#allocation3 + $0x67] sm:$0xff] }
 0x86c   : > { %7638 = vmatmul.mubr.f32.gmra.mrb[174].mxu0 %v7135_v52 }
 0x86d   : > { %7642 = vmatprep.mubr.f32.mxu0 %v12858_v20  ;;  %v7141_v20 = vld [vmem:[#allocation3 + $0x6f] sm:$0xff] }
 0x870   : > { %7643 = vmatmul.mubr.f32.gmra.mrb[176].mxu0 %v7136_v37 }
 0x871   : > { %7647 = vmatprep.mubr.f32.mxu0 %v12862_v44  ;;  %v7142_v44 = vld [vmem:[#allocation3 + $0x77] sm:$0xff] }
 0x874   : > { %7648 = vmatmul.mubr.f32.gmra.mrb[178].mxu0 %v7137_v9  ;;  %v7958_v9 = vld [vmem:[#allocation23 + $0xa40] sm:$0xff] }
 0x875   : > { %7652 = vmatprep.mubr.f32.mxu0 %v12867_v6  ;;  %v7143_v6 = vld [vmem:[#allocation3 + $0x7f] sm:$0xff] }
 0x878   : > { %7653 = vmatmul.mubr.f32.gmra.mrb[180].mxu0 %v7138_v27 }
 0x879   : > { %7657 = vmatprep.mubr.f32.mxu0 %v12871_v26  ;;  %v7144_v26 = vld [vmem:[#allocation3 + $0x87] sm:$0xff] }
 0x87c   : > { %7658 = vmatmul.mubr.f32.gmra.mrb[182].mxu0 %v7139_v30 }
 0x87d   : > { %7662 = vmatprep.mubr.f32.mxu0 %v12875_v10  ;;  %v7145_v10 = vld [vmem:[#allocation3 + $0x8f] sm:$0xff] }
 0x880   : > { %7663 = vmatmul.mubr.f32.gmra.mrb[184].mxu0 %v7140_v61 }
 0x881   : > { %7667 = vmatprep.mubr.f32.mxu0 %v12879_v43  ;;  %v7146_v43 = vld [vmem:[#allocation3 + $0x97] sm:$0xff] }
 0x884   : > { %7668 = vmatmul.mubr.f32.gmra.mrb[186].mxu0 %v7141_v20 }
 0x885   : > { %7672 = vmatprep.mubr.f32.mxu0 %v12883_v14  ;;  %v7147_v14 = vld [vmem:[#allocation3 + $0x9f] sm:$0xff] }
 0x888   : > { %7673 = vmatmul.mubr.f32.gmra.mrb[188].mxu0 %v7142_v44 }
 0x889   : > { %7677 = vmatprep.mubr.f32.mxu0 %v12887_v60  ;;  %v7148_v60 = vld [vmem:[#allocation3 + $0xa7] sm:$0xff] }
 0x88c   : > { %7678 = vmatmul.mubr.f32.gmra.mrb[190].mxu0 %v7143_v6 }
 0x88d   : > { %7682 = vmatprep.mubr.f32.mxu0 %v12891_v22  ;;  %v7149_v22 = vld [vmem:[#allocation3 + $0xaf] sm:$0xff] }
 0x890   : > { %7683 = vmatmul.mubr.f32.gmra.mrb[192].mxu0 %v7144_v26 }
 0x891   : > { %7687 = vmatprep.mubr.f32.mxu0 %v12895_v56  ;;  %v7150_v56 = vld [vmem:[#allocation3 + $0xb7] sm:$0xff] }
 0x894   : > { %7688 = vmatmul.mubr.f32.gmra.mrb[194].mxu0 %v7145_v10 }
 0x895   : > { %7692 = vmatprep.mubr.f32.mxu0 %v12899_v40  ;;  %v7151_v40 = vld [vmem:[#allocation3 + $0xbf] sm:$0xff] }
 0x898   : > { %7693 = vmatmul.mubr.f32.gmra.mrb[196].mxu0 %v7146_v43  ;;  %v7959_v43 = vld [vmem:[#allocation23 + $0xa48] sm:$0xff] }
 0x899   : > { %7697 = vmatprep.mubr.f32.mxu0 %v12903_v53  ;;  %v7152_v53 = vld [vmem:[#allocation3 + $0xc7] sm:$0xff] }
 0x89c   : > { %7698 = vmatmul.mubr.f32.gmra.mrb[198].mxu0 %v7147_v14 }
 0x89d   : > { %7702 = vmatprep.mubr.f32.mxu0 %v12907_v35  ;;  %v7153_v35 = vld [vmem:[#allocation3 + $0xcf] sm:$0xff] }
 0x8a0   : > { %7703 = vmatmul.mubr.f32.gmra.mrb[200].mxu0 %v7148_v60 }
 0x8a1   : > { %7707 = vmatprep.mubr.f32.mxu0 %v12911_v49  ;;  %v7154_v49 = vld [vmem:[#allocation3 + $0xd7] sm:$0xff] }
 0x8a4   : > { %7708 = vmatmul.mubr.f32.gmra.mrb[202].mxu0 %v7149_v22 }
 0x8a5   : > { %7712 = vmatprep.mubr.f32.mxu0 %v12915_v58  ;;  %v7155_v58 = vld [vmem:[#allocation3 + $0xdf] sm:$0xff] }
 0x8a8   : > { %7713 = vmatmul.mubr.f32.gmra.mrb[204].mxu0 %v7150_v56 }
 0x8a9   : > { %7717 = vmatprep.mubr.f32.mxu0 %v12919_v12  ;;  %v7156_v12 = vld [vmem:[#allocation3 + $0xe7] sm:$0xff] }
 0x8ac   : > { %7718 = vmatmul.mubr.f32.gmra.mrb[206].mxu0 %v7151_v40 }
 0x8ad   : > { %7722 = vmatprep.mubr.f32.mxu0 %v12923_v3  ;;  %v7157_v3 = vld [vmem:[#allocation3 + $0xef] sm:$0xff] }
 0x8b0   : > { %7723 = vmatmul.mubr.f32.gmra.mrb[208].mxu0 %v7152_v53 }
 0x8b1   : > { %7727 = vmatprep.mubr.f32.mxu0 %v12927_v47  ;;  %v7158_v47 = vld [vmem:[#allocation3 + $0xf7] sm:$0xff] }
 0x8b4   : > { %7728 = vmatmul.mubr.f32.gmra.mrb[210].mxu0 %v7153_v35 }
 0x8b5   : > { %7732 = vmatprep.mubr.f32.mxu0 %v12931_v15  ;;  %v7159_v15 = vld [vmem:[#allocation3 + $0xff] sm:$0xff] }
 0x8b8   : > { %7733 = vmatmul.mubr.f32.gmra.mrb[212].mxu0 %v7154_v49 }
 0x8b9   : > { %7737 = vmatprep.mubr.f32.mxu0 %v12935_v5  ;;  %v7160_v5 = vld [vmem:[#allocation3 + $0x107] sm:$0xff] }
 0x8bc   : > { %7738 = vmatmul.mubr.f32.gmra.mrb[214].mxu0 %v7155_v58  ;;  %v7960_v58 = vld [vmem:[#allocation23 + $0xa50] sm:$0xff] }
 0x8bd   : > { %7742 = vmatprep.mubr.f32.mxu0 %v12939_v62  ;;  %v7161_v62 = vld [vmem:[#allocation3 + $0x10f] sm:$0xff] }
 0x8c0   : > { %7743 = vmatmul.mubr.f32.gmra.mrb[216].mxu0 %v7156_v12 }
 0x8c1   : > { %7747 = vmatprep.mubr.f32.mxu0 %v12943_v45  ;;  %v7162_v45 = vld [vmem:[#allocation3 + $0x117] sm:$0xff] }
 0x8c4   : > { %7748 = vmatmul.mubr.f32.gmra.mrb[218].mxu0 %v7157_v3 }
 0x8c5   : > { %7752 = vmatprep.mubr.f32.mxu0 %v12947_v8  ;;  %v7163_v8 = vld [vmem:[#allocation3 + $0x11f] sm:$0xff] }
 0x8c8   : > { %7753 = vmatmul.mubr.f32.gmra.mrb[220].mxu0 %v7158_v47 }
 0x8c9   : > { %7757 = vmatprep.mubr.f32.mxu0 %v12951_v25  ;;  %v7164_v25 = vld [vmem:[#allocation3 + $0x127] sm:$0xff] }
 0x8cc   : > { %7758 = vmatmul.mubr.f32.gmra.mrb[222].mxu0 %v7159_v15 }
 0x8cd   : > { %7762 = vmatprep.mubr.f32.mxu0 %v12955_v23  ;;  %v7165_v23 = vld [vmem:[#allocation3 + $0x12f] sm:$0xff] }
 0x8d0   : > { %7763 = vmatmul.mubr.f32.gmra.mrb[224].mxu0 %v7160_v5 }
 0x8d1   : > { %7767 = vmatprep.mubr.f32.mxu0 %v12959_v4  ;;  %v7166_v4 = vld [vmem:[#allocation3 + $0x137] sm:$0xff] }
 0x8d4   : > { %7768 = vmatmul.mubr.f32.gmra.mrb[226].mxu0 %v7161_v62 }
 0x8d5   : > { %7772 = vmatprep.mubr.f32.mxu0 %v12963_v48  ;;  %v7167_v48 = vld [vmem:[#allocation3 + $0x13f] sm:$0xff] }
 0x8d8   : > { %7773 = vmatmul.mubr.f32.gmra.mrb[228].mxu0 %v7162_v45 }
 0x8d9   : > { %7777 = vmatprep.mubr.f32.mxu0 %v12967_v0  ;;  %v7168_v0 = vld [vmem:[#allocation3 + $0x147] sm:$0xff] }
 0x8dc   : > { %7778 = vmatmul.mubr.f32.gmra.mrb[230].mxu0 %v7163_v8 }
 0x8dd   : > { %7782 = vmatprep.mubr.f32.mxu0 %v12971_v55  ;;  %v7169_v55 = vld [vmem:[#allocation3 + $0x14f] sm:$0xff] }
 0x8e0   : > { %7783 = vmatmul.mubr.f32.gmra.mrb[232].mxu0 %v7164_v25  ;;  %v7961_v25 = vld [vmem:[#allocation23 + $0xa58] sm:$0xff] }
 0x8e1   : > { %7787 = vmatprep.mubr.f32.mxu0 %v12975_v21  ;;  %v7170_v21 = vld [vmem:[#allocation3 + $0x157] sm:$0xff] }
 0x8e4   : > { %7788 = vmatmul.mubr.f32.gmra.mrb[234].mxu0 %v7165_v23 }
 0x8e5   : > { %7792 = vmatprep.mubr.f32.mxu0 %v12979_v63 }
 0x8e8   : > { %7793 = vmatmul.mubr.f32.gmra.mrb[246].mxu0 %v7166_v4 }
 0x8e9   : > { %7796 = vmatprep.mubr.f32.mxu0 %v12983_v13 }
 0x8ec   : > { %7797 = vmatmul.mubr.f32.gmra.mrb[248].mxu0 %v7167_v48 }
 0x8ed   : > { %7800 = vmatprep.mubr.f32.mxu0 %v12987_v28 }
 0x8f0   : > { %7801 = vmatmul.mubr.f32.gmra.mrb[250].mxu0 %v7168_v0 }
 0x8f1   : > { %7804 = vmatprep.mubr.f32.mxu0 %v12991_v42 }
 0x8f4   : > { %7805 = vmatmul.mubr.f32.gmra.mrb[252].mxu0 %v7169_v55 }
 0x8f5   : > { %7808 = vmatprep.mubr.f32.mxu0 %v12995_v1 }
 0x8f8   : > { %7809 = vmatmul.mubr.f32.gmra.mrb[254].mxu0 %v7170_v21 }
 0x917   : > { %v7529_v54 = vpop.f32.mrb[236].mxu0 }
 0x918   : > { %v7530_v63 = vpop.f32.mrb[237].mxu0 }
 0x91b   : > { %v7533_v57 = vpop.f32.mrb[238].mxu0 }
 0x91c   : > { %v7534_v41 = vpop.f32.mrb[239].mxu0  ;;  %v7962_v57 = vld [vmem:[#allocation23 + $0xa60] sm:$0xff] }
 0x91f   : > { %v7537_v38 = vpop.f32.mrb[240].mxu0 }
 0x920   : > { %v7538_v13 = vpop.f32.mrb[241].mxu0 }
 0x923   : > { %v7541_v39 = vpop.f32.mrb[242].mxu0 }
 0x924   : > { %v7542_v19 = vpop.f32.mrb[243].mxu0 }
 0x927   : > { %v7545_v24 = vpop.f32.mrb[244].mxu0 }
 0x928   : > { %v7546_v28 = vpop.f32.mrb[245].mxu0 }
 0x92b   : > { %v7614_v59 = vpop.f32.mrb[164].mxu0 }
 0x92c   : > { %v8982_v42 = vadd.f32 %v13036_v7, %v7614_v59  ;;  %v7616_v16 = vpop.f32.mrb[165].mxu0 }
 0x92e   : > { %v7813_v50 = vmul.f32 0.5, %v8982_v42  ;;  %v7963_v42 = vld [vmem:[#allocation23 + $0xa68] sm:$0xff] }
 0x92f   : > { %v7619_v17 = vpop.f32.mrb[166].mxu0 }
 0x930   : > { %9483 = vtanh.f32 %v7813_v50  ;;  %v8983_v18 = vadd.f32 %v13036_v7, %v7619_v17  ;;  %v7621_v1 = vpop.f32.mrb[167].mxu0 }
 0x932   : > { %v7814_v34 = vmul.f32 0.5, %v8983_v18 }
 0x933   : > { %v7624_v33 = vpop.f32.mrb[168].mxu0 }
 0x934   : > { %9485 = vtanh.f32 %v7814_v34  ;;  %v8984_v11 = vadd.f32 %v13036_v7, %v7624_v33  ;;  %v7626_v32 = vpop.f32.mrb[169].mxu0 }
 0x935   : > { %v7964_v32 = vld [vmem:[#allocation23 + $0xa70] sm:$0xff] }
 0x936   : > { %v7815_v31 = vmul.f32 0.5, %v8984_v11 }
 0x937   : > { %v7629_v36 = vpop.f32.mrb[170].mxu0 }
 0x938   : > { %9487 = vtanh.f32 %v7815_v31  ;;  %v8985_v51 = vadd.f32 %v13036_v7, %v7629_v36  ;;  %v7631_v46 = vpop.f32.mrb[171].mxu0 }
 0x93a   : > { %v9484_v2 = vpop.eup %9483  ;;  %v7816_v29 = vmul.f32 0.5, %v8985_v51 }
 0x93b   : > { %v7885_v52 = vmul.f32 0.5, %v9484_v2  ;;  %v7634_v37 = vpop.f32.mrb[172].mxu0 }
 0x93c   : > { %9489 = vtanh.f32 %v7816_v29  ;;  %v8986_v27 = vadd.f32 %v13036_v7, %v7634_v37  ;;  %v7636_v30 = vpop.f32.mrb[173].mxu0 }
 0x93d   : > { %v7921_v61 = vadd.f32 0.5, %v7885_v52 }
 0x93e   : > { %v9486_v20 = vpop.eup %9485  ;;  %v7817_v44 = vmul.f32 0.5, %v8986_v27 }
 0x93f   : > { %v7994_v6 = vmul.f32 %v7958_v9, %v7921_v61  ;;  %v7886_v26 = vmul.f32 0.5, %v9486_v20  ;;  %v7639_v10 = vpop.f32.mrb[174].mxu0  ;;  %v7965_v9 = vld [vmem:[#allocation23 + $0xa78] sm:$0xff] }
 0x940   : > { %9491 = vtanh.f32 %v7817_v44  ;;  %v8987_v14 = vadd.f32 %v13036_v7, %v7639_v10  ;;  %v7641_v60 = vpop.f32.mrb[175].mxu0 }
 0x941   : > { %8030 = vst [vmem:[%s13047_s26] sm:$0xff] %v7994_v6  ;;  %v7922_v22 = vadd.f32 0.5, %v7886_v26 }
 0x942   : > { %v9488_v56 = vpop.eup %9487  ;;  %v7818_v40 = vmul.f32 0.5, %v8987_v14 }
 0x943   : > { %v7995_v53 = vmul.f32 %v7959_v43, %v7922_v22  ;;  %v7887_v35 = vmul.f32 0.5, %v9488_v56  ;;  %v7644_v49 = vpop.f32.mrb[176].mxu0  ;;  %v7966_v43 = vld [vmem:[#allocation23 + $0xa80] sm:$0xff] }
 0x944   : > { %9493 = vtanh.f32 %v7818_v40  ;;  %v8988_v12 = vadd.f32 %v13036_v7, %v7644_v49  ;;  %v7646_v3 = vpop.f32.mrb[177].mxu0 }
 0x945   : > { %8031 = vst [vmem:[%s13047_s26 + $0x8] sm:$0xff] %v7995_v53  ;;  %v7923_v47 = vadd.f32 0.5, %v7887_v35 }
 0x946   : > { %v9490_v15 = vpop.eup %9489  ;;  %v7819_v5 = vmul.f32 0.5, %v8988_v12 }
 0x947   : > { %v7996_v62 = vmul.f32 %v7960_v58, %v7923_v47  ;;  %v7888_v45 = vmul.f32 0.5, %v9490_v15  ;;  %v7649_v8 = vpop.f32.mrb[178].mxu0  ;;  %v7967_v58 = vld [vmem:[#allocation23 + $0xa88] sm:$0xff] }
 0x948   : > { %9495 = vtanh.f32 %v7819_v5  ;;  %v8989_v23 = vadd.f32 %v13036_v7, %v7649_v8  ;;  %v7651_v4 = vpop.f32.mrb[179].mxu0 }
 0x949   : > { %8032 = vst [vmem:[%s13047_s26 + $0x10] sm:$0xff] %v7996_v62  ;;  %v7924_v48 = vadd.f32 0.5, %v7888_v45 }
 0x94a   : > { %v9492_v0 = vpop.eup %9491  ;;  %v7820_v55 = vmul.f32 0.5, %v8989_v23 }
 0x94b   : > { %v7997_v21 = vmul.f32 %v7961_v25, %v7924_v48  ;;  %v7889_v54 = vmul.f32 0.5, %v9492_v0  ;;  %v7654_v63 = vpop.f32.mrb[180].mxu0  ;;  %v7968_v25 = vld [vmem:[#allocation23 + $0xa90] sm:$0xff] }
 0x94c   : > { %9497 = vtanh.f32 %v7820_v55  ;;  %v8990_v41 = vadd.f32 %v13036_v7, %v7654_v63  ;;  %v7656_v38 = vpop.f32.mrb[181].mxu0 }
 0x94d   : > { %8033 = vst [vmem:[%s13047_s26 + $0x18] sm:$0xff] %v7997_v21  ;;  %v7925_v13 = vadd.f32 0.5, %v7889_v54 }
 0x94e   : > { %v9494_v39 = vpop.eup %9493  ;;  %v7821_v19 = vmul.f32 0.5, %v8990_v41 }
 0x94f   : > { %v7998_v24 = vmul.f32 %v7962_v57, %v7925_v13  ;;  %v7890_v28 = vmul.f32 0.5, %v9494_v39  ;;  %v7659_v59 = vpop.f32.mrb[182].mxu0  ;;  %v7969_v57 = vld [vmem:[#allocation23 + $0xa98] sm:$0xff] }
 0x950   : > { %9499 = vtanh.f32 %v7821_v19  ;;  %v8991_v16 = vadd.f32 %v13036_v7, %v7659_v59  ;;  %v7661_v50 = vpop.f32.mrb[183].mxu0 }
 0x951   : > { %8034 = vst [vmem:[%s13047_s26 + $0x20] sm:$0xff] %v7998_v24  ;;  %v7926_v17 = vadd.f32 0.5, %v7890_v28 }
 0x952   : > { %v9496_v18 = vpop.eup %9495  ;;  %v7822_v1 = vmul.f32 0.5, %v8991_v16 }
 0x953   : > { %v7999_v34 = vmul.f32 %v7963_v42, %v7926_v17  ;;  %v7891_v33 = vmul.f32 0.5, %v9496_v18  ;;  %v7664_v11 = vpop.f32.mrb[184].mxu0  ;;  %v7970_v42 = vld [vmem:[#allocation23 + $0xaa0] sm:$0xff] }
 0x954   : > { %9501 = vtanh.f32 %v7822_v1  ;;  %v8992_v31 = vadd.f32 %v13036_v7, %v7664_v11  ;;  %v7666_v36 = vpop.f32.mrb[185].mxu0 }
 0x955   : > { %8035 = vst [vmem:[%s13047_s26 + $0x28] sm:$0xff] %v7999_v34  ;;  %v7927_v51 = vadd.f32 0.5, %v7891_v33 }
 0x956   : > { %v9498_v46 = vpop.eup %9497  ;;  %v7823_v2 = vmul.f32 0.5, %v8992_v31 }
 0x957   : > { %v8000_v29 = vmul.f32 %v7964_v32, %v7927_v51  ;;  %v7892_v52 = vmul.f32 0.5, %v9498_v46  ;;  %v7669_v37 = vpop.f32.mrb[186].mxu0  ;;  %v7971_v32 = vld [vmem:[#allocation23 + $0xaa8] sm:$0xff] }
 0x958   : > { %9503 = vtanh.f32 %v7823_v2  ;;  %v8993_v27 = vadd.f32 %v13036_v7, %v7669_v37  ;;  %v7671_v30 = vpop.f32.mrb[187].mxu0 }
 0x959   : > { %8036 = vst [vmem:[%s13047_s26 + $0x30] sm:$0xff] %v8000_v29  ;;  %v7928_v61 = vadd.f32 0.5, %v7892_v52 }
 0x95a   : > { %v9500_v20 = vpop.eup %9499  ;;  %v7824_v44 = vmul.f32 0.5, %v8993_v27 }
 0x95b   : > { %v8001_v6 = vmul.f32 %v7965_v9, %v7928_v61  ;;  %v7893_v26 = vmul.f32 0.5, %v9500_v20  ;;  %v7674_v10 = vpop.f32.mrb[188].mxu0  ;;  %v7972_v9 = vld [vmem:[#allocation23 + $0xab0] sm:$0xff] }
 0x95c   : > { %9505 = vtanh.f32 %v7824_v44  ;;  %v8994_v14 = vadd.f32 %v13036_v7, %v7674_v10  ;;  %v7676_v60 = vpop.f32.mrb[189].mxu0 }
 0x95d   : > { %8037 = vst [vmem:[%s13047_s26 + $0x38] sm:$0xff] %v8001_v6  ;;  %v7929_v22 = vadd.f32 0.5, %v7893_v26 }
 0x95e   : > { %v9502_v56 = vpop.eup %9501  ;;  %v7825_v40 = vmul.f32 0.5, %v8994_v14 }
 0x95f   : > { %v8002_v53 = vmul.f32 %v7966_v43, %v7929_v22  ;;  %v7894_v35 = vmul.f32 0.5, %v9502_v56  ;;  %v7679_v49 = vpop.f32.mrb[190].mxu0  ;;  %v7973_v43 = vld [vmem:[#allocation23 + $0xab8] sm:$0xff] }
 0x960   : > { %9507 = vtanh.f32 %v7825_v40  ;;  %v8995_v12 = vadd.f32 %v13036_v7, %v7679_v49  ;;  %v7681_v3 = vpop.f32.mrb[191].mxu0 }
 0x961   : > { %8038 = vst [vmem:[%s13047_s26 + $0x40] sm:$0xff] %v8002_v53  ;;  %v7930_v47 = vadd.f32 0.5, %v7894_v35 }
 0x962   : > { %v9504_v15 = vpop.eup %9503  ;;  %v7826_v5 = vmul.f32 0.5, %v8995_v12 }
 0x963   : > { %v8003_v62 = vmul.f32 %v7967_v58, %v7930_v47  ;;  %v7895_v45 = vmul.f32 0.5, %v9504_v15  ;;  %v7684_v8 = vpop.f32.mrb[192].mxu0  ;;  %v7974_v58 = vld [vmem:[#allocation23 + $0xac0] sm:$0xff] }
 0x964   : > { %9509 = vtanh.f32 %v7826_v5  ;;  %v8996_v23 = vadd.f32 %v13036_v7, %v7684_v8  ;;  %v7686_v4 = vpop.f32.mrb[193].mxu0 }
 0x965   : > { %8039 = vst [vmem:[%s13047_s26 + $0x48] sm:$0xff] %v8003_v62  ;;  %v7931_v48 = vadd.f32 0.5, %v7895_v45 }
 0x966   : > { %v9506_v0 = vpop.eup %9505  ;;  %v7827_v55 = vmul.f32 0.5, %v8996_v23 }
 0x967   : > { %v8004_v21 = vmul.f32 %v7968_v25, %v7931_v48  ;;  %v7896_v54 = vmul.f32 0.5, %v9506_v0  ;;  %v7689_v63 = vpop.f32.mrb[194].mxu0  ;;  %v7975_v25 = vld [vmem:[#allocation23 + $0xac8] sm:$0xff] }
 0x968   : > { %9511 = vtanh.f32 %v7827_v55  ;;  %v8997_v41 = vadd.f32 %v13036_v7, %v7689_v63  ;;  %v7691_v38 = vpop.f32.mrb[195].mxu0 }
 0x969   : > { %8040 = vst [vmem:[%s13047_s26 + $0x50] sm:$0xff] %v8004_v21  ;;  %v7932_v13 = vadd.f32 0.5, %v7896_v54 }
 0x96a   : > { %v9508_v39 = vpop.eup %9507  ;;  %v7828_v19 = vmul.f32 0.5, %v8997_v41 }
 0x96b   : > { %v8005_v24 = vmul.f32 %v7969_v57, %v7932_v13  ;;  %v7897_v28 = vmul.f32 0.5, %v9508_v39  ;;  %v7694_v59 = vpop.f32.mrb[196].mxu0  ;;  %v7976_v57 = vld [vmem:[#allocation23 + $0xad0] sm:$0xff] }
 0x96c   : > { %9513 = vtanh.f32 %v7828_v19  ;;  %v8998_v16 = vadd.f32 %v13036_v7, %v7694_v59  ;;  %v7696_v50 = vpop.f32.mrb[197].mxu0 }
 0x96d   : > { %8041 = vst [vmem:[%s13047_s26 + $0x58] sm:$0xff] %v8005_v24  ;;  %v7933_v17 = vadd.f32 0.5, %v7897_v28 }
 0x96e   : > { %v9510_v18 = vpop.eup %9509  ;;  %v7829_v1 = vmul.f32 0.5, %v8998_v16 }
 0x96f   : > { %v8006_v34 = vmul.f32 %v7970_v42, %v7933_v17  ;;  %v7898_v33 = vmul.f32 0.5, %v9510_v18  ;;  %v7699_v11 = vpop.f32.mrb[198].mxu0  ;;  %v7977_v42 = vld [vmem:[#allocation23 + $0xad8] sm:$0xff] }
 0x970   : > { %9515 = vtanh.f32 %v7829_v1  ;;  %v8999_v31 = vadd.f32 %v13036_v7, %v7699_v11  ;;  %v7701_v36 = vpop.f32.mrb[199].mxu0 }
 0x971   : > { %8042 = vst [vmem:[%s13047_s26 + $0x60] sm:$0xff] %v8006_v34  ;;  %v7934_v51 = vadd.f32 0.5, %v7898_v33 }
 0x972   : > { %v9512_v46 = vpop.eup %9511  ;;  %v7830_v2 = vmul.f32 0.5, %v8999_v31 }
 0x973   : > { %v8007_v29 = vmul.f32 %v7971_v32, %v7934_v51  ;;  %v7899_v52 = vmul.f32 0.5, %v9512_v46  ;;  %v7704_v37 = vpop.f32.mrb[200].mxu0  ;;  %v7978_v32 = vld [vmem:[#allocation23 + $0xae0] sm:$0xff] }
 0x974   : > { %9517 = vtanh.f32 %v7830_v2  ;;  %v9000_v27 = vadd.f32 %v13036_v7, %v7704_v37  ;;  %v7706_v30 = vpop.f32.mrb[201].mxu0 }
 0x975   : > { %8043 = vst [vmem:[%s13047_s26 + $0x68] sm:$0xff] %v8007_v29  ;;  %v7935_v61 = vadd.f32 0.5, %v7899_v52 }
 0x976   : > { %v9514_v20 = vpop.eup %9513  ;;  %v7831_v44 = vmul.f32 0.5, %v9000_v27 }
 0x977   : > { %v8008_v6 = vmul.f32 %v7972_v9, %v7935_v61  ;;  %v7900_v26 = vmul.f32 0.5, %v9514_v20  ;;  %v7709_v10 = vpop.f32.mrb[202].mxu0  ;;  %v7979_v9 = vld [vmem:[#allocation23 + $0xae8] sm:$0xff] }
 0x978   : > { %9519 = vtanh.f32 %v7831_v44  ;;  %v9001_v14 = vadd.f32 %v13036_v7, %v7709_v10  ;;  %v7711_v60 = vpop.f32.mrb[203].mxu0 }
 0x979   : > { %8044 = vst [vmem:[%s13047_s26 + $0x70] sm:$0xff] %v8008_v6  ;;  %v7936_v22 = vadd.f32 0.5, %v7900_v26 }
 0x97a   : > { %v9516_v56 = vpop.eup %9515  ;;  %v7832_v40 = vmul.f32 0.5, %v9001_v14 }
 0x97b   : > { %v8009_v53 = vmul.f32 %v7973_v43, %v7936_v22  ;;  %v7901_v35 = vmul.f32 0.5, %v9516_v56  ;;  %v7714_v49 = vpop.f32.mrb[204].mxu0  ;;  %v7980_v43 = vld [vmem:[#allocation23 + $0xaf0] sm:$0xff] }
 0x97c   : > { %9521 = vtanh.f32 %v7832_v40  ;;  %v9002_v12 = vadd.f32 %v13036_v7, %v7714_v49  ;;  %v7716_v3 = vpop.f32.mrb[205].mxu0 }
 0x97d   : > { %8045 = vst [vmem:[%s13047_s26 + $0x78] sm:$0xff] %v8009_v53  ;;  %v7937_v47 = vadd.f32 0.5, %v7901_v35 }
 0x97e   : > { %v9518_v15 = vpop.eup %9517  ;;  %v7833_v5 = vmul.f32 0.5, %v9002_v12 }
 0x97f   : > { %v8010_v62 = vmul.f32 %v7974_v58, %v7937_v47  ;;  %v7902_v45 = vmul.f32 0.5, %v9518_v15  ;;  %v7719_v8 = vpop.f32.mrb[206].mxu0  ;;  %v7981_v58 = vld [vmem:[#allocation23 + $0xaf8] sm:$0xff] }
 0x980   : > { %9523 = vtanh.f32 %v7833_v5  ;;  %v9003_v23 = vadd.f32 %v13036_v7, %v7719_v8  ;;  %v7721_v4 = vpop.f32.mrb[207].mxu0 }
 0x981   : > { %8046 = vst [vmem:[%s13047_s26 + $0x80] sm:$0xff] %v8010_v62  ;;  %v7938_v48 = vadd.f32 0.5, %v7902_v45 }
 0x982   : > { %v9520_v0 = vpop.eup %9519  ;;  %v7834_v55 = vmul.f32 0.5, %v9003_v23 }
 0x983   : > { %v8011_v21 = vmul.f32 %v7975_v25, %v7938_v48  ;;  %v7903_v54 = vmul.f32 0.5, %v9520_v0  ;;  %v7724_v63 = vpop.f32.mrb[208].mxu0  ;;  %v7982_v25 = vld [vmem:[#allocation23 + $0xb00] sm:$0xff] }
 0x984   : > { %9525 = vtanh.f32 %v7834_v55  ;;  %v9004_v41 = vadd.f32 %v13036_v7, %v7724_v63  ;;  %v7726_v38 = vpop.f32.mrb[209].mxu0 }
 0x985   : > { %8047 = vst [vmem:[%s13047_s26 + $0x88] sm:$0xff] %v8011_v21  ;;  %v7939_v13 = vadd.f32 0.5, %v7903_v54 }
 0x986   : > { %v9522_v39 = vpop.eup %9521  ;;  %v7835_v19 = vmul.f32 0.5, %v9004_v41 }
 0x987   : > { %v8012_v24 = vmul.f32 %v7976_v57, %v7939_v13  ;;  %v7904_v28 = vmul.f32 0.5, %v9522_v39  ;;  %v7729_v59 = vpop.f32.mrb[210].mxu0  ;;  %v7983_v57 = vld [vmem:[#allocation23 + $0xb08] sm:$0xff] }
 0x988   : > { %9527 = vtanh.f32 %v7835_v19  ;;  %v9005_v16 = vadd.f32 %v13036_v7, %v7729_v59  ;;  %v7731_v50 = vpop.f32.mrb[211].mxu0 }
 0x989   : > { %8048 = vst [vmem:[%s13047_s26 + $0x90] sm:$0xff] %v8012_v24  ;;  %v7940_v17 = vadd.f32 0.5, %v7904_v28 }
 0x98a   : > { %v9524_v18 = vpop.eup %9523  ;;  %v7836_v1 = vmul.f32 0.5, %v9005_v16 }
 0x98b   : > { %v8013_v34 = vmul.f32 %v7977_v42, %v7940_v17  ;;  %v7905_v33 = vmul.f32 0.5, %v9524_v18  ;;  %v7734_v11 = vpop.f32.mrb[212].mxu0  ;;  %v7984_v42 = vld [vmem:[#allocation23 + $0xb10] sm:$0xff] }
 0x98c   : > { %9529 = vtanh.f32 %v7836_v1  ;;  %v9006_v31 = vadd.f32 %v13036_v7, %v7734_v11  ;;  %v7736_v36 = vpop.f32.mrb[213].mxu0 }
 0x98d   : > { %8049 = vst [vmem:[%s13047_s26 + $0x98] sm:$0xff] %v8013_v34  ;;  %v7941_v51 = vadd.f32 0.5, %v7905_v33 }
 0x98e   : > { %v9526_v46 = vpop.eup %9525  ;;  %v7837_v2 = vmul.f32 0.5, %v9006_v31 }
 0x98f   : > { %v8014_v29 = vmul.f32 %v7978_v32, %v7941_v51  ;;  %v7906_v52 = vmul.f32 0.5, %v9526_v46  ;;  %v7739_v37 = vpop.f32.mrb[214].mxu0  ;;  %v7985_v32 = vld [vmem:[#allocation23 + $0xb18] sm:$0xff] }
 0x990   : > { %9531 = vtanh.f32 %v7837_v2  ;;  %v9007_v27 = vadd.f32 %v13036_v7, %v7739_v37  ;;  %v7741_v30 = vpop.f32.mrb[215].mxu0 }
 0x991   : > { %8050 = vst [vmem:[%s13047_s26 + $0xa0] sm:$0xff] %v8014_v29  ;;  %v7942_v61 = vadd.f32 0.5, %v7906_v52 }
 0x992   : > { %v9528_v20 = vpop.eup %9527  ;;  %v7838_v44 = vmul.f32 0.5, %v9007_v27 }
 0x993   : > { %v8015_v6 = vmul.f32 %v7979_v9, %v7942_v61  ;;  %v7907_v26 = vmul.f32 0.5, %v9528_v20  ;;  %v7744_v10 = vpop.f32.mrb[216].mxu0  ;;  %v7986_v9 = vld [vmem:[#allocation23 + $0xb20] sm:$0xff] }
 0x994   : > { %9533 = vtanh.f32 %v7838_v44  ;;  %v9008_v14 = vadd.f32 %v13036_v7, %v7744_v10  ;;  %v7746_v60 = vpop.f32.mrb[217].mxu0 }
 0x995   : > { %8051 = vst [vmem:[%s13047_s26 + $0xa8] sm:$0xff] %v8015_v6  ;;  %v7943_v22 = vadd.f32 0.5, %v7907_v26 }
 0x996   : > { %v9530_v56 = vpop.eup %9529  ;;  %v7839_v40 = vmul.f32 0.5, %v9008_v14 }
 0x997   : > { %v8016_v53 = vmul.f32 %v7980_v43, %v7943_v22  ;;  %v7908_v35 = vmul.f32 0.5, %v9530_v56  ;;  %v7749_v49 = vpop.f32.mrb[218].mxu0  ;;  %v7987_v43 = vld [vmem:[#allocation23 + $0xb28] sm:$0xff] }
 0x998   : > { %9535 = vtanh.f32 %v7839_v40  ;;  %v9009_v12 = vadd.f32 %v13036_v7, %v7749_v49  ;;  %v7751_v3 = vpop.f32.mrb[219].mxu0 }
 0x999   : > { %8052 = vst [vmem:[%s13047_s26 + $0xb0] sm:$0xff] %v8016_v53  ;;  %v7944_v47 = vadd.f32 0.5, %v7908_v35 }
 0x99a   : > { %v9532_v15 = vpop.eup %9531  ;;  %v7840_v5 = vmul.f32 0.5, %v9009_v12 }
 0x99b   : > { %v8017_v62 = vmul.f32 %v7981_v58, %v7944_v47  ;;  %v7909_v45 = vmul.f32 0.5, %v9532_v15  ;;  %v7754_v8 = vpop.f32.mrb[220].mxu0  ;;  %v7988_v58 = vld [vmem:[#allocation23 + $0xb30] sm:$0xff] }
 0x99c   : > { %9537 = vtanh.f32 %v7840_v5  ;;  %v9010_v23 = vadd.f32 %v13036_v7, %v7754_v8  ;;  %v7756_v4 = vpop.f32.mrb[221].mxu0 }
 0x99d   : > { %8053 = vst [vmem:[%s13047_s26 + $0xb8] sm:$0xff] %v8017_v62  ;;  %v7945_v48 = vadd.f32 0.5, %v7909_v45 }
 0x99e   : > { %v9534_v0 = vpop.eup %9533  ;;  %v7841_v55 = vmul.f32 0.5, %v9010_v23 }
 0x99f   : > { %v8018_v21 = vmul.f32 %v7982_v25, %v7945_v48  ;;  %v7910_v54 = vmul.f32 0.5, %v9534_v0  ;;  %v7759_v63 = vpop.f32.mrb[222].mxu0  ;;  %v7989_v25 = vld [vmem:[#allocation23 + $0xb38] sm:$0xff] }
 0x9a0   : > { %9539 = vtanh.f32 %v7841_v55  ;;  %v9011_v41 = vadd.f32 %v13036_v7, %v7759_v63  ;;  %v7761_v38 = vpop.f32.mrb[223].mxu0 }
 0x9a1   : > { %8054 = vst [vmem:[%s13047_s26 + $0xc0] sm:$0xff] %v8018_v21  ;;  %v7946_v13 = vadd.f32 0.5, %v7910_v54 }
 0x9a2   : > { %v9536_v39 = vpop.eup %9535  ;;  %v7842_v19 = vmul.f32 0.5, %v9011_v41 }
 0x9a3   : > { %v8019_v24 = vmul.f32 %v7983_v57, %v7946_v13  ;;  %v7911_v28 = vmul.f32 0.5, %v9536_v39  ;;  %v7764_v59 = vpop.f32.mrb[224].mxu0  ;;  %v7990_v57 = vld [vmem:[#allocation23 + $0xb40] sm:$0xff] }
 0x9a4   : > { %9541 = vtanh.f32 %v7842_v19  ;;  %v9012_v16 = vadd.f32 %v13036_v7, %v7764_v59  ;;  %v7766_v50 = vpop.f32.mrb[225].mxu0 }
 0x9a5   : > { %8055 = vst [vmem:[%s13047_s26 + $0xc8] sm:$0xff] %v8019_v24  ;;  %v7947_v17 = vadd.f32 0.5, %v7911_v28 }
 0x9a6   : > { %v9538_v18 = vpop.eup %9537  ;;  %v7843_v1 = vmul.f32 0.5, %v9012_v16 }
 0x9a7   : > { %v8020_v34 = vmul.f32 %v7984_v42, %v7947_v17  ;;  %v7912_v33 = vmul.f32 0.5, %v9538_v18  ;;  %v7769_v11 = vpop.f32.mrb[226].mxu0  ;;  %v7992_v18 = vld [vmem:[#allocation23 + $0xb50] sm:$0xff] }
 0x9a8   : > { %9543 = vtanh.f32 %v7843_v1  ;;  %v9013_v31 = vadd.f32 %v13036_v7, %v7769_v11  ;;  %v7771_v36 = vpop.f32.mrb[227].mxu0 }
 0x9a9   : > { %8056 = vst [vmem:[%s13047_s26 + $0xd0] sm:$0xff] %v8020_v34  ;;  %v7948_v51 = vadd.f32 0.5, %v7912_v33  ;;  %v7993_v36 = vld [vmem:[#allocation23 + $0xb58] sm:$0xff] }
 0x9aa   : > { %v9540_v46 = vpop.eup %9539  ;;  %v7844_v2 = vmul.f32 0.5, %v9013_v31 }
 0x9ab   : > { %v8021_v29 = vmul.f32 %v7985_v32, %v7948_v51  ;;  %v7913_v52 = vmul.f32 0.5, %v9540_v46  ;;  %v7774_v37 = vpop.f32.mrb[228].mxu0 }
 0x9ac   : > { %9545 = vtanh.f32 %v7844_v2  ;;  %v9014_v27 = vadd.f32 %v13036_v7, %v7774_v37  ;;  %v7776_v30 = vpop.f32.mrb[229].mxu0 }
 0x9ad   : > { %8057 = vst [vmem:[%s13047_s26 + $0xd8] sm:$0xff] %v8021_v29  ;;  %v7949_v61 = vadd.f32 0.5, %v7913_v52 }
 0x9ae   : > { %v9542_v20 = vpop.eup %9541  ;;  %v7845_v44 = vmul.f32 0.5, %v9014_v27 }
 0x9af   : > { %v8022_v6 = vmul.f32 %v7986_v9, %v7949_v61  ;;  %v7914_v26 = vmul.f32 0.5, %v9542_v20  ;;  %v7779_v10 = vpop.f32.mrb[230].mxu0 }
 0x9b0   : > { %9547 = vtanh.f32 %v7845_v44  ;;  %v9015_v14 = vadd.f32 %v13036_v7, %v7779_v10  ;;  %v7781_v60 = vpop.f32.mrb[231].mxu0 }
 0x9b1   : > { %8058 = vst [vmem:[%s13047_s26 + $0xe0] sm:$0xff] %v8022_v6  ;;  %v7950_v22 = vadd.f32 0.5, %v7914_v26 }
 0x9b2   : > { %v9544_v56 = vpop.eup %9543  ;;  %v7846_v40 = vmul.f32 0.5, %v9015_v14 }
 0x9b3   : > { %v8023_v53 = vmul.f32 %v7987_v43, %v7950_v22  ;;  %v7915_v35 = vmul.f32 0.5, %v9544_v56  ;;  %v7784_v49 = vpop.f32.mrb[232].mxu0 }
 0x9b4   : > { %9549 = vtanh.f32 %v7846_v40  ;;  %v9016_v12 = vadd.f32 %v13036_v7, %v7784_v49  ;;  %v7786_v3 = vpop.f32.mrb[233].mxu0 }
 0x9b5   : > { %8059 = vst [vmem:[%s13047_s26 + $0xe8] sm:$0xff] %v8023_v53  ;;  %v7951_v47 = vadd.f32 0.5, %v7915_v35 }
 0x9b6   : > { %v9546_v15 = vpop.eup %9545  ;;  %v7847_v5 = vmul.f32 0.5, %v9016_v12 }
 0x9b7   : > { %v8024_v62 = vmul.f32 %v7988_v58, %v7951_v47  ;;  %v7916_v45 = vmul.f32 0.5, %v9546_v15  ;;  %v7789_v8 = vpop.f32.mrb[234].mxu0 }
 0x9b8   : > { %9551 = vtanh.f32 %v7847_v5  ;;  %v9017_v23 = vadd.f32 %v13036_v7, %v7789_v8  ;;  %v7791_v4 = vpop.f32.mrb[235].mxu0  ;;  %v7991_v7 = vld [vmem:[#allocation23 + $0xb48] sm:$0xff] }
 0x9b9   : > { %8060 = vst [vmem:[%s13047_s26 + $0xf0] sm:$0xff] %v8024_v62  ;;  %v7952_v48 = vadd.f32 0.5, %v7916_v45 }
 0x9ba   : > { %v9548_v0 = vpop.eup %9547  ;;  %v7848_v55 = vmul.f32 0.5, %v9017_v23 }
 0x9bb   : > { %v8025_v21 = vmul.f32 %v7989_v25, %v7952_v48  ;;  %v7917_v54 = vmul.f32 0.5, %v9548_v0  ;;  %v7794_v63 = vpop.f32.mrb[246].mxu0 }
 0x9bc   : > { %9553 = vtanh.f32 %v7848_v55  ;;  %v7795_v41 = vpop.f32.mrb[247].mxu0 }
 0x9bd   : > { %8061 = vst [vmem:[%s13047_s26 + $0xf8] sm:$0xff] %v8025_v21  ;;  %v7953_v38 = vadd.f32 0.5, %v7917_v54 }
 0x9be   : > { %v9550_v13 = vpop.eup %9549 }
 0x9bf   : > { %v8026_v39 = vmul.f32 %v7990_v57, %v7953_v38  ;;  %v7918_v19 = vmul.f32 0.5, %v9550_v13  ;;  %v7798_v24 = vpop.f32.mrb[248].mxu0 }
 0x9c0   : > { %v7799_v28 = vpop.f32.mrb[249].mxu0 }
 0x9c1   : > { %8062 = vst [vmem:[%s13047_s26 + $0x100] sm:$0xff] %v8026_v39  ;;  %v7954_v59 = vadd.f32 0.5, %v7918_v19 }
 0x9c2   : > { %v9552_v42 = vpop.eup %9551 }
 0x9c3   : > { %v8027_v16 = vmul.f32 %v7991_v7, %v7954_v59  ;;  %v7919_v50 = vmul.f32 0.5, %v9552_v42  ;;  %v7802_v17 = vpop.f32.mrb[250].mxu0 }
 0x9c4   : > { %v7803_v1 = vpop.f32.mrb[251].mxu0 }
 0x9c5   : > { %8063 = vst [vmem:[%s13047_s26 + $0x108] sm:$0xff] %v8027_v16  ;;  %v7955_v34 = vadd.f32 0.5, %v7919_v50 }
 0x9c6   : > { %v9554_v33 = vpop.eup %9553 }
 0x9c7   : > { %v8028_v11 = vmul.f32 %v7992_v18, %v7955_v34  ;;  %v7920_v32 = vmul.f32 0.5, %v9554_v33  ;;  %v7806_v31 = vpop.f32.mrb[252].mxu0 }
 0x9c8   : > { %v7807_v51 = vpop.f32.mrb[253].mxu0 }
 0x9c9   : > { %8064 = vst [vmem:[%s13047_s26 + $0x110] sm:$0xff] %v8028_v11  ;;  %v7956_v46 = vadd.f32 0.5, %v7920_v32 }
 0x9cb   : > { %v8029_v2 = vmul.f32 %v7993_v36, %v7956_v46  ;;  %v7810_v29 = vpop.f32.mrb[254].mxu0 }
 0x9cc   : > { %v7811_v52 = vpop.f32.mrb[255].mxu0 }
 0x9cd   : > { %8065 = vst [vmem:[%s13047_s26 + $0x118] sm:$0xff] %v8029_v2 }
 0x9ce PF: > { %s13212_s16 = sld [smem:[#allocation31_spill]] }
 0x9d4   : > { %s31_s29 = sadd.s32 1, %s13212_s16  }
 0x9d5   : > { %p28_p4 = scmp.ge.s32.totalorder %s31_s29, 4  }
 0x9d7   :  { %30 = sbr.rel (!%p28_p4) target bundleno = 12 (0xc), region = 175 }
 0x9de   :  { %8087 = vsyncpa [#allocation5], 1 }
 0x9df   :  { %8089 = vsyncpa [#allocation5 + $0x1], 1 }
 0x9e0   :  { %8090 = vsyncpa [#allocation7], 1 }
 0x9e1   :  { %8091 = vsyncpa [#allocation10], 1 }
 0x9e2   :  { %8092 = vsyncpa [#allocation13], 1 }
 0x9e3   :  { %8093 = vsyncpa [#allocation16], 1 }
 0x9e4   :  { %8094 = vsyncpa [#allocation19], 1 }
 0x9e5   :  { %8095 = vsyncpa [#allocation22], 1 }

</bundles_post_ra>
